<compile_context>
chip_gen: v6e
topology: v6e:2x2x1
jax: 0.10.0
libtpu: 0.0.40
codegen_flags: <defaults>
</compile_context>

<pallas_src>
import numpy as np
import jax
import jax.numpy as jnp
from jax import lax
from jax.experimental import pallas as pl
from jax.experimental.pallas import tpu as pltpu


SEL_LANES = 128  # lane-dense width of the per-step output block / mean matmul


# ----------------------------------------------------------------------------
# Host-side static tables (numpy): tap shifts, boundary masks, mean selection.
# ----------------------------------------------------------------------------
def _build_static_tables(H, W, C, B):
    L = H * W
    BL = B * L
    xi = np.arange(L) % W
    yi = np.arange(L) // W

    shifts = []                                        # shifts[blk][tap]
    masks = np.zeros((3 * 9 * C, BL), np.float32)      # rows (blk*9+t)*C .. +C
    for blk, stride in enumerate((1, 2, 4)):           # pooling level per block
        blk_shifts = []
        for ky in range(3):
            for kx in range(3):
                dx = (kx - 1) * stride
                dy = (ky - 1) * stride
                blk_shifts.append(dy * W + dx)
                ok = ((xi + dx >= 0) & (xi + dx < W) &
                      (yi + dy >= 0) & (yi + dy < H)).astype(np.float32)
                row0 = (blk * 9 + ky * 3 + kx) * C
                # mask true  =>  f + shift stays inside the same sample's [0, L)
                masks[row0:row0 + C, :] = np.tile(ok, B)[None, :]
        shifts.append(tuple(blk_shifts))

    # Live lanes after two 2x2 pools (dilated in-place grid, stride 4).
    final_stride = 4
    live = ((xi % final_stride) == 0) & ((yi % final_stride) == 0)
    n_live = int(live.sum())
    sel = np.zeros((BL, SEL_LANES), np.float32)        # mean = x @ sel
    for b in range(B):
        sel[b * L:(b + 1) * L, b] = live.astype(np.float32) / n_live
    return tuple(shifts), masks, sel


# ----------------------------------------------------------------------------
# Fused kernel: 9x (conv3x3 + folded BN + LeakyReLU), 2 maxpools, spatial mean.
# One grid step processes B samples packed along the lane axis.
# ----------------------------------------------------------------------------
def _make_fused_kernel(H, W, C, B, shifts):
    BL = B * H * W
    KP = ((9 * C + 1 + 7) // 8) * 8      # im2col rows incl. bias row, 8-aligned

    def kernel(x_ref, w_ref, m_ref, s_ref, o_ref, p_ref):
        # x_ref : (1, C, BL)        B samples, channels-first, flattened spatial
        # w_ref : (9, C, KP)        folded conv+BN weights, bias in column 9*C
        # m_ref : (27*C, BL)        per-(block, tap) boundary masks (f32 0/1)
        # s_ref : (BL, SEL_LANES)   mean-selection matrix (1/n_live at live lanes)
        # o_ref : (1, C, SEL_LANES) per-step features (sample b in lane b)
        # p_ref : (KP, BL)          persistent im2col scratch
        x = x_ref[0].astype(jnp.float32)                         # (C, BL)

        # Constant rows of the im2col matrix: row 9*C is all-ones (bias row),
        # remaining padding rows are zero.  Written once per step (cheap).
        pad_rows = KP - 9 * C
        rid = lax.broadcasted_iota(jnp.int32, (pad_rows, BL), 0)
        p_ref[pl.ds(9 * C, pad_rows), :] = (rid == 0).astype(jnp.float32)

        layer = 0
        for blk in range(3):
            stride = 1 << blk          # dilation of taps / pool step this block
            for _ in range(3):
                # Build im2col directly into VMEM scratch: one rolled+masked
                # copy of x per tap (roll = XLU, mask-mul = VPU, aligned store).
                for t in range(9):
                    s = shifts[blk][t]
                    rows = pl.ds(t * C, C)
                    if s == 0:                       # center tap: mask is all-1
                        p_ref[rows, :] = x
                    else:
                        rolled = pltpu.roll(x, (-s) % BL, axis=1)  # out[f]=x[f+s]
                        p_ref[rows, :] = rolled * m_ref[pl.ds((blk * 9 + t) * C, C), :]
                # One MXU push per layer: (C, KP) @ (KP, BL); bias folded in.
                acc = jnp.dot(w_ref[layer], p_ref[...],
                              preferred_element_type=jnp.float32)  # (C, BL)
                x = jnp.maximum(acc, 0.1 * acc)                    # LeakyReLU(0.1)
                layer += 1

            if blk < 2:
                # 2x2 max-pool (stride 2), kept in place on the dilated grid:
                # only lanes with x % (2*stride) == 0, y % (2*stride) == 0 stay
                # live; dead lanes are never read back at live positions.
                h = jnp.maximum(x, pltpu.roll(x, (-stride) % BL, axis=1))
                x = jnp.maximum(h, pltpu.roll(h, (-(stride * W)) % BL, axis=1))

        # Per-sample spatial mean over the live (H/4 x W/4) grid, as one MXU
        # dot against the precomputed selection matrix -> lane-dense output.
        mean = jnp.dot(x, s_ref[...], preferred_element_type=jnp.float32)
        o_ref[...] = mean[None].astype(o_ref.dtype)               # (1, C, 128)

    return kernel, KP


# ----------------------------------------------------------------------------
# Wrapper: fold BN into conv weights/bias, pack samples along lanes, call kernel.
# ----------------------------------------------------------------------------
def fold_and_stack_params(params, C):
    """params[l] = (w_hwio (3,3,cin,C), bias (C,), bn_scale (C,), bn_shift (C,)).

    Returns w_all (9, C, KP): BN folded in, bias appended as column 9*C, first
    layer's input channels zero-padded to C, K padded to a multiple of 8.
    """
    KP = ((9 * C + 1 + 7) // 8) * 8
    w_list = []
    for (w, b, scale, shift) in params:
        cin = w.shape[2]
        assert C >= cin, "ef_dim must be >= input channel count"
        if cin < C:
            w = jnp.pad(w, ((0, 0), (0, 0), (0, C - cin), (0, 0)))
        # Row order (ky, kx, ci) matches the kernel's im2col construction.
        wf = jnp.transpose(w, (3, 0, 1, 2)).reshape(C, 9 * C) * scale[:, None]
        bias = (b * scale + shift)[:, None]
        wf = jnp.concatenate(
            [wf, bias, jnp.zeros((C, KP - 9 * C - 1), wf.dtype)], axis=1)
        w_list.append(wf)
    return jnp.stack(w_list).astype(jnp.float32)


def choose_lane_batch(N, max_b=16):
    """Largest divisor of N that is <= max_b while keeping >= 2 grid steps
    (so both v7x TensorCores get work)."""
    best = 1
    for b in range(1, min(N, max_b) + 1):
        if N % b == 0 and N // b >= 2:
            best = b
    return best


def make_basic_forward(H, W, C, B):
    # Fail loudly instead of silently corrupting pooled values (review note).
    assert H % 4 == 0 and W % 4 == 0, "H, W must be multiples of 4 (two 2x2 pools)"
    assert H >= 8 and W >= 8, "spatial dims must cover the dilation-4 taps"
    assert B <= SEL_LANES
    L = H * W
    BL = B * L
    assert BL % 128 == 0, "B*H*W must be a multiple of 128 for lane alignment"

    shifts, masks_np, sel_np = _build_static_tables(H, W, C, B)
    kernel, KP = _make_fused_kernel(H, W, C, B, shifts)
    masks = jnp.asarray(masks_np)
    sel = jnp.asarray(sel_np)

    @jax.jit
    def forward(x_nchw, w_all):
        N, cin = x_nchw.shape[0], x_nchw.shape[1]
        assert N % B == 0, "batch must be divisible by the lane-batch B"
        G = N // B
        x = x_nchw.astype(jnp.float32).reshape(N, cin, L)
        if cin < C:
            x = jnp.pad(x, ((0, 0), (0, C - cin), (0, 0)))
        # Pack B consecutive samples along the lane axis: (G, C, B*L).
        x = x.reshape(G, B, C, L).transpose(0, 2, 1, 3).reshape(G, C, BL)

        out = pl.pallas_call(
            kernel,
            out_shape=jax.ShapeDtypeStruct((G, C, SEL_LANES), jnp.float32),
            grid=(G,),
            in_specs=[
                pl.BlockSpec((1, C, BL), lambda g: (g, 0, 0)),
                pl.BlockSpec((9, C, KP), lambda g: (0, 0, 0)),
                pl.BlockSpec((27 * C, BL), lambda g: (0, 0)),
                pl.BlockSpec((BL, SEL_LANES), lambda g: (0, 0)),
            ],
            out_specs=pl.BlockSpec((1, C, SEL_LANES), lambda g: (g, 0, 0)),
            scratch_shapes=[pltpu.VMEM((KP, BL), jnp.float32)],
            compiler_params=pltpu.CompilerParams(
                dimension_semantics=("parallel",)),
        )(x, w_all, masks, sel)

        # (G, C, 128) -> take the B real sample columns -> (N, C)
        return out[:, :, :B].transpose(0, 2, 1).reshape(N, C)

    return forward


# ----------------------------------------------------------------------------
# Pure-JAX reference (for numerical self-check)
# ----------------------------------------------------------------------------
def ref_forward(x_nchw, params):
    x = jnp.transpose(x_nchw, (0, 2, 3, 1))

    def conv_layer(x, w, b, s, sh):
        y = lax.conv_general_dilated(
            x, w, window_strides=(1, 1), padding="SAME",
            dimension_numbers=("NHWC", "HWIO", "NHWC"))
        y = y + b
        y = y * s + sh
        return jnp.where(y > 0, y, 0.1 * y)

    def pool(x):
        return lax.reduce_window(
            x, -jnp.inf, lax.max,
            window_dimensions=(1, 2, 2, 1), window_strides=(1, 2, 2, 1),
            padding="VALID")

    for i in range(3):
        x = conv_layer(x, *params[i])
    x = pool(x)
    for i in range(3, 6):
        x = conv_layer(x, *params[i])
    x = pool(x)
    for i in range(6, 9):
        x = conv_layer(x, *params[i])
    return x.mean(axis=(1, 2))


if __name__ == "__main__":
    ef_dim = 8
    N, Cin, H, W = 8, 3, 16, 16
    B = choose_lane_batch(N)            # -> 4 samples/step, grid of 2 steps

    key = jax.random.PRNGKey(0)
    key, kx = jax.random.split(key)
    x = jax.random.normal(kx, (N, Cin, H, W), dtype=jnp.float32)

    # 9 conv layers: block1 (3->ef, ef->ef, ef->ef), block2 x3, block3 x3
    layer_io = [(Cin, ef_dim)] + [(ef_dim, ef_dim)] * 8
    eps = 1e-5
    params = []
    for (ci, co) in layer_io:
        key, kw, kb, kg, kbe, km, kv = jax.random.split(key, 7)
        w = 0.1 * jax.random.normal(kw, (3, 3, ci, co), dtype=jnp.float32)
        b = 0.01 * jax.random.normal(kb, (co,), dtype=jnp.float32)
        # Non-trivial BatchNorm running stats / affine params (eval mode).
        gamma = 1.0 + 0.1 * jax.random.normal(kg, (co,), dtype=jnp.float32)
        beta = 0.05 * jax.random.normal(kbe, (co,), dtype=jnp.float32)
        rmean = 0.02 * jax.random.normal(km, (co,), dtype=jnp.float32)
        rvar = jnp.exp(0.2 * jax.random.normal(kv, (co,), dtype=jnp.float32))
        scale = gamma / jnp.sqrt(rvar + eps)
        shift = beta - rmean * scale
        params.append((w, b, scale, shift))
    params = tuple(params)

    w_all = fold_and_stack_params(params, ef_dim)
    forward = make_basic_forward(H, W, ef_dim, B)

    out = jax.block_until_ready(forward(x, w_all))
    ref = jax.block_until_ready(ref_forward(x, params))

    assert out.shape == (N, ef_dim), out.shape
    max_err = float(jnp.max(jnp.abs(out - ref)))
    assert jnp.allclose(out, ref, atol=2e-3, rtol=2e-3), ("mismatch", max_err)

    print("KERNEL_OK")
</pallas_src>

<mosaic_0001>
module attributes {stable_mosaic.version = 11 : i64} {
  func.func @kernel(%arg0: i32, %arg1: memref<1x8x1024xf32, #tpu.memory_space<vmem>>, %arg2: memref<9x8x80xf32, #tpu.memory_space<vmem>>, %arg3: memref<216x1024xf32, #tpu.memory_space<vmem>>, %arg4: memref<1024x128xf32, #tpu.memory_space<vmem>>, %arg5: memref<1x8x128xf32, #tpu.memory_space<vmem>>, %arg6: memref<80x1024xf32, #tpu.memory_space<vmem>>) attributes {dimension_semantics = [#tpu.dimension_semantics<parallel>], iteration_bounds = array<i64: 2>, scalar_prefetch = 0 : i64, scratch_operands = 1 : i64, tpu.core_type = #tpu.core_type<tc>, window_params = [{transform_indices = @transform_0, window_bounds = array<i64: 1, 8, 1024>}, {pipeline_mode = #tpu.pipeline_mode<synchronous>, transform_indices = @transform_1, window_bounds = array<i64: 9, 8, 80>}, {pipeline_mode = #tpu.pipeline_mode<synchronous>, transform_indices = @transform_2, window_bounds = array<i64: 216, 1024>}, {pipeline_mode = #tpu.pipeline_mode<synchronous>, transform_indices = @transform_3, window_bounds = array<i64: 1024, 128>}, {transform_indices = @transform_4, window_bounds = array<i64: 1, 8, 128>}]} {
    %c0 = arith.constant 0 : index
    %c0_0 = arith.constant 0 : index
    %c0_1 = arith.constant 0 : index
    %0 = vector.load %arg1[%c0, %c0_0, %c0_1] : memref<1x8x1024xf32, #tpu.memory_space<vmem>>, vector<1x8x1024xf32>
    %1 = vector.shape_cast %0 : vector<1x8x1024xf32> to vector<8x1024xf32>
    %2 = tpu.iota {dimensions = array<i32: 0>} : vector<8x1024xi32>
    %c0_i32 = arith.constant 0 : i32
    %3 = vector.broadcast %c0_i32 : i32 to vector<8x1024xi32>
    %4 = arith.cmpi eq, %2, %3 : vector<8x1024xi32>
    %5 = arith.extui %4 : vector<8x1024xi1> to vector<8x1024xi32>
    %6 = arith.sitofp %5 : vector<8x1024xi32> to vector<8x1024xf32>
    %c72 = arith.constant 72 : index
    %c0_2 = arith.constant 0 : index
    %7 = vector.load %arg6[%c72, %c0_2] : memref<80x1024xf32, #tpu.memory_space<vmem>>, vector<8x1024xf32>
    tpu.vector_store %arg6[%c72, %c0_2], %6 {strides = array<i32>} : memref<80x1024xf32, #tpu.memory_space<vmem>>, vector<8x1024xf32>,
    %c17_i32 = arith.constant 17 : i32
    %8 = tpu.dynamic_rotate %1 by %c17_i32 dim 1 : vector<8x1024xf32>, i32 -> vector<8x1024xf32>
    %c0_3 = arith.constant 0 : index
    %c0_4 = arith.constant 0 : index
    %9 = vector.load %arg3[%c0_3, %c0_4] : memref<216x1024xf32, #tpu.memory_space<vmem>>, vector<8x1024xf32>
    %10 = arith.mulf %8, %9 : vector<8x1024xf32>
    %c0_5 = arith.constant 0 : index
    %c0_6 = arith.constant 0 : index
    %11 = vector.load %arg6[%c0_5, %c0_6] : memref<80x1024xf32, #tpu.memory_space<vmem>>, vector<8x1024xf32>
    tpu.vector_store %arg6[%c0_5, %c0_6], %10 {strides = array<i32>} : memref<80x1024xf32, #tpu.memory_space<vmem>>, vector<8x1024xf32>,
    %c16_i32 = arith.constant 16 : i32
    %12 = tpu.dynamic_rotate %1 by %c16_i32 dim 1 : vector<8x1024xf32>, i32 -> vector<8x1024xf32>
    %c8 = arith.constant 8 : index
    %c0_7 = arith.constant 0 : index
    %13 = vector.load %arg3[%c8, %c0_7] : memref<216x1024xf32, #tpu.memory_space<vmem>>, vector<8x1024xf32>
    %14 = arith.mulf %12, %13 : vector<8x1024xf32>
    %c8_8 = arith.constant 8 : index
    %c0_9 = arith.constant 0 : index
    %15 = vector.load %arg6[%c8_8, %c0_9] : memref<80x1024xf32, #tpu.memory_space<vmem>>, vector<8x1024xf32>
    tpu.vector_store %arg6[%c8_8, %c0_9], %14 {strides = array<i32>} : memref<80x1024xf32, #tpu.memory_space<vmem>>, vector<8x1024xf32>,
    %c15_i32 = arith.constant 15 : i32
    %16 = tpu.dynamic_rotate %1 by %c15_i32 dim 1 : vector<8x1024xf32>, i32 -> vector<8x1024xf32>
    %c16 = arith.constant 16 : index
    %c0_10 = arith.constant 0 : index
    %17 = vector.load %arg3[%c16, %c0_10] : memref<216x1024xf32, #tpu.memory_space<vmem>>, vector<8x1024xf32>
    %18 = arith.mulf %16, %17 : vector<8x1024xf32>
    %c16_11 = arith.constant 16 : index
    %c0_12 = arith.constant 0 : index
    %19 = vector.load %arg6[%c16_11, %c0_12] : memref<80x1024xf32, #tpu.memory_space<vmem>>, vector<8x1024xf32>
    tpu.vector_store %arg6[%c16_11, %c0_12], %18 {strides = array<i32>} : memref<80x1024xf32, #tpu.memory_space<vmem>>, vector<8x1024xf32>,
    %c1_i32 = arith.constant 1 : i32
    %20 = tpu.dynamic_rotate %1 by %c1_i32 dim 1 : vector<8x1024xf32>, i32 -> vector<8x1024xf32>
    %c24 = arith.constant 24 : index
    %c0_13 = arith.constant 0 : index
    %21 = vector.load %arg3[%c24, %c0_13] : memref<216x1024xf32, #tpu.memory_space<vmem>>, vector<8x1024xf32>
    %22 = arith.mulf %20, %21 : vector<8x1024xf32>
    %c24_14 = arith.constant 24 : index
    %c0_15 = arith.constant 0 : index
    %23 = vector.load %arg6[%c24_14, %c0_15] : memref<80x1024xf32, #tpu.memory_space<vmem>>, vector<8x1024xf32>
    tpu.vector_store %arg6[%c24_14, %c0_15], %22 {strides = array<i32>} : memref<80x1024xf32, #tpu.memory_space<vmem>>, vector<8x1024xf32>,
    %c32 = arith.constant 32 : index
    %c0_16 = arith.constant 0 : index
    %24 = vector.load %arg6[%c32, %c0_16] : memref<80x1024xf32, #tpu.memory_space<vmem>>, vector<8x1024xf32>
    tpu.vector_store %arg6[%c32, %c0_16], %1 {strides = array<i32>} : memref<80x1024xf32, #tpu.memory_space<vmem>>, vector<8x1024xf32>,
    %c1023_i32 = arith.constant 1023 : i32
    %25 = tpu.dynamic_rotate %1 by %c1023_i32 dim 1 : vector<8x1024xf32>, i32 -> vector<8x1024xf32>
    %c40 = arith.constant 40 : index
    %c0_17 = arith.constant 0 : index
    %26 = vector.load %arg3[%c40, %c0_17] : memref<216x1024xf32, #tpu.memory_space<vmem>>, vector<8x1024xf32>
    %27 = arith.mulf %25, %26 : vector<8x1024xf32>
    %c40_18 = arith.constant 40 : index
    %c0_19 = arith.constant 0 : index
    %28 = vector.load %arg6[%c40_18, %c0_19] : memref<80x1024xf32, #tpu.memory_space<vmem>>, vector<8x1024xf32>
    tpu.vector_store %arg6[%c40_18, %c0_19], %27 {strides = array<i32>} : memref<80x1024xf32, #tpu.memory_space<vmem>>, vector<8x1024xf32>,
    %c1009_i32 = arith.constant 1009 : i32
    %29 = tpu.dynamic_rotate %1 by %c1009_i32 dim 1 : vector<8x1024xf32>, i32 -> vector<8x1024xf32>
    %c48 = arith.constant 48 : index
    %c0_20 = arith.constant 0 : index
    %30 = vector.load %arg3[%c48, %c0_20] : memref<216x1024xf32, #tpu.memory_space<vmem>>, vector<8x1024xf32>
    %31 = arith.mulf %29, %30 : vector<8x1024xf32>
    %c48_21 = arith.constant 48 : index
    %c0_22 = arith.constant 0 : index
    %32 = vector.load %arg6[%c48_21, %c0_22] : memref<80x1024xf32, #tpu.memory_space<vmem>>, vector<8x1024xf32>
    tpu.vector_store %arg6[%c48_21, %c0_22], %31 {strides = array<i32>} : memref<80x1024xf32, #tpu.memory_space<vmem>>, vector<8x1024xf32>,
    %c1008_i32 = arith.constant 1008 : i32
    %33 = tpu.dynamic_rotate %1 by %c1008_i32 dim 1 : vector<8x1024xf32>, i32 -> vector<8x1024xf32>
    %c56 = arith.constant 56 : index
    %c0_23 = arith.constant 0 : index
    %34 = vector.load %arg3[%c56, %c0_23] : memref<216x1024xf32, #tpu.memory_space<vmem>>, vector<8x1024xf32>
    %35 = arith.mulf %33, %34 : vector<8x1024xf32>
    %c56_24 = arith.constant 56 : index
    %c0_25 = arith.constant 0 : index
    %36 = vector.load %arg6[%c56_24, %c0_25] : memref<80x1024xf32, #tpu.memory_space<vmem>>, vector<8x1024xf32>
    tpu.vector_store %arg6[%c56_24, %c0_25], %35 {strides = array<i32>} : memref<80x1024xf32, #tpu.memory_space<vmem>>, vector<8x1024xf32>,
    %c1007_i32 = arith.constant 1007 : i32
    %37 = tpu.dynamic_rotate %1 by %c1007_i32 dim 1 : vector<8x1024xf32>, i32 -> vector<8x1024xf32>
    %c64 = arith.constant 64 : index
    %c0_26 = arith.constant 0 : index
    %38 = vector.load %arg3[%c64, %c0_26] : memref<216x1024xf32, #tpu.memory_space<vmem>>, vector<8x1024xf32>
    %39 = arith.mulf %37, %38 : vector<8x1024xf32>
    %c64_27 = arith.constant 64 : index
    %c0_28 = arith.constant 0 : index
    %40 = vector.load %arg6[%c64_27, %c0_28] : memref<80x1024xf32, #tpu.memory_space<vmem>>, vector<8x1024xf32>
    tpu.vector_store %arg6[%c64_27, %c0_28], %39 {strides = array<i32>} : memref<80x1024xf32, #tpu.memory_space<vmem>>, vector<8x1024xf32>,
    %c0_29 = arith.constant 0 : index
    %c0_30 = arith.constant 0 : index
    %c0_31 = arith.constant 0 : index
    %41 = vector.load %arg2[%c0_29, %c0_30, %c0_31] : memref<9x8x80xf32, #tpu.memory_space<vmem>>, vector<1x8x80xf32>
    %42 = vector.shape_cast %41 : vector<1x8x80xf32> to vector<8x80xf32>
    %c0_32 = arith.constant 0 : index
    %c0_33 = arith.constant 0 : index
    %43 = vector.load %arg6[%c0_32, %c0_33] : memref<80x1024xf32, #tpu.memory_space<vmem>>, vector<80x1024xf32>
    %cst = arith.constant dense<0.000000e+00> : vector<8x1024xf32>
    %44 = tpu.matmul %42, %43, %cst {dimension_numbers = #tpu.dot_dimension_numbers<[1], [0], [0], [1], [0, 0, 1, 1], [], []>} : vector<8x80xf32>, vector<80x1024xf32>, vector<8x1024xf32> -> vector<8x1024xf32>
    %cst_34 = arith.constant 1.000000e-01 : f32
    %45 = vector.broadcast %cst_34 : f32 to vector<8x1024xf32>
    %46 = arith.mulf %45, %44 : vector<8x1024xf32>
    %47 = arith.maximumf %44, %46 : vector<8x1024xf32>
    %c17_i32_35 = arith.constant 17 : i32
    %48 = tpu.dynamic_rotate %47 by %c17_i32_35 dim 1 : vector<8x1024xf32>, i32 -> vector<8x1024xf32>
    %c0_36 = arith.constant 0 : index
    %c0_37 = arith.constant 0 : index
    %49 = vector.load %arg3[%c0_36, %c0_37] : memref<216x1024xf32, #tpu.memory_space<vmem>>, vector<8x1024xf32>
    %50 = arith.mulf %48, %49 : vector<8x1024xf32>
    %c0_38 = arith.constant 0 : index
    %c0_39 = arith.constant 0 : index
    %51 = vector.load %arg6[%c0_38, %c0_39] : memref<80x1024xf32, #tpu.memory_space<vmem>>, vector<8x1024xf32>
    tpu.vector_store %arg6[%c0_38, %c0_39], %50 {strides = array<i32>} : memref<80x1024xf32, #tpu.memory_space<vmem>>, vector<8x1024xf32>,
    %c16_i32_40 = arith.constant 16 : i32
    %52 = tpu.dynamic_rotate %47 by %c16_i32_40 dim 1 : vector<8x1024xf32>, i32 -> vector<8x1024xf32>
    %c8_41 = arith.constant 8 : index
    %c0_42 = arith.constant 0 : index
    %53 = vector.load %arg3[%c8_41, %c0_42] : memref<216x1024xf32, #tpu.memory_space<vmem>>, vector<8x1024xf32>
    %54 = arith.mulf %52, %53 : vector<8x1024xf32>
    %c8_43 = arith.constant 8 : index
    %c0_44 = arith.constant 0 : index
    %55 = vector.load %arg6[%c8_43, %c0_44] : memref<80x1024xf32, #tpu.memory_space<vmem>>, vector<8x1024xf32>
    tpu.vector_store %arg6[%c8_43, %c0_44], %54 {strides = array<i32>} : memref<80x1024xf32, #tpu.memory_space<vmem>>, vector<8x1024xf32>,
    %c15_i32_45 = arith.constant 15 : i32
    %56 = tpu.dynamic_rotate %47 by %c15_i32_45 dim 1 : vector<8x1024xf32>, i32 -> vector<8x1024xf32>
    %c16_46 = arith.constant 16 : index
    %c0_47 = arith.constant 0 : index
    %57 = vector.load %arg3[%c16_46, %c0_47] : memref<216x1024xf32, #tpu.memory_space<vmem>>, vector<8x1024xf32>
    %58 = arith.mulf %56, %57 : vector<8x1024xf32>
    %c16_48 = arith.constant 16 : index
    %c0_49 = arith.constant 0 : index
    %59 = vector.load %arg6[%c16_48, %c0_49] : memref<80x1024xf32, #tpu.memory_space<vmem>>, vector<8x1024xf32>
    tpu.vector_store %arg6[%c16_48, %c0_49], %58 {strides = array<i32>} : memref<80x1024xf32, #tpu.memory_space<vmem>>, vector<8x1024xf32>,
    %c1_i32_50 = arith.constant 1 : i32
    %60 = tpu.dynamic_rotate %47 by %c1_i32_50 dim 1 : vector<8x1024xf32>, i32 -> vector<8x1024xf32>
    %c24_51 = arith.constant 24 : index
    %c0_52 = arith.constant 0 : index
    %61 = vector.load %arg3[%c24_51, %c0_52] : memref<216x1024xf32, #tpu.memory_space<vmem>>, vector<8x1024xf32>
    %62 = arith.mulf %60, %61 : vector<8x1024xf32>
    %c24_53 = arith.constant 24 : index
    %c0_54 = arith.constant 0 : index
    %63 = vector.load %arg6[%c24_53, %c0_54] : memref<80x1024xf32, #tpu.memory_space<vmem>>, vector<8x1024xf32>
    tpu.vector_store %arg6[%c24_53, %c0_54], %62 {strides = array<i32>} : memref<80x1024xf32, #tpu.memory_space<vmem>>, vector<8x1024xf32>,
    %c32_55 = arith.constant 32 : index
    %c0_56 = arith.constant 0 : index
    %64 = vector.load %arg6[%c32_55, %c0_56] : memref<80x1024xf32, #tpu.memory_space<vmem>>, vector<8x1024xf32>
    tpu.vector_store %arg6[%c32_55, %c0_56], %47 {strides = array<i32>} : memref<80x1024xf32, #tpu.memory_space<vmem>>, vector<8x1024xf32>,
    %c1023_i32_57 = arith.constant 1023 : i32
    %65 = tpu.dynamic_rotate %47 by %c1023_i32_57 dim 1 : vector<8x1024xf32>, i32 -> vector<8x1024xf32>
    %c40_58 = arith.constant 40 : index
    %c0_59 = arith.constant 0 : index
    %66 = vector.load %arg3[%c40_58, %c0_59] : memref<216x1024xf32, #tpu.memory_space<vmem>>, vector<8x1024xf32>
    %67 = arith.mulf %65, %66 : vector<8x1024xf32>
    %c40_60 = arith.constant 40 : index
    %c0_61 = arith.constant 0 : index
    %68 = vector.load %arg6[%c40_60, %c0_61] : memref<80x1024xf32, #tpu.memory_space<vmem>>, vector<8x1024xf32>
    tpu.vector_store %arg6[%c40_60, %c0_61], %67 {strides = array<i32>} : memref<80x1024xf32, #tpu.memory_space<vmem>>, vector<8x1024xf32>,
    %c1009_i32_62 = arith.constant 1009 : i32
    %69 = tpu.dynamic_rotate %47 by %c1009_i32_62 dim 1 : vector<8x1024xf32>, i32 -> vector<8x1024xf32>
    %c48_63 = arith.constant 48 : index
    %c0_64 = arith.constant 0 : index
    %70 = vector.load %arg3[%c48_63, %c0_64] : memref<216x1024xf32, #tpu.memory_space<vmem>>, vector<8x1024xf32>
    %71 = arith.mulf %69, %70 : vector<8x1024xf32>
    %c48_65 = arith.constant 48 : index
    %c0_66 = arith.constant 0 : index
    %72 = vector.load %arg6[%c48_65, %c0_66] : memref<80x1024xf32, #tpu.memory_space<vmem>>, vector<8x1024xf32>
    tpu.vector_store %arg6[%c48_65, %c0_66], %71 {strides = array<i32>} : memref<80x1024xf32, #tpu.memory_space<vmem>>, vector<8x1024xf32>,
    %c1008_i32_67 = arith.constant 1008 : i32
    %73 = tpu.dynamic_rotate %47 by %c1008_i32_67 dim 1 : vector<8x1024xf32>, i32 -> vector<8x1024xf32>
    %c56_68 = arith.constant 56 : index
    %c0_69 = arith.constant 0 : index
    %74 = vector.load %arg3[%c56_68, %c0_69] : memref<216x1024xf32, #tpu.memory_space<vmem>>, vector<8x1024xf32>
    %75 = arith.mulf %73, %74 : vector<8x1024xf32>
    %c56_70 = arith.constant 56 : index
    %c0_71 = arith.constant 0 : index
    %76 = vector.load %arg6[%c56_70, %c0_71] : memref<80x1024xf32, #tpu.memory_space<vmem>>, vector<8x1024xf32>
    tpu.vector_store %arg6[%c56_70, %c0_71], %75 {strides = array<i32>} : memref<80x1024xf32, #tpu.memory_space<vmem>>, vector<8x1024xf32>,
    %c1007_i32_72 = arith.constant 1007 : i32
    %77 = tpu.dynamic_rotate %47 by %c1007_i32_72 dim 1 : vector<8x1024xf32>, i32 -> vector<8x1024xf32>
    %c64_73 = arith.constant 64 : index
    %c0_74 = arith.constant 0 : index
    %78 = vector.load %arg3[%c64_73, %c0_74] : memref<216x1024xf32, #tpu.memory_space<vmem>>, vector<8x1024xf32>
    %79 = arith.mulf %77, %78 : vector<8x1024xf32>
    %c64_75 = arith.constant 64 : index
    %c0_76 = arith.constant 0 : index
    %80 = vector.load %arg6[%c64_75, %c0_76] : memref<80x1024xf32, #tpu.memory_space<vmem>>, vector<8x1024xf32>
    tpu.vector_store %arg6[%c64_75, %c0_76], %79 {strides = array<i32>} : memref<80x1024xf32, #tpu.memory_space<vmem>>, vector<8x1024xf32>,
    %c1 = arith.constant 1 : index
    %c0_77 = arith.constant 0 : index
    %c0_78 = arith.constant 0 : index
    %81 = vector.load %arg2[%c1, %c0_77, %c0_78] : memref<9x8x80xf32, #tpu.memory_space<vmem>>, vector<1x8x80xf32>
    %82 = vector.shape_cast %81 : vector<1x8x80xf32> to vector<8x80xf32>
    %c0_79 = arith.constant 0 : index
    %c0_80 = arith.constant 0 : index
    %83 = vector.load %arg6[%c0_79, %c0_80] : memref<80x1024xf32, #tpu.memory_space<vmem>>, vector<80x1024xf32>
    %cst_81 = arith.constant dense<0.000000e+00> : vector<8x1024xf32>
    %84 = tpu.matmul %82, %83, %cst_81 {dimension_numbers = #tpu.dot_dimension_numbers<[1], [0], [0], [1], [0, 0, 1, 1], [], []>} : vector<8x80xf32>, vector<80x1024xf32>, vector<8x1024xf32> -> vector<8x1024xf32>
    %cst_82 = arith.constant 1.000000e-01 : f32
    %85 = vector.broadcast %cst_82 : f32 to vector<8x1024xf32>
    %86 = arith.mulf %85, %84 : vector<8x1024xf32>
    %87 = arith.maximumf %84, %86 : vector<8x1024xf32>
    %c17_i32_83 = arith.constant 17 : i32
    %88 = tpu.dynamic_rotate %87 by %c17_i32_83 dim 1 : vector<8x1024xf32>, i32 -> vector<8x1024xf32>
    %c0_84 = arith.constant 0 : index
    %c0_85 = arith.constant 0 : index
    %89 = vector.load %arg3[%c0_84, %c0_85] : memref<216x1024xf32, #tpu.memory_space<vmem>>, vector<8x1024xf32>
    %90 = arith.mulf %88, %89 : vector<8x1024xf32>
    %c0_86 = arith.constant 0 : index
    %c0_87 = arith.constant 0 : index
    %91 = vector.load %arg6[%c0_86, %c0_87] : memref<80x1024xf32, #tpu.memory_space<vmem>>, vector<8x1024xf32>
    tpu.vector_store %arg6[%c0_86, %c0_87], %90 {strides = array<i32>} : memref<80x1024xf32, #tpu.memory_space<vmem>>, vector<8x1024xf32>,
    %c16_i32_88 = arith.constant 16 : i32
    %92 = tpu.dynamic_rotate %87 by %c16_i32_88 dim 1 : vector<8x1024xf32>, i32 -> vector<8x1024xf32>
    %c8_89 = arith.constant 8 : index
    %c0_90 = arith.constant 0 : index
    %93 = vector.load %arg3[%c8_89, %c0_90] : memref<216x1024xf32, #tpu.memory_space<vmem>>, vector<8x1024xf32>
    %94 = arith.mulf %92, %93 : vector<8x1024xf32>
    %c8_91 = arith.constant 8 : index
    %c0_92 = arith.constant 0 : index
    %95 = vector.load %arg6[%c8_91, %c0_92] : memref<80x1024xf32, #tpu.memory_space<vmem>>, vector<8x1024xf32>
    tpu.vector_store %arg6[%c8_91, %c0_92], %94 {strides = array<i32>} : memref<80x1024xf32, #tpu.memory_space<vmem>>, vector<8x1024xf32>,
    %c15_i32_93 = arith.constant 15 : i32
    %96 = tpu.dynamic_rotate %87 by %c15_i32_93 dim 1 : vector<8x1024xf32>, i32 -> vector<8x1024xf32>
    %c16_94 = arith.constant 16 : index
    %c0_95 = arith.constant 0 : index
    %97 = vector.load %arg3[%c16_94, %c0_95] : memref<216x1024xf32, #tpu.memory_space<vmem>>, vector<8x1024xf32>
    %98 = arith.mulf %96, %97 : vector<8x1024xf32>
    %c16_96 = arith.constant 16 : index
    %c0_97 = arith.constant 0 : index
    %99 = vector.load %arg6[%c16_96, %c0_97] : memref<80x1024xf32, #tpu.memory_space<vmem>>, vector<8x1024xf32>
    tpu.vector_store %arg6[%c16_96, %c0_97], %98 {strides = array<i32>} : memref<80x1024xf32, #tpu.memory_space<vmem>>, vector<8x1024xf32>,
    %c1_i32_98 = arith.constant 1 : i32
    %100 = tpu.dynamic_rotate %87 by %c1_i32_98 dim 1 : vector<8x1024xf32>, i32 -> vector<8x1024xf32>
    %c24_99 = arith.constant 24 : index
    %c0_100 = arith.constant 0 : index
    %101 = vector.load %arg3[%c24_99, %c0_100] : memref<216x1024xf32, #tpu.memory_space<vmem>>, vector<8x1024xf32>
    %102 = arith.mulf %100, %101 : vector<8x1024xf32>
    %c24_101 = arith.constant 24 : index
    %c0_102 = arith.constant 0 : index
    %103 = vector.load %arg6[%c24_101, %c0_102] : memref<80x1024xf32, #tpu.memory_space<vmem>>, vector<8x1024xf32>
    tpu.vector_store %arg6[%c24_101, %c0_102], %102 {strides = array<i32>} : memref<80x1024xf32, #tpu.memory_space<vmem>>, vector<8x1024xf32>,
    %c32_103 = arith.constant 32 : index
    %c0_104 = arith.constant 0 : index
    %104 = vector.load %arg6[%c32_103, %c0_104] : memref<80x1024xf32, #tpu.memory_space<vmem>>, vector<8x1024xf32>
    tpu.vector_store %arg6[%c32_103, %c0_104], %87 {strides = array<i32>} : memref<80x1024xf32, #tpu.memory_space<vmem>>, vector<8x1024xf32>,
    %c1023_i32_105 = arith.constant 1023 : i32
    %105 = tpu.dynamic_rotate %87 by %c1023_i32_105 dim 1 : vector<8x1024xf32>, i32 -> vector<8x1024xf32>
    %c40_106 = arith.constant 40 : index
    %c0_107 = arith.constant 0 : index
    %106 = vector.load %arg3[%c40_106, %c0_107] : memref<216x1024xf32, #tpu.memory_space<vmem>>, vector<8x1024xf32>
    %107 = arith.mulf %105, %106 : vector<8x1024xf32>
    %c40_108 = arith.constant 40 : index
    %c0_109 = arith.constant 0 : index
    %108 = vector.load %arg6[%c40_108, %c0_109] : memref<80x1024xf32, #tpu.memory_space<vmem>>, vector<8x1024xf32>
    tpu.vector_store %arg6[%c40_108, %c0_109], %107 {strides = array<i32>} : memref<80x1024xf32, #tpu.memory_space<vmem>>, vector<8x1024xf32>,
    %c1009_i32_110 = arith.constant 1009 : i32
    %109 = tpu.dynamic_rotate %87 by %c1009_i32_110 dim 1 : vector<8x1024xf32>, i32 -> vector<8x1024xf32>
    %c48_111 = arith.constant 48 : index
    %c0_112 = arith.constant 0 : index
    %110 = vector.load %arg3[%c48_111, %c0_112] : memref<216x1024xf32, #tpu.memory_space<vmem>>, vector<8x1024xf32>
    %111 = arith.mulf %109, %110 : vector<8x1024xf32>
    %c48_113 = arith.constant 48 : index
    %c0_114 = arith.constant 0 : index
    %112 = vector.load %arg6[%c48_113, %c0_114] : memref<80x1024xf32, #tpu.memory_space<vmem>>, vector<8x1024xf32>
    tpu.vector_store %arg6[%c48_113, %c0_114], %111 {strides = array<i32>} : memref<80x1024xf32, #tpu.memory_space<vmem>>, vector<8x1024xf32>,
    %c1008_i32_115 = arith.constant 1008 : i32
    %113 = tpu.dynamic_rotate %87 by %c1008_i32_115 dim 1 : vector<8x1024xf32>, i32 -> vector<8x1024xf32>
    %c56_116 = arith.constant 56 : index
    %c0_117 = arith.constant 0 : index
    %114 = vector.load %arg3[%c56_116, %c0_117] : memref<216x1024xf32, #tpu.memory_space<vmem>>, vector<8x1024xf32>
    %115 = arith.mulf %113, %114 : vector<8x1024xf32>
    %c56_118 = arith.constant 56 : index
    %c0_119 = arith.constant 0 : index
    %116 = vector.load %arg6[%c56_118, %c0_119] : memref<80x1024xf32, #tpu.memory_space<vmem>>, vector<8x1024xf32>
    tpu.vector_store %arg6[%c56_118, %c0_119], %115 {strides = array<i32>} : memref<80x1024xf32, #tpu.memory_space<vmem>>, vector<8x1024xf32>,
    %c1007_i32_120 = arith.constant 1007 : i32
    %117 = tpu.dynamic_rotate %87 by %c1007_i32_120 dim 1 : vector<8x1024xf32>, i32 -> vector<8x1024xf32>
    %c64_121 = arith.constant 64 : index
    %c0_122 = arith.constant 0 : index
    %118 = vector.load %arg3[%c64_121, %c0_122] : memref<216x1024xf32, #tpu.memory_space<vmem>>, vector<8x1024xf32>
    %119 = arith.mulf %117, %118 : vector<8x1024xf32>
    %c64_123 = arith.constant 64 : index
    %c0_124 = arith.constant 0 : index
    %120 = vector.load %arg6[%c64_123, %c0_124] : memref<80x1024xf32, #tpu.memory_space<vmem>>, vector<8x1024xf32>
    tpu.vector_store %arg6[%c64_123, %c0_124], %119 {strides = array<i32>} : memref<80x1024xf32, #tpu.memory_space<vmem>>, vector<8x1024xf32>,
    %c2 = arith.constant 2 : index
    %c0_125 = arith.constant 0 : index
    %c0_126 = arith.constant 0 : index
    %121 = vector.load %arg2[%c2, %c0_125, %c0_126] : memref<9x8x80xf32, #tpu.memory_space<vmem>>, vector<1x8x80xf32>
    %122 = vector.shape_cast %121 : vector<1x8x80xf32> to vector<8x80xf32>
    %c0_127 = arith.constant 0 : index
    %c0_128 = arith.constant 0 : index
    %123 = vector.load %arg6[%c0_127, %c0_128] : memref<80x1024xf32, #tpu.memory_space<vmem>>, vector<80x1024xf32>
    %cst_129 = arith.constant dense<0.000000e+00> : vector<8x1024xf32>
    %124 = tpu.matmul %122, %123, %cst_129 {dimension_numbers = #tpu.dot_dimension_numbers<[1], [0], [0], [1], [0, 0, 1, 1], [], []>} : vector<8x80xf32>, vector<80x1024xf32>, vector<8x1024xf32> -> vector<8x1024xf32>
    %cst_130 = arith.constant 1.000000e-01 : f32
    %125 = vector.broadcast %cst_130 : f32 to vector<8x1024xf32>
    %126 = arith.mulf %125, %124 : vector<8x1024xf32>
    %127 = arith.maximumf %124, %126 : vector<8x1024xf32>
    %c1023_i32_131 = arith.constant 1023 : i32
    %128 = tpu.dynamic_rotate %127 by %c1023_i32_131 dim 1 : vector<8x1024xf32>, i32 -> vector<8x1024xf32>
    %129 = arith.maximumf %127, %128 : vector<8x1024xf32>
    %c1008_i32_132 = arith.constant 1008 : i32
    %130 = tpu.dynamic_rotate %129 by %c1008_i32_132 dim 1 : vector<8x1024xf32>, i32 -> vector<8x1024xf32>
    %131 = arith.maximumf %129, %130 : vector<8x1024xf32>
    %c34_i32 = arith.constant 34 : i32
    %132 = tpu.dynamic_rotate %131 by %c34_i32 dim 1 : vector<8x1024xf32>, i32 -> vector<8x1024xf32>
    %c72_133 = arith.constant 72 : index
    %c0_134 = arith.constant 0 : index
    %133 = vector.load %arg3[%c72_133, %c0_134] : memref<216x1024xf32, #tpu.memory_space<vmem>>, vector<8x1024xf32>
    %134 = arith.mulf %132, %133 : vector<8x1024xf32>
    %c0_135 = arith.constant 0 : index
    %c0_136 = arith.constant 0 : index
    %135 = vector.load %arg6[%c0_135, %c0_136] : memref<80x1024xf32, #tpu.memory_space<vmem>>, vector<8x1024xf32>
    tpu.vector_store %arg6[%c0_135, %c0_136], %134 {strides = array<i32>} : memref<80x1024xf32, #tpu.memory_space<vmem>>, vector<8x1024xf32>,
    %c32_i32 = arith.constant 32 : i32
    %136 = tpu.dynamic_rotate %131 by %c32_i32 dim 1 : vector<8x1024xf32>, i32 -> vector<8x1024xf32>
    %c80 = arith.constant 80 : index
    %c0_137 = arith.constant 0 : index
    %137 = vector.load %arg3[%c80, %c0_137] : memref<216x1024xf32, #tpu.memory_space<vmem>>, vector<8x1024xf32>
    %138 = arith.mulf %136, %137 : vector<8x1024xf32>
    %c8_138 = arith.constant 8 : index
    %c0_139 = arith.constant 0 : index
    %139 = vector.load %arg6[%c8_138, %c0_139] : memref<80x1024xf32, #tpu.memory_space<vmem>>, vector<8x1024xf32>
    tpu.vector_store %arg6[%c8_138, %c0_139], %138 {strides = array<i32>} : memref<80x1024xf32, #tpu.memory_space<vmem>>, vector<8x1024xf32>,
    %c30_i32 = arith.constant 30 : i32
    %140 = tpu.dynamic_rotate %131 by %c30_i32 dim 1 : vector<8x1024xf32>, i32 -> vector<8x1024xf32>
    %c88 = arith.constant 88 : index
    %c0_140 = arith.constant 0 : index
    %141 = vector.load %arg3[%c88, %c0_140] : memref<216x1024xf32, #tpu.memory_space<vmem>>, vector<8x1024xf32>
    %142 = arith.mulf %140, %141 : vector<8x1024xf32>
    %c16_141 = arith.constant 16 : index
    %c0_142 = arith.constant 0 : index
    %143 = vector.load %arg6[%c16_141, %c0_142] : memref<80x1024xf32, #tpu.memory_space<vmem>>, vector<8x1024xf32>
    tpu.vector_store %arg6[%c16_141, %c0_142], %142 {strides = array<i32>} : memref<80x1024xf32, #tpu.memory_space<vmem>>, vector<8x1024xf32>,
    %c2_i32 = arith.constant 2 : i32
    %144 = tpu.dynamic_rotate %131 by %c2_i32 dim 1 : vector<8x1024xf32>, i32 -> vector<8x1024xf32>
    %c96 = arith.constant 96 : index
    %c0_143 = arith.constant 0 : index
    %145 = vector.load %arg3[%c96, %c0_143] : memref<216x1024xf32, #tpu.memory_space<vmem>>, vector<8x1024xf32>
    %146 = arith.mulf %144, %145 : vector<8x1024xf32>
    %c24_144 = arith.constant 24 : index
    %c0_145 = arith.constant 0 : index
    %147 = vector.load %arg6[%c24_144, %c0_145] : memref<80x1024xf32, #tpu.memory_space<vmem>>, vector<8x1024xf32>
    tpu.vector_store %arg6[%c24_144, %c0_145], %146 {strides = array<i32>} : memref<80x1024xf32, #tpu.memory_space<vmem>>, vector<8x1024xf32>,
    %c32_146 = arith.constant 32 : index
    %c0_147 = arith.constant 0 : index
    %148 = vector.load %arg6[%c32_146, %c0_147] : memref<80x1024xf32, #tpu.memory_space<vmem>>, vector<8x1024xf32>
    tpu.vector_store %arg6[%c32_146, %c0_147], %131 {strides = array<i32>} : memref<80x1024xf32, #tpu.memory_space<vmem>>, vector<8x1024xf32>,
    %c1022_i32 = arith.constant 1022 : i32
    %149 = tpu.dynamic_rotate %131 by %c1022_i32 dim 1 : vector<8x1024xf32>, i32 -> vector<8x1024xf32>
    %c112 = arith.constant 112 : index
    %c0_148 = arith.constant 0 : index
    %150 = vector.load %arg3[%c112, %c0_148] : memref<216x1024xf32, #tpu.memory_space<vmem>>, vector<8x1024xf32>
    %151 = arith.mulf %149, %150 : vector<8x1024xf32>
    %c40_149 = arith.constant 40 : index
    %c0_150 = arith.constant 0 : index
    %152 = vector.load %arg6[%c40_149, %c0_150] : memref<80x1024xf32, #tpu.memory_space<vmem>>, vector<8x1024xf32>
    tpu.vector_store %arg6[%c40_149, %c0_150], %151 {strides = array<i32>} : memref<80x1024xf32, #tpu.memory_space<vmem>>, vector<8x1024xf32>,
    %c994_i32 = arith.constant 994 : i32
    %153 = tpu.dynamic_rotate %131 by %c994_i32 dim 1 : vector<8x1024xf32>, i32 -> vector<8x1024xf32>
    %c120 = arith.constant 120 : index
    %c0_151 = arith.constant 0 : index
    %154 = vector.load %arg3[%c120, %c0_151] : memref<216x1024xf32, #tpu.memory_space<vmem>>, vector<8x1024xf32>
    %155 = arith.mulf %153, %154 : vector<8x1024xf32>
    %c48_152 = arith.constant 48 : index
    %c0_153 = arith.constant 0 : index
    %156 = vector.load %arg6[%c48_152, %c0_153] : memref<80x1024xf32, #tpu.memory_space<vmem>>, vector<8x1024xf32>
    tpu.vector_store %arg6[%c48_152, %c0_153], %155 {strides = array<i32>} : memref<80x1024xf32, #tpu.memory_space<vmem>>, vector<8x1024xf32>,
    %c992_i32 = arith.constant 992 : i32
    %157 = tpu.dynamic_rotate %131 by %c992_i32 dim 1 : vector<8x1024xf32>, i32 -> vector<8x1024xf32>
    %c128 = arith.constant 128 : index
    %c0_154 = arith.constant 0 : index
    %158 = vector.load %arg3[%c128, %c0_154] : memref<216x1024xf32, #tpu.memory_space<vmem>>, vector<8x1024xf32>
    %159 = arith.mulf %157, %158 : vector<8x1024xf32>
    %c56_155 = arith.constant 56 : index
    %c0_156 = arith.constant 0 : index
    %160 = vector.load %arg6[%c56_155, %c0_156] : memref<80x1024xf32, #tpu.memory_space<vmem>>, vector<8x1024xf32>
    tpu.vector_store %arg6[%c56_155, %c0_156], %159 {strides = array<i32>} : memref<80x1024xf32, #tpu.memory_space<vmem>>, vector<8x1024xf32>,
    %c990_i32 = arith.constant 990 : i32
    %161 = tpu.dynamic_rotate %131 by %c990_i32 dim 1 : vector<8x1024xf32>, i32 -> vector<8x1024xf32>
    %c136 = arith.constant 136 : index
    %c0_157 = arith.constant 0 : index
    %162 = vector.load %arg3[%c136, %c0_157] : memref<216x1024xf32, #tpu.memory_space<vmem>>, vector<8x1024xf32>
    %163 = arith.mulf %161, %162 : vector<8x1024xf32>
    %c64_158 = arith.constant 64 : index
    %c0_159 = arith.constant 0 : index
    %164 = vector.load %arg6[%c64_158, %c0_159] : memref<80x1024xf32, #tpu.memory_space<vmem>>, vector<8x1024xf32>
    tpu.vector_store %arg6[%c64_158, %c0_159], %163 {strides = array<i32>} : memref<80x1024xf32, #tpu.memory_space<vmem>>, vector<8x1024xf32>,
    %c3 = arith.constant 3 : index
    %c0_160 = arith.constant 0 : index
    %c0_161 = arith.constant 0 : index
    %165 = vector.load %arg2[%c3, %c0_160, %c0_161] : memref<9x8x80xf32, #tpu.memory_space<vmem>>, vector<1x8x80xf32>
    %166 = vector.shape_cast %165 : vector<1x8x80xf32> to vector<8x80xf32>
    %c0_162 = arith.constant 0 : index
    %c0_163 = arith.constant 0 : index
    %167 = vector.load %arg6[%c0_162, %c0_163] : memref<80x1024xf32, #tpu.memory_space<vmem>>, vector<80x1024xf32>
    %cst_164 = arith.constant dense<0.000000e+00> : vector<8x1024xf32>
    %168 = tpu.matmul %166, %167, %cst_164 {dimension_numbers = #tpu.dot_dimension_numbers<[1], [0], [0], [1], [0, 0, 1, 1], [], []>} : vector<8x80xf32>, vector<80x1024xf32>, vector<8x1024xf32> -> vector<8x1024xf32>
    %cst_165 = arith.constant 1.000000e-01 : f32
    %169 = vector.broadcast %cst_165 : f32 to vector<8x1024xf32>
    %170 = arith.mulf %169, %168 : vector<8x1024xf32>
    %171 = arith.maximumf %168, %170 : vector<8x1024xf32>
    %c34_i32_166 = arith.constant 34 : i32
    %172 = tpu.dynamic_rotate %171 by %c34_i32_166 dim 1 : vector<8x1024xf32>, i32 -> vector<8x1024xf32>
    %c72_167 = arith.constant 72 : index
    %c0_168 = arith.constant 0 : index
    %173 = vector.load %arg3[%c72_167, %c0_168] : memref<216x1024xf32, #tpu.memory_space<vmem>>, vector<8x1024xf32>
    %174 = arith.mulf %172, %173 : vector<8x1024xf32>
    %c0_169 = arith.constant 0 : index
    %c0_170 = arith.constant 0 : index
    %175 = vector.load %arg6[%c0_169, %c0_170] : memref<80x1024xf32, #tpu.memory_space<vmem>>, vector<8x1024xf32>
    tpu.vector_store %arg6[%c0_169, %c0_170], %174 {strides = array<i32>} : memref<80x1024xf32, #tpu.memory_space<vmem>>, vector<8x1024xf32>,
    %c32_i32_171 = arith.constant 32 : i32
    %176 = tpu.dynamic_rotate %171 by %c32_i32_171 dim 1 : vector<8x1024xf32>, i32 -> vector<8x1024xf32>
    %c80_172 = arith.constant 80 : index
    %c0_173 = arith.constant 0 : index
    %177 = vector.load %arg3[%c80_172, %c0_173] : memref<216x1024xf32, #tpu.memory_space<vmem>>, vector<8x1024xf32>
    %178 = arith.mulf %176, %177 : vector<8x1024xf32>
    %c8_174 = arith.constant 8 : index
    %c0_175 = arith.constant 0 : index
    %179 = vector.load %arg6[%c8_174, %c0_175] : memref<80x1024xf32, #tpu.memory_space<vmem>>, vector<8x1024xf32>
    tpu.vector_store %arg6[%c8_174, %c0_175], %178 {strides = array<i32>} : memref<80x1024xf32, #tpu.memory_space<vmem>>, vector<8x1024xf32>,
    %c30_i32_176 = arith.constant 30 : i32
    %180 = tpu.dynamic_rotate %171 by %c30_i32_176 dim 1 : vector<8x1024xf32>, i32 -> vector<8x1024xf32>
    %c88_177 = arith.constant 88 : index
    %c0_178 = arith.constant 0 : index
    %181 = vector.load %arg3[%c88_177, %c0_178] : memref<216x1024xf32, #tpu.memory_space<vmem>>, vector<8x1024xf32>
    %182 = arith.mulf %180, %181 : vector<8x1024xf32>
    %c16_179 = arith.constant 16 : index
    %c0_180 = arith.constant 0 : index
    %183 = vector.load %arg6[%c16_179, %c0_180] : memref<80x1024xf32, #tpu.memory_space<vmem>>, vector<8x1024xf32>
    tpu.vector_store %arg6[%c16_179, %c0_180], %182 {strides = array<i32>} : memref<80x1024xf32, #tpu.memory_space<vmem>>, vector<8x1024xf32>,
    %c2_i32_181 = arith.constant 2 : i32
    %184 = tpu.dynamic_rotate %171 by %c2_i32_181 dim 1 : vector<8x1024xf32>, i32 -> vector<8x1024xf32>
    %c96_182 = arith.constant 96 : index
    %c0_183 = arith.constant 0 : index
    %185 = vector.load %arg3[%c96_182, %c0_183] : memref<216x1024xf32, #tpu.memory_space<vmem>>, vector<8x1024xf32>
    %186 = arith.mulf %184, %185 : vector<8x1024xf32>
    %c24_184 = arith.constant 24 : index
    %c0_185 = arith.constant 0 : index
    %187 = vector.load %arg6[%c24_184, %c0_185] : memref<80x1024xf32, #tpu.memory_space<vmem>>, vector<8x1024xf32>
    tpu.vector_store %arg6[%c24_184, %c0_185], %186 {strides = array<i32>} : memref<80x1024xf32, #tpu.memory_space<vmem>>, vector<8x1024xf32>,
    %c32_186 = arith.constant 32 : index
    %c0_187 = arith.constant 0 : index
    %188 = vector.load %arg6[%c32_186, %c0_187] : memref<80x1024xf32, #tpu.memory_space<vmem>>, vector<8x1024xf32>
    tpu.vector_store %arg6[%c32_186, %c0_187], %171 {strides = array<i32>} : memref<80x1024xf32, #tpu.memory_space<vmem>>, vector<8x1024xf32>,
    %c1022_i32_188 = arith.constant 1022 : i32
    %189 = tpu.dynamic_rotate %171 by %c1022_i32_188 dim 1 : vector<8x1024xf32>, i32 -> vector<8x1024xf32>
    %c112_189 = arith.constant 112 : index
    %c0_190 = arith.constant 0 : index
    %190 = vector.load %arg3[%c112_189, %c0_190] : memref<216x1024xf32, #tpu.memory_space<vmem>>, vector<8x1024xf32>
    %191 = arith.mulf %189, %190 : vector<8x1024xf32>
    %c40_191 = arith.constant 40 : index
    %c0_192 = arith.constant 0 : index
    %192 = vector.load %arg6[%c40_191, %c0_192] : memref<80x1024xf32, #tpu.memory_space<vmem>>, vector<8x1024xf32>
    tpu.vector_store %arg6[%c40_191, %c0_192], %191 {strides = array<i32>} : memref<80x1024xf32, #tpu.memory_space<vmem>>, vector<8x1024xf32>,
    %c994_i32_193 = arith.constant 994 : i32
    %193 = tpu.dynamic_rotate %171 by %c994_i32_193 dim 1 : vector<8x1024xf32>, i32 -> vector<8x1024xf32>
    %c120_194 = arith.constant 120 : index
    %c0_195 = arith.constant 0 : index
    %194 = vector.load %arg3[%c120_194, %c0_195] : memref<216x1024xf32, #tpu.memory_space<vmem>>, vector<8x1024xf32>
    %195 = arith.mulf %193, %194 : vector<8x1024xf32>
    %c48_196 = arith.constant 48 : index
    %c0_197 = arith.constant 0 : index
    %196 = vector.load %arg6[%c48_196, %c0_197] : memref<80x1024xf32, #tpu.memory_space<vmem>>, vector<8x1024xf32>
    tpu.vector_store %arg6[%c48_196, %c0_197], %195 {strides = array<i32>} : memref<80x1024xf32, #tpu.memory_space<vmem>>, vector<8x1024xf32>,
    %c992_i32_198 = arith.constant 992 : i32
    %197 = tpu.dynamic_rotate %171 by %c992_i32_198 dim 1 : vector<8x1024xf32>, i32 -> vector<8x1024xf32>
    %c128_199 = arith.constant 128 : index
    %c0_200 = arith.constant 0 : index
    %198 = vector.load %arg3[%c128_199, %c0_200] : memref<216x1024xf32, #tpu.memory_space<vmem>>, vector<8x1024xf32>
    %199 = arith.mulf %197, %198 : vector<8x1024xf32>
    %c56_201 = arith.constant 56 : index
    %c0_202 = arith.constant 0 : index
    %200 = vector.load %arg6[%c56_201, %c0_202] : memref<80x1024xf32, #tpu.memory_space<vmem>>, vector<8x1024xf32>
    tpu.vector_store %arg6[%c56_201, %c0_202], %199 {strides = array<i32>} : memref<80x1024xf32, #tpu.memory_space<vmem>>, vector<8x1024xf32>,
    %c990_i32_203 = arith.constant 990 : i32
    %201 = tpu.dynamic_rotate %171 by %c990_i32_203 dim 1 : vector<8x1024xf32>, i32 -> vector<8x1024xf32>
    %c136_204 = arith.constant 136 : index
    %c0_205 = arith.constant 0 : index
    %202 = vector.load %arg3[%c136_204, %c0_205] : memref<216x1024xf32, #tpu.memory_space<vmem>>, vector<8x1024xf32>
    %203 = arith.mulf %201, %202 : vector<8x1024xf32>
    %c64_206 = arith.constant 64 : index
    %c0_207 = arith.constant 0 : index
    %204 = vector.load %arg6[%c64_206, %c0_207] : memref<80x1024xf32, #tpu.memory_space<vmem>>, vector<8x1024xf32>
    tpu.vector_store %arg6[%c64_206, %c0_207], %203 {strides = array<i32>} : memref<80x1024xf32, #tpu.memory_space<vmem>>, vector<8x1024xf32>,
    %c4 = arith.constant 4 : index
    %c0_208 = arith.constant 0 : index
    %c0_209 = arith.constant 0 : index
    %205 = vector.load %arg2[%c4, %c0_208, %c0_209] : memref<9x8x80xf32, #tpu.memory_space<vmem>>, vector<1x8x80xf32>
    %206 = vector.shape_cast %205 : vector<1x8x80xf32> to vector<8x80xf32>
    %c0_210 = arith.constant 0 : index
    %c0_211 = arith.constant 0 : index
    %207 = vector.load %arg6[%c0_210, %c0_211] : memref<80x1024xf32, #tpu.memory_space<vmem>>, vector<80x1024xf32>
    %cst_212 = arith.constant dense<0.000000e+00> : vector<8x1024xf32>
    %208 = tpu.matmul %206, %207, %cst_212 {dimension_numbers = #tpu.dot_dimension_numbers<[1], [0], [0], [1], [0, 0, 1, 1], [], []>} : vector<8x80xf32>, vector<80x1024xf32>, vector<8x1024xf32> -> vector<8x1024xf32>
    %cst_213 = arith.constant 1.000000e-01 : f32
    %209 = vector.broadcast %cst_213 : f32 to vector<8x1024xf32>
    %210 = arith.mulf %209, %208 : vector<8x1024xf32>
    %211 = arith.maximumf %208, %210 : vector<8x1024xf32>
    %c34_i32_214 = arith.constant 34 : i32
    %212 = tpu.dynamic_rotate %211 by %c34_i32_214 dim 1 : vector<8x1024xf32>, i32 -> vector<8x1024xf32>
    %c72_215 = arith.constant 72 : index
    %c0_216 = arith.constant 0 : index
    %213 = vector.load %arg3[%c72_215, %c0_216] : memref<216x1024xf32, #tpu.memory_space<vmem>>, vector<8x1024xf32>
    %214 = arith.mulf %212, %213 : vector<8x1024xf32>
    %c0_217 = arith.constant 0 : index
    %c0_218 = arith.constant 0 : index
    %215 = vector.load %arg6[%c0_217, %c0_218] : memref<80x1024xf32, #tpu.memory_space<vmem>>, vector<8x1024xf32>
    tpu.vector_store %arg6[%c0_217, %c0_218], %214 {strides = array<i32>} : memref<80x1024xf32, #tpu.memory_space<vmem>>, vector<8x1024xf32>,
    %c32_i32_219 = arith.constant 32 : i32
    %216 = tpu.dynamic_rotate %211 by %c32_i32_219 dim 1 : vector<8x1024xf32>, i32 -> vector<8x1024xf32>
    %c80_220 = arith.constant 80 : index
    %c0_221 = arith.constant 0 : index
    %217 = vector.load %arg3[%c80_220, %c0_221] : memref<216x1024xf32, #tpu.memory_space<vmem>>, vector<8x1024xf32>
    %218 = arith.mulf %216, %217 : vector<8x1024xf32>
    %c8_222 = arith.constant 8 : index
    %c0_223 = arith.constant 0 : index
    %219 = vector.load %arg6[%c8_222, %c0_223] : memref<80x1024xf32, #tpu.memory_space<vmem>>, vector<8x1024xf32>
    tpu.vector_store %arg6[%c8_222, %c0_223], %218 {strides = array<i32>} : memref<80x1024xf32, #tpu.memory_space<vmem>>, vector<8x1024xf32>,
    %c30_i32_224 = arith.constant 30 : i32
    %220 = tpu.dynamic_rotate %211 by %c30_i32_224 dim 1 : vector<8x1024xf32>, i32 -> vector<8x1024xf32>
    %c88_225 = arith.constant 88 : index
    %c0_226 = arith.constant 0 : index
    %221 = vector.load %arg3[%c88_225, %c0_226] : memref<216x1024xf32, #tpu.memory_space<vmem>>, vector<8x1024xf32>
    %222 = arith.mulf %220, %221 : vector<8x1024xf32>
    %c16_227 = arith.constant 16 : index
    %c0_228 = arith.constant 0 : index
    %223 = vector.load %arg6[%c16_227, %c0_228] : memref<80x1024xf32, #tpu.memory_space<vmem>>, vector<8x1024xf32>
    tpu.vector_store %arg6[%c16_227, %c0_228], %222 {strides = array<i32>} : memref<80x1024xf32, #tpu.memory_space<vmem>>, vector<8x1024xf32>,
    %c2_i32_229 = arith.constant 2 : i32
    %224 = tpu.dynamic_rotate %211 by %c2_i32_229 dim 1 : vector<8x1024xf32>, i32 -> vector<8x1024xf32>
    %c96_230 = arith.constant 96 : index
    %c0_231 = arith.constant 0 : index
    %225 = vector.load %arg3[%c96_230, %c0_231] : memref<216x1024xf32, #tpu.memory_space<vmem>>, vector<8x1024xf32>
    %226 = arith.mulf %224, %225 : vector<8x1024xf32>
    %c24_232 = arith.constant 24 : index
    %c0_233 = arith.constant 0 : index
    %227 = vector.load %arg6[%c24_232, %c0_233] : memref<80x1024xf32, #tpu.memory_space<vmem>>, vector<8x1024xf32>
    tpu.vector_store %arg6[%c24_232, %c0_233], %226 {strides = array<i32>} : memref<80x1024xf32, #tpu.memory_space<vmem>>, vector<8x1024xf32>,
    %c32_234 = arith.constant 32 : index
    %c0_235 = arith.constant 0 : index
    %228 = vector.load %arg6[%c32_234, %c0_235] : memref<80x1024xf32, #tpu.memory_space<vmem>>, vector<8x1024xf32>
    tpu.vector_store %arg6[%c32_234, %c0_235], %211 {strides = array<i32>} : memref<80x1024xf32, #tpu.memory_space<vmem>>, vector<8x1024xf32>,
    %c1022_i32_236 = arith.constant 1022 : i32
    %229 = tpu.dynamic_rotate %211 by %c1022_i32_236 dim 1 : vector<8x1024xf32>, i32 -> vector<8x1024xf32>
    %c112_237 = arith.constant 112 : index
    %c0_238 = arith.constant 0 : index
    %230 = vector.load %arg3[%c112_237, %c0_238] : memref<216x1024xf32, #tpu.memory_space<vmem>>, vector<8x1024xf32>
    %231 = arith.mulf %229, %230 : vector<8x1024xf32>
    %c40_239 = arith.constant 40 : index
    %c0_240 = arith.constant 0 : index
    %232 = vector.load %arg6[%c40_239, %c0_240] : memref<80x1024xf32, #tpu.memory_space<vmem>>, vector<8x1024xf32>
    tpu.vector_store %arg6[%c40_239, %c0_240], %231 {strides = array<i32>} : memref<80x1024xf32, #tpu.memory_space<vmem>>, vector<8x1024xf32>,
    %c994_i32_241 = arith.constant 994 : i32
    %233 = tpu.dynamic_rotate %211 by %c994_i32_241 dim 1 : vector<8x1024xf32>, i32 -> vector<8x1024xf32>
    %c120_242 = arith.constant 120 : index
    %c0_243 = arith.constant 0 : index
    %234 = vector.load %arg3[%c120_242, %c0_243] : memref<216x1024xf32, #tpu.memory_space<vmem>>, vector<8x1024xf32>
    %235 = arith.mulf %233, %234 : vector<8x1024xf32>
    %c48_244 = arith.constant 48 : index
    %c0_245 = arith.constant 0 : index
    %236 = vector.load %arg6[%c48_244, %c0_245] : memref<80x1024xf32, #tpu.memory_space<vmem>>, vector<8x1024xf32>
    tpu.vector_store %arg6[%c48_244, %c0_245], %235 {strides = array<i32>} : memref<80x1024xf32, #tpu.memory_space<vmem>>, vector<8x1024xf32>,
    %c992_i32_246 = arith.constant 992 : i32
    %237 = tpu.dynamic_rotate %211 by %c992_i32_246 dim 1 : vector<8x1024xf32>, i32 -> vector<8x1024xf32>
    %c128_247 = arith.constant 128 : index
    %c0_248 = arith.constant 0 : index
    %238 = vector.load %arg3[%c128_247, %c0_248] : memref<216x1024xf32, #tpu.memory_space<vmem>>, vector<8x1024xf32>
    %239 = arith.mulf %237, %238 : vector<8x1024xf32>
    %c56_249 = arith.constant 56 : index
    %c0_250 = arith.constant 0 : index
    %240 = vector.load %arg6[%c56_249, %c0_250] : memref<80x1024xf32, #tpu.memory_space<vmem>>, vector<8x1024xf32>
    tpu.vector_store %arg6[%c56_249, %c0_250], %239 {strides = array<i32>} : memref<80x1024xf32, #tpu.memory_space<vmem>>, vector<8x1024xf32>,
    %c990_i32_251 = arith.constant 990 : i32
    %241 = tpu.dynamic_rotate %211 by %c990_i32_251 dim 1 : vector<8x1024xf32>, i32 -> vector<8x1024xf32>
    %c136_252 = arith.constant 136 : index
    %c0_253 = arith.constant 0 : index
    %242 = vector.load %arg3[%c136_252, %c0_253] : memref<216x1024xf32, #tpu.memory_space<vmem>>, vector<8x1024xf32>
    %243 = arith.mulf %241, %242 : vector<8x1024xf32>
    %c64_254 = arith.constant 64 : index
    %c0_255 = arith.constant 0 : index
    %244 = vector.load %arg6[%c64_254, %c0_255] : memref<80x1024xf32, #tpu.memory_space<vmem>>, vector<8x1024xf32>
    tpu.vector_store %arg6[%c64_254, %c0_255], %243 {strides = array<i32>} : memref<80x1024xf32, #tpu.memory_space<vmem>>, vector<8x1024xf32>,
    %c5 = arith.constant 5 : index
    %c0_256 = arith.constant 0 : index
    %c0_257 = arith.constant 0 : index
    %245 = vector.load %arg2[%c5, %c0_256, %c0_257] : memref<9x8x80xf32, #tpu.memory_space<vmem>>, vector<1x8x80xf32>
    %246 = vector.shape_cast %245 : vector<1x8x80xf32> to vector<8x80xf32>
    %c0_258 = arith.constant 0 : index
    %c0_259 = arith.constant 0 : index
    %247 = vector.load %arg6[%c0_258, %c0_259] : memref<80x1024xf32, #tpu.memory_space<vmem>>, vector<80x1024xf32>
    %cst_260 = arith.constant dense<0.000000e+00> : vector<8x1024xf32>
    %248 = tpu.matmul %246, %247, %cst_260 {dimension_numbers = #tpu.dot_dimension_numbers<[1], [0], [0], [1], [0, 0, 1, 1], [], []>} : vector<8x80xf32>, vector<80x1024xf32>, vector<8x1024xf32> -> vector<8x1024xf32>
    %cst_261 = arith.constant 1.000000e-01 : f32
    %249 = vector.broadcast %cst_261 : f32 to vector<8x1024xf32>
    %250 = arith.mulf %249, %248 : vector<8x1024xf32>
    %251 = arith.maximumf %248, %250 : vector<8x1024xf32>
    %c1022_i32_262 = arith.constant 1022 : i32
    %252 = tpu.dynamic_rotate %251 by %c1022_i32_262 dim 1 : vector<8x1024xf32>, i32 -> vector<8x1024xf32>
    %253 = arith.maximumf %251, %252 : vector<8x1024xf32>
    %c992_i32_263 = arith.constant 992 : i32
    %254 = tpu.dynamic_rotate %253 by %c992_i32_263 dim 1 : vector<8x1024xf32>, i32 -> vector<8x1024xf32>
    %255 = arith.maximumf %253, %254 : vector<8x1024xf32>
    %c68_i32 = arith.constant 68 : i32
    %256 = tpu.dynamic_rotate %255 by %c68_i32 dim 1 : vector<8x1024xf32>, i32 -> vector<8x1024xf32>
    %c144 = arith.constant 144 : index
    %c0_264 = arith.constant 0 : index
    %257 = vector.load %arg3[%c144, %c0_264] : memref<216x1024xf32, #tpu.memory_space<vmem>>, vector<8x1024xf32>
    %258 = arith.mulf %256, %257 : vector<8x1024xf32>
    %c0_265 = arith.constant 0 : index
    %c0_266 = arith.constant 0 : index
    %259 = vector.load %arg6[%c0_265, %c0_266] : memref<80x1024xf32, #tpu.memory_space<vmem>>, vector<8x1024xf32>
    tpu.vector_store %arg6[%c0_265, %c0_266], %258 {strides = array<i32>} : memref<80x1024xf32, #tpu.memory_space<vmem>>, vector<8x1024xf32>,
    %c64_i32 = arith.constant 64 : i32
    %260 = tpu.dynamic_rotate %255 by %c64_i32 dim 1 : vector<8x1024xf32>, i32 -> vector<8x1024xf32>
    %c152 = arith.constant 152 : index
    %c0_267 = arith.constant 0 : index
    %261 = vector.load %arg3[%c152, %c0_267] : memref<216x1024xf32, #tpu.memory_space<vmem>>, vector<8x1024xf32>
    %262 = arith.mulf %260, %261 : vector<8x1024xf32>
    %c8_268 = arith.constant 8 : index
    %c0_269 = arith.constant 0 : index
    %263 = vector.load %arg6[%c8_268, %c0_269] : memref<80x1024xf32, #tpu.memory_space<vmem>>, vector<8x1024xf32>
    tpu.vector_store %arg6[%c8_268, %c0_269], %262 {strides = array<i32>} : memref<80x1024xf32, #tpu.memory_space<vmem>>, vector<8x1024xf32>,
    %c60_i32 = arith.constant 60 : i32
    %264 = tpu.dynamic_rotate %255 by %c60_i32 dim 1 : vector<8x1024xf32>, i32 -> vector<8x1024xf32>
    %c160 = arith.constant 160 : index
    %c0_270 = arith.constant 0 : index
    %265 = vector.load %arg3[%c160, %c0_270] : memref<216x1024xf32, #tpu.memory_space<vmem>>, vector<8x1024xf32>
    %266 = arith.mulf %264, %265 : vector<8x1024xf32>
    %c16_271 = arith.constant 16 : index
    %c0_272 = arith.constant 0 : index
    %267 = vector.load %arg6[%c16_271, %c0_272] : memref<80x1024xf32, #tpu.memory_space<vmem>>, vector<8x1024xf32>
    tpu.vector_store %arg6[%c16_271, %c0_272], %266 {strides = array<i32>} : memref<80x1024xf32, #tpu.memory_space<vmem>>, vector<8x1024xf32>,
    %c4_i32 = arith.constant 4 : i32
    %268 = tpu.dynamic_rotate %255 by %c4_i32 dim 1 : vector<8x1024xf32>, i32 -> vector<8x1024xf32>
    %c168 = arith.constant 168 : index
    %c0_273 = arith.constant 0 : index
    %269 = vector.load %arg3[%c168, %c0_273] : memref<216x1024xf32, #tpu.memory_space<vmem>>, vector<8x1024xf32>
    %270 = arith.mulf %268, %269 : vector<8x1024xf32>
    %c24_274 = arith.constant 24 : index
    %c0_275 = arith.constant 0 : index
    %271 = vector.load %arg6[%c24_274, %c0_275] : memref<80x1024xf32, #tpu.memory_space<vmem>>, vector<8x1024xf32>
    tpu.vector_store %arg6[%c24_274, %c0_275], %270 {strides = array<i32>} : memref<80x1024xf32, #tpu.memory_space<vmem>>, vector<8x1024xf32>,
    %c32_276 = arith.constant 32 : index
    %c0_277 = arith.constant 0 : index
    %272 = vector.load %arg6[%c32_276, %c0_277] : memref<80x1024xf32, #tpu.memory_space<vmem>>, vector<8x1024xf32>
    tpu.vector_store %arg6[%c32_276, %c0_277], %255 {strides = array<i32>} : memref<80x1024xf32, #tpu.memory_space<vmem>>, vector<8x1024xf32>,
    %c1020_i32 = arith.constant 1020 : i32
    %273 = tpu.dynamic_rotate %255 by %c1020_i32 dim 1 : vector<8x1024xf32>, i32 -> vector<8x1024xf32>
    %c184 = arith.constant 184 : index
    %c0_278 = arith.constant 0 : index
    %274 = vector.load %arg3[%c184, %c0_278] : memref<216x1024xf32, #tpu.memory_space<vmem>>, vector<8x1024xf32>
    %275 = arith.mulf %273, %274 : vector<8x1024xf32>
    %c40_279 = arith.constant 40 : index
    %c0_280 = arith.constant 0 : index
    %276 = vector.load %arg6[%c40_279, %c0_280] : memref<80x1024xf32, #tpu.memory_space<vmem>>, vector<8x1024xf32>
    tpu.vector_store %arg6[%c40_279, %c0_280], %275 {strides = array<i32>} : memref<80x1024xf32, #tpu.memory_space<vmem>>, vector<8x1024xf32>,
    %c964_i32 = arith.constant 964 : i32
    %277 = tpu.dynamic_rotate %255 by %c964_i32 dim 1 : vector<8x1024xf32>, i32 -> vector<8x1024xf32>
    %c192 = arith.constant 192 : index
    %c0_281 = arith.constant 0 : index
    %278 = vector.load %arg3[%c192, %c0_281] : memref<216x1024xf32, #tpu.memory_space<vmem>>, vector<8x1024xf32>
    %279 = arith.mulf %277, %278 : vector<8x1024xf32>
    %c48_282 = arith.constant 48 : index
    %c0_283 = arith.constant 0 : index
    %280 = vector.load %arg6[%c48_282, %c0_283] : memref<80x1024xf32, #tpu.memory_space<vmem>>, vector<8x1024xf32>
    tpu.vector_store %arg6[%c48_282, %c0_283], %279 {strides = array<i32>} : memref<80x1024xf32, #tpu.memory_space<vmem>>, vector<8x1024xf32>,
    %c960_i32 = arith.constant 960 : i32
    %281 = tpu.dynamic_rotate %255 by %c960_i32 dim 1 : vector<8x1024xf32>, i32 -> vector<8x1024xf32>
    %c200 = arith.constant 200 : index
    %c0_284 = arith.constant 0 : index
    %282 = vector.load %arg3[%c200, %c0_284] : memref<216x1024xf32, #tpu.memory_space<vmem>>, vector<8x1024xf32>
    %283 = arith.mulf %281, %282 : vector<8x1024xf32>
    %c56_285 = arith.constant 56 : index
    %c0_286 = arith.constant 0 : index
    %284 = vector.load %arg6[%c56_285, %c0_286] : memref<80x1024xf32, #tpu.memory_space<vmem>>, vector<8x1024xf32>
    tpu.vector_store %arg6[%c56_285, %c0_286], %283 {strides = array<i32>} : memref<80x1024xf32, #tpu.memory_space<vmem>>, vector<8x1024xf32>,
    %c956_i32 = arith.constant 956 : i32
    %285 = tpu.dynamic_rotate %255 by %c956_i32 dim 1 : vector<8x1024xf32>, i32 -> vector<8x1024xf32>
    %c208 = arith.constant 208 : index
    %c0_287 = arith.constant 0 : index
    %286 = vector.load %arg3[%c208, %c0_287] : memref<216x1024xf32, #tpu.memory_space<vmem>>, vector<8x1024xf32>
    %287 = arith.mulf %285, %286 : vector<8x1024xf32>
    %c64_288 = arith.constant 64 : index
    %c0_289 = arith.constant 0 : index
    %288 = vector.load %arg6[%c64_288, %c0_289] : memref<80x1024xf32, #tpu.memory_space<vmem>>, vector<8x1024xf32>
    tpu.vector_store %arg6[%c64_288, %c0_289], %287 {strides = array<i32>} : memref<80x1024xf32, #tpu.memory_space<vmem>>, vector<8x1024xf32>,
    %c6 = arith.constant 6 : index
    %c0_290 = arith.constant 0 : index
    %c0_291 = arith.constant 0 : index
    %289 = vector.load %arg2[%c6, %c0_290, %c0_291] : memref<9x8x80xf32, #tpu.memory_space<vmem>>, vector<1x8x80xf32>
    %290 = vector.shape_cast %289 : vector<1x8x80xf32> to vector<8x80xf32>
    %c0_292 = arith.constant 0 : index
    %c0_293 = arith.constant 0 : index
    %291 = vector.load %arg6[%c0_292, %c0_293] : memref<80x1024xf32, #tpu.memory_space<vmem>>, vector<80x1024xf32>
    %cst_294 = arith.constant dense<0.000000e+00> : vector<8x1024xf32>
    %292 = tpu.matmul %290, %291, %cst_294 {dimension_numbers = #tpu.dot_dimension_numbers<[1], [0], [0], [1], [0, 0, 1, 1], [], []>} : vector<8x80xf32>, vector<80x1024xf32>, vector<8x1024xf32> -> vector<8x1024xf32>
    %cst_295 = arith.constant 1.000000e-01 : f32
    %293 = vector.broadcast %cst_295 : f32 to vector<8x1024xf32>
    %294 = arith.mulf %293, %292 : vector<8x1024xf32>
    %295 = arith.maximumf %292, %294 : vector<8x1024xf32>
    %c68_i32_296 = arith.constant 68 : i32
    %296 = tpu.dynamic_rotate %295 by %c68_i32_296 dim 1 : vector<8x1024xf32>, i32 -> vector<8x1024xf32>
    %c144_297 = arith.constant 144 : index
    %c0_298 = arith.constant 0 : index
    %297 = vector.load %arg3[%c144_297, %c0_298] : memref<216x1024xf32, #tpu.memory_space<vmem>>, vector<8x1024xf32>
    %298 = arith.mulf %296, %297 : vector<8x1024xf32>
    %c0_299 = arith.constant 0 : index
    %c0_300 = arith.constant 0 : index
    %299 = vector.load %arg6[%c0_299, %c0_300] : memref<80x1024xf32, #tpu.memory_space<vmem>>, vector<8x1024xf32>
    tpu.vector_store %arg6[%c0_299, %c0_300], %298 {strides = array<i32>} : memref<80x1024xf32, #tpu.memory_space<vmem>>, vector<8x1024xf32>,
    %c64_i32_301 = arith.constant 64 : i32
    %300 = tpu.dynamic_rotate %295 by %c64_i32_301 dim 1 : vector<8x1024xf32>, i32 -> vector<8x1024xf32>
    %c152_302 = arith.constant 152 : index
    %c0_303 = arith.constant 0 : index
    %301 = vector.load %arg3[%c152_302, %c0_303] : memref<216x1024xf32, #tpu.memory_space<vmem>>, vector<8x1024xf32>
    %302 = arith.mulf %300, %301 : vector<8x1024xf32>
    %c8_304 = arith.constant 8 : index
    %c0_305 = arith.constant 0 : index
    %303 = vector.load %arg6[%c8_304, %c0_305] : memref<80x1024xf32, #tpu.memory_space<vmem>>, vector<8x1024xf32>
    tpu.vector_store %arg6[%c8_304, %c0_305], %302 {strides = array<i32>} : memref<80x1024xf32, #tpu.memory_space<vmem>>, vector<8x1024xf32>,
    %c60_i32_306 = arith.constant 60 : i32
    %304 = tpu.dynamic_rotate %295 by %c60_i32_306 dim 1 : vector<8x1024xf32>, i32 -> vector<8x1024xf32>
    %c160_307 = arith.constant 160 : index
    %c0_308 = arith.constant 0 : index
    %305 = vector.load %arg3[%c160_307, %c0_308] : memref<216x1024xf32, #tpu.memory_space<vmem>>, vector<8x1024xf32>
    %306 = arith.mulf %304, %305 : vector<8x1024xf32>
    %c16_309 = arith.constant 16 : index
    %c0_310 = arith.constant 0 : index
    %307 = vector.load %arg6[%c16_309, %c0_310] : memref<80x1024xf32, #tpu.memory_space<vmem>>, vector<8x1024xf32>
    tpu.vector_store %arg6[%c16_309, %c0_310], %306 {strides = array<i32>} : memref<80x1024xf32, #tpu.memory_space<vmem>>, vector<8x1024xf32>,
    %c4_i32_311 = arith.constant 4 : i32
    %308 = tpu.dynamic_rotate %295 by %c4_i32_311 dim 1 : vector<8x1024xf32>, i32 -> vector<8x1024xf32>
    %c168_312 = arith.constant 168 : index
    %c0_313 = arith.constant 0 : index
    %309 = vector.load %arg3[%c168_312, %c0_313] : memref<216x1024xf32, #tpu.memory_space<vmem>>, vector<8x1024xf32>
    %310 = arith.mulf %308, %309 : vector<8x1024xf32>
    %c24_314 = arith.constant 24 : index
    %c0_315 = arith.constant 0 : index
    %311 = vector.load %arg6[%c24_314, %c0_315] : memref<80x1024xf32, #tpu.memory_space<vmem>>, vector<8x1024xf32>
    tpu.vector_store %arg6[%c24_314, %c0_315], %310 {strides = array<i32>} : memref<80x1024xf32, #tpu.memory_space<vmem>>, vector<8x1024xf32>,
    %c32_316 = arith.constant 32 : index
    %c0_317 = arith.constant 0 : index
    %312 = vector.load %arg6[%c32_316, %c0_317] : memref<80x1024xf32, #tpu.memory_space<vmem>>, vector<8x1024xf32>
    tpu.vector_store %arg6[%c32_316, %c0_317], %295 {strides = array<i32>} : memref<80x1024xf32, #tpu.memory_space<vmem>>, vector<8x1024xf32>,
    %c1020_i32_318 = arith.constant 1020 : i32
    %313 = tpu.dynamic_rotate %295 by %c1020_i32_318 dim 1 : vector<8x1024xf32>, i32 -> vector<8x1024xf32>
    %c184_319 = arith.constant 184 : index
    %c0_320 = arith.constant 0 : index
    %314 = vector.load %arg3[%c184_319, %c0_320] : memref<216x1024xf32, #tpu.memory_space<vmem>>, vector<8x1024xf32>
    %315 = arith.mulf %313, %314 : vector<8x1024xf32>
    %c40_321 = arith.constant 40 : index
    %c0_322 = arith.constant 0 : index
    %316 = vector.load %arg6[%c40_321, %c0_322] : memref<80x1024xf32, #tpu.memory_space<vmem>>, vector<8x1024xf32>
    tpu.vector_store %arg6[%c40_321, %c0_322], %315 {strides = array<i32>} : memref<80x1024xf32, #tpu.memory_space<vmem>>, vector<8x1024xf32>,
    %c964_i32_323 = arith.constant 964 : i32
    %317 = tpu.dynamic_rotate %295 by %c964_i32_323 dim 1 : vector<8x1024xf32>, i32 -> vector<8x1024xf32>
    %c192_324 = arith.constant 192 : index
    %c0_325 = arith.constant 0 : index
    %318 = vector.load %arg3[%c192_324, %c0_325] : memref<216x1024xf32, #tpu.memory_space<vmem>>, vector<8x1024xf32>
    %319 = arith.mulf %317, %318 : vector<8x1024xf32>
    %c48_326 = arith.constant 48 : index
    %c0_327 = arith.constant 0 : index
    %320 = vector.load %arg6[%c48_326, %c0_327] : memref<80x1024xf32, #tpu.memory_space<vmem>>, vector<8x1024xf32>
    tpu.vector_store %arg6[%c48_326, %c0_327], %319 {strides = array<i32>} : memref<80x1024xf32, #tpu.memory_space<vmem>>, vector<8x1024xf32>,
    %c960_i32_328 = arith.constant 960 : i32
    %321 = tpu.dynamic_rotate %295 by %c960_i32_328 dim 1 : vector<8x1024xf32>, i32 -> vector<8x1024xf32>
    %c200_329 = arith.constant 200 : index
    %c0_330 = arith.constant 0 : index
    %322 = vector.load %arg3[%c200_329, %c0_330] : memref<216x1024xf32, #tpu.memory_space<vmem>>, vector<8x1024xf32>
    %323 = arith.mulf %321, %322 : vector<8x1024xf32>
    %c56_331 = arith.constant 56 : index
    %c0_332 = arith.constant 0 : index
    %324 = vector.load %arg6[%c56_331, %c0_332] : memref<80x1024xf32, #tpu.memory_space<vmem>>, vector<8x1024xf32>
    tpu.vector_store %arg6[%c56_331, %c0_332], %323 {strides = array<i32>} : memref<80x1024xf32, #tpu.memory_space<vmem>>, vector<8x1024xf32>,
    %c956_i32_333 = arith.constant 956 : i32
    %325 = tpu.dynamic_rotate %295 by %c956_i32_333 dim 1 : vector<8x1024xf32>, i32 -> vector<8x1024xf32>
    %c208_334 = arith.constant 208 : index
    %c0_335 = arith.constant 0 : index
    %326 = vector.load %arg3[%c208_334, %c0_335] : memref<216x1024xf32, #tpu.memory_space<vmem>>, vector<8x1024xf32>
    %327 = arith.mulf %325, %326 : vector<8x1024xf32>
    %c64_336 = arith.constant 64 : index
    %c0_337 = arith.constant 0 : index
    %328 = vector.load %arg6[%c64_336, %c0_337] : memref<80x1024xf32, #tpu.memory_space<vmem>>, vector<8x1024xf32>
    tpu.vector_store %arg6[%c64_336, %c0_337], %327 {strides = array<i32>} : memref<80x1024xf32, #tpu.memory_space<vmem>>, vector<8x1024xf32>,
    %c7 = arith.constant 7 : index
    %c0_338 = arith.constant 0 : index
    %c0_339 = arith.constant 0 : index
    %329 = vector.load %arg2[%c7, %c0_338, %c0_339] : memref<9x8x80xf32, #tpu.memory_space<vmem>>, vector<1x8x80xf32>
    %330 = vector.shape_cast %329 : vector<1x8x80xf32> to vector<8x80xf32>
    %c0_340 = arith.constant 0 : index
    %c0_341 = arith.constant 0 : index
    %331 = vector.load %arg6[%c0_340, %c0_341] : memref<80x1024xf32, #tpu.memory_space<vmem>>, vector<80x1024xf32>
    %cst_342 = arith.constant dense<0.000000e+00> : vector<8x1024xf32>
    %332 = tpu.matmul %330, %331, %cst_342 {dimension_numbers = #tpu.dot_dimension_numbers<[1], [0], [0], [1], [0, 0, 1, 1], [], []>} : vector<8x80xf32>, vector<80x1024xf32>, vector<8x1024xf32> -> vector<8x1024xf32>
    %cst_343 = arith.constant 1.000000e-01 : f32
    %333 = vector.broadcast %cst_343 : f32 to vector<8x1024xf32>
    %334 = arith.mulf %333, %332 : vector<8x1024xf32>
    %335 = arith.maximumf %332, %334 : vector<8x1024xf32>
    %c68_i32_344 = arith.constant 68 : i32
    %336 = tpu.dynamic_rotate %335 by %c68_i32_344 dim 1 : vector<8x1024xf32>, i32 -> vector<8x1024xf32>
    %c144_345 = arith.constant 144 : index
    %c0_346 = arith.constant 0 : index
    %337 = vector.load %arg3[%c144_345, %c0_346] : memref<216x1024xf32, #tpu.memory_space<vmem>>, vector<8x1024xf32>
    %338 = arith.mulf %336, %337 : vector<8x1024xf32>
    %c0_347 = arith.constant 0 : index
    %c0_348 = arith.constant 0 : index
    %339 = vector.load %arg6[%c0_347, %c0_348] : memref<80x1024xf32, #tpu.memory_space<vmem>>, vector<8x1024xf32>
    tpu.vector_store %arg6[%c0_347, %c0_348], %338 {strides = array<i32>} : memref<80x1024xf32, #tpu.memory_space<vmem>>, vector<8x1024xf32>,
    %c64_i32_349 = arith.constant 64 : i32
    %340 = tpu.dynamic_rotate %335 by %c64_i32_349 dim 1 : vector<8x1024xf32>, i32 -> vector<8x1024xf32>
    %c152_350 = arith.constant 152 : index
    %c0_351 = arith.constant 0 : index
    %341 = vector.load %arg3[%c152_350, %c0_351] : memref<216x1024xf32, #tpu.memory_space<vmem>>, vector<8x1024xf32>
    %342 = arith.mulf %340, %341 : vector<8x1024xf32>
    %c8_352 = arith.constant 8 : index
    %c0_353 = arith.constant 0 : index
    %343 = vector.load %arg6[%c8_352, %c0_353] : memref<80x1024xf32, #tpu.memory_space<vmem>>, vector<8x1024xf32>
    tpu.vector_store %arg6[%c8_352, %c0_353], %342 {strides = array<i32>} : memref<80x1024xf32, #tpu.memory_space<vmem>>, vector<8x1024xf32>,
    %c60_i32_354 = arith.constant 60 : i32
    %344 = tpu.dynamic_rotate %335 by %c60_i32_354 dim 1 : vector<8x1024xf32>, i32 -> vector<8x1024xf32>
    %c160_355 = arith.constant 160 : index
    %c0_356 = arith.constant 0 : index
    %345 = vector.load %arg3[%c160_355, %c0_356] : memref<216x1024xf32, #tpu.memory_space<vmem>>, vector<8x1024xf32>
    %346 = arith.mulf %344, %345 : vector<8x1024xf32>
    %c16_357 = arith.constant 16 : index
    %c0_358 = arith.constant 0 : index
    %347 = vector.load %arg6[%c16_357, %c0_358] : memref<80x1024xf32, #tpu.memory_space<vmem>>, vector<8x1024xf32>
    tpu.vector_store %arg6[%c16_357, %c0_358], %346 {strides = array<i32>} : memref<80x1024xf32, #tpu.memory_space<vmem>>, vector<8x1024xf32>,
    %c4_i32_359 = arith.constant 4 : i32
    %348 = tpu.dynamic_rotate %335 by %c4_i32_359 dim 1 : vector<8x1024xf32>, i32 -> vector<8x1024xf32>
    %c168_360 = arith.constant 168 : index
    %c0_361 = arith.constant 0 : index
    %349 = vector.load %arg3[%c168_360, %c0_361] : memref<216x1024xf32, #tpu.memory_space<vmem>>, vector<8x1024xf32>
    %350 = arith.mulf %348, %349 : vector<8x1024xf32>
    %c24_362 = arith.constant 24 : index
    %c0_363 = arith.constant 0 : index
    %351 = vector.load %arg6[%c24_362, %c0_363] : memref<80x1024xf32, #tpu.memory_space<vmem>>, vector<8x1024xf32>
    tpu.vector_store %arg6[%c24_362, %c0_363], %350 {strides = array<i32>} : memref<80x1024xf32, #tpu.memory_space<vmem>>, vector<8x1024xf32>,
    %c32_364 = arith.constant 32 : index
    %c0_365 = arith.constant 0 : index
    %352 = vector.load %arg6[%c32_364, %c0_365] : memref<80x1024xf32, #tpu.memory_space<vmem>>, vector<8x1024xf32>
    tpu.vector_store %arg6[%c32_364, %c0_365], %335 {strides = array<i32>} : memref<80x1024xf32, #tpu.memory_space<vmem>>, vector<8x1024xf32>,
    %c1020_i32_366 = arith.constant 1020 : i32
    %353 = tpu.dynamic_rotate %335 by %c1020_i32_366 dim 1 : vector<8x1024xf32>, i32 -> vector<8x1024xf32>
    %c184_367 = arith.constant 184 : index
    %c0_368 = arith.constant 0 : index
    %354 = vector.load %arg3[%c184_367, %c0_368] : memref<216x1024xf32, #tpu.memory_space<vmem>>, vector<8x1024xf32>
    %355 = arith.mulf %353, %354 : vector<8x1024xf32>
    %c40_369 = arith.constant 40 : index
    %c0_370 = arith.constant 0 : index
    %356 = vector.load %arg6[%c40_369, %c0_370] : memref<80x1024xf32, #tpu.memory_space<vmem>>, vector<8x1024xf32>
    tpu.vector_store %arg6[%c40_369, %c0_370], %355 {strides = array<i32>} : memref<80x1024xf32, #tpu.memory_space<vmem>>, vector<8x1024xf32>,
    %c964_i32_371 = arith.constant 964 : i32
    %357 = tpu.dynamic_rotate %335 by %c964_i32_371 dim 1 : vector<8x1024xf32>, i32 -> vector<8x1024xf32>
    %c192_372 = arith.constant 192 : index
    %c0_373 = arith.constant 0 : index
    %358 = vector.load %arg3[%c192_372, %c0_373] : memref<216x1024xf32, #tpu.memory_space<vmem>>, vector<8x1024xf32>
    %359 = arith.mulf %357, %358 : vector<8x1024xf32>
    %c48_374 = arith.constant 48 : index
    %c0_375 = arith.constant 0 : index
    %360 = vector.load %arg6[%c48_374, %c0_375] : memref<80x1024xf32, #tpu.memory_space<vmem>>, vector<8x1024xf32>
    tpu.vector_store %arg6[%c48_374, %c0_375], %359 {strides = array<i32>} : memref<80x1024xf32, #tpu.memory_space<vmem>>, vector<8x1024xf32>,
    %c960_i32_376 = arith.constant 960 : i32
    %361 = tpu.dynamic_rotate %335 by %c960_i32_376 dim 1 : vector<8x1024xf32>, i32 -> vector<8x1024xf32>
    %c200_377 = arith.constant 200 : index
    %c0_378 = arith.constant 0 : index
    %362 = vector.load %arg3[%c200_377, %c0_378] : memref<216x1024xf32, #tpu.memory_space<vmem>>, vector<8x1024xf32>
    %363 = arith.mulf %361, %362 : vector<8x1024xf32>
    %c56_379 = arith.constant 56 : index
    %c0_380 = arith.constant 0 : index
    %364 = vector.load %arg6[%c56_379, %c0_380] : memref<80x1024xf32, #tpu.memory_space<vmem>>, vector<8x1024xf32>
    tpu.vector_store %arg6[%c56_379, %c0_380], %363 {strides = array<i32>} : memref<80x1024xf32, #tpu.memory_space<vmem>>, vector<8x1024xf32>,
    %c956_i32_381 = arith.constant 956 : i32
    %365 = tpu.dynamic_rotate %335 by %c956_i32_381 dim 1 : vector<8x1024xf32>, i32 -> vector<8x1024xf32>
    %c208_382 = arith.constant 208 : index
    %c0_383 = arith.constant 0 : index
    %366 = vector.load %arg3[%c208_382, %c0_383] : memref<216x1024xf32, #tpu.memory_space<vmem>>, vector<8x1024xf32>
    %367 = arith.mulf %365, %366 : vector<8x1024xf32>
    %c64_384 = arith.constant 64 : index
    %c0_385 = arith.constant 0 : index
    %368 = vector.load %arg6[%c64_384, %c0_385] : memref<80x1024xf32, #tpu.memory_space<vmem>>, vector<8x1024xf32>
    tpu.vector_store %arg6[%c64_384, %c0_385], %367 {strides = array<i32>} : memref<80x1024xf32, #tpu.memory_space<vmem>>, vector<8x1024xf32>,
    %c8_386 = arith.constant 8 : index
    %c0_387 = arith.constant 0 : index
    %c0_388 = arith.constant 0 : index
    %369 = vector.load %arg2[%c8_386, %c0_387, %c0_388] : memref<9x8x80xf32, #tpu.memory_space<vmem>>, vector<1x8x80xf32>
    %370 = vector.shape_cast %369 : vector<1x8x80xf32> to vector<8x80xf32>
    %c0_389 = arith.constant 0 : index
    %c0_390 = arith.constant 0 : index
    %371 = vector.load %arg6[%c0_389, %c0_390] : memref<80x1024xf32, #tpu.memory_space<vmem>>, vector<80x1024xf32>
    %cst_391 = arith.constant dense<0.000000e+00> : vector<8x1024xf32>
    %372 = tpu.matmul %370, %371, %cst_391 {dimension_numbers = #tpu.dot_dimension_numbers<[1], [0], [0], [1], [0, 0, 1, 1], [], []>} : vector<8x80xf32>, vector<80x1024xf32>, vector<8x1024xf32> -> vector<8x1024xf32>
    %cst_392 = arith.constant 1.000000e-01 : f32
    %373 = vector.broadcast %cst_392 : f32 to vector<8x1024xf32>
    %374 = arith.mulf %373, %372 : vector<8x1024xf32>
    %375 = arith.maximumf %372, %374 : vector<8x1024xf32>
    %c0_393 = arith.constant 0 : index
    %c0_394 = arith.constant 0 : index
    %376 = vector.load %arg4[%c0_393, %c0_394] : memref<1024x128xf32, #tpu.memory_space<vmem>>, vector<1024x128xf32>
    %cst_395 = arith.constant dense<0.000000e+00> : vector<8x128xf32>
    %377 = tpu.matmul %375, %376, %cst_395 {dimension_numbers = #tpu.dot_dimension_numbers<[1], [0], [0], [1], [0, 0, 1, 1], [], []>} : vector<8x1024xf32>, vector<1024x128xf32>, vector<8x128xf32> -> vector<8x128xf32>
    %378 = vector.shape_cast %377 : vector<8x128xf32> to vector<1x8x128xf32>
    %c0_396 = arith.constant 0 : index
    %c0_397 = arith.constant 0 : index
    %c0_398 = arith.constant 0 : index
    %379 = vector.load %arg5[%c0_396, %c0_397, %c0_398] : memref<1x8x128xf32, #tpu.memory_space<vmem>>, vector<1x8x128xf32>
    tpu.vector_store %arg5[%c0_396, %c0_397, %c0_398], %378 {strides = array<i32>} : memref<1x8x128xf32, #tpu.memory_space<vmem>>, vector<1x8x128xf32>,
    return
  }
  func.func @transform_0(%arg0: i32) -> (i32, i32, i32) {
    %c0_i32 = arith.constant 0 : i32
    %c0_i32_0 = arith.constant 0 : i32
    %c0_i32_1 = arith.constant 0 : i32
    return %arg0, %c0_i32, %c0_i32_0 : i32, i32, i32
  }
  func.func @transform_1(%arg0: i32) -> (i32, i32, i32) {
    %c0_i32 = arith.constant 0 : i32
    %c0_i32_0 = arith.constant 0 : i32
    %c0_i32_1 = arith.constant 0 : i32
    %c0_i32_2 = arith.constant 0 : i32
    return %c0_i32, %c0_i32_0, %c0_i32_1 : i32, i32, i32
  }
  func.func @transform_2(%arg0: i32) -> (i32, i32) {
    %c0_i32 = arith.constant 0 : i32
    %c0_i32_0 = arith.constant 0 : i32
    %c0_i32_1 = arith.constant 0 : i32
    return %c0_i32, %c0_i32_0 : i32, i32
  }
  func.func @transform_3(%arg0: i32) -> (i32, i32) {
    %c0_i32 = arith.constant 0 : i32
    %c0_i32_0 = arith.constant 0 : i32
    %c0_i32_1 = arith.constant 0 : i32
    return %c0_i32, %c0_i32_0 : i32, i32
  }
  func.func @transform_4(%arg0: i32) -> (i32, i32, i32) {
    %c0_i32 = arith.constant 0 : i32
    %c0_i32_0 = arith.constant 0 : i32
    %c0_i32_1 = arith.constant 0 : i32
    return %arg0, %c0_i32, %c0_i32_0 : i32, i32, i32
  }
}

</mosaic_0001>

<bundles_post_ra>
// kernel: forward.1
= control target key start
LH: loop header
LB: loop body
LE: loop exit
PB: predicated region body
PF: predicated region fallthrough
CT: control target
= control target key end

     0   :  { %9 = vsyncpa [#allocation4], 0  ;;  %s12870_s0 = inlined_call_operand.vmem [shape: f32[2,8,1024], index: 0, kind: input, shape index: {}]   ;;  %s12871_s1 = inlined_call_operand.vmem [shape: f32[9,8,80], index: 1, kind: input, shape index: {}]   ;;  %s12872_s2 = inlined_call_operand.hbm [shape: f32[216,1024], index: 2, kind: input, shape index: {}]   ;;  %s12873_s3 = inlined_call_operand.hbm [shape: f32[1024,128], index: 3, kind: input, shape index: {}]   ;;  %s12874_s4 = inlined_call_operand.vmem [shape: f32[2,8,128], index: 4, kind: output, shape index: {}]  }
   0x1   :  { %10 = vsyncpa [#allocation6], 0  ;;  %s8109_s15 = smov 0  }
   0x2 LB: > { %s8055_s16 = smov [#allocation3]   ;;  %s8115_s18 = sadd.s32 4294967295, %s8053_s15   ;;  %s8053_s15 = sphi %s8109_s15, %s16_s15  }
   0x3   : > { %s151_s17 = sshll.u32 %s8055_s16, 4  ;;  %p7661_p0 = scmp.ge.s32.totalorder %s8053_s15, 1  ;;  %s152_s17 = int_to_ptr.vmem [resolvable:$true] %s151_s17 }
   0x4   : > { %p136_p1 = scmp.lt.s32.totalorder %s8053_s15, 3  ;;  %p7946_p3 = scmp.eq.s32.totalorder %s8115_s18, 0 }
   0x5   : > { %s8056_s20 = smov [#allocation5]   ;;  %s7998_s23 = scalar_lea.vmem %s152_s17, 27648 }
   0x6   : > { %p8119_p2 = pnand %p7661_p0, %p136_p1  ;;  %s164_s21 = sshll.u32 %s8056_s20, 4  ;;  %s165_s21 = int_to_ptr.vmem [resolvable:$true] %s164_s21 }
   0x7   : > { %p7999_p7 = scmp.ne.s32.totalorder %s152_s17, %s7998_s23  ;;  %p8006_p10 = scmp.lt.s32.totalorder %s152_s17, %s152_s17 }
   0x8   : > { %p7939_p4 = pneg %p8119_p2  ;;  %p8007_p11 = scmp.lt.s32.totalorder %s7998_s23, %s7998_s23 }
   0xa   : > { %p8128_p5 = pnand %p7946_p3, %p7939_p4  ;;  %p8008_p12 = por %p8007_p11, %p8006_p10 }
   0xc   : > { %p7989_p6 = pneg %p8128_p5 }
   0xe   : > { %p8001_p8 = pnand %p7999_p7, %p7989_p6 }
  0x10   : > { %p8002_p9 = pneg %p8001_p8 }
  0x12   : > { %p8009_p13 = pnand %p8008_p12, %p8002_p9 }
  0x14   : > { %8012 = shalt.err (!%p8009_p13)
}
  0x15   : > { %s8057_s24 = smov 1024   ;;  %s8058_s25 = smov 64  }
  0x16   : > { %7942 = dma.hbm_to_vmem [thread:$0]  (!%p8128_p5), %s12872_s2, 27648, %s152_s17, [#allocation4], %s8057_s24, %s8057_s24, %s8058_s25  }
  0x17   : > { %s8024_s28 = scalar_lea.vmem %s165_s21, 16384  ;;  %p8032_p7 = scmp.lt.s32.totalorder %s165_s21, %s165_s21 }
  0x18   : > { %p8025_p0 = scmp.ne.s32.totalorder %s165_s21, %s8024_s28  ;;  %p8033_p8 = scmp.lt.s32.totalorder %s8024_s28, %s8024_s28 }
  0x1a   : > { %p8027_p1 = pnand %p8025_p0, %p7989_p6  ;;  %p8034_p10 = por %p8033_p8, %p8032_p7 }
  0x1c   : > { %p8028_p4 = pneg %p8027_p1 }
  0x1e   : > { %p8035_p9 = pnand %p8034_p10, %p8028_p4 }
  0x20   : > { %8038 = shalt.err (!%p8035_p9)
}
  0x21   : > { %s8059_s29 = smov 128   ;;  %s8060_s30 = smov 8  }
  0x22   : > { %7945 = dma.hbm_to_vmem [thread:$0]  (!%p8128_p5), %s12873_s3, 16384, %s165_s21, [#allocation6], %s8059_s29, %s8059_s29, %s8060_s30  }
  0x23   : > { %188 = sbr.rel (%p8119_p2) target bundleno = 4331 (0x10eb), region = 36 }
  0x28   : > { %8044 = dma.done.wait (%p7946_p3), [#allocation4], 27648  }
  0x29   : > { %8046 = vsyncadd (%p7946_p3), [#allocation4], 4294939648 }
  0x2a   : > { %8048 = dma.done.wait (%p7946_p3), [#allocation6], 16384  }
  0x2b   : > { %8050 = vsyncadd (%p7946_p3), [#allocation6], 4294950912  ;;  %p217_p6 = scmp.lt.s32.totalorder %s8115_s18, 1  ;;  %v234_v0 = vlaneseq  ;;  %v12878_v2 = vmov 1.0   ;;  %s8062_s11 = smov 111   ;;  %v12875_v9 = vmov 0.0  }
  0x2c   : > { %s8063_s12 = smov 112   ;;  %s8064_s13 = smov 113   ;;  %798 = vmatprep.mubr.f32.mxu0 %v12875_v9  ;;  %869 = vmatprep.mubr.f32.mxu1 %v12875_v9  ;;  %v8338_v15 = vld [vmem:[#allocation3 + $0x208] sm:$0xff]  ;;  %v8343_v19 = vld [vmem:[#allocation3 + $0x200] sm:$0xff]  ;;  %v628_v29 = vld [vmem:[#allocation3 + $0x218] sm:$0xff]  ;;  %vm730_vm9 = vcmask 654336  }
  0x2d   : > { %s13237_s18 = smov (!%p217_p6, %s8115_s18), 1  ;;  %v8165_v1 = vshrl.u32 %v234_v0, 7  ;;  %s8065_s14 = smov 127   ;;  %v8325_v12 = vand.u32 127, %v234_v0  ;;  %v8354_v23 = vld [vmem:[#allocation3 + $0x1c8] sm:$0xff]  ;;  %v8363_v28 = vld [vmem:[#allocation3 + $0x1c0] sm:$0xff] }
  0x2e   : > { %s7718_s7 = sshll.u32 %s13237_s18, 6  ;;  %s8066_s16 = smov 1   ;;  %v8371_v33 = vld [vmem:[#allocation3 + $0x210] sm:$0xff]  ;;  %v8382_v39 = vld [vmem:[#allocation3 + $0x188] sm:$0xff]  ;;  %v8387_v44 = vld [vmem:[#allocation3 + $0x1d8] sm:$0xff] }
  0x2f   : > { %vm236_vm0 = vcmp.eq.s32.totalorder %v8165_v1, 0  ;;  %s8172_s10 = scalar_lea.vmem %s12870_s0, %s7718_s7  ;;  %s8067_s17 = smov 15   ;;  %vm616_vm1 = vcmp.lt.s32.totalorder %v8325_v12, 111  ;;  %vm567_vm2 = vcmp.lt.s32.totalorder %v8325_v12, 112  ;;  %vm518_vm3 = vcmp.lt.s32.totalorder %v8325_v12, 113  ;;  %v8389_v45 = vld [vmem:[#allocation3 + $0x1d0] sm:$0xff] }
  0x30   : > { %7719 = vmatprep.subr.msk.mxu0 %vm236_vm0, %v12878_v2  ;;  %7721 = vmatprep.subr.msk.mxu1 %vm236_vm0, %v12878_v2  ;;  %v8187_v3 = vld [vmem:[%s8172_s10 + $0x8] sm:$0xff]  ;;  %v8190_v4 = vld [vmem:[%s8172_s10] sm:$0xff]  ;;  %v8197_v5 = vld [vmem:[%s8172_s10 + $0x10] sm:$0xff]  ;;  %s8068_s19 = smov 16   ;;  %s8070_s20 = smov 17   ;;  %vm469_vm4 = vcmp.lt.s32.totalorder %v8325_v12, 127 }
  0x31   : > { %7720 = vmatpush1.msk.msra.mxu0 %vm236_vm0, %v12878_v2  ;;  %7722 = vmatpush1.msk.msra.mxu1 %vm236_vm0, %v12878_v2  ;;  %v8204_v6 = vld [vmem:[%s8172_s10 + $0x18] sm:$0xff]  ;;  %v8211_v7 = vld [vmem:[%s8172_s10 + $0x20] sm:$0xff]  ;;  %v8287_v10 = vld [vmem:[%s8172_s10 + $0x28] sm:$0xff]  ;;  %vm412_vm5 = vcmp.lt.s32.totalorder %v8325_v12, 1  ;;  %vm363_vm6 = vcmp.lt.s32.totalorder %v8325_v12, 15  ;;  %vm314_vm7 = vcmp.lt.s32.totalorder %v8325_v12, 16 }
  0x32   : > { %602 = vrot.lane.b32.xlu0 %v8187_v3, %s8062_s11  ;;  %600 = vrot.lane.b32.xlu1 %v8190_v4, %s8062_s11  ;;  %v8246_v8 = vld [vmem:[%s8172_s10 + $0x38] sm:$0xff]  ;;  %v8290_v11 = vld [vmem:[%s8172_s10 + $0x30] sm:$0xff]  ;;  %v8400_v52 = vld [vmem:[#allocation3 + $0x180] sm:$0xff]  ;;  %vm265_vm8 = vcmp.lt.s32.totalorder %v8325_v12, 17  ;;  %s8071_s27 = smov 96   ;;  %s8072_s28 = smov 94  }
  0x33   : > { %v8409_v57 = vld [vmem:[#allocation3 + $0x148] sm:$0xff]  ;;  %v8414_v62 = vld [vmem:[#allocation3 + $0x140] sm:$0xff]  ;;  %v8416_v63 = vld [vmem:[#allocation3 + $0x198] sm:$0xff]  ;;  %s8073_s29 = smov 126   ;;  %s8074_s30 = smov 98   ;;  %vm3019_vm10 = vcmp.lt.s32.totalorder %v8325_v12, 94 }
  0x34   : > { %s8075_s5 = smov 2   ;;  %s8076_s6 = smov 30   ;;  %vm2970_vm11 = vcmp.lt.s32.totalorder %v8325_v12, 96  ;;  %vm2921_vm12 = vcmp.lt.s32.totalorder %v8325_v12, 98  ;;  %vm2872_vm13 = vcmp.lt.s32.totalorder %v8325_v12, 126  ;;  %vm2815_vm14 = vcmp.lt.s32.totalorder %v8325_v12, 2 }
  0x35   : > { %s8077_s7 = smov 32   ;;  %s8078_s8 = smov 34   ;;  %vm2766_vm15 = vcmp.lt.s32.totalorder %v8325_v12, 30 }
  0x36   : > { %604 = vrot.lane.b32.xlu0 %v8197_v5, %s8062_s11  ;;  %553 = vrot.lane.b32.xlu1 %v8187_v3, %s8063_s12  ;;  %s8083_s21 = smov 4  }
  0x3a   : > { %555 = vrot.lane.b32.xlu0 %v8197_v5, %s8063_s12  ;;  %606 = vrot.lane.b32.xlu1 %v8204_v6, %s8062_s11 }
  0x3e   : > { %608 = vrot.lane.b32.xlu0 %v8211_v7, %s8062_s11  ;;  %551 = vrot.lane.b32.xlu1 %v8190_v4, %s8063_s12 }
  0x42   : > { %504 = vrot.lane.b32.xlu0 %v8187_v3, %s8064_s13  ;;  %506 = vrot.lane.b32.xlu1 %v8197_v5, %s8064_s13 }
  0x46   : > { %557 = vrot.lane.b32.xlu0 %v8204_v6, %s8063_s12  ;;  %559 = vrot.lane.b32.xlu1 %v8211_v7, %s8063_s12 }
  0x4a   : > { %502 = vrot.lane.b32.xlu0 %v8190_v4, %s8064_s13  ;;  %455 = vrot.lane.b32.xlu1 %v8187_v3, %s8065_s14 }
  0x4e   : > { %457 = vrot.lane.b32.xlu0 %v8197_v5, %s8065_s14  ;;  %508 = vrot.lane.b32.xlu1 %v8204_v6, %s8064_s13 }
  0x52   : > { %510 = vrot.lane.b32.xlu0 %v8211_v7, %s8064_s13  ;;  %453 = vrot.lane.b32.xlu1 %v8190_v4, %s8065_s14 }
  0x56   : > { %459 = vrot.lane.b32.xlu0 %v8204_v6, %s8065_s14  ;;  %461 = vrot.lane.b32.xlu1 %v8211_v7, %s8065_s14 }
  0x5a   : > { %396 = vrot.lane.b32.xlu0 %v8190_v4, %s8066_s16  ;;  %398 = vrot.lane.b32.xlu1 %v8187_v3, %s8066_s16 }
  0x5e   : > { %410 = vrot.lane.b32.xlu0 %v8246_v8, %s8066_s16  ;;  %347 = vrot.lane.b32.xlu1 %v8190_v4, %s8067_s17 }
  0x62   : > { %349 = vrot.lane.b32.xlu0 %v8187_v3, %s8067_s17  ;;  %400 = vrot.lane.b32.xlu1 %v8197_v5, %s8066_s16 }
  0x66   : > { %402 = vrot.lane.b32.xlu0 %v8204_v6, %s8066_s16  ;;  %361 = vrot.lane.b32.xlu1 %v8246_v8, %s8067_s17 }
  0x6a   : > { %298 = vrot.lane.b32.xlu0 %v8190_v4, %s8068_s19  ;;  %300 = vrot.lane.b32.xlu1 %v8187_v3, %s8068_s19 }
  0x6e   : > { %351 = vrot.lane.b32.xlu0 %v8197_v5, %s8067_s17  ;;  %353 = vrot.lane.b32.xlu1 %v8204_v6, %s8067_s17 }
  0x72   : > { %312 = vrot.lane.b32.xlu0 %v8246_v8, %s8068_s19  ;;  %247 = vrot.lane.b32.xlu1 %v8190_v4, %s8070_s20 }
  0x76   : > { %249 = vrot.lane.b32.xlu0 %v8187_v3, %s8070_s20  ;;  %302 = vrot.lane.b32.xlu1 %v8197_v5, %s8068_s19 }
  0x7a   : > { %304 = vrot.lane.b32.xlu0 %v8204_v6, %s8068_s19  ;;  %261 = vrot.lane.b32.xlu1 %v8246_v8, %s8070_s20 }
  0x7e   : > { %251 = vrot.lane.b32.xlu0 %v8197_v5, %s8070_s20  ;;  %253 = vrot.lane.b32.xlu1 %v8204_v6, %s8070_s20 }
  0x82   : > { %610 = vrot.lane.b32.xlu0 %v8287_v10, %s8062_s11  ;;  %612 = vrot.lane.b32.xlu1 %v8290_v11, %s8062_s11 }
  0x86   : > { %561 = vrot.lane.b32.xlu0 %v8287_v10, %s8063_s12  ;;  %563 = vrot.lane.b32.xlu1 %v8290_v11, %s8063_s12 }
  0x8a   : > { %614 = vrot.lane.b32.xlu0 %v8246_v8, %s8062_s11  ;;  %512 = vrot.lane.b32.xlu1 %v8287_v10, %s8064_s13 }
  0x8e   : > { %514 = vrot.lane.b32.xlu0 %v8290_v11, %s8064_s13  ;;  %565 = vrot.lane.b32.xlu1 %v8246_v8, %s8063_s12 }
  0x92   : > { %463 = vrot.lane.b32.xlu0 %v8287_v10, %s8065_s14  ;;  %465 = vrot.lane.b32.xlu1 %v8290_v11, %s8065_s14 }
  0x96   : > { %516 = vrot.lane.b32.xlu0 %v8246_v8, %s8064_s13  ;;  %467 = vrot.lane.b32.xlu1 %v8246_v8, %s8065_s14 }
  0x9a   : > { %404 = vrot.lane.b32.xlu0 %v8211_v7, %s8066_s16  ;;  %406 = vrot.lane.b32.xlu1 %v8287_v10, %s8066_s16 }
  0x9e   : > { %355 = vrot.lane.b32.xlu0 %v8211_v7, %s8067_s17  ;;  %357 = vrot.lane.b32.xlu1 %v8287_v10, %s8067_s17 }
  0xa2   : > { %408 = vrot.lane.b32.xlu0 %v8290_v11, %s8066_s16  ;;  %306 = vrot.lane.b32.xlu1 %v8211_v7, %s8068_s19 }
  0xa4   : > { %v603_v13 = vpop.permute.xlu0 %602  ;;  %v8331_v14 = vpop.permute.xlu1 %600 }
  0xa5   : > { %v623_v16 = vsel %vm616_vm1, %v8331_v14, %v603_v13 }
  0xa6   : > { %308 = vrot.lane.b32.xlu0 %v8287_v10, %s8068_s19  ;;  %359 = vrot.lane.b32.xlu1 %v8290_v11, %s8067_s17  ;;  %v633_v22 = vmul.f32 %v8343_v19, %v623_v16 }
  0xa8   : > { %v605_v17 = vpop.permute.xlu0 %604  ;;  %v554_v18 = vpop.permute.xlu1 %553 }
  0xa9   : > { %v622_v20 = vsel %vm616_vm1, %v603_v13, %v605_v17 }
  0xaa   : > { %255 = vrot.lane.b32.xlu0 %v8211_v7, %s8070_s20  ;;  %257 = vrot.lane.b32.xlu1 %v8287_v10, %s8070_s20  ;;  %v634_v21 = vmul.f32 %v8338_v15, %v622_v20 }
  0xac   : > { %748 = vmatprep.subr.mxu0 %v634_v21  ;;  %v556_v24 = vpop.permute.xlu0 %555  ;;  %v607_v25 = vpop.permute.xlu1 %606 }
  0xad   : > { %v573_v26 = vsel %vm567_vm2, %v554_v18, %v556_v24  ;;  %749 = vmatpush1.msra.mxu0 %v633_v22  ;;  %v621_v30 = vsel %vm616_vm1, %v605_v17, %v607_v25  ;;  %v8424_v17 = vld [vmem:[#allocation3 + $0x190] sm:$0xff] }
  0xae   : > { %310 = vrot.lane.b32.xlu0 %v8290_v11, %s8068_s19  ;;  %259 = vrot.lane.b32.xlu1 %v8290_v11, %s8070_s20  ;;  %v585_v27 = vmul.f32 %v8354_v23, %v573_v26  ;;  %v635_v38 = vmul.f32 %v8371_v33, %v621_v30  ;;  %v8437_v26 = vld [vmem:[#allocation3 + $0x150] sm:$0xff] }
  0xb0   : > { %v8367_v31 = vpop.permute.xlu0 %608  ;;  %750 = vmatprep.subr.mxu0 %v585_v27  ;;  %v8369_v32 = vpop.permute.xlu1 %551 }
  0xb1   : > { %v620_v34 = vsel %vm616_vm1, %v607_v25, %v8367_v31  ;;  %v574_v35 = vsel %vm567_vm2, %v8369_v32, %v554_v18  ;;  %v8435_v25 = vld [vmem:[#allocation3 + $0x158] sm:$0xff] }
  0xb2   : > { %v584_v36 = vmul.f32 %v8363_v28, %v574_v35  ;;  %v636_v37 = vmul.f32 %v628_v29, %v620_v34 }
  0xb4   : > { %v505_v40 = vpop.permute.xlu0 %504  ;;  %751 = vmatpush1.msra.mxu0 %v584_v36  ;;  %819 = vmatprep.subr.mxu1 %v636_v37  ;;  %v507_v41 = vpop.permute.xlu1 %506  ;;  %v8451_v37 = vld [vmem:[#allocation3 + $0xc8] sm:$0xff] }
  0xb5   : > { %v524_v42 = vsel %vm518_vm3, %v505_v40, %v507_v41  ;;  %820 = vmatpush1.msra.mxu1 %v635_v38 }
  0xb6   : > { %v536_v43 = vmul.f32 %v8382_v39, %v524_v42 }
  0xb8   : > { %v558_v46 = vpop.permute.xlu0 %557  ;;  %752 = vmatprep.subr.mxu0 %v536_v43  ;;  %v8391_v47 = vpop.permute.xlu1 %559 }
  0xb9   : > { %v572_v48 = vsel %vm567_vm2, %v556_v24, %v558_v46  ;;  %v571_v49 = vsel %vm567_vm2, %v558_v46, %v8391_v47 }
  0xba   : > { %v587_v50 = vmul.f32 %v8387_v44, %v571_v49  ;;  %v586_v51 = vmul.f32 %v8389_v45, %v572_v48  ;;  %v8467_v49 = vld [vmem:[#allocation3 + $0x88] sm:$0xff] }
  0xbc   : > { %v8402_v53 = vpop.permute.xlu0 %502  ;;  %821 = vmatprep.subr.mxu1 %v587_v50  ;;  %v456_v54 = vpop.permute.xlu1 %455 }
  0xbd   : > { %v525_v55 = vsel %vm518_vm3, %v8402_v53, %v505_v40  ;;  %822 = vmatpush1.msra.mxu1 %v586_v51 }
  0xbe   : > { %v535_v56 = vmul.f32 %v8400_v52, %v525_v55  ;;  %v8474_v55 = vld [vmem:[#allocation3 + $0xd8] sm:$0xff] }
  0xc0   : > { %v458_v58 = vpop.permute.xlu0 %457  ;;  %753 = vmatpush1.msra.mxu0 %v535_v56  ;;  %v509_v59 = vpop.permute.xlu1 %508 }
  0xc1   : > { %v475_v60 = vsel %vm469_vm4, %v456_v54, %v458_v58  ;;  %v523_v0 = vsel %vm518_vm3, %v507_v41, %v509_v59 }
  0xc2   : > { %v487_v61 = vmul.f32 %v8409_v57, %v475_v60  ;;  %v537_v24 = vmul.f32 %v8424_v17, %v523_v0  ;;  %v8482_v60 = vld [vmem:[#allocation3 + $0xd0] sm:$0xff] }
  0xc4   : > { %v8420_v13 = vpop.permute.xlu0 %510  ;;  %754 = vmatprep.subr.mxu0 %v487_v61  ;;  %v8422_v16 = vpop.permute.xlu1 %453 }
  0xc5   : > { %v522_v18 = vsel %vm518_vm3, %v509_v59, %v8420_v13  ;;  %v476_v20 = vsel %vm469_vm4, %v8422_v16, %v456_v54  ;;  %v8472_v54 = vld [vmem:[#allocation3 + $0x80] sm:$0xff] }
  0xc6   : > { %v486_v21 = vmul.f32 %v8414_v62, %v476_v20  ;;  %v538_v22 = vmul.f32 %v8416_v63, %v522_v18  ;;  %12999 = vst [vmem:[#allocation9_spill] sm:$0xff] %v8472_v54 }
  0xc8   : > { %v460_v27 = vpop.permute.xlu0 %459  ;;  %755 = vmatpush1.msra.mxu0 %v486_v21  ;;  %823 = vmatprep.subr.mxu1 %v538_v22  ;;  %v8439_v29 = vpop.permute.xlu1 %461  ;;  %v8494_v22 = vld [vmem:[#allocation3 + $0x48] sm:$0xff] }
  0xc9   : > { %v474_v30 = vsel %vm469_vm4, %v458_v58, %v460_v27  ;;  %v473_v34 = vsel %vm469_vm4, %v460_v27, %v8439_v29  ;;  %824 = vmatpush1.msra.mxu1 %v537_v24  ;;  %756 = vmatprep.subr.mxu0 %v8187_v3  ;;  %v8457_v3 = vld [vmem:[#allocation3 + $0xc0] sm:$0xff]  ;;  %13000 = vst [vmem:[#allocation10_spill] sm:$0xff] %v8494_v22 }
  0xca   : > { %v489_v35 = vmul.f32 %v8435_v25, %v473_v34  ;;  %v488_v36 = vmul.f32 %v8437_v26, %v474_v30  ;;  %757 = vmatpush1.msra.mxu0 %v8190_v4 }
  0xcc   : > { %v397_v38 = vpop.permute.xlu0 %396  ;;  %825 = vmatprep.subr.mxu1 %v489_v35  ;;  %v399_v40 = vpop.permute.xlu1 %398  ;;  %v8499_v35 = vld [vmem:[#allocation3 + $0x98] sm:$0xff] }
  0xcd   : > { %v419_v41 = vsel %vm412_vm5, %v397_v38, %v399_v40  ;;  %826 = vmatpush1.msra.mxu1 %v488_v36  ;;  %v8501_v36 = vld [vmem:[#allocation3 + $0x90] sm:$0xff] }
  0xce   : > { %v430_v42 = vmul.f32 %v8451_v37, %v419_v41  ;;  %827 = vmatprep.subr.mxu1 %v8204_v6 }
  0xcf   : > { %828 = vmatpush1.msra.mxu1 %v8197_v5 }
  0xd0   : > { %v8460_v43 = vpop.permute.xlu0 %410  ;;  %758 = vmatprep.subr.mxu0 %v430_v42  ;;  %v348_v4 = vpop.permute.xlu1 %347 }
  0xd1   : > { %v420_v46 = vsel %vm412_vm5, %v8460_v43, %v397_v38 }
  0xd2   : > { %v429_v48 = vmul.f32 %v8457_v3, %v420_v46 }
  0xd4   : > { %v350_v50 = vpop.permute.xlu0 %349  ;;  %759 = vmatpush1.msra.mxu0 %v429_v48  ;;  %v401_v6 = vpop.permute.xlu1 %400  ;;  %v8512_v48 = vld [vmem:[#allocation3 + $0x40] sm:$0xff] }
  0xd5   : > { %v370_v5 = vsel %vm363_vm6, %v348_v4, %v350_v50  ;;  %v418_v56 = vsel %vm412_vm5, %v399_v40, %v401_v6  ;;  %13001 = vst [vmem:[#allocation11_spill] sm:$0xff] %v8512_v48 }
  0xd6   : > { %v381_v51 = vmul.f32 %v8467_v49, %v370_v5  ;;  %v431_v21 = vmul.f32 %v8482_v60, %v418_v56  ;;  %v8521_v56 = vld [vmem:[#allocation3 + $0x8] sm:$0xff] }
  0xd7   : > { %13002 = vst [vmem:[#allocation12_spill] sm:$0xff] %v8521_v56 }
  0xd8   : > { %v8478_v58 = vpop.permute.xlu0 %402  ;;  %760 = vmatprep.subr.mxu0 %v381_v51  ;;  %v8480_v59 = vpop.permute.xlu1 %361 }
  0xd9   : > { %v417_v61 = vsel %vm412_vm5, %v401_v6, %v8478_v58  ;;  %v371_v0 = vsel %vm363_vm6, %v8480_v59, %v348_v4 }
  0xda   : > { %v380_v18 = vmul.f32 %v8472_v54, %v371_v0  ;;  %v432_v20 = vmul.f32 %v8474_v55, %v417_v61 }
  0xdc   : > { %v299_v24 = vpop.permute.xlu0 %298  ;;  %761 = vmatpush1.msra.mxu0 %v380_v18  ;;  %829 = vmatprep.subr.mxu1 %v432_v20  ;;  %v301_v27 = vpop.permute.xlu1 %300 }
  0xdd   : > { %v321_v30 = vsel %vm314_vm7, %v299_v24, %v301_v27  ;;  %830 = vmatpush1.msra.mxu1 %v431_v21  ;;  %v8526_v21 = vld [vmem:[#allocation3] sm:$0xff] }
  0xde   : > { %v332_v34 = vmul.f32 %v8494_v22, %v321_v30  ;;  %13003 = vst [vmem:[#allocation13_spill] sm:$0xff] %v8526_v21  ;;  %v8528_v30 = vld [vmem:[#allocation3 + $0x58] sm:$0xff] }
  0xdf   : > { %v8607_v22 = vld [vmem:[#allocation3 + $0x238] sm:$0xff] }
  0xe0   : > { %v352_v38 = vpop.permute.xlu0 %351  ;;  %762 = vmatprep.subr.mxu0 %v332_v34  ;;  %v8503_v40 = vpop.permute.xlu1 %353  ;;  %13013 = vst [vmem:[#allocation21_spill] sm:$0xff] %v8607_v22 }
  0xe1   : > { %v369_v41 = vsel %vm363_vm6, %v350_v50, %v352_v38  ;;  %v368_v42 = vsel %vm363_vm6, %v352_v38, %v8503_v40 }
  0xe2   : > { %v383_v4 = vmul.f32 %v8499_v35, %v368_v42  ;;  %v382_v46 = vmul.f32 %v8501_v36, %v369_v41  ;;  %v8536_v41 = vld [vmem:[#allocation3 + $0x50] sm:$0xff] }
  0xe4   : > { %v8514_v6 = vpop.permute.xlu0 %312  ;;  %831 = vmatprep.subr.mxu1 %v383_v4  ;;  %v248_v5 = vpop.permute.xlu1 %247 }
  0xe5   : > { %v322_v51 = vsel %vm314_vm7, %v8514_v6, %v299_v24  ;;  %832 = vmatpush1.msra.mxu1 %v382_v46 }
  0xe6   : > { %v331_v50 = vmul.f32 %v8512_v48, %v322_v51  ;;  %v8592_v48 = vld [vmem:[#allocation3 + $0x1e8] sm:$0xff] }
  0xe7   : > { %13011 = vst [vmem:[#allocation19_spill] sm:$0xff] %v8592_v48 }
  0xe8   : > { %v250_v61 = vpop.permute.xlu0 %249  ;;  %763 = vmatpush1.msra.mxu0 %v331_v50  ;;  %v303_v0 = vpop.permute.xlu1 %302 }
  0xe9   : > { %v272_v18 = vsel %vm265_vm8, %v248_v5, %v250_v61  ;;  %v320_v24 = vsel %vm314_vm7, %v301_v27, %v303_v0  ;;  %v8549_v27 = vld [vmem:[%s12871_s1] sm:$0xff] }
  0xea   : > { %v283_v20 = vmul.f32 %v8521_v56, %v272_v18  ;;  %v333_v50 = vmul.f32 %v8536_v41, %v320_v24  ;;  %v8552_v18 = vld [vmem:[#allocation3 + $0x18] sm:$0xff]  ;;  %v13009_v56 = vmov 1.0  }
  0xeb   : > { %13004 = vst [vmem:[#allocation14_spill] sm:$0xff] %v8552_v18 }
  0xec   : > { %v8532_v34 = vpop.permute.xlu0 %304  ;;  %764 = vmatprep.subr.mxu0 %v283_v20  ;;  %v8534_v38 = vpop.permute.xlu1 %261  ;;  %v8554_v20 = vld [vmem:[#allocation3 + $0x10] sm:$0xff] }
  0xed   : > { %v319_v42 = vsel %vm314_vm7, %v303_v0, %v8532_v34  ;;  %v273_v4 = vsel %vm265_vm8, %v8534_v38, %v248_v5  ;;  %13005 = vst [vmem:[#allocation15_spill] sm:$0xff] %v8554_v20 }
  0xee   : > { %v282_v46 = vmul.f32 %v8526_v21, %v273_v4  ;;  %v334_v51 = vmul.f32 %v8528_v30, %v319_v42 }
  0xf0   : > { %v252_v0 = vpop.permute.xlu0 %251  ;;  %765 = vmatpush1.msra.mxu0 %v282_v46  ;;  %833 = vmatprep.subr.mxu1 %v334_v51  ;;  %v8556_v5 = vpop.permute.xlu1 %253  ;;  %v13006_v46 = vmov 0.0   ;;  %v8571_v51 = vld [vmem:[#allocation3 + $0x220] sm:$0xff] }
  0xf1   : > { %v271_v42 = vsel %vm265_vm8, %v250_v61, %v252_v0  ;;  %v270_v4 = vsel %vm265_vm8, %v252_v0, %v8556_v5  ;;  %834 = vmatpush1.msra.mxu1 %v333_v50  ;;  %7672 = vmatmul.mubr.msk.f32.vlgmr.msra.gmra.mxu0 %vm730_vm9, %v8549_v27  ;;  %13007 = vst [vmem:[#allocation16_spill] sm:$0xff] %v8571_v51  ;;  %v8576_v61 = vld [vmem:[#allocation3 + $0x228] sm:$0xff] }
  0xf2   : > { %v285_v24 = vmul.f32 %v8552_v18, %v270_v4  ;;  %v284_v9 = vmul.f32 %v8554_v20, %v271_v42  ;;  %7723 = vmatprep.subr.msk.mxu0 %vm236_vm0, %v12878_v2  ;;  %940 = vmatprep.mubr.f32.mxu0 %v13006_v46  ;;  %13008 = vst [vmem:[#allocation17_spill] sm:$0xff] %v8576_v61  ;;  %v8640_v18 = vld [vmem:[#allocation3 + $0x168] sm:$0xff] }
  0xf3   : > { %7724 = vmatpush1.msk.msra.mxu0 %vm236_vm0, %v12878_v2  ;;  %13018 = vst [vmem:[#allocation26_spill] sm:$0xff] %v8640_v18 }
  0xf4   : > { %v611_v50 = vpop.permute.xlu0 %610  ;;  %835 = vmatprep.subr.mxu1 %v285_v24  ;;  %v613_v0 = vpop.permute.xlu1 %612  ;;  %v8590_v24 = vld [vmem:[#allocation3 + $0x1e0] sm:$0xff] }
  0xf5   : > { %v619_v42 = vsel %vm616_vm1, %v8367_v31, %v611_v50  ;;  %v618_v4 = vsel %vm616_vm1, %v611_v50, %v613_v0  ;;  %836 = vmatpush1.msra.mxu1 %v284_v9  ;;  %13010 = vst [vmem:[#allocation18_spill] sm:$0xff] %v8590_v24 }
  0xf6   : > { %v637_v21 = vmul.f32 %v8571_v51, %v619_v42  ;;  %7673 = vmatmul.mubr.msk.f32.vlgmr.msra.gmra.mxu1 %vm730_vm9, %v8549_v27  ;;  %v638_v2 = vmul.f32 %v8576_v61, %v618_v4  ;;  %7725 = vmatprep.subr.msk.mxu1 %vm236_vm0, %v13009_v56  ;;  %v8605_v51 = vld [vmem:[#allocation3 + $0x230] sm:$0xff] }
  0xf7   : > { %7726 = vmatpush1.msk.msra.mxu1 %vm236_vm0, %v13009_v56  ;;  %1011 = vmatprep.mubr.f32.mxu1 %v13006_v46  ;;  %13012 = vst [vmem:[#allocation20_spill] sm:$0xff] %v8605_v51 }
  0xf8   : > { %v562_v9 = vpop.permute.xlu0 %561  ;;  %890 = vmatprep.subr.mxu0 %v638_v2  ;;  %v564_v31 = vpop.permute.xlu1 %563 }
  0xf9   : > { %v570_v50 = vsel %vm567_vm2, %v8391_v47, %v562_v9  ;;  %v569_v42 = vsel %vm567_vm2, %v562_v9, %v564_v31  ;;  %891 = vmatpush1.msra.mxu0 %v637_v21 }
  0xfa   : > { %v588_v4 = vmul.f32 %v8590_v24, %v570_v50  ;;  %v589_v61 = vmul.f32 %v8592_v48, %v569_v42  ;;  %v8616_v50 = vld [vmem:[#allocation3 + $0x1f0] sm:$0xff]  ;;  %v8618_v42 = vld [vmem:[#allocation3 + $0x1a8] sm:$0xff]  ;;  %v8620_v48 = vld [vmem:[#allocation3 + $0x1f8] sm:$0xff] }
  0xfb   : > { %13014 = vst [vmem:[#allocation22_spill] sm:$0xff] %v8616_v50  ;;  %13015 = vst [vmem:[#allocation23_spill] sm:$0xff] %v8618_v42 }
  0xfc   : > { %v615_v54 = vpop.permute.xlu0 %614  ;;  %892 = vmatprep.subr.mxu0 %v589_v61  ;;  %v513_v2 = vpop.permute.xlu1 %512  ;;  %v8622_v61 = vld [vmem:[#allocation3 + $0x1a0] sm:$0xff] }
  0xfd   : > { %v617_v20 = vsel %vm616_vm1, %v613_v0, %v615_v54  ;;  %v624_v47 = vsel %vm616_vm1, %v615_v54, %v8331_v14  ;;  %893 = vmatpush1.msra.mxu0 %v588_v4  ;;  %13016 = vst [vmem:[#allocation24_spill] sm:$0xff] %v8622_v61  ;;  %v521_v0 = vsel %vm518_vm3, %v8420_v13, %v513_v2 }
  0xfe   : > { %v639_v21 = vmul.f32 %v8605_v51, %v617_v20  ;;  %v640_v9 = vmul.f32 %v8607_v22, %v624_v47  ;;  %v8638_v51 = vld [vmem:[#allocation3 + $0x160] sm:$0xff] }
  0xff   : > { %13017 = vst [vmem:[#allocation25_spill] sm:$0xff] %v8638_v51 }
 0x100   : > { %v515_v24 = vpop.permute.xlu0 %514  ;;  %961 = vmatprep.subr.mxu1 %v640_v9  ;;  %v566_v14 = vpop.permute.xlu1 %565  ;;  %v539_v9 = vmul.f32 %v8622_v61, %v521_v0 }
 0x101   : > { %v520_v54 = vsel %vm518_vm3, %v513_v2, %v515_v24  ;;  %v568_v20 = vsel %vm567_vm2, %v564_v31, %v566_v14  ;;  %v575_v4 = vsel %vm567_vm2, %v566_v14, %v8369_v32  ;;  %962 = vmatpush1.msra.mxu1 %v639_v21 }
 0x102   : > { %v590_v47 = vmul.f32 %v8616_v50, %v568_v20  ;;  %v540_v22 = vmul.f32 %v8618_v42, %v520_v54  ;;  %v591_v13 = vmul.f32 %v8620_v48, %v575_v4  ;;  %v8649_v54 = vld [vmem:[#allocation3 + $0x1b0] sm:$0xff]  ;;  %v8651_v20 = vld [vmem:[#allocation3 + $0x1b8] sm:$0xff] }
 0x103   : > { %13019 = vst [vmem:[#allocation27_spill] sm:$0xff] %v8649_v54  ;;  %13020 = vst [vmem:[#allocation28_spill] sm:$0xff] %v8651_v20  ;;  %v8653_v4 = vld [vmem:[#allocation3 + $0x170] sm:$0xff] }
 0x104   : > { %v464_v2 = vpop.permute.xlu0 %463  ;;  %894 = vmatprep.subr.mxu0 %v540_v22  ;;  %963 = vmatprep.subr.mxu1 %v591_v13  ;;  %v466_v31 = vpop.permute.xlu1 %465  ;;  %13021 = vst [vmem:[#allocation29_spill] sm:$0xff] %v8653_v4 }
 0x105   : > { %v472_v32 = vsel %vm469_vm4, %v8439_v29, %v464_v2  ;;  %v471_v21 = vsel %vm469_vm4, %v464_v2, %v466_v31  ;;  %895 = vmatpush1.msra.mxu0 %v539_v9  ;;  %964 = vmatpush1.msra.mxu1 %v590_v47 }
 0x106   : > { %v490_v14 = vmul.f32 %v8638_v51, %v472_v32  ;;  %v491_v0 = vmul.f32 %v8640_v18, %v471_v21  ;;  %v8665_v32 = vld [vmem:[#allocation3 + $0x178] sm:$0xff]  ;;  %v8671_v18 = vld [vmem:[#allocation3 + $0xe0] sm:$0xff] }
 0x107   : > { %13022 = vst [vmem:[#allocation30_spill] sm:$0xff] %v8665_v32  ;;  %13023 = vst [vmem:[#allocation31_spill] sm:$0xff] %v8671_v18 }
 0x108   : > { %v517_v22 = vpop.permute.xlu0 %516  ;;  %896 = vmatprep.subr.mxu0 %v491_v0  ;;  %v468_v13 = vpop.permute.xlu1 %467 }
 0x109   : > { %v519_v29 = vsel %vm518_vm3, %v515_v24, %v517_v22  ;;  %v526_v47 = vsel %vm518_vm3, %v517_v22, %v8402_v53  ;;  %v470_v9 = vsel %vm469_vm4, %v466_v31, %v468_v13  ;;  %v477_v2 = vsel %vm469_vm4, %v468_v13, %v8422_v16  ;;  %897 = vmatpush1.msra.mxu0 %v490_v14  ;;  %v8674_v53 = vld [vmem:[#allocation3 + $0xe8] sm:$0xff] }
 0x10a   : > { %v541_v21 = vmul.f32 %v8649_v54, %v519_v29  ;;  %v542_v0 = vmul.f32 %v8651_v20, %v526_v47  ;;  %898 = vmatprep.subr.mxu0 %v8287_v10  ;;  %v492_v24 = vmul.f32 %v8653_v4, %v470_v9  ;;  %13024 = vst [vmem:[#allocation32_spill] sm:$0xff] %v8674_v53  ;;  %v8684_v29 = vld [vmem:[#allocation3 + $0xa0] sm:$0xff]  ;;  %v8686_v47 = vld [vmem:[#allocation3 + $0xa8] sm:$0xff] }
 0x10b   : > { %899 = vmatpush1.msra.mxu0 %v8211_v7  ;;  %v493_v14 = vmul.f32 %v8665_v32, %v477_v2  ;;  %13025 = vst [vmem:[#allocation33_spill] sm:$0xff] %v8684_v29  ;;  %13026 = vst [vmem:[#allocation34_spill] sm:$0xff] %v8686_v47 }
 0x10c   : > { %v405_v31 = vpop.permute.xlu0 %404  ;;  %965 = vmatprep.subr.mxu1 %v542_v0  ;;  %v407_v16 = vpop.permute.xlu1 %406 }
 0x10d   : > { %v416_v22 = vsel %vm412_vm5, %v8478_v58, %v405_v31  ;;  %v415_v10 = vsel %vm412_vm5, %v405_v31, %v407_v16  ;;  %966 = vmatpush1.msra.mxu1 %v541_v21 }
 0x10e   : > { %v433_v13 = vmul.f32 %v8671_v18, %v416_v22  ;;  %967 = vmatprep.subr.mxu1 %v493_v14  ;;  %v434_v7 = vmul.f32 %v8674_v53, %v415_v10  ;;  %v8699_v14 = vld [vmem:[#allocation3 + $0xf8] sm:$0xff] }
 0x10f   : > { %968 = vmatpush1.msra.mxu1 %v492_v24  ;;  %v8697_v24 = vld [vmem:[#allocation3 + $0xf0] sm:$0xff]  ;;  %13028 = vst [vmem:[#allocation36_spill] sm:$0xff] %v8699_v14 }
 0x110   : > { %v356_v9 = vpop.permute.xlu0 %355  ;;  %900 = vmatprep.subr.mxu0 %v434_v7  ;;  %v358_v2 = vpop.permute.xlu1 %357  ;;  %969 = vmatprep.subr.mxu1 %v8246_v8  ;;  %13027 = vst [vmem:[#allocation35_spill] sm:$0xff] %v8697_v24  ;;  %v8708_v7 = vld [vmem:[#allocation3 + $0xb0] sm:$0xff] }
 0x111   : > { %v367_v58 = vsel %vm363_vm6, %v8503_v40, %v356_v9  ;;  %v366_v21 = vsel %vm363_vm6, %v356_v9, %v358_v2  ;;  %901 = vmatpush1.msra.mxu0 %v433_v13  ;;  %970 = vmatpush1.msra.mxu1 %v8290_v11  ;;  %13029 = vst [vmem:[#allocation37_spill] sm:$0xff] %v8708_v7  ;;  %v8710_v9 = vld [vmem:[#allocation3 + $0x68] sm:$0xff] }
 0x112   : > { %v384_v0 = vmul.f32 %v8684_v29, %v367_v58  ;;  %v385_v31 = vmul.f32 %v8686_v47, %v366_v21  ;;  %13030 = vst [vmem:[#allocation38_spill] sm:$0xff] %v8710_v9  ;;  %v8712_v58 = vld [vmem:[#allocation3 + $0xb8] sm:$0xff]  ;;  %v8714_v21 = vld [vmem:[#allocation3 + $0x60] sm:$0xff]  ;;  %v8732_v29 = vld [vmem:[#allocation3 + $0x28] sm:$0xff] }
 0x113   : > { %13031 = vst [vmem:[#allocation39_spill] sm:$0xff] %v8712_v58  ;;  %13032 = vst [vmem:[#allocation40_spill] sm:$0xff] %v8714_v21 }
 0x114   : > { %v409_v22 = vpop.permute.xlu0 %408  ;;  %902 = vmatprep.subr.mxu0 %v385_v31  ;;  %v307_v8 = vpop.permute.xlu1 %306  ;;  %13034 = vst [vmem:[#allocation42_spill] sm:$0xff] %v8732_v29 }
 0x115   : > { %v413_v40 = vsel %vm412_vm5, %v409_v22, %v8460_v43  ;;  %v414_v10 = vsel %vm412_vm5, %v407_v16, %v409_v22  ;;  %903 = vmatpush1.msra.mxu0 %v384_v0  ;;  %v318_v43 = vsel %vm314_vm7, %v8532_v34, %v307_v8 }
 0x116   : > { %v435_v11 = vmul.f32 %v8697_v24, %v414_v10  ;;  %v436_v13 = vmul.f32 %v8699_v14, %v413_v40  ;;  %v8730_v24 = vld [vmem:[#allocation3 + $0x20] sm:$0xff] }
 0x117   : > { %13033 = vst [vmem:[#allocation41_spill] sm:$0xff] %v8730_v24 }
 0x118   : > { %v309_v31 = vpop.permute.xlu0 %308  ;;  %971 = vmatprep.subr.mxu1 %v436_v13  ;;  %v360_v16 = vpop.permute.xlu1 %359  ;;  %v335_v13 = vmul.f32 %v8714_v21, %v318_v43 }
 0x119   : > { %v317_v0 = vsel %vm314_vm7, %v307_v8, %v309_v31  ;;  %v364_v22 = vsel %vm363_vm6, %v360_v16, %v8480_v59  ;;  %v365_v40 = vsel %vm363_vm6, %v358_v2, %v360_v16  ;;  %972 = vmatpush1.msra.mxu1 %v435_v11 }
 0x11a   : > { %v386_v10 = vmul.f32 %v8708_v7, %v365_v40  ;;  %v336_v14 = vmul.f32 %v8710_v9, %v317_v0  ;;  %v387_v34 = vmul.f32 %v8712_v58, %v364_v22  ;;  %v8741_v0 = vld [vmem:[#allocation3 + $0x70] sm:$0xff]  ;;  %v8743_v22 = vld [vmem:[#allocation3 + $0x78] sm:$0xff] }
 0x11b   : > { %13035 = vst [vmem:[#allocation43_spill] sm:$0xff] %v8741_v0  ;;  %13036 = vst [vmem:[#allocation44_spill] sm:$0xff] %v8743_v22  ;;  %v8745_v40 = vld [vmem:[#allocation3 + $0x30] sm:$0xff] }
 0x11c   : > { %v256_v8 = vpop.permute.xlu0 %255  ;;  %904 = vmatprep.subr.mxu0 %v336_v14  ;;  %973 = vmatprep.subr.mxu1 %v387_v34  ;;  %v258_v59 = vpop.permute.xlu1 %257  ;;  %13037 = vst [vmem:[#allocation45_spill] sm:$0xff] %v8745_v40 }
 0x11d   : > { %v269_v2 = vsel %vm265_vm8, %v8556_v5, %v256_v8  ;;  %v268_v11 = vsel %vm265_vm8, %v256_v8, %v258_v59  ;;  %905 = vmatpush1.msra.mxu0 %v335_v13  ;;  %974 = vmatpush1.msra.mxu1 %v386_v10 }
 0x11e   : > { %v286_v16 = vmul.f32 %v8730_v24, %v269_v2  ;;  %v287_v43 = vmul.f32 %v8732_v29, %v268_v11  ;;  %v8757_v2 = vld [vmem:[#allocation3 + $0x38] sm:$0xff] }
 0x11f   : > { %13038 = vst [vmem:[#allocation46_spill] sm:$0xff] %v8757_v2 }
 0x120   : > { %v311_v14 = vpop.permute.xlu0 %310  ;;  %906 = vmatprep.subr.mxu0 %v287_v43  ;;  %v260_v34 = vpop.permute.xlu1 %259 }
 0x121   : > { %v315_v5 = vsel %vm314_vm7, %v311_v14, %v8514_v6  ;;  %v316_v10 = vsel %vm314_vm7, %v309_v31, %v311_v14  ;;  %v266_v13 = vsel %vm265_vm8, %v260_v34, %v8534_v38  ;;  %v267_v8 = vsel %vm265_vm8, %v258_v59, %v260_v34  ;;  %907 = vmatpush1.msra.mxu0 %v286_v16 }
 0x122   : > { %v337_v11 = vmul.f32 %v8741_v0, %v316_v10  ;;  %v338_v43 = vmul.f32 %v8743_v22, %v315_v5  ;;  %7674 = vmatmul.mubr.msk.f32.vlgmr.msra.gmra.mxu0 %vm730_vm9, %v8549_v27  ;;  %v288_v6 = vmul.f32 %v8745_v40, %v267_v8  ;;  %7727 = vmatprep.subr.msk.mxu0 %vm236_vm0, %v13009_v56 }
 0x123   : > { %1575 = vmatprep.mubr.f32.mxu0 %v13006_v46  ;;  %v289_v38 = vmul.f32 %v8757_v2, %v266_v13  ;;  %7728 = vmatpush1.msk.msra.mxu0 %vm236_vm0, %v13009_v56 }
 0x124   : > { %975 = vmatprep.subr.mxu1 %v338_v43 }
 0x125   : > { %976 = vmatpush1.msra.mxu1 %v337_v11 }
 0x126   : > { %977 = vmatprep.subr.mxu1 %v289_v38 }
 0x127   : > { %978 = vmatpush1.msra.mxu1 %v288_v6 }
 0x128   : > { %7675 = vmatmul.mubr.msk.f32.vlgmr.msra.gmra.mxu1 %vm730_vm9, %v8549_v27  ;;  %7729 = vmatprep.subr.msk.mxu1 %vm236_vm0, %v13009_v56 }
 0x129   : > { %7730 = vmatpush1.msk.msra.mxu1 %vm236_vm0, %v13009_v56  ;;  %1646 = vmatprep.mubr.f32.mxu1 %v13006_v46 }
 0x1b1   : > { %v800_v31 = vpop.f32.mrf.mxu0 }
 0x1b2   : > { %v1018_v59 = vmul.f32 0.1, %v800_v31 }
 0x1b3   : > { %v802_v5 = vpop.f32.mrf.mxu0 }
 0x1b4   : > { %v8781_v16 = vmax.f32 %v800_v31, %v1018_v59  ;;  %v1019_v10 = vmul.f32 0.1, %v802_v5 }
 0x1b6   : > { %v871_v14 = vpop.f32.mrf.mxu1  ;;  %1378 = vrot.lane.b32.xlu0 %v8781_v16, %s8062_s11  ;;  %v8811_v13 = vmax.f32 %v802_v5, %v1019_v10 }
 0x1b7   : > { %v1020_v34 = vmul.f32 0.1, %v871_v14 }
 0x1b8   : > { %v873_v8 = vpop.f32.mrf.mxu1 }
 0x1b9   : > { %v8785_v27 = vmax.f32 %v871_v14, %v1020_v34  ;;  %v1021_v11 = vmul.f32 0.1, %v873_v8 }
 0x1bb   : > { %1334 = vrot.lane.b32.xlu0 %v8785_v27, %s8063_s12  ;;  %1382 = vrot.lane.b32.xlu1 %v8785_v27, %s8062_s11  ;;  %v8825_v43 = vmax.f32 %v873_v8, %v1021_v11 }
 0x1bf   : > { %1282 = vrot.lane.b32.xlu0 %v8781_v16, %s8064_s13  ;;  %1330 = vrot.lane.b32.xlu1 %v8781_v16, %s8063_s12 }
 0x1c3   : > { %1238 = vrot.lane.b32.xlu0 %v8785_v27, %s8065_s14  ;;  %1286 = vrot.lane.b32.xlu1 %v8785_v27, %s8064_s13 }
 0x1c7   : > { %1178 = vrot.lane.b32.xlu0 %v8781_v16, %s8066_s16  ;;  %1234 = vrot.lane.b32.xlu1 %v8781_v16, %s8065_s14 }
 0x1cb   : > { %1082 = vrot.lane.b32.xlu0 %v8781_v16, %s8068_s19  ;;  %1130 = vrot.lane.b32.xlu1 %v8781_v16, %s8067_s17 }
 0x1cf   : > { %1182 = vrot.lane.b32.xlu0 %v8785_v27, %s8066_s16  ;;  %1034 = vrot.lane.b32.xlu1 %v8781_v16, %s8070_s20 }
 0x1d3   : > { %1134 = vrot.lane.b32.xlu0 %v8785_v27, %s8067_s17  ;;  %1332 = vrot.lane.b32.xlu1 %v8811_v13, %s8063_s12 }
 0x1d7   : > { %1086 = vrot.lane.b32.xlu0 %v8785_v27, %s8068_s19  ;;  %1236 = vrot.lane.b32.xlu1 %v8811_v13, %s8065_s14 }
 0x1db   : > { %1038 = vrot.lane.b32.xlu0 %v8785_v27, %s8070_s20  ;;  %1180 = vrot.lane.b32.xlu1 %v8811_v13, %s8066_s16 }
 0x1df   : > { %1380 = vrot.lane.b32.xlu0 %v8811_v13, %s8062_s11  ;;  %1288 = vrot.lane.b32.xlu1 %v8825_v43, %s8064_s13 }
 0x1e2   : > { %v942_v6 = vpop.f32.mrf.mxu0 }
 0x1e3   : > { %1284 = vrot.lane.b32.xlu0 %v8811_v13, %s8064_s13  ;;  %1084 = vrot.lane.b32.xlu1 %v8811_v13, %s8068_s19  ;;  %v1022_v38 = vmul.f32 0.1, %v942_v6 }
 0x1e4   : > { %v944_v11 = vpop.f32.mrf.mxu0 }
 0x1e5   : > { %v8851_v31 = vmax.f32 %v942_v6, %v1022_v38  ;;  %v1023_v6 = vmul.f32 0.1, %v944_v11 }
 0x1e7   : > { %1184 = vrot.lane.b32.xlu1 %v8825_v43, %s8066_s16  ;;  %1384 = vrot.lane.b32.xlu0 %v8825_v43, %s8062_s11  ;;  %13039 = vst [vmem:[#allocation47_spill] sm:$0xff] %v8851_v31  ;;  %v8881_v38 = vmax.f32 %v944_v11, %v1023_v6 }
 0x1e8   : > { %v1013_v59 = vpop.f32.mrf.mxu1 }
 0x1e9   : > { %v1024_v14 = vmul.f32 0.1, %v1013_v59  ;;  %13042 = vst [vmem:[#allocation50_spill] sm:$0xff] %v8881_v38 }
 0x1ea   : > { %v1015_v34 = vpop.f32.mrf.mxu1 }
 0x1eb   : > { %1136 = vrot.lane.b32.xlu1 %v8825_v43, %s8067_s17  ;;  %1336 = vrot.lane.b32.xlu0 %v8825_v43, %s8063_s12  ;;  %v8865_v5 = vmax.f32 %v1013_v59, %v1024_v14  ;;  %v1025_v10 = vmul.f32 0.1, %v1015_v34 }
 0x1ed   : > { %13040 = vst [vmem:[#allocation48_spill] sm:$0xff] %v8865_v5  ;;  %v8871_v8 = vmax.f32 %v1015_v34, %v1025_v10 }
 0x1ef   : > { %1088 = vrot.lane.b32.xlu1 %v8825_v43, %s8068_s19  ;;  %1132 = vrot.lane.b32.xlu0 %v8811_v13, %s8067_s17  ;;  %13041 = vst [vmem:[#allocation49_spill] sm:$0xff] %v8871_v8 }
 0x1f3   : > { %1040 = vrot.lane.b32.xlu1 %v8825_v43, %s8070_s20  ;;  %1240 = vrot.lane.b32.xlu0 %v8825_v43, %s8065_s14 }
 0x1f7   : > { %1036 = vrot.lane.b32.xlu0 %v8811_v13, %s8070_s20  ;;  %1386 = vrot.lane.b32.xlu1 %v8851_v31, %s8062_s11 }
 0x1fb   : > { %1290 = vrot.lane.b32.xlu0 %v8851_v31, %s8064_s13  ;;  %1338 = vrot.lane.b32.xlu1 %v8851_v31, %s8063_s12 }
 0x1ff   : > { %1186 = vrot.lane.b32.xlu0 %v8851_v31, %s8066_s16  ;;  %1242 = vrot.lane.b32.xlu1 %v8851_v31, %s8065_s14 }
 0x203   : > { %1090 = vrot.lane.b32.xlu0 %v8851_v31, %s8068_s19  ;;  %1390 = vrot.lane.b32.xlu1 %v8865_v5, %s8062_s11 }
 0x207   : > { %1342 = vrot.lane.b32.xlu1 %v8865_v5, %s8063_s12  ;;  %1192 = vrot.lane.b32.xlu0 %v8871_v8, %s8066_s16 }
 0x20b   : > { %1294 = vrot.lane.b32.xlu1 %v8865_v5, %s8064_s13  ;;  %1096 = vrot.lane.b32.xlu0 %v8871_v8, %s8068_s19 }
 0x20f   : > { %1246 = vrot.lane.b32.xlu1 %v8865_v5, %s8065_s14  ;;  %1388 = vrot.lane.b32.xlu0 %v8881_v38, %s8062_s11 }
 0x213   : > { %1138 = vrot.lane.b32.xlu1 %v8851_v31, %s8067_s17  ;;  %1340 = vrot.lane.b32.xlu0 %v8881_v38, %s8063_s12 }
 0x217   : > { %1144 = vrot.lane.b32.xlu1 %v8871_v8, %s8067_s17  ;;  %1292 = vrot.lane.b32.xlu0 %v8881_v38, %s8064_s13 }
 0x21b   : > { %1048 = vrot.lane.b32.xlu1 %v8871_v8, %s8070_s20  ;;  %1244 = vrot.lane.b32.xlu0 %v8881_v38, %s8065_s14 }
 0x21f   : > { %1344 = vrot.lane.b32.xlu1 %v8871_v8, %s8063_s12  ;;  %1392 = vrot.lane.b32.xlu0 %v8871_v8, %s8062_s11 }
 0x223   : > { %1188 = vrot.lane.b32.xlu1 %v8881_v38, %s8066_s16  ;;  %1296 = vrot.lane.b32.xlu0 %v8871_v8, %s8064_s13 }
 0x227   : > { %1248 = vrot.lane.b32.xlu1 %v8871_v8, %s8065_s14  ;;  %1140 = vrot.lane.b32.xlu0 %v8881_v38, %s8067_s17 }
 0x228   : > { %v8911_v59 = vpop.permute.xlu0 %1378 }
 0x22b   : > { %1092 = vrot.lane.b32.xlu1 %v8881_v38, %s8068_s19  ;;  %1042 = vrot.lane.b32.xlu0 %v8851_v31, %s8070_s20 }
 0x22d   : > { %v8917_v14 = vpop.permute.xlu0 %1334  ;;  %v8919_v34 = vpop.permute.xlu1 %1382 }
 0x22f   : > { %1044 = vrot.lane.b32.xlu1 %v8881_v38, %s8070_s20  ;;  %1190 = vrot.lane.b32.xlu0 %v8865_v5, %s8066_s16 }
 0x231   : > { %v8925_v10 = vpop.permute.xlu0 %1282  ;;  %v8927_v11 = vpop.permute.xlu1 %1330 }
 0x233   : > { %1142 = vrot.lane.b32.xlu1 %v8865_v5, %s8067_s17  ;;  %1094 = vrot.lane.b32.xlu0 %v8865_v5, %s8068_s19 }
 0x235   : > { %v8933_v6 = vpop.permute.xlu0 %1238  ;;  %v8935_v2 = vpop.permute.xlu1 %1286 }
 0x237   : > { %1046 = vrot.lane.b32.xlu1 %v8865_v5, %s8070_s20 }
 0x239   : > { %v8939_v40 = vpop.permute.xlu0 %1178  ;;  %v8941_v0 = vpop.permute.xlu1 %1234 }
 0x23d   : > { %v8943_v22 = vpop.permute.xlu0 %1082  ;;  %v8945_v58 = vpop.permute.xlu1 %1130 }
 0x241   : > { %v8947_v7 = vpop.permute.xlu0 %1182  ;;  %v8949_v24 = vpop.permute.xlu1 %1034 }
 0x245   : > { %v8951_v29 = vpop.permute.xlu0 %1134  ;;  %v1333_v21 = vpop.permute.xlu1 %1332 }
 0x246   : > { %v1351_v53 = vsel %vm567_vm2, %v1333_v21, %v8917_v14  ;;  %v1352_v4 = vsel %vm567_vm2, %v8927_v11, %v1333_v21 }
 0x247   : > { %v1363_v54 = vmul.f32 %v1351_v53, %v8354_v23  ;;  %v1362_v50 = vmul.f32 %v1352_v4, %v8363_v28 }
 0x249   : > { %v8953_v9 = vpop.permute.xlu0 %1086  ;;  %v1237_v47 = vpop.permute.xlu1 %1236 }
 0x24d   : > { %v8955_v8 = vpop.permute.xlu0 %1038  ;;  %v8957_v5 = vpop.permute.xlu1 %1180 }
 0x251   : > { %v1381_v31 = vpop.permute.xlu0 %1380  ;;  %v1289_v18 = vpop.permute.xlu1 %1288 }
 0x252   : > { %v1399_v38 = vsel %vm616_vm1, %v1381_v31, %v8919_v34  ;;  %v1400_v32 = vsel %vm616_vm1, %v8911_v59, %v1381_v31  ;;  %v1255_v31 = vsel %vm469_vm4, %v1237_v47, %v8933_v6 }
 0x253   : > { %v1410_v51 = vmul.f32 %v1400_v32, %v8343_v19  ;;  %v1411_v61 = vmul.f32 %v1399_v38, %v8338_v15  ;;  %v1256_v19 = vsel %vm469_vm4, %v8941_v0, %v1237_v47  ;;  %v1267_v32 = vmul.f32 %v1255_v31, %v8409_v57  ;;  %v9008_v47 = vld [vmem:[#allocation3 + $0x218] sm:$0xff] }
 0x254   : > { %v1266_v53 = vmul.f32 %v1256_v19, %v8414_v62 }
 0x255   : > { %v1285_v20 = vpop.permute.xlu0 %1284  ;;  %1525 = vmatprep.subr.mxu0 %v1411_v61  ;;  %v8973_v42 = vpop.permute.xlu1 %1084 }
 0x256   : > { %v1303_v21 = vsel %vm518_vm3, %v1285_v20, %v8935_v2  ;;  %v1304_v15 = vsel %vm518_vm3, %v8925_v10, %v1285_v20  ;;  %1526 = vmatpush1.msra.mxu0 %v1410_v51  ;;  %v1200_v51 = vsel %vm412_vm5, %v8939_v40, %v8957_v5 }
 0x257   : > { %v1314_v23 = vmul.f32 %v1304_v15, %v8400_v52  ;;  %1527 = vmatprep.subr.mxu0 %v1363_v54  ;;  %v1315_v28 = vmul.f32 %v1303_v21, %v8382_v39 }
 0x258   : > { %1528 = vmatpush1.msra.mxu0 %v1362_v50  ;;  %v1211_v50 = vmul.f32 %v1200_v51, %v8451_v37 }
 0x259   : > { %v1385_v61 = vpop.permute.xlu0 %1384  ;;  %1529 = vmatprep.subr.mxu0 %v1315_v28  ;;  %v8991_v4 = vpop.permute.xlu1 %1184 }
 0x25a   : > { %1530 = vmatpush1.msra.mxu0 %v1314_v23  ;;  %v1398_v38 = vsel %vm616_vm1, %v8919_v34, %v1385_v61 }
 0x25b   : > { %1531 = vmatprep.subr.mxu0 %v1267_v32  ;;  %v1412_v21 = vmul.f32 %v1398_v38, %v8371_v33  ;;  %v1302_v33 = vsel %vm518_vm3, %v8935_v2, %v1289_v18  ;;  %v1103_v38 = vsel %vm314_vm7, %v8973_v42, %v8953_v9 }
 0x25c   : > { %1532 = vmatpush1.msra.mxu0 %v1266_v53 }
 0x25d   : > { %v1337_v52 = vpop.permute.xlu0 %1336  ;;  %1533 = vmatprep.subr.mxu0 %v8811_v13  ;;  %v9000_v39 = vpop.permute.xlu1 %1136 }
 0x25e   : > { %1534 = vmatpush1.msra.mxu0 %v8781_v16  ;;  %v1350_v15 = vsel %vm567_vm2, %v8917_v14, %v1337_v52 }
 0x25f   : > { %1535 = vmatprep.subr.mxu0 %v1211_v50  ;;  %v1316_v50 = vmul.f32 %v1302_v33, %v8424_v17  ;;  %v13044_v33 = vld [vmem:[#allocation15_spill] sm:$0xff] }
 0x261   : > { %v1133_v57 = vpop.permute.xlu0 %1132  ;;  %v9004_v62 = vpop.permute.xlu1 %1088 }
 0x265   : > { %v1241_v54 = vpop.permute.xlu0 %1240  ;;  %v9006_v20 = vpop.permute.xlu1 %1040 }
 0x266   : > { %v1254_v32 = vsel %vm469_vm4, %v8933_v6, %v1241_v54 }
 0x267   : > { %v1268_v2 = vmul.f32 %v1254_v32, %v8437_v26  ;;  %v1151_v26 = vsel %vm363_vm6, %v1133_v57, %v8951_v29 }
 0x269   : > { %v9013_v13 = vpop.permute.xlu0 %1036  ;;  %v9015_v31 = vpop.permute.xlu1 %1386 }
 0x26a   : > { %v1397_v37 = vsel %vm616_vm1, %v1385_v61, %v9015_v31  ;;  %v1364_v61 = vmul.f32 %v1350_v15, %v8389_v45  ;;  %v1198_v45 = vsel %vm412_vm5, %v8947_v7, %v8991_v4 }
 0x26b   : > { %v1413_v16 = vmul.f32 %v9008_v47, %v1397_v37  ;;  %v1164_v37 = vmul.f32 %v1151_v26, %v8501_v36 }
 0x26d   : > { %v9025_v19 = vpop.permute.xlu0 %1290  ;;  %1596 = vmatprep.subr.mxu1 %v1413_v16  ;;  %v9027_v34 = vpop.permute.xlu1 %1338  ;;  %v1116_v16 = vmul.f32 %v1103_v38, %v8536_v41 }
 0x26e   : > { %v1301_v23 = vsel %vm518_vm3, %v1289_v18, %v9025_v19  ;;  %v1349_v28 = vsel %vm567_vm2, %v1337_v52, %v9027_v34  ;;  %1597 = vmatpush1.msra.mxu1 %v1412_v21 }
 0x26f   : > { %v1365_v14 = vmul.f32 %v1349_v28, %v8387_v44  ;;  %v1317_v52 = vmul.f32 %v1301_v23, %v8416_v63  ;;  %v1199_v63 = vsel %vm412_vm5, %v8957_v5, %v8947_v7  ;;  %v1102_v5 = vsel %vm314_vm7, %v8953_v9, %v9004_v62  ;;  %v13043_v23 = vld [vmem:[#allocation14_spill] sm:$0xff] }
 0x270   : > { %v1212_v7 = vmul.f32 %v1199_v63, %v8482_v60  ;;  %v1117_v36 = vmul.f32 %v1102_v5, %v8528_v30 }
 0x271   : > { %v9043_v53 = vpop.permute.xlu0 %1186  ;;  %1598 = vmatprep.subr.mxu1 %v1365_v14  ;;  %v9045_v51 = vpop.permute.xlu1 %1242 }
 0x272   : > { %v1253_v18 = vsel %vm469_vm4, %v1241_v54, %v9045_v51  ;;  %1599 = vmatpush1.msra.mxu1 %v1364_v61  ;;  %v1213_v54 = vmul.f32 %v1198_v45, %v8474_v55  ;;  %v1104_v61 = vsel %vm314_vm7, %v8943_v22, %v8973_v42  ;;  %v13045_v45 = vld [vmem:[#allocation9_spill] sm:$0xff] }
 0x273   : > { %1600 = vmatprep.subr.mxu1 %v1317_v52  ;;  %v1269_v44 = vmul.f32 %v1253_v18, %v8435_v25  ;;  %v1150_v25 = vsel %vm363_vm6, %v8951_v29, %v9000_v39  ;;  %v1152_v29 = vsel %vm363_vm6, %v8945_v58, %v1133_v57  ;;  %v1055_v57 = vsel %vm265_vm8, %v9013_v13, %v8955_v8 }
 0x274   : > { %1601 = vmatpush1.msra.mxu1 %v1316_v50  ;;  %v1165_v60 = vmul.f32 %v1150_v25, %v8499_v35  ;;  %v1163_v21 = vmul.f32 %v1152_v29, %v8467_v49  ;;  %v13047_v25 = vld [vmem:[#allocation11_spill] sm:$0xff]  ;;  %v13049_v29 = vld [vmem:[#allocation13_spill] sm:$0xff] }
 0x275   : > { %v9062_v17 = vpop.permute.xlu0 %1090  ;;  %1602 = vmatprep.subr.mxu1 %v1269_v44  ;;  %v9064_v6 = vpop.permute.xlu1 %1390  ;;  %v1056_v44 = vsel %vm265_vm8, %v8949_v24, %v9013_v13  ;;  %v13048_v13 = vld [vmem:[#allocation12_spill] sm:$0xff] }
 0x276   : > { %1603 = vmatpush1.msra.mxu1 %v1268_v2  ;;  %v13046_v2 = vld [vmem:[#allocation10_spill] sm:$0xff]  ;;  %v1067_v5 = vmul.f32 %v1056_v44, %v13048_v13 }
 0x277   : > { %1604 = vmatprep.subr.mxu1 %v8825_v43  ;;  %v1115_v63 = vmul.f32 %v1104_v61, %v13046_v2  ;;  %v13055_v61 = vld [vmem:[#allocation19_spill] sm:$0xff] }
 0x278   : > { %1605 = vmatpush1.msra.mxu1 %v8785_v27  ;;  %v1054_v27 = vsel %vm265_vm8, %v8955_v8, %v9006_v20  ;;  %v1068_v8 = vmul.f32 %v1055_v57, %v13044_v33  ;;  %v13053_v33 = vld [vmem:[#allocation20_spill] sm:$0xff] }
 0x279   : > { %v9088_v43 = vpop.permute.xlu0 %1192  ;;  %1606 = vmatprep.subr.mxu1 %v1213_v54  ;;  %v9090_v55 = vpop.permute.xlu1 %1342  ;;  %v1069_v28 = vmul.f32 %v1054_v27, %v13043_v23  ;;  %v13052_v23 = vld [vmem:[#allocation18_spill] sm:$0xff] }
 0x27a   : > { %v1201_v9 = vsel %vm412_vm5, %v9088_v43, %v8939_v40  ;;  %1607 = vmatpush1.msra.mxu1 %v1212_v7 }
 0x27b   : > { %v1210_v35 = vmul.f32 %v1201_v9, %v8457_v3  ;;  %1608 = vmatprep.subr.mxu1 %v1165_v60  ;;  %v9119_v3 = vld [vmem:[%s12871_s1 + $0x8] sm:$0xff] }
 0x27c   : > { %1609 = vmatpush1.msra.mxu1 %v1164_v37 }
 0x27d   : > { %v9110_v15 = vpop.permute.xlu0 %1096  ;;  %1536 = vmatpush1.msra.mxu0 %v1210_v35  ;;  %1610 = vmatprep.subr.mxu1 %v1117_v36  ;;  %v9112_v40 = vpop.permute.xlu1 %1294 }
 0x27e   : > { %1537 = vmatprep.subr.mxu0 %v1163_v21  ;;  %1611 = vmatpush1.msra.mxu1 %v1116_v16  ;;  %v1105_v50 = vsel %vm314_vm7, %v9110_v15, %v8943_v22  ;;  %v13051_v16 = vld [vmem:[#allocation17_spill] sm:$0xff] }
 0x27f   : > { %1612 = vmatprep.subr.mxu1 %v1069_v28  ;;  %v1114_v26 = vmul.f32 %v1105_v50, %v13047_v25  ;;  %v13057_v25 = vld [vmem:[#allocation27_spill] sm:$0xff] }
 0x280   : > { %1613 = vmatpush1.msra.mxu1 %v1068_v8 }
 0x281   : > { %v1389_v49 = vpop.permute.xlu0 %1388  ;;  %v9121_v30 = vpop.permute.xlu1 %1246  ;;  %7733 = vmatprep.subr.msk.mxu1 %vm236_vm0, %v13009_v56  ;;  %7678 = vmatmul.mubr.msk.f32.vlgmr.msra.gmra.mxu1 %vm730_vm9, %v9119_v3 }
 0x282   : > { %7734 = vmatpush1.msk.msra.mxu1 %vm236_vm0, %v13009_v56  ;;  %1788 = vmatprep.mubr.f32.mxu1 %v13006_v46  ;;  %v1396_v22 = vsel %vm616_vm1, %v9015_v31, %v1389_v49  ;;  %v1395_v38 = vsel %vm616_vm1, %v1389_v49, %v9064_v6  ;;  %v13050_v31 = vld [vmem:[#allocation16_spill] sm:$0xff] }
 0x283   : > { %v1414_v27 = vmul.f32 %v1396_v22, %v13050_v31  ;;  %v1415_v21 = vmul.f32 %v1395_v38, %v13051_v16  ;;  %v13059_v22 = vld [vmem:[#allocation28_spill] sm:$0xff] }
 0x285   : > { %v1341_v41 = vpop.permute.xlu0 %1340  ;;  %v9132_v14 = vpop.permute.xlu1 %1138 }
 0x286   : > { %v1348_v37 = vsel %vm567_vm2, %v9027_v34, %v1341_v41 }
 0x287   : > { %v1366_v28 = vmul.f32 %v1348_v37, %v13052_v23  ;;  %v13067_v23 = vld [vmem:[#allocation31_spill] sm:$0xff] }
 0x289   : > { %v1293_v32 = vpop.permute.xlu0 %1292  ;;  %v9138_v52 = vpop.permute.xlu1 %1144 }
 0x28a   : > { %v1153_v18 = vsel %vm363_vm6, %v9138_v52, %v8945_v58 }
 0x28b   : > { %v1162_v42 = vmul.f32 %v1153_v18, %v13045_v45  ;;  %v13056_v45 = vld [vmem:[#allocation22_spill] sm:$0xff] }
 0x28d   : > { %v1245_v54 = vpop.permute.xlu0 %1244  ;;  %1538 = vmatpush1.msra.mxu0 %v1162_v42  ;;  %v9155_v7 = vpop.permute.xlu1 %1048 }
 0x28e   : > { %v1057_v58 = vsel %vm265_vm8, %v9155_v7, %v8949_v24  ;;  %1539 = vmatprep.subr.mxu0 %v1115_v63  ;;  %v1347_v24 = vsel %vm567_vm2, %v1341_v41, %v9090_v55  ;;  %v1300_v41 = vsel %vm518_vm3, %v9025_v19, %v1293_v32  ;;  %v1251_v50 = vsel %vm469_vm4, %v1245_v54, %v9121_v30 }
 0x28f   : > { %v1066_v60 = vmul.f32 %v1057_v58, %v13049_v29  ;;  %1540 = vmatpush1.msra.mxu0 %v1114_v26  ;;  %v1252_v18 = vsel %vm469_vm4, %v9045_v51, %v1245_v54  ;;  %v13058_v26 = vld [vmem:[#allocation23_spill] sm:$0xff]  ;;  %v13060_v58 = vld [vmem:[#allocation24_spill] sm:$0xff]  ;;  %v13062_v29 = vld [vmem:[#allocation26_spill] sm:$0xff] }
 0x290   : > { %1541 = vmatprep.subr.mxu0 %v1067_v5  ;;  %v1318_v13 = vmul.f32 %v1300_v41, %v13060_v58  ;;  %v13061_v5 = vld [vmem:[#allocation25_spill] sm:$0xff] }
 0x291   : > { %v1393_v9 = vpop.permute.xlu0 %1392  ;;  %1542 = vmatpush1.msra.mxu0 %v1066_v60  ;;  %v1345_v57 = vpop.permute.xlu1 %1344  ;;  %v1271_v60 = vmul.f32 %v1251_v50, %v13062_v29  ;;  %v13072_v41 = vld [vmem:[#allocation33_spill] sm:$0xff]  ;;  %v13080_v29 = vld [vmem:[#allocation39_spill] sm:$0xff] }
 0x292   : > { %v1394_v35 = vsel %vm616_vm1, %v9064_v6, %v1393_v9  ;;  %v1401_v36 = vsel %vm616_vm1, %v1393_v9, %v8911_v59  ;;  %v1353_v34 = vsel %vm567_vm2, %v1345_v57, %v8927_v11  ;;  %7677 = vmatmul.mubr.msk.f32.vlgmr.msra.gmra.mxu0 %vm730_vm9, %v9119_v3  ;;  %v1346_v6 = vsel %vm567_vm2, %v9090_v55, %v1345_v57  ;;  %v13054_v59 = vld [vmem:[#allocation21_spill] sm:$0xff] }
 0x293   : > { %v1416_v8 = vmul.f32 %v1394_v35, %v13053_v33  ;;  %7731 = vmatprep.subr.msk.mxu0 %vm236_vm0, %v13009_v56  ;;  %v1417_v49 = vmul.f32 %v1401_v36, %v13054_v59  ;;  %v1299_v11 = vsel %vm518_vm3, %v1293_v32, %v9112_v40  ;;  %v1367_v55 = vmul.f32 %v1347_v24, %v13055_v61  ;;  %v13063_v9 = vld [vmem:[#allocation29_spill] sm:$0xff]  ;;  %v13064_v35 = vld [vmem:[#allocation30_spill] sm:$0xff]  ;;  %v13068_v33 = vld [vmem:[#allocation47_spill] sm:$0xff] }
 0x294   : > { %7732 = vmatpush1.msk.msra.mxu0 %vm236_vm0, %v13009_v56  ;;  %1717 = vmatprep.mubr.f32.mxu0 %v13006_v46  ;;  %v1369_v32 = vmul.f32 %v1353_v34, %v8620_v48  ;;  %v1368_v42 = vmul.f32 %v1346_v6, %v13056_v45  ;;  %v1319_v54 = vmul.f32 %v1299_v11, %v13058_v26  ;;  %v13070_v6 = vld [vmem:[#allocation34_spill] sm:$0xff] }
 0x295   : > { %1667 = vmatprep.subr.mxu0 %v1415_v21  ;;  %v1297_v44 = vpop.permute.xlu0 %1296  ;;  %1738 = vmatprep.subr.mxu1 %v1417_v49  ;;  %v1189_v19 = vpop.permute.xlu1 %1188  ;;  %v1197_v24 = vsel %vm412_vm5, %v8991_v4, %v9043_v53  ;;  %v13071_v49 = vld [vmem:[#allocation38_spill] sm:$0xff] }
 0x296   : > { %v1298_v2 = vsel %vm518_vm3, %v9112_v40, %v1297_v44  ;;  %v1305_v63 = vsel %vm518_vm3, %v1297_v44, %v8925_v10  ;;  %1668 = vmatpush1.msra.mxu0 %v1414_v27  ;;  %1739 = vmatpush1.msra.mxu1 %v1416_v8  ;;  %v1270_v40 = vmul.f32 %v1252_v18, %v13061_v5 }
 0x297   : > { %v1320_v51 = vmul.f32 %v1298_v2, %v13057_v25  ;;  %1669 = vmatprep.subr.mxu0 %v1367_v55  ;;  %1740 = vmatprep.subr.mxu1 %v1369_v32  ;;  %v1321_v48 = vmul.f32 %v1305_v63, %v13059_v22  ;;  %v1196_v37 = vsel %vm412_vm5, %v9043_v53, %v1189_v19  ;;  %v13066_v53 = vld [vmem:[#allocation32_spill] sm:$0xff]  ;;  %v13075_v2 = vld [vmem:[#allocation35_spill] sm:$0xff] }
 0x298   : > { %1670 = vmatpush1.msra.mxu0 %v1366_v28  ;;  %1741 = vmatpush1.msra.mxu1 %v1368_v42  ;;  %v1215_v21 = vmul.f32 %v1196_v37, %v13066_v53  ;;  %v1214_v28 = vmul.f32 %v1197_v24, %v13067_v23  ;;  %v13073_v55 = vld [vmem:[#allocation48_spill] sm:$0xff]  ;;  %v13082_v37 = vld [vmem:[#allocation43_spill] sm:$0xff] }
 0x299   : > { %1671 = vmatprep.subr.mxu0 %v1319_v54  ;;  %v1141_v38 = vpop.permute.xlu0 %1140  ;;  %1742 = vmatprep.subr.mxu1 %v1321_v48  ;;  %v1249_v10 = vpop.permute.xlu1 %1248  ;;  %v13078_v54 = vld [vmem:[#allocation41_spill] sm:$0xff] }
 0x29a   : > { %1672 = vmatpush1.msra.mxu0 %v1318_v13  ;;  %v1250_v31 = vsel %vm469_vm4, %v9121_v30, %v1249_v10  ;;  %v1257_v27 = vsel %vm469_vm4, %v1249_v10, %v8941_v0  ;;  %1743 = vmatpush1.msra.mxu1 %v1320_v51  ;;  %v1148_v34 = vsel %vm363_vm6, %v9132_v14, %v1141_v38  ;;  %v13065_v30 = vld [vmem:[#allocation50_spill] sm:$0xff]  ;;  %v13077_v51 = vld [vmem:[#allocation36_spill] sm:$0xff] }
 0x29b   : > { %v1272_v57 = vmul.f32 %v1250_v31, %v13063_v9  ;;  %1673 = vmatprep.subr.mxu0 %v1271_v60  ;;  %v1273_v36 = vmul.f32 %v1257_v27, %v13064_v35  ;;  %v1149_v0 = vsel %vm363_vm6, %v9000_v39, %v9132_v14  ;;  %v1101_v39 = vsel %vm314_vm7, %v9004_v62, %v9062_v17  ;;  %v13069_v14 = vld [vmem:[#allocation49_spill] sm:$0xff]  ;;  %v13074_v62 = vld [vmem:[#allocation40_spill] sm:$0xff]  ;;  %v13084_v35 = vld [vmem:[#allocation46_spill] sm:$0xff] }
 0x29c   : > { %1674 = vmatpush1.msra.mxu0 %v1270_v40  ;;  %v1167_v59 = vmul.f32 %v1148_v34, %v13070_v6  ;;  %v1166_v61 = vmul.f32 %v1149_v0, %v13072_v41  ;;  %v13079_v40 = vld [vmem:[#allocation37_spill] sm:$0xff] }
 0x29d   : > { %1675 = vmatprep.subr.mxu0 %v13065_v30  ;;  %v1043_v16 = vpop.permute.xlu0 %1042  ;;  %1744 = vmatprep.subr.mxu1 %v1273_v36  ;;  %v1093_v4 = vpop.permute.xlu1 %1092  ;;  %v13083_v9 = vld [vmem:[#allocation45_spill] sm:$0xff] }
 0x29e   : > { %1676 = vmatpush1.msra.mxu0 %v13068_v33  ;;  %v1100_v8 = vsel %vm314_vm7, %v9062_v17, %v1093_v4  ;;  %1745 = vmatpush1.msra.mxu1 %v1272_v57  ;;  %v1053_v50 = vsel %vm265_vm8, %v9006_v20, %v1043_v16  ;;  %v1118_v17 = vmul.f32 %v1101_v39, %v13074_v62  ;;  %v13076_v20 = vld [vmem:[#allocation42_spill] sm:$0xff] }
 0x29f   : > { %1677 = vmatprep.subr.mxu0 %v1215_v21  ;;  %1746 = vmatprep.subr.mxu1 %v13069_v14  ;;  %v1119_v11 = vmul.f32 %v1100_v8, %v13071_v49  ;;  %v1070_v22 = vmul.f32 %v1053_v50, %v13078_v54 }
 0x2a0   : > { %1678 = vmatpush1.msra.mxu0 %v1214_v28  ;;  %1747 = vmatpush1.msra.mxu1 %v13073_v55 }
 0x2a1   : > { %1679 = vmatprep.subr.mxu0 %v1167_v59  ;;  %v1191_v18 = vpop.permute.xlu0 %1190  ;;  %v1045_v44 = vpop.permute.xlu1 %1044 }
 0x2a2   : > { %v1194_v32 = vsel %vm412_vm5, %v1191_v18, %v9088_v43  ;;  %v1195_v45 = vsel %vm412_vm5, %v1189_v19, %v1191_v18  ;;  %1680 = vmatpush1.msra.mxu0 %v1166_v61  ;;  %v1052_v42 = vsel %vm265_vm8, %v1043_v16, %v1045_v44 }
 0x2a3   : > { %v1216_v63 = vmul.f32 %v1195_v45, %v13075_v2  ;;  %1681 = vmatprep.subr.mxu0 %v1119_v11  ;;  %v1071_v25 = vmul.f32 %v1052_v42, %v13076_v20  ;;  %v1217_v26 = vmul.f32 %v1194_v32, %v13077_v51 }
 0x2a4   : > { %1682 = vmatpush1.msra.mxu0 %v1118_v17 }
 0x2a5   : > { %v1095_v48 = vpop.permute.xlu0 %1094  ;;  %1683 = vmatprep.subr.mxu0 %v1071_v25  ;;  %1748 = vmatprep.subr.mxu1 %v1217_v26  ;;  %v1143_v43 = vpop.permute.xlu1 %1142 }
 0x2a6   : > { %v1098_v19 = vsel %vm314_vm7, %v1095_v48, %v9110_v15  ;;  %v1146_v58 = vsel %vm363_vm6, %v1143_v43, %v9138_v52  ;;  %v1147_v13 = vsel %vm363_vm6, %v1141_v38, %v1143_v43  ;;  %1684 = vmatpush1.msra.mxu0 %v1070_v22  ;;  %v1099_v5 = vsel %vm314_vm7, %v1093_v4, %v1095_v48  ;;  %v13081_v52 = vld [vmem:[#allocation44_spill] sm:$0xff] }
 0x2a7   : > { %v1168_v10 = vmul.f32 %v1147_v13, %v13079_v40  ;;  %1749 = vmatpush1.msra.mxu1 %v1216_v63  ;;  %v1169_v60 = vmul.f32 %v1146_v58, %v13080_v29  ;;  %7679 = vmatmul.mubr.msk.f32.vlgmr.msra.gmra.mxu0 %vm730_vm9, %v9119_v3  ;;  %v1121_v38 = vmul.f32 %v1098_v19, %v13081_v52  ;;  %v2180_v19 = vld [vmem:[#allocation3 + $0x208] sm:$0xff]  ;;  %v2179_v58 = vld [vmem:[#allocation3 + $0x200] sm:$0xff] }
 0x2a8   : > { %7735 = vmatprep.subr.msk.mxu0 %vm236_vm0, %v13009_v56  ;;  %v1120_v31 = vmul.f32 %v1099_v5, %v13082_v37  ;;  %2352 = vmatprep.mubr.f32.mxu0 %v13006_v46 }
 0x2a9   : > { %1750 = vmatprep.subr.mxu1 %v1169_v60  ;;  %v1047_v15 = vpop.permute.xlu1 %1046  ;;  %7736 = vmatpush1.msk.msra.mxu0 %vm236_vm0, %v13009_v56  ;;  %v2132_v60 = vld [vmem:[#allocation3 + $0x1c8] sm:$0xff] }
 0x2aa   : > { %v1050_v27 = vsel %vm265_vm8, %v1047_v15, %v9155_v7  ;;  %v1051_v24 = vsel %vm265_vm8, %v1045_v44, %v1047_v15  ;;  %1751 = vmatpush1.msra.mxu1 %v1168_v10  ;;  %v2131_v15 = vld [vmem:[#allocation3 + $0x1c0] sm:$0xff] }
 0x2ab   : > { %v1072_v57 = vmul.f32 %v1051_v24, %v13083_v9  ;;  %1752 = vmatprep.subr.mxu1 %v1121_v38  ;;  %v1073_v36 = vmul.f32 %v1050_v27, %v13084_v35  ;;  %v2083_v27 = vld [vmem:[#allocation3 + $0x180] sm:$0xff] }
 0x2ac   : > { %1753 = vmatpush1.msra.mxu1 %v1120_v31  ;;  %v2084_v31 = vld [vmem:[#allocation3 + $0x188] sm:$0xff] }
 0x2ad   : > { %1754 = vmatprep.subr.mxu1 %v1073_v36 }
 0x2ae   : > { %1755 = vmatpush1.msra.mxu1 %v1072_v57 }
 0x2af   : > { %7680 = vmatmul.mubr.msk.f32.vlgmr.msra.gmra.mxu1 %vm730_vm9, %v9119_v3  ;;  %7737 = vmatprep.subr.msk.mxu1 %vm236_vm0, %v13009_v56 }
 0x2b0   : > { %7738 = vmatpush1.msk.msra.mxu1 %vm236_vm0, %v13009_v56  ;;  %2423 = vmatprep.mubr.f32.mxu1 %v13006_v46 }
 0x341   : > { %v1648_v4 = vpop.f32.mrf.mxu1 }
 0x342   : > { %v1797_v53 = vmul.f32 0.1, %v1648_v4 }
 0x343   : > { %v1650_v23 = vpop.f32.mrf.mxu1 }
 0x344   : > { %v9356_v21 = vmax.f32 %v1648_v4, %v1797_v53  ;;  %v1798_v28 = vmul.f32 0.1, %v1650_v23 }
 0x346   : > { %v9374_v33 = vmax.f32 %v1650_v23, %v1798_v28 }
 0x352   : > { %v1577_v7 = vpop.f32.mrf.mxu0 }
 0x353   : > { %v1795_v34 = vmul.f32 0.1, %v1577_v7 }
 0x354   : > { %v1579_v3 = vpop.f32.mrf.mxu0 }
 0x355   : > { %v9320_v0 = vmax.f32 %v1577_v7, %v1795_v34  ;;  %v1796_v30 = vmul.f32 0.1, %v1579_v3 }
 0x357   : > { %2107 = vrot.lane.b32.xlu1 %v9320_v0, %s8063_s12  ;;  %2155 = vrot.lane.b32.xlu0 %v9320_v0, %s8062_s11  ;;  %v9338_v16 = vmax.f32 %v1579_v3, %v1796_v30  ;;  %v2036_v3 = vld [vmem:[#allocation3 + $0x148] sm:$0xff]  ;;  %v2035_v30 = vld [vmem:[#allocation3 + $0x140] sm:$0xff] }
 0x35b   : > { %2011 = vrot.lane.b32.xlu1 %v9320_v0, %s8065_s14  ;;  %2059 = vrot.lane.b32.xlu0 %v9320_v0, %s8064_s13 }
 0x35f   : > { %1907 = vrot.lane.b32.xlu1 %v9320_v0, %s8067_s17  ;;  %1955 = vrot.lane.b32.xlu0 %v9320_v0, %s8066_s16 }
 0x363   : > { %1811 = vrot.lane.b32.xlu1 %v9320_v0, %s8070_s20  ;;  %1859 = vrot.lane.b32.xlu0 %v9320_v0, %s8068_s19 }
 0x367   : > { %2109 = vrot.lane.b32.xlu1 %v9338_v16, %s8063_s12  ;;  %2157 = vrot.lane.b32.xlu0 %v9338_v16, %s8062_s11  ;;  %v1719_v8 = vpop.f32.mrf.mxu0 }
 0x368   : > { %v1799_v39 = vmul.f32 0.1, %v1719_v8 }
 0x369   : > { %v1721_v6 = vpop.f32.mrf.mxu0 }
 0x36a   : > { %v9392_v14 = vmax.f32 %v1719_v8, %v1799_v39  ;;  %v1800_v59 = vmul.f32 0.1, %v1721_v6 }
 0x36b   : > { %2013 = vrot.lane.b32.xlu1 %v9338_v16, %s8065_s14  ;;  %2061 = vrot.lane.b32.xlu0 %v9338_v16, %s8064_s13 }
 0x36c   : > { %v9402_v49 = vmax.f32 %v1721_v6, %v1800_v59 }
 0x36f   : > { %1957 = vrot.lane.b32.xlu1 %v9338_v16, %s8066_s16  ;;  %1909 = vrot.lane.b32.xlu0 %v9338_v16, %s8067_s17  ;;  %v1790_v11 = vpop.f32.mrf.mxu1 }
 0x370   : > { %v1801_v41 = vmul.f32 0.1, %v1790_v11 }
 0x371   : > { %v1792_v55 = vpop.f32.mrf.mxu1 }
 0x372   : > { %v9412_v61 = vmax.f32 %v1790_v11, %v1801_v41  ;;  %v1802_v50 = vmul.f32 0.1, %v1792_v55  ;;  %v1980_v11 = vld [vmem:[#allocation3 + $0xc8] sm:$0xff] }
 0x373   : > { %1861 = vrot.lane.b32.xlu1 %v9338_v16, %s8068_s19  ;;  %1813 = vrot.lane.b32.xlu0 %v9338_v16, %s8070_s20 }
 0x374   : > { %v9430_v18 = vmax.f32 %v1792_v55, %v1802_v50 }
 0x377   : > { %2159 = vrot.lane.b32.xlu1 %v9356_v21, %s8062_s11  ;;  %2111 = vrot.lane.b32.xlu0 %v9356_v21, %s8063_s12 }
 0x37b   : > { %2063 = vrot.lane.b32.xlu1 %v9356_v21, %s8064_s13  ;;  %2015 = vrot.lane.b32.xlu0 %v9356_v21, %s8065_s14 }
 0x37f   : > { %1959 = vrot.lane.b32.xlu1 %v9356_v21, %s8066_s16  ;;  %1911 = vrot.lane.b32.xlu0 %v9356_v21, %s8067_s17 }
 0x383   : > { %1863 = vrot.lane.b32.xlu1 %v9356_v21, %s8068_s19  ;;  %1815 = vrot.lane.b32.xlu0 %v9356_v21, %s8070_s20 }
 0x387   : > { %2161 = vrot.lane.b32.xlu1 %v9374_v33, %s8062_s11  ;;  %2113 = vrot.lane.b32.xlu0 %v9374_v33, %s8063_s12 }
 0x38b   : > { %2065 = vrot.lane.b32.xlu1 %v9374_v33, %s8064_s13  ;;  %2017 = vrot.lane.b32.xlu0 %v9374_v33, %s8065_s14 }
 0x38f   : > { %1913 = vrot.lane.b32.xlu1 %v9374_v33, %s8067_s17  ;;  %1961 = vrot.lane.b32.xlu0 %v9374_v33, %s8066_s16 }
 0x393   : > { %1817 = vrot.lane.b32.xlu1 %v9374_v33, %s8070_s20  ;;  %1865 = vrot.lane.b32.xlu0 %v9374_v33, %s8068_s19 }
 0x397   : > { %2115 = vrot.lane.b32.xlu1 %v9392_v14, %s8063_s12  ;;  %2163 = vrot.lane.b32.xlu0 %v9392_v14, %s8062_s11 }
 0x39b   : > { %2019 = vrot.lane.b32.xlu1 %v9392_v14, %s8065_s14  ;;  %2067 = vrot.lane.b32.xlu0 %v9392_v14, %s8064_s13 }
 0x39f   : > { %1963 = vrot.lane.b32.xlu0 %v9392_v14, %s8066_s16  ;;  %2069 = vrot.lane.b32.xlu1 %v9402_v49, %s8064_s13 }
 0x3a3   : > { %1915 = vrot.lane.b32.xlu0 %v9392_v14, %s8067_s17  ;;  %1965 = vrot.lane.b32.xlu1 %v9402_v49, %s8066_s16 }
 0x3a7   : > { %1917 = vrot.lane.b32.xlu1 %v9402_v49, %s8067_s17  ;;  %2165 = vrot.lane.b32.xlu0 %v9402_v49, %s8062_s11 }
 0x3ab   : > { %2117 = vrot.lane.b32.xlu0 %v9402_v49, %s8063_s12  ;;  %2167 = vrot.lane.b32.xlu1 %v9412_v61, %s8062_s11 }
 0x3af   : > { %2021 = vrot.lane.b32.xlu0 %v9402_v49, %s8065_s14  ;;  %2119 = vrot.lane.b32.xlu1 %v9412_v61, %s8063_s12 }
 0x3b3   : > { %2071 = vrot.lane.b32.xlu0 %v9412_v61, %s8064_s13  ;;  %2023 = vrot.lane.b32.xlu1 %v9412_v61, %s8065_s14 }
 0x3b7   : > { %1921 = vrot.lane.b32.xlu1 %v9430_v18, %s8067_s17  ;;  %1969 = vrot.lane.b32.xlu0 %v9430_v18, %s8066_s16 }
 0x3bb   : > { %1825 = vrot.lane.b32.xlu1 %v9430_v18, %s8070_s20  ;;  %1873 = vrot.lane.b32.xlu0 %v9430_v18, %s8068_s19 }
 0x3bf   : > { %1867 = vrot.lane.b32.xlu1 %v9392_v14, %s8068_s19  ;;  %1967 = vrot.lane.b32.xlu0 %v9412_v61, %s8066_s16  ;;  %s8079_s16 = smov 64  }
 0x3c3   : > { %2121 = vrot.lane.b32.xlu1 %v9430_v18, %s8063_s12  ;;  %2169 = vrot.lane.b32.xlu0 %v9430_v18, %s8062_s11 }
 0x3c7   : > { %2025 = vrot.lane.b32.xlu1 %v9430_v18, %s8065_s14  ;;  %2073 = vrot.lane.b32.xlu0 %v9430_v18, %s8064_s13 }
 0x3c9   : > { %v9452_v44 = vpop.permute.xlu0 %2155  ;;  %v9454_v62 = vpop.permute.xlu1 %2107 }
 0x3cb   : > { %1919 = vrot.lane.b32.xlu1 %v9412_v61, %s8067_s17  ;;  %1869 = vrot.lane.b32.xlu0 %v9402_v49, %s8068_s19  ;;  %s8080_s17 = smov 60  }
 0x3cd   : > { %v9460_v17 = vpop.permute.xlu0 %2059  ;;  %v9462_v32 = vpop.permute.xlu1 %2011 }
 0x3cf   : > { %1821 = vrot.lane.b32.xlu1 %v9402_v49, %s8070_s20  ;;  %1819 = vrot.lane.b32.xlu0 %v9392_v14, %s8070_s20 }
 0x3d1   : > { %v9468_v45 = vpop.permute.xlu0 %1955  ;;  %v9470_v42 = vpop.permute.xlu1 %1907 }
 0x3d3   : > { %1823 = vrot.lane.b32.xlu1 %v9412_v61, %s8070_s20  ;;  %1871 = vrot.lane.b32.xlu0 %v9412_v61, %s8068_s19  ;;  %s8081_s19 = smov 124   ;;  %s8082_s20 = smov 68  }
 0x3d5   : > { %v9476_v2 = vpop.permute.xlu0 %1859  ;;  %v9478_v63 = vpop.permute.xlu1 %1811 }
 0x3d9   : > { %v2158_v20 = vpop.permute.xlu0 %2157  ;;  %v2110_v25 = vpop.permute.xlu1 %2109 }
 0x3da   : > { %v2177_v13 = vsel %vm616_vm1, %v9452_v44, %v2158_v20  ;;  %v2129_v52 = vsel %vm567_vm2, %v9454_v62, %v2110_v25 }
 0x3db   : > { %v2187_v37 = vmul.f32 %v2179_v58, %v2177_v13  ;;  %v2139_v36 = vmul.f32 %v2131_v15, %v2129_v52 }
 0x3dd   : > { %v2062_v51 = vpop.permute.xlu0 %2061  ;;  %v2014_v26 = vpop.permute.xlu1 %2013 }
 0x3de   : > { %v2081_v24 = vsel %vm518_vm3, %v9460_v17, %v2062_v51  ;;  %v2033_v4 = vsel %vm469_vm4, %v9462_v32, %v2014_v26 }
 0x3df   : > { %v2091_v23 = vmul.f32 %v2083_v27, %v2081_v24  ;;  %v2043_v6 = vmul.f32 %v2035_v30, %v2033_v4  ;;  %v2086_v24 = vld [vmem:[#allocation3 + $0x198] sm:$0xff] }
 0x3e1   : > { %v9480_v54 = vpop.permute.xlu0 %1909  ;;  %v9482_v22 = vpop.permute.xlu1 %1957 }
 0x3e2   : > { %v1977_v59 = vsel %vm412_vm5, %v9468_v45, %v9482_v22 }
 0x3e3   : > { %v1988_v50 = vmul.f32 %v1980_v11, %v1977_v59 }
 0x3e5   : > { %v9484_v48 = vpop.permute.xlu0 %1813  ;;  %v9486_v43 = vpop.permute.xlu1 %1861 }
 0x3e9   : > { %v2112_v5 = vpop.permute.xlu0 %2111  ;;  %v2160_v40 = vpop.permute.xlu1 %2159 }
 0x3ea   : > { %v2128_v10 = vsel %vm567_vm2, %v2110_v25, %v2112_v5  ;;  %v2176_v29 = vsel %vm616_vm1, %v2158_v20, %v2160_v40 }
 0x3eb   : > { %v2188_v38 = vmul.f32 %v2180_v19, %v2176_v29  ;;  %v2140_v35 = vmul.f32 %v2132_v60, %v2128_v10  ;;  %v2181_v29 = vld [vmem:[#allocation3 + $0x210] sm:$0xff] }
 0x3ed   : > { %v9501_v9 = vpop.permute.xlu0 %2015  ;;  %2302 = vmatprep.subr.mxu0 %v2188_v38  ;;  %v2064_v57 = vpop.permute.xlu1 %2063  ;;  %v2134_v38 = vld [vmem:[#allocation3 + $0x1d8] sm:$0xff] }
 0x3ee   : > { %v2032_v7 = vsel %vm469_vm4, %v2014_v26, %v9501_v9  ;;  %v2080_v34 = vsel %vm518_vm3, %v2062_v51, %v2064_v57  ;;  %2303 = vmatpush1.msra.mxu0 %v2187_v37  ;;  %v2133_v37 = vld [vmem:[#allocation3 + $0x1d0] sm:$0xff] }
 0x3ef   : > { %2304 = vmatprep.subr.mxu0 %v2140_v35  ;;  %v2092_v53 = vmul.f32 %v2084_v31, %v2080_v34  ;;  %v2044_v39 = vmul.f32 %v2036_v3, %v2032_v7  ;;  %v2085_v35 = vld [vmem:[#allocation3 + $0x190] sm:$0xff] }
 0x3f0   : > { %2305 = vmatpush1.msra.mxu0 %v2139_v36 }
 0x3f1   : > { %v9511_v28 = vpop.permute.xlu0 %1911  ;;  %2306 = vmatprep.subr.mxu0 %v2092_v53  ;;  %v1960_v8 = vpop.permute.xlu1 %1959  ;;  %v2037_v53 = vld [vmem:[#allocation3 + $0x150] sm:$0xff] }
 0x3f2   : > { %2307 = vmatpush1.msra.mxu0 %v2091_v23 }
 0x3f3   : > { %2308 = vmatprep.subr.mxu0 %v2044_v39 }
 0x3f4   : > { %2309 = vmatpush1.msra.mxu0 %v2043_v6 }
 0x3f5   : > { %v9517_v41 = vpop.permute.xlu0 %1815  ;;  %2310 = vmatprep.subr.mxu0 %v9338_v16  ;;  %v9520_v55 = vpop.permute.xlu1 %1863 }
 0x3f6   : > { %2311 = vmatpush1.msra.mxu0 %v9320_v0 }
 0x3f7   : > { %2312 = vmatprep.subr.mxu0 %v1988_v50 }
 0x3f9   : > { %v2114_v20 = vpop.permute.xlu0 %2113  ;;  %v2162_v25 = vpop.permute.xlu1 %2161 }
 0x3fa   : > { %v2175_v16 = vsel %vm616_vm1, %v2160_v40, %v2162_v25  ;;  %v2127_v31 = vsel %vm567_vm2, %v2112_v5, %v2114_v20  ;;  %v2038_v5 = vld [vmem:[#allocation3 + $0x158] sm:$0xff] }
 0x3fb   : > { %v2189_v40 = vmul.f32 %v2181_v29, %v2175_v16  ;;  %v2141_v30 = vmul.f32 %v2133_v37, %v2127_v31  ;;  %v1934_v29 = vld [vmem:[#allocation3 + $0x98] sm:$0xff]  ;;  %v1933_v16 = vld [vmem:[#allocation3 + $0x90] sm:$0xff] }
 0x3fc   : > { %v1886_v31 = vld [vmem:[#allocation3 + $0x58] sm:$0xff] }
 0x3fd   : > { %v2018_v51 = vpop.permute.xlu0 %2017  ;;  %v2066_v26 = vpop.permute.xlu1 %2065 }
 0x3fe   : > { %v2079_v36 = vsel %vm518_vm3, %v2064_v57, %v2066_v26  ;;  %v2031_v57 = vsel %vm469_vm4, %v9501_v9, %v2018_v51  ;;  %v1976_v9 = vsel %vm412_vm5, %v9482_v22, %v1960_v8 }
 0x3ff   : > { %v2093_v39 = vmul.f32 %v2085_v35, %v2079_v36  ;;  %v2045_v50 = vmul.f32 %v2037_v53, %v2031_v57  ;;  %v1838_v35 = vld [vmem:[#allocation3 + $0x18] sm:$0xff]  ;;  %v1837_v36 = vld [vmem:[#allocation3 + $0x10] sm:$0xff] }
 0x401   : > { %v9523_v19 = vpop.permute.xlu0 %1961  ;;  %v9525_v58 = vpop.permute.xlu1 %1913 }
 0x405   : > { %v9527_v13 = vpop.permute.xlu0 %1865  ;;  %v9529_v10 = vpop.permute.xlu1 %1817 }
 0x406   : > { %v1879_v37 = vsel %vm314_vm7, %v9520_v55, %v9527_v13 }
 0x409   : > { %v9533_v60 = vpop.permute.xlu0 %2163  ;;  %v9535_v0 = vpop.permute.xlu1 %2115 }
 0x40a   : > { %v2174_v15 = vsel %vm616_vm1, %v2162_v25, %v9533_v60  ;;  %v2126_v52 = vsel %vm567_vm2, %v2114_v20, %v9535_v0  ;;  %v1975_v20 = vsel %vm412_vm5, %v1960_v8, %v9523_v19  ;;  %v1982_v25 = vld [vmem:[#allocation3 + $0xd8] sm:$0xff] }
 0x40b   : > { %v2190_v27 = vmul.f32 %v2174_v15, %v9008_v47  ;;  %v2142_v3 = vmul.f32 %v2134_v38, %v2126_v52  ;;  %v1928_v15 = vsel %vm363_vm6, %v9480_v54, %v9511_v28  ;;  %v1990_v22 = vmul.f32 %v1982_v25, %v1975_v20  ;;  %v1979_v20 = vld [vmem:[#allocation3 + $0xc0] sm:$0xff] }
 0x40c   : > { %v1929_v25 = vsel %vm363_vm6, %v9470_v42, %v9480_v54  ;;  %v1881_v54 = vsel %vm314_vm7, %v9476_v2, %v9486_v43 }
 0x40d   : > { %v9548_v7 = vpop.permute.xlu0 %2067  ;;  %2373 = vmatprep.subr.mxu1 %v2190_v27  ;;  %v9550_v34 = vpop.permute.xlu1 %2019  ;;  %v1885_v27 = vld [vmem:[#allocation3 + $0x50] sm:$0xff] }
 0x40e   : > { %v2078_v4 = vsel %vm518_vm3, %v2066_v26, %v9548_v7  ;;  %v2030_v47 = vsel %vm469_vm4, %v2018_v51, %v9550_v34  ;;  %2374 = vmatpush1.msra.mxu1 %v2189_v40  ;;  %v1981_v26 = vld [vmem:[#allocation3 + $0xd0] sm:$0xff]  ;;  %v1927_v51 = vsel %vm363_vm6, %v9511_v28, %v9525_v58  ;;  %v1880_v28 = vsel %vm314_vm7, %v9486_v43, %v9520_v55 }
 0x40f   : > { %2375 = vmatprep.subr.mxu1 %v2142_v3  ;;  %v2094_v23 = vmul.f32 %v2086_v24, %v2078_v4  ;;  %v2046_v11 = vmul.f32 %v2038_v5, %v2030_v47  ;;  %v1989_v8 = vmul.f32 %v1981_v26, %v1976_v9  ;;  %v1941_v40 = vmul.f32 %v1933_v16, %v1928_v15  ;;  %v1931_v16 = vld [vmem:[#allocation3 + $0x80] sm:$0xff] }
 0x410   : > { %2376 = vmatpush1.msra.mxu1 %v2141_v30  ;;  %v1831_v24 = vsel %vm265_vm8, %v9517_v41, %v9529_v10  ;;  %v1894_v55 = vmul.f32 %v1886_v31, %v1879_v37  ;;  %v1893_v4 = vmul.f32 %v1885_v27, %v1880_v28  ;;  %v1883_v37 = vld [vmem:[#allocation3 + $0x40] sm:$0xff] }
 0x411   : > { %v9561_v6 = vpop.permute.xlu0 %1963  ;;  %2377 = vmatprep.subr.mxu1 %v2094_v23  ;;  %v9563_v59 = vpop.permute.xlu1 %2069  ;;  %v1846_v47 = vmul.f32 %v1838_v35, %v1831_v24 }
 0x412   : > { %2378 = vmatpush1.msra.mxu1 %v2093_v39 }
 0x413   : > { %2379 = vmatprep.subr.mxu1 %v2046_v11 }
 0x414   : > { %2380 = vmatpush1.msra.mxu1 %v2045_v50 }
 0x415   : > { %v9579_v52 = vpop.permute.xlu0 %1915  ;;  %2381 = vmatprep.subr.mxu1 %v9374_v33  ;;  %v9582_v38 = vpop.permute.xlu1 %1965  ;;  %v1942_v33 = vmul.f32 %v1934_v29, %v1927_v51  ;;  %v1932_v51 = vld [vmem:[#allocation3 + $0x88] sm:$0xff] }
 0x416   : > { %2382 = vmatpush1.msra.mxu1 %v9356_v21  ;;  %v1832_v21 = vsel %vm265_vm8, %v9484_v48, %v9517_v41  ;;  %v9608_v41 = vld [vmem:[%s12871_s1 + $0x10] sm:$0xff]  ;;  %v1940_v31 = vmul.f32 %v1932_v51, %v1929_v25  ;;  %v2136_v51 = vld [vmem:[#allocation3 + $0x1e8] sm:$0xff] }
 0x417   : > { %2383 = vmatprep.subr.mxu1 %v1990_v22  ;;  %v1845_v5 = vmul.f32 %v1837_v36, %v1832_v21  ;;  %v2183_v21 = vld [vmem:[#allocation3 + $0x220] sm:$0xff] }
 0x418   : > { %2384 = vmatpush1.msra.mxu1 %v1989_v8  ;;  %v1884_v8 = vld [vmem:[#allocation3 + $0x48] sm:$0xff] }
 0x419   : > { %v2166_v3 = vpop.permute.xlu0 %2165  ;;  %2385 = vmatprep.subr.mxu1 %v1942_v33  ;;  %v9601_v30 = vpop.permute.xlu1 %1917 }
 0x41a   : > { %2386 = vmatpush1.msra.mxu1 %v1941_v40  ;;  %v1835_v40 = vld [vmem:[#allocation3] sm:$0xff] }
 0x41b   : > { %2387 = vmatprep.subr.mxu1 %v1894_v55  ;;  %v2173_v55 = vsel %vm616_vm1, %v9533_v60, %v2166_v3 }
 0x41c   : > { %2388 = vmatpush1.msra.mxu1 %v1893_v4 }
 0x41d   : > { %v2118_v53 = vpop.permute.xlu0 %2117  ;;  %2389 = vmatprep.subr.mxu1 %v1846_v47  ;;  %v9603_v57 = vpop.permute.xlu1 %2167 }
 0x41e   : > { %2390 = vmatpush1.msra.mxu1 %v1845_v5  ;;  %v2184_v5 = vld [vmem:[#allocation3 + $0x228] sm:$0xff]  ;;  %v2125_v25 = vsel %vm567_vm2, %v9535_v0, %v2118_v53  ;;  %v2185_v0 = vld [vmem:[#allocation3 + $0x230] sm:$0xff] }
 0x41f   : > { %7683 = vmatmul.mubr.msk.f32.vlgmr.msra.gmra.mxu1 %vm730_vm9, %v9608_v41  ;;  %7741 = vmatprep.subr.msk.mxu1 %vm236_vm0, %v13009_v56 }
 0x420   : > { %7742 = vmatpush1.msk.msra.mxu1 %vm236_vm0, %v13009_v56  ;;  %2565 = vmatprep.mubr.f32.mxu1 %v13006_v46 }
 0x421   : > { %v9619_v23 = vpop.permute.xlu0 %2021  ;;  %v9621_v39 = vpop.permute.xlu1 %2119 }
 0x422   : > { %v2124_v60 = vsel %vm567_vm2, %v2118_v53, %v9621_v39 }
 0x425   : > { %v9623_v11 = vpop.permute.xlu0 %2071  ;;  %v9625_v50 = vpop.permute.xlu1 %2023 }
 0x429   : > { %v9631_v26 = vpop.permute.xlu0 %1969  ;;  %v9633_v9 = vpop.permute.xlu1 %1921 }
 0x42a   : > { %v1978_v29 = vsel %vm412_vm5, %v9631_v26, %v9468_v45  ;;  %v1930_v15 = vsel %vm363_vm6, %v9633_v9, %v9470_v42  ;;  %v1833_v45 = vsel %vm265_vm8, %v9478_v63, %v9484_v48  ;;  %v1836_v42 = vld [vmem:[#allocation3 + $0x8] sm:$0xff]  ;;  %v1892_v48 = vmul.f32 %v1884_v8, %v1881_v54  ;;  %v2087_v54 = vld [vmem:[#allocation3 + $0x1a0] sm:$0xff] }
 0x42b   : > { %v1987_v22 = vmul.f32 %v1979_v20, %v1978_v29  ;;  %v1939_v27 = vmul.f32 %v1931_v16, %v1930_v15  ;;  %v1844_v36 = vmul.f32 %v1836_v42, %v1833_v45  ;;  %v2135_v20 = vld [vmem:[#allocation3 + $0x1e0] sm:$0xff]  ;;  %v2191_v29 = vmul.f32 %v2183_v21, %v2173_v55  ;;  %v2186_v15 = vld [vmem:[#allocation3 + $0x238] sm:$0xff]  ;;  %v2089_v21 = vld [vmem:[#allocation3 + $0x1b0] sm:$0xff] }
 0x42c   : > { %v2143_v53 = vmul.f32 %v2135_v20, %v2125_v25  ;;  %v2039_v45 = vld [vmem:[#allocation3 + $0x160] sm:$0xff]  ;;  %v2144_v42 = vmul.f32 %v2136_v51, %v2124_v60  ;;  %v2090_v55 = vld [vmem:[#allocation3 + $0x1b8] sm:$0xff] }
 0x42d   : > { %v9651_v28 = vpop.permute.xlu0 %1873  ;;  %2313 = vmatpush1.msra.mxu0 %v1987_v22  ;;  %v9653_v33 = vpop.permute.xlu1 %1825  ;;  %v2029_v22 = vsel %vm469_vm4, %v9550_v34, %v9619_v23  ;;  %v2028_v34 = vsel %vm469_vm4, %v9619_v23, %v9625_v50 }
 0x42e   : > { %v1882_v43 = vsel %vm314_vm7, %v9651_v28, %v9476_v2  ;;  %v1834_v24 = vsel %vm265_vm8, %v9653_v33, %v9478_v63  ;;  %2314 = vmatprep.subr.mxu0 %v1940_v31  ;;  %v2172_v2 = vsel %vm616_vm1, %v2166_v3, %v9603_v57  ;;  %v2077_v3 = vsel %vm518_vm3, %v9548_v7, %v9563_v59  ;;  %v2088_v31 = vld [vmem:[#allocation3 + $0x1a8] sm:$0xff] }
 0x42f   : > { %v1891_v35 = vmul.f32 %v1883_v37, %v1882_v43  ;;  %2315 = vmatpush1.msra.mxu0 %v1939_v27  ;;  %v1843_v4 = vmul.f32 %v1835_v40, %v1834_v24  ;;  %v2192_v16 = vmul.f32 %v2184_v5, %v2172_v2  ;;  %v2076_v7 = vsel %vm518_vm3, %v9563_v59, %v9623_v11  ;;  %v2040_v43 = vld [vmem:[#allocation3 + $0x168] sm:$0xff]  ;;  %v2137_v24 = vld [vmem:[#allocation3 + $0x1f0] sm:$0xff] }
 0x430   : > { %2316 = vmatprep.subr.mxu0 %v1892_v48  ;;  %v1973_v2 = vsel %vm412_vm5, %v9561_v6, %v9582_v38  ;;  %v2048_v20 = vmul.f32 %v2040_v43, %v2028_v34  ;;  %v1887_v43 = vld [vmem:[#allocation3 + $0x60] sm:$0xff] }
 0x431   : > { %v9669_v47 = vpop.permute.xlu0 %1967  ;;  %2317 = vmatpush1.msra.mxu0 %v1891_v35  ;;  %v9671_v63 = vpop.permute.xlu1 %1867 }
 0x432   : > { %2318 = vmatprep.subr.mxu0 %v1844_v36  ;;  %v2095_v36 = vmul.f32 %v2087_v54, %v2077_v3  ;;  %v1984_v3 = vld [vmem:[#allocation3 + $0xe8] sm:$0xff]  ;;  %v1983_v54 = vld [vmem:[#allocation3 + $0xe0] sm:$0xff] }
 0x433   : > { %2319 = vmatpush1.msra.mxu0 %v1843_v4  ;;  %v2047_v4 = vmul.f32 %v2039_v45, %v2029_v22  ;;  %v1935_v22 = vld [vmem:[#allocation3 + $0xa0] sm:$0xff]  ;;  %v1986_v45 = vld [vmem:[#allocation3 + $0xf8] sm:$0xff] }
 0x434   : > { %7682 = vmatmul.mubr.msk.f32.vlgmr.msra.gmra.mxu0 %vm730_vm9, %v9608_v41  ;;  %7739 = vmatprep.subr.msk.mxu0 %vm236_vm0, %v13009_v56 }
 0x435   : > { %v2170_v8 = vpop.permute.xlu0 %2169  ;;  %7740 = vmatpush1.msk.msra.mxu0 %vm236_vm0, %v13009_v56  ;;  %v2122_v37 = vpop.permute.xlu1 %2121  ;;  %2494 = vmatprep.mubr.f32.mxu0 %v13006_v46 }
 0x436   : > { %v2171_v27 = vsel %vm616_vm1, %v9603_v57, %v2170_v8  ;;  %v2178_v59 = vsel %vm616_vm1, %v2170_v8, %v9452_v44  ;;  %2444 = vmatprep.subr.mxu0 %v2192_v16  ;;  %v2123_v48 = vsel %vm567_vm2, %v9621_v39, %v2122_v37  ;;  %v2130_v23 = vsel %vm567_vm2, %v2122_v37, %v9454_v62  ;;  %v2138_v57 = vld [vmem:[#allocation3 + $0x1f8] sm:$0xff]  ;;  %v1936_v37 = vld [vmem:[#allocation3 + $0xa8] sm:$0xff] }
 0x437   : > { %v2193_v40 = vmul.f32 %v2185_v0, %v2171_v27  ;;  %2445 = vmatpush1.msra.mxu0 %v2191_v29  ;;  %v2194_v35 = vmul.f32 %v2186_v15, %v2178_v59  ;;  %v2096_v44 = vmul.f32 %v2088_v31, %v2076_v7  ;;  %v2145_v62 = vmul.f32 %v2137_v24, %v2123_v48  ;;  %v2042_v15 = vld [vmem:[#allocation3 + $0x178] sm:$0xff] }
 0x438   : > { %2446 = vmatprep.subr.mxu0 %v2144_v42  ;;  %v2146_v51 = vmul.f32 %v2138_v57, %v2130_v23  ;;  %v1925_v7 = vsel %vm363_vm6, %v9579_v52, %v9601_v30  ;;  %v1992_v8 = vmul.f32 %v1984_v3, %v1973_v2  ;;  %v1971_v31 = vsel %vm412_vm5, %v9669_v47, %v9631_v26  ;;  %v1888_v26 = vld [vmem:[#allocation3 + $0x68] sm:$0xff]  ;;  %v1937_v57 = vld [vmem:[#allocation3 + $0xb0] sm:$0xff] }
 0x439   : > { %v2074_v5 = vpop.permute.xlu0 %2073  ;;  %2447 = vmatpush1.msra.mxu0 %v2143_v53  ;;  %2515 = vmatprep.subr.mxu1 %v2194_v35  ;;  %v2026_v39 = vpop.permute.xlu1 %2025  ;;  %v2041_v53 = vld [vmem:[#allocation3 + $0x170] sm:$0xff]  ;;  %v1994_v23 = vmul.f32 %v1986_v45, %v1971_v31  ;;  %v1938_v35 = vld [vmem:[#allocation3 + $0xb8] sm:$0xff]  ;;  %vm2717_vm1 = vcmp.lt.s32.totalorder %v8325_v12, 32 }
 0x43a   : > { %v2075_v25 = vsel %vm518_vm3, %v9623_v11, %v2074_v5  ;;  %v2082_v60 = vsel %vm518_vm3, %v2074_v5, %v9460_v17  ;;  %2448 = vmatprep.subr.mxu0 %v2096_v44  ;;  %v2034_v0 = vsel %vm469_vm4, %v2026_v39, %v9462_v32  ;;  %2516 = vmatpush1.msra.mxu1 %v2193_v40  ;;  %vm5169_vm3 = vcmp.lt.s32.totalorder %v8325_v12, 60 }
 0x43b   : > { %v2097_v29 = vmul.f32 %v2089_v21, %v2075_v25  ;;  %2449 = vmatpush1.msra.mxu0 %v2095_v36  ;;  %v2098_v16 = vmul.f32 %v2090_v55, %v2082_v60  ;;  %v1974_v11 = vsel %vm412_vm5, %v9523_v19, %v9561_v6  ;;  %v2027_v17 = vsel %vm469_vm4, %v9625_v50, %v2026_v39  ;;  %v1985_v50 = vld [vmem:[#allocation3 + $0xf0] sm:$0xff]  ;;  %v1842_v25 = vld [vmem:[#allocation3 + $0x38] sm:$0xff] }
 0x43c   : > { %2517 = vmatprep.subr.mxu1 %v2146_v51  ;;  %2450 = vmatprep.subr.mxu0 %v2048_v20  ;;  %v1926_v32 = vsel %vm363_vm6, %v9525_v58, %v9579_v52  ;;  %v1972_v58 = vsel %vm412_vm5, %v9582_v38, %v9669_v47  ;;  %v2050_v52 = vmul.f32 %v2042_v15, %v2034_v0  ;;  %v1840_v47 = vld [vmem:[#allocation3 + $0x28] sm:$0xff]  ;;  %v1841_v51 = vld [vmem:[#allocation3 + $0x30] sm:$0xff]  ;;  %vm5071_vm5 = vcmp.lt.s32.totalorder %v8325_v12, 68 }
 0x43d   : > { %2518 = vmatpush1.msra.mxu1 %v2145_v62  ;;  %v1870_v19 = vpop.permute.xlu0 %1869  ;;  %2451 = vmatpush1.msra.mxu0 %v2047_v4  ;;  %v1920_v6 = vpop.permute.xlu1 %1919  ;;  %v1991_v34 = vmul.f32 %v1983_v54, %v1974_v11  ;;  %v2049_v27 = vmul.f32 %v2041_v53, %v2027_v17  ;;  %v1943_v42 = vmul.f32 %v1935_v22, %v1926_v32 }
 0x43e   : > { %2519 = vmatprep.subr.mxu1 %v2098_v16  ;;  %2452 = vmatprep.subr.mxu0 %v9402_v49  ;;  %v1877_v59 = vsel %vm314_vm7, %v9671_v63, %v1870_v19  ;;  %v1878_v38 = vsel %vm314_vm7, %v9527_v13, %v9671_v63  ;;  %v1944_v49 = vmul.f32 %v1936_v37, %v1925_v7 }
 0x43f   : > { %2520 = vmatpush1.msra.mxu1 %v2097_v29  ;;  %2453 = vmatpush1.msra.mxu0 %v9392_v14  ;;  %v1993_v40 = vmul.f32 %v1985_v50, %v1972_v58  ;;  %v1923_v24 = vsel %vm363_vm6, %v1920_v6, %v9633_v9  ;;  %v1924_v13 = vsel %vm363_vm6, %v9601_v30, %v1920_v6  ;;  %v1839_v9 = vld [vmem:[#allocation3 + $0x20] sm:$0xff]  ;;  %v1889_v30 = vld [vmem:[#allocation3 + $0x70] sm:$0xff]  ;;  %vm5275_vm6 = vcmp.lt.s32.totalorder %v8325_v12, 124 }
 0x440   : > { %2521 = vmatprep.subr.mxu1 %v2050_v52  ;;  %2454 = vmatprep.subr.mxu0 %v1992_v8  ;;  %v1896_v36 = vmul.f32 %v1888_v26, %v1877_v59  ;;  %v1895_v21 = vmul.f32 %v1887_v43, %v1878_v38  ;;  %v1946_v2 = vmul.f32 %v1938_v35, %v1923_v24 }
 0x441   : > { %2522 = vmatpush1.msra.mxu1 %v2049_v27  ;;  %v1820_v48 = vpop.permute.xlu0 %1819  ;;  %2455 = vmatpush1.msra.mxu0 %v1991_v34  ;;  %v1822_v14 = vpop.permute.xlu1 %1821  ;;  %v1945_v4 = vmul.f32 %v1937_v57, %v1924_v13 }
 0x442   : > { %2523 = vmatprep.subr.mxu1 %v9430_v18  ;;  %v1829_v63 = vsel %vm265_vm8, %v1820_v48, %v1822_v14  ;;  %2456 = vmatprep.subr.mxu0 %v1944_v49  ;;  %v1830_v44 = vsel %vm265_vm8, %v9529_v10, %v1820_v48  ;;  %v1890_v18 = vld [vmem:[#allocation3 + $0x78] sm:$0xff] }
 0x443   : > { %2524 = vmatpush1.msra.mxu1 %v9412_v61  ;;  %2457 = vmatpush1.msra.mxu0 %v1943_v42  ;;  %v1848_v55 = vmul.f32 %v1840_v47, %v1829_v63  ;;  %v1847_v20 = vmul.f32 %v1839_v9, %v1830_v44 }
 0x444   : > { %2525 = vmatprep.subr.mxu1 %v1994_v23  ;;  %2458 = vmatprep.subr.mxu0 %v1896_v36 }
 0x445   : > { %2526 = vmatpush1.msra.mxu1 %v1993_v40  ;;  %v1872_v5 = vpop.permute.xlu0 %1871  ;;  %2459 = vmatpush1.msra.mxu0 %v1895_v21  ;;  %v1824_v39 = vpop.permute.xlu1 %1823 }
 0x446   : > { %v1875_v62 = vsel %vm314_vm7, %v1872_v5, %v9651_v28  ;;  %v1876_v61 = vsel %vm314_vm7, %v1870_v19, %v1872_v5  ;;  %2527 = vmatprep.subr.mxu1 %v1946_v2  ;;  %v1827_v10 = vsel %vm265_vm8, %v1824_v39, %v9653_v33  ;;  %v1828_v3 = vsel %vm265_vm8, %v1822_v14, %v1824_v39 }
 0x447   : > { %v1897_v60 = vmul.f32 %v1889_v30, %v1876_v61  ;;  %2460 = vmatprep.subr.mxu0 %v1848_v55  ;;  %2528 = vmatpush1.msra.mxu1 %v1945_v4  ;;  %v1898_v29 = vmul.f32 %v1890_v18, %v1875_v62  ;;  %v1850_v28 = vmul.f32 %v1842_v25, %v1827_v10  ;;  %vm5218_vm7 = vcmp.lt.s32.totalorder %v8325_v12, 4 }
 0x448   : > { %2461 = vmatpush1.msra.mxu0 %v1847_v20  ;;  %v1849_v0 = vmul.f32 %v1841_v51, %v1828_v3 }
 0x449   : > { %7684 = vmatmul.mubr.msk.f32.vlgmr.msra.gmra.mxu0 %vm730_vm9, %v9608_v41  ;;  %2529 = vmatprep.subr.mxu1 %v1898_v29 }
 0x44a   : > { %2530 = vmatpush1.msra.mxu1 %v1897_v60  ;;  %7743 = vmatprep.subr.msk.mxu0 %vm236_vm0, %v13009_v56 }
 0x44b   : > { %2531 = vmatprep.subr.mxu1 %v1850_v28  ;;  %7744 = vmatpush1.msk.msra.mxu0 %vm236_vm0, %v13009_v56 }
 0x44c   : > { %2532 = vmatpush1.msra.mxu1 %v1849_v0  ;;  %3201 = vmatprep.mubr.f32.mxu0 %v13006_v46 }
 0x44d   : > { %7685 = vmatmul.mubr.msk.f32.vlgmr.msra.gmra.mxu1 %vm730_vm9, %v9608_v41  ;;  %7745 = vmatprep.subr.msk.mxu1 %vm236_vm0, %v13009_v56 }
 0x44e   : > { %7746 = vmatpush1.msk.msra.mxu1 %vm236_vm0, %v13009_v56  ;;  %3272 = vmatprep.mubr.f32.mxu1 %v13006_v46 }
 0x4df   : > { %v2425_v33 = vpop.f32.mrf.mxu1 }
 0x4e0   : > { %v2574_v16 = vmul.f32 0.1, %v2425_v33 }
 0x4e1   : > { %v2427_v22 = vpop.f32.mrf.mxu1 }
 0x4e2   : > { %v2582_v15 = vmax.f32 %v2425_v33, %v2574_v16  ;;  %v2575_v7 = vmul.f32 0.1, %v2427_v22 }
 0x4e4   : > { %2592 = vrot.lane.b32.xlu1 %v2582_v15, %s8065_s14  ;;  %v2583_v19 = vmax.f32 %v2427_v22, %v2575_v7 }
 0x4f4   : > { %v2354_v54 = vpop.f32.mrf.mxu0 }
 0x4f5   : > { %v2572_v11 = vmul.f32 0.1, %v2354_v54 }
 0x4f6   : > { %v2356_v53 = vpop.f32.mrf.mxu0 }
 0x4f7   : > { %v2580_v17 = vmax.f32 %v2354_v54, %v2572_v11  ;;  %v2573_v41 = vmul.f32 0.1, %v2356_v53 }
 0x4f9   : > { %2588 = vrot.lane.b32.xlu0 %v2580_v17, %s8065_s14  ;;  %v2581_v32 = vmax.f32 %v2356_v53, %v2573_v41 }
 0x4fd   : > { %2590 = vrot.lane.b32.xlu0 %v2581_v32, %s8065_s14 }
 0x501   : > { %2594 = vrot.lane.b32.xlu0 %v2583_v19, %s8065_s14 }
 0x509   : > { %v2496_v6 = vpop.f32.mrf.mxu0 }
 0x50a   : > { %v2576_v8 = vmul.f32 0.1, %v2496_v6 }
 0x50b   : > { %v2498_v37 = vpop.f32.mrf.mxu0 }
 0x50c   : > { %v2584_v50 = vmax.f32 %v2496_v6, %v2576_v8  ;;  %v2577_v31 = vmul.f32 0.1, %v2498_v37 }
 0x50d   : > { %v2567_v58 = vpop.f32.mrf.mxu1 }
 0x50e   : > { %v2585_v52 = vmax.f32 %v2498_v37, %v2577_v31  ;;  %2596 = vrot.lane.b32.xlu1 %v2584_v50, %s8065_s14  ;;  %v2578_v45 = vmul.f32 0.1, %v2567_v58 }
 0x50f   : > { %v2569_v34 = vpop.f32.mrf.mxu1 }
 0x510   : > { %v2586_v27 = vmax.f32 %v2567_v58, %v2578_v45  ;;  %v2579_v59 = vmul.f32 0.1, %v2569_v34 }
 0x512   : > { %v2587_v26 = vmax.f32 %v2569_v34, %v2579_v59  ;;  %2598 = vrot.lane.b32.xlu1 %v2585_v52, %s8065_s14  ;;  %2600 = vrot.lane.b32.xlu0 %v2586_v27, %s8065_s14 }
 0x516   : > { %2602 = vrot.lane.b32.xlu1 %v2587_v26, %s8065_s14 }
 0x556   : > { %v2593_v43 = vpop.permute.xlu1 %2592 }
 0x56b   : > { %v2589_v42 = vpop.permute.xlu0 %2588 }
 0x56f   : > { %v2591_v38 = vpop.permute.xlu0 %2590 }
 0x570   : > { %v2609_v49 = vsel %vm469_vm4, %v2591_v38, %v2593_v43  ;;  %v2610_v14 = vsel %vm469_vm4, %v2589_v42, %v2591_v38 }
 0x571   : > { %v2613_v47 = vmax.f32 %v2581_v32, %v2609_v49  ;;  %v2612_v23 = vmax.f32 %v2580_v17, %v2610_v14 }
 0x573   : > { %v2595_v40 = vpop.permute.xlu0 %2594  ;;  %2622 = vrot.lane.b32.xlu0 %v2613_v47, %s8063_s12 }
 0x574   : > { %v2608_v24 = vsel %vm469_vm4, %v2593_v43, %v2595_v40 }
 0x575   : > { %v2614_v48 = vmax.f32 %v2582_v15, %v2608_v24 }
 0x577   : > { %2624 = vrot.lane.b32.xlu1 %v2614_v48, %s8063_s12 }
 0x57b   : > { %2620 = vrot.lane.b32.xlu1 %v2612_v23, %s8063_s12 }
 0x580   : > { %v2597_v35 = vpop.permute.xlu1 %2596 }
 0x581   : > { %v2607_v57 = vsel %vm469_vm4, %v2595_v40, %v2597_v35  ;;  %v10034_v40 = vld [vmem:[#allocation3 + $0x440] sm:$0xff] }
 0x582   : > { %v9821_v13 = vmax.f32 %v2583_v19, %v2607_v57  ;;  %v10044_v57 = vld [vmem:[#allocation3 + $0x408] sm:$0xff] }
 0x584   : > { %2626 = vrot.lane.b32.xlu0 %v9821_v13, %s8063_s12  ;;  %v2599_v63 = vpop.permute.xlu1 %2598  ;;  %v2601_v36 = vpop.permute.xlu0 %2600 }
 0x585   : > { %v2606_v21 = vsel %vm469_vm4, %v2597_v35, %v2599_v63  ;;  %v2605_v9 = vsel %vm469_vm4, %v2599_v63, %v2601_v36 }
 0x586   : > { %v2616_v44 = vmax.f32 %v2584_v50, %v2606_v21  ;;  %v9829_v55 = vmax.f32 %v2585_v52, %v2605_v9  ;;  %v10054_v9 = vld [vmem:[#allocation3 + $0x3c8] sm:$0xff] }
 0x588   : > { %2628 = vrot.lane.b32.xlu0 %v2616_v44, %s8063_s12  ;;  %v2603_v30 = vpop.permute.xlu1 %2602  ;;  %2630 = vrot.lane.b32.xlu1 %v9829_v55, %s8063_s12 }
 0x589   : > { %v2604_v2 = vsel %vm469_vm4, %v2601_v36, %v2603_v30  ;;  %v2611_v18 = vsel %vm469_vm4, %v2603_v30, %v2589_v42  ;;  %vm5120_vm4 = vcmp.lt.s32.totalorder %v8325_v12, 64 }
 0x58a   : > { %v9838_v4 = vmax.f32 %v2586_v27, %v2604_v2  ;;  %v2619_v5 = vmax.f32 %v2587_v26, %v2611_v18 }
 0x58c   : > { %2634 = vrot.lane.b32.xlu0 %v2619_v5, %s8063_s12  ;;  %2632 = vrot.lane.b32.xlu1 %v9838_v4, %s8063_s12 }
 0x5e5   : > { %v2623_v39 = vpop.permute.xlu0 %2622 }
 0x5e9   : > { %v2625_v20 = vpop.permute.xlu1 %2624 }
 0x5ea   : > { %v2641_v62 = vsel %vm567_vm2, %v2623_v39, %v2625_v20 }
 0x5eb   : > { %v9845_v61 = vmax.f32 %v2613_v47, %v2641_v62  ;;  %v10032_v47 = vld [vmem:[#allocation3 + $0x448] sm:$0xff]  ;;  %v10072_v62 = vld [vmem:[#allocation3 + $0x380] sm:$0xff] }
 0x5ed   : > { %2956 = vrot.lane.b32.xlu1 %v9845_v61, %s8071_s27  ;;  %3005 = vrot.lane.b32.xlu0 %v9845_v61, %s8072_s28  ;;  %v2621_v10 = vpop.permute.xlu1 %2620 }
 0x5ee   : > { %v2642_v25 = vsel %vm567_vm2, %v2621_v10, %v2623_v39 }
 0x5ef   : > { %v9853_v60 = vmax.f32 %v2612_v23, %v2642_v25 }
 0x5f1   : > { %2954 = vrot.lane.b32.xlu1 %v9853_v60, %s8071_s27  ;;  %3003 = vrot.lane.b32.xlu0 %v9853_v60, %s8072_s28 }
 0x5f5   : > { %2858 = vrot.lane.b32.xlu1 %v9845_v61, %s8073_s29  ;;  %2907 = vrot.lane.b32.xlu0 %v9845_v61, %s8074_s30 }
 0x5f6   : > { %v2627_v51 = vpop.permute.xlu0 %2626 }
 0x5f7   : > { %v2640_v3 = vsel %vm567_vm2, %v2625_v20, %v2627_v51  ;;  %v10070_v20 = vld [vmem:[#allocation3 + $0x388] sm:$0xff] }
 0x5f8   : > { %v9885_v29 = vmax.f32 %v2614_v48, %v2640_v3 }
 0x5f9   : > { %2856 = vrot.lane.b32.xlu1 %v9853_v60, %s8073_s29  ;;  %2905 = vrot.lane.b32.xlu0 %v9853_v60, %s8074_s30 }
 0x5fa   : > { %v2629_v28 = vpop.permute.xlu0 %2628  ;;  %v2631_v0 = vpop.permute.xlu1 %2630 }
 0x5fb   : > { %v2639_v33 = vsel %vm567_vm2, %v2627_v51, %v2629_v28  ;;  %v2638_v16 = vsel %vm567_vm2, %v2629_v28, %v2631_v0 }
 0x5fc   : > { %v9908_v15 = vmax.f32 %v9821_v13, %v2639_v33  ;;  %v9910_v54 = vmax.f32 %v2616_v44, %v2638_v16  ;;  %v10046_v13 = vld [vmem:[#allocation3 + $0x400] sm:$0xff] }
 0x5fd   : > { %2801 = vrot.lane.b32.xlu1 %v9845_v61, %s8075_s5  ;;  %2799 = vrot.lane.b32.xlu0 %v9853_v60, %s8075_s5  ;;  %v10056_v44 = vld [vmem:[#allocation3 + $0x3c0] sm:$0xff] }
 0x5fe   : > { %v2635_v11 = vpop.permute.xlu0 %2634  ;;  %v2633_v41 = vpop.permute.xlu1 %2632 }
 0x5ff   : > { %v2643_v53 = vsel %vm567_vm2, %v2635_v11, %v2621_v10  ;;  %v2636_v22 = vsel %vm567_vm2, %v2633_v41, %v2635_v11  ;;  %v2637_v32 = vsel %vm567_vm2, %v2631_v0, %v2633_v41  ;;  %v10090_v11 = vld [vmem:[#allocation3 + $0x308] sm:$0xff]  ;;  %vm2668_vm2 = vcmp.lt.s32.totalorder %v8325_v12, 34  ;;  %v6548_v12 = vld [vmem:[#allocation3 + $0x4f0] sm:$0xff] }
 0x600   : > { %v9930_v17 = vmax.f32 %v2619_v5, %v2643_v53  ;;  %v9953_v7 = vmax.f32 %v9829_v55, %v2637_v32  ;;  %v9956_v19 = vmax.f32 %v9838_v4, %v2636_v22  ;;  %v10099_v32 = vld [vmem:[#allocation3 + $0x450] sm:$0xff] }
 0x601   : > { %2750 = vrot.lane.b32.xlu1 %v9853_v60, %s8076_s6  ;;  %2752 = vrot.lane.b32.xlu0 %v9845_v61, %s8076_s6 }
 0x605   : > { %2703 = vrot.lane.b32.xlu1 %v9845_v61, %s8077_s7  ;;  %2701 = vrot.lane.b32.xlu0 %v9853_v60, %s8077_s7 }
 0x609   : > { %2652 = vrot.lane.b32.xlu1 %v9853_v60, %s8078_s8  ;;  %2654 = vrot.lane.b32.xlu0 %v9845_v61, %s8078_s8 }
 0x60d   : > { %3007 = vrot.lane.b32.xlu1 %v9885_v29, %s8072_s28  ;;  %2958 = vrot.lane.b32.xlu0 %v9885_v29, %s8071_s27 }
 0x611   : > { %2909 = vrot.lane.b32.xlu1 %v9885_v29, %s8074_s30  ;;  %2860 = vrot.lane.b32.xlu0 %v9885_v29, %s8073_s29 }
 0x615   : > { %2803 = vrot.lane.b32.xlu1 %v9885_v29, %s8075_s5  ;;  %2754 = vrot.lane.b32.xlu0 %v9885_v29, %s8076_s6 }
 0x619   : > { %2705 = vrot.lane.b32.xlu1 %v9885_v29, %s8077_s7  ;;  %2656 = vrot.lane.b32.xlu0 %v9885_v29, %s8078_s8 }
 0x61d   : > { %3009 = vrot.lane.b32.xlu1 %v9908_v15, %s8072_s28  ;;  %3011 = vrot.lane.b32.xlu0 %v9910_v54, %s8072_s28 }
 0x621   : > { %2962 = vrot.lane.b32.xlu1 %v9910_v54, %s8071_s27  ;;  %2960 = vrot.lane.b32.xlu0 %v9908_v15, %s8071_s27 }
 0x625   : > { %2911 = vrot.lane.b32.xlu1 %v9908_v15, %s8074_s30  ;;  %2913 = vrot.lane.b32.xlu0 %v9910_v54, %s8074_s30 }
 0x629   : > { %2864 = vrot.lane.b32.xlu1 %v9910_v54, %s8073_s29  ;;  %2862 = vrot.lane.b32.xlu0 %v9908_v15, %s8073_s29 }
 0x62d   : > { %2764 = vrot.lane.b32.xlu1 %v9930_v17, %s8076_s6  ;;  %2813 = vrot.lane.b32.xlu0 %v9930_v17, %s8075_s5 }
 0x631   : > { %2756 = vrot.lane.b32.xlu1 %v9908_v15, %s8076_s6  ;;  %2805 = vrot.lane.b32.xlu0 %v9908_v15, %s8075_s5 }
 0x635   : > { %2666 = vrot.lane.b32.xlu1 %v9930_v17, %s8078_s8  ;;  %2715 = vrot.lane.b32.xlu0 %v9930_v17, %s8077_s7 }
 0x639   : > { %2658 = vrot.lane.b32.xlu1 %v9908_v15, %s8078_s8  ;;  %2707 = vrot.lane.b32.xlu0 %v9908_v15, %s8077_s7 }
 0x63d   : > { %3013 = vrot.lane.b32.xlu0 %v9953_v7, %s8072_s28  ;;  %3015 = vrot.lane.b32.xlu1 %v9956_v19, %s8072_s28 }
 0x641   : > { %2964 = vrot.lane.b32.xlu0 %v9953_v7, %s8071_s27  ;;  %2966 = vrot.lane.b32.xlu1 %v9956_v19, %s8071_s27 }
 0x645   : > { %3017 = vrot.lane.b32.xlu0 %v9930_v17, %s8072_s28  ;;  %2915 = vrot.lane.b32.xlu1 %v9953_v7, %s8074_s30 }
 0x649   : > { %2917 = vrot.lane.b32.xlu0 %v9956_v19, %s8074_s30  ;;  %2968 = vrot.lane.b32.xlu1 %v9930_v17, %s8071_s27 }
 0x64d   : > { %2866 = vrot.lane.b32.xlu0 %v9953_v7, %s8073_s29  ;;  %2868 = vrot.lane.b32.xlu1 %v9956_v19, %s8073_s29 }
 0x651   : > { %2919 = vrot.lane.b32.xlu0 %v9930_v17, %s8074_s30  ;;  %2870 = vrot.lane.b32.xlu1 %v9930_v17, %s8073_s29 }
 0x655   : > { %2807 = vrot.lane.b32.xlu0 %v9910_v54, %s8075_s5  ;;  %2809 = vrot.lane.b32.xlu1 %v9953_v7, %s8075_s5 }
 0x659   : > { %2758 = vrot.lane.b32.xlu0 %v9910_v54, %s8076_s6  ;;  %2760 = vrot.lane.b32.xlu1 %v9953_v7, %s8076_s6 }
 0x65d   : > { %2811 = vrot.lane.b32.xlu0 %v9956_v19, %s8075_s5  ;;  %2709 = vrot.lane.b32.xlu1 %v9910_v54, %s8077_s7 }
 0x65f   : > { %v3006_v6 = vpop.permute.xlu0 %3005  ;;  %v2957_v8 = vpop.permute.xlu1 %2956 }
 0x661   : > { %2711 = vrot.lane.b32.xlu0 %v9953_v7, %s8077_s7  ;;  %2762 = vrot.lane.b32.xlu1 %v9956_v19, %s8076_s6 }
 0x663   : > { %v9998_v37 = vpop.permute.xlu0 %3003  ;;  %v10000_v50 = vpop.permute.xlu1 %2954 }
 0x664   : > { %v3026_v24 = vsel %vm3019_vm10, %v9998_v37, %v3006_v6  ;;  %v2977_v63 = vsel %vm2970_vm11, %v10000_v50, %v2957_v8 }
 0x665   : > { %2660 = vrot.lane.b32.xlu0 %v9910_v54, %s8078_s8  ;;  %2662 = vrot.lane.b32.xlu1 %v9953_v7, %s8078_s8  ;;  %v3036_v21 = vmul.f32 %v10034_v40, %v3026_v24  ;;  %v2987_v4 = vmul.f32 %v10046_v13, %v2977_v63 }
 0x667   : > { %v2908_v31 = vpop.permute.xlu0 %2907  ;;  %v2859_v58 = vpop.permute.xlu1 %2858 }
 0x669   : > { %2713 = vrot.lane.b32.xlu0 %v9956_v19, %s8077_s7  ;;  %2664 = vrot.lane.b32.xlu1 %v9956_v19, %s8078_s8 }
 0x66b   : > { %v10010_v52 = vpop.permute.xlu0 %2905  ;;  %v10012_v45 = vpop.permute.xlu1 %2856 }
 0x66c   : > { %v2928_v55 = vsel %vm2921_vm12, %v10010_v52, %v2908_v31  ;;  %v2879_v10 = vsel %vm2872_vm13, %v10012_v45, %v2859_v58 }
 0x66d   : > { %v2938_v51 = vmul.f32 %v10056_v44, %v2928_v55  ;;  %v2889_v33 = vmul.f32 %v10072_v62, %v2879_v10 }
 0x66f   : > { %v10014_v34 = vpop.permute.xlu0 %2799  ;;  %v10016_v27 = vpop.permute.xlu1 %2801 }
 0x670   : > { %v2822_v16 = vsel %vm2815_vm14, %v10014_v34, %v10016_v27 }
 0x671   : > { %v2833_v22 = vmul.f32 %v10090_v11, %v2822_v16  ;;  %v10140_v16 = vld [vmem:[#allocation3 + $0x398] sm:$0xff] }
 0x673   : > { %v10018_v59 = vpop.permute.xlu0 %2752  ;;  %v10020_v26 = vpop.permute.xlu1 %2750 }
 0x677   : > { %v10022_v42 = vpop.permute.xlu0 %2701  ;;  %v10024_v43 = vpop.permute.xlu1 %2703 }
 0x67b   : > { %v10026_v38 = vpop.permute.xlu0 %2654  ;;  %v10028_v49 = vpop.permute.xlu1 %2652 }
 0x67f   : > { %v2959_v48 = vpop.permute.xlu0 %2958  ;;  %v3008_v14 = vpop.permute.xlu1 %3007 }
 0x680   : > { %v2976_v23 = vsel %vm2970_vm11, %v2957_v8, %v2959_v48  ;;  %v3025_v35 = vsel %vm3019_vm10, %v3006_v6, %v3008_v14  ;;  %v10101_v6 = vld [vmem:[#allocation3 + $0x458] sm:$0xff] }
 0x681   : > { %v3037_v36 = vmul.f32 %v10032_v47, %v3025_v35  ;;  %v2988_v18 = vmul.f32 %v10044_v57, %v2976_v23  ;;  %v10114_v35 = vld [vmem:[#allocation3 + $0x418] sm:$0xff] }
 0x683   : > { %v10061_v30 = vpop.permute.xlu0 %2860  ;;  %3151 = vmatprep.subr.mxu0 %v3037_v36  ;;  %v2910_v2 = vpop.permute.xlu1 %2909 }
 0x684   : > { %v2878_v5 = vsel %vm2872_vm13, %v2859_v58, %v10061_v30  ;;  %v2927_v39 = vsel %vm2921_vm12, %v2908_v31, %v2910_v2  ;;  %3152 = vmatpush1.msra.mxu0 %v3036_v21 }
 0x685   : > { %3153 = vmatprep.subr.mxu0 %v2988_v18  ;;  %v2939_v25 = vmul.f32 %v10054_v9, %v2927_v39  ;;  %v2890_v0 = vmul.f32 %v10070_v20, %v2878_v5  ;;  %v10127_v5 = vld [vmem:[#allocation3 + $0x3d8] sm:$0xff] }
 0x686   : > { %3154 = vmatpush1.msra.mxu0 %v2987_v4  ;;  %v10125_v4 = vld [vmem:[#allocation3 + $0x3d0] sm:$0xff] }
 0x687   : > { %v10080_v3 = vpop.permute.xlu0 %2754  ;;  %3155 = vmatprep.subr.mxu0 %v2939_v25  ;;  %v10082_v28 = vpop.permute.xlu1 %2803 }
 0x688   : > { %3156 = vmatpush1.msra.mxu0 %v2938_v51 }
 0x689   : > { %3157 = vmatprep.subr.mxu0 %v2890_v0 }
 0x68a   : > { %3158 = vmatpush1.msra.mxu0 %v2889_v33  ;;  %v10138_v33 = vld [vmem:[#allocation3 + $0x390] sm:$0xff] }
 0x68b   : > { %v10092_v53 = vpop.permute.xlu0 %2656  ;;  %3159 = vmatprep.subr.mxu0 %v9845_v61  ;;  %v10095_v41 = vpop.permute.xlu1 %2705 }
 0x68c   : > { %3160 = vmatpush1.msra.mxu0 %v9853_v60  ;;  %v10112_v60 = vld [vmem:[#allocation3 + $0x410] sm:$0xff] }
 0x68d   : > { %3161 = vmatprep.subr.mxu0 %v2833_v22 }
 0x68f   : > { %v10103_v8 = vpop.permute.xlu0 %3011  ;;  %v3010_v31 = vpop.permute.xlu1 %3009 }
 0x690   : > { %v3023_v58 = vsel %vm3019_vm10, %v3010_v31, %v10103_v8  ;;  %v3024_v61 = vsel %vm3019_vm10, %v3008_v14, %v3010_v31 }
 0x691   : > { %v3038_v24 = vmul.f32 %v10099_v32, %v3024_v61  ;;  %v3039_v23 = vmul.f32 %v10101_v6, %v3023_v58 }
 0x693   : > { %v2961_v63 = vpop.permute.xlu0 %2960  ;;  %3222 = vmatprep.subr.mxu1 %v3039_v23  ;;  %v10116_v36 = vpop.permute.xlu1 %2962  ;;  %v10154_v23 = vld [vmem:[#allocation3 + $0x300] sm:$0xff] }
 0x694   : > { %v2975_v21 = vsel %vm2970_vm11, %v2959_v48, %v2961_v63  ;;  %v2974_v55 = vsel %vm2970_vm11, %v2961_v63, %v10116_v36  ;;  %3223 = vmatpush1.msra.mxu1 %v3038_v24  ;;  %13085 = vst [vmem:[#allocation14_spill] sm:$0xff] %v10154_v23  ;;  %v2773_v63 = vsel %vm2766_vm15, %v10020_v26, %v10018_v59 }
 0x695   : > { %v2989_v14 = vmul.f32 %v10112_v60, %v2975_v21  ;;  %v2990_v18 = vmul.f32 %v10114_v35, %v2974_v55  ;;  %v10164_v55 = vld [vmem:[#allocation3 + $0x2c8] sm:$0xff] }
 0x696   : > { %13086 = vst [vmem:[#allocation15_spill] sm:$0xff] %v10164_v55 }
 0x697   : > { %v10129_v39 = vpop.permute.xlu0 %2913  ;;  %3224 = vmatprep.subr.mxu1 %v2990_v18  ;;  %v2912_v10 = vpop.permute.xlu1 %2911  ;;  %v10170_v18 = vld [vmem:[#allocation3 + $0x2c0] sm:$0xff] }
 0x698   : > { %v2925_v48 = vsel %vm2921_vm12, %v2912_v10, %v10129_v39  ;;  %v2926_v25 = vsel %vm2921_vm12, %v2910_v2, %v2912_v10  ;;  %3225 = vmatpush1.msra.mxu1 %v2989_v14  ;;  %13087 = vst [vmem:[#allocation9_spill] sm:$0xff] %v10170_v18 }
 0x699   : > { %v2940_v51 = vmul.f32 %v10125_v4, %v2926_v25  ;;  %v2941_v0 = vmul.f32 %v10127_v5, %v2925_v48  ;;  %v2724_v48 = vsel %vm2717_vm1, %v10022_v42, %v10024_v43 }
 0x69b   : > { %v2863_v22 = vpop.permute.xlu0 %2862  ;;  %3226 = vmatprep.subr.mxu1 %v2941_v0  ;;  %v10142_v31 = vpop.permute.xlu1 %2864  ;;  %v10186_v0 = vld [vmem:[#allocation3 + $0x318] sm:$0xff] }
 0x69c   : > { %v2877_v58 = vsel %vm2872_vm13, %v10061_v30, %v2863_v22  ;;  %v2876_v2 = vsel %vm2872_vm13, %v2863_v22, %v10142_v31  ;;  %3227 = vmatpush1.msra.mxu1 %v2940_v51  ;;  %v10182_v51 = vld [vmem:[#allocation3 + $0x288] sm:$0xff]  ;;  %v10188_v22 = vld [vmem:[#allocation3 + $0x310] sm:$0xff] }
 0x69d   : > { %v2891_v61 = vmul.f32 %v10138_v33, %v2877_v58  ;;  %v2892_v24 = vmul.f32 %v10140_v16, %v2876_v2  ;;  %13088 = vst [vmem:[#allocation10_spill] sm:$0xff] %v10182_v51 }
 0x69f   : > { %v10160_v21 = vpop.permute.xlu0 %2813  ;;  %3228 = vmatprep.subr.mxu1 %v2892_v24  ;;  %v10162_v30 = vpop.permute.xlu1 %2764  ;;  %v10209_v24 = vld [vmem:[#allocation3 + $0x2d8] sm:$0xff] }
 0x6a0   : > { %v2823_v14 = vsel %vm2815_vm14, %v10160_v21, %v10014_v34  ;;  %v2774_v10 = vsel %vm2766_vm15, %v10162_v30, %v10020_v26  ;;  %3229 = vmatpush1.msra.mxu1 %v2891_v61  ;;  %v2784_v34 = vmul.f32 %v10164_v55, %v2773_v63  ;;  %v2821_v26 = vsel %vm2815_vm14, %v10016_v27, %v10082_v28  ;;  %v10211_v63 = vld [vmem:[#allocation3 + $0x2d0] sm:$0xff] }
 0x6a1   : > { %v2832_v25 = vmul.f32 %v10154_v23, %v2823_v14  ;;  %3230 = vmatprep.subr.mxu1 %v9908_v15  ;;  %v2783_v58 = vmul.f32 %v10170_v18, %v2774_v10  ;;  %v2735_v27 = vmul.f32 %v10182_v51, %v2724_v48  ;;  %v2772_v14 = vsel %vm2766_vm15, %v10018_v59, %v10080_v3  ;;  %v10247_v18 = vld [vmem:[#allocation3 + $0x290] sm:$0xff] }
 0x6a2   : > { %3231 = vmatpush1.msra.mxu1 %v9885_v29  ;;  %v2834_v10 = vmul.f32 %v10188_v22, %v2821_v26  ;;  %v2675_v48 = vsel %vm2668_vm2, %v10028_v49, %v10026_v38 }
 0x6a3   : > { %v10195_v2 = vpop.permute.xlu0 %2805  ;;  %3162 = vmatpush1.msra.mxu0 %v2832_v25  ;;  %v10197_v15 = vpop.permute.xlu1 %2756  ;;  %v10219_v25 = vld [vmem:[#allocation3 + $0x280] sm:$0xff] }
 0x6a4   : > { %v2820_v29 = vsel %vm2815_vm14, %v10082_v28, %v10195_v2  ;;  %v2771_v61 = vsel %vm2766_vm15, %v10080_v3, %v10197_v15  ;;  %3163 = vmatprep.subr.mxu0 %v2784_v34  ;;  %13089 = vst [vmem:[#allocation11_spill] sm:$0xff] %v10219_v25  ;;  %v10230_v3 = vld [vmem:[#allocation3 + $0x248] sm:$0xff] }
 0x6a5   : > { %3164 = vmatpush1.msra.mxu0 %v2783_v58  ;;  %v2835_v28 = vmul.f32 %v10186_v0, %v2820_v29  ;;  %v2786_v59 = vmul.f32 %v10209_v24, %v2771_v61  ;;  %13090 = vst [vmem:[#allocation12_spill] sm:$0xff] %v10230_v3  ;;  %v2785_v58 = vmul.f32 %v10211_v63, %v2772_v14  ;;  %v10237_v29 = vld [vmem:[#allocation3 + $0x240] sm:$0xff]  ;;  %v10245_v14 = vld [vmem:[#allocation3 + $0x298] sm:$0xff] }
 0x6a6   : > { %3165 = vmatprep.subr.mxu0 %v2735_v27  ;;  %13091 = vst [vmem:[#allocation13_spill] sm:$0xff] %v10237_v29  ;;  %v2686_v61 = vmul.f32 %v10230_v3, %v2675_v48 }
 0x6a7   : > { %v10225_v34 = vpop.permute.xlu0 %2715  ;;  %3232 = vmatprep.subr.mxu1 %v2835_v28  ;;  %v10227_v51 = vpop.permute.xlu1 %2666 }
 0x6a8   : > { %v2725_v26 = vsel %vm2717_vm1, %v10225_v34, %v10022_v42  ;;  %v2676_v27 = vsel %vm2668_vm2, %v10227_v51, %v10028_v49  ;;  %3233 = vmatpush1.msra.mxu1 %v2834_v10  ;;  %v2723_v42 = vsel %vm2717_vm1, %v10024_v43, %v10095_v41  ;;  %v10261_v10 = vld [vmem:[%s12871_s1 + $0x18] sm:$0xff] }
 0x6a9   : > { %v2734_v28 = vmul.f32 %v10219_v25, %v2725_v26  ;;  %3234 = vmatprep.subr.mxu1 %v2786_v59  ;;  %v2685_v55 = vmul.f32 %v10237_v29, %v2676_v27  ;;  %v10271_v59 = vld [vmem:[#allocation3 + $0x258] sm:$0xff]  ;;  %v2674_v26 = vsel %vm2668_vm2, %v10026_v38, %v10092_v53  ;;  %v10305_v25 = vld [vmem:[#allocation3 + $0x428] sm:$0xff] }
 0x6aa   : > { %3235 = vmatpush1.msra.mxu1 %v2785_v58  ;;  %v10273_v58 = vld [vmem:[#allocation3 + $0x250] sm:$0xff]  ;;  %13096 = vst [vmem:[#allocation21_spill] sm:$0xff] %v10305_v25 }
 0x6ab   : > { %v10254_v23 = vpop.permute.xlu0 %2707  ;;  %3166 = vmatpush1.msra.mxu0 %v2734_v28  ;;  %v10256_v49 = vpop.permute.xlu1 %2658  ;;  %13092 = vst [vmem:[#allocation16_spill] sm:$0xff] %v10273_v58  ;;  %v10283_v28 = vld [vmem:[#allocation3 + $0x460] sm:$0xff] }
 0x6ac   : > { %v2722_v48 = vsel %vm2717_vm1, %v10095_v41, %v10254_v23  ;;  %v2673_v43 = vsel %vm2668_vm2, %v10092_v53, %v10256_v49  ;;  %3167 = vmatprep.subr.mxu0 %v2686_v61  ;;  %v2736_v41 = vmul.f32 %v10247_v18, %v2723_v42  ;;  %13093 = vst [vmem:[#allocation17_spill] sm:$0xff] %v10283_v28  ;;  %v10288_v61 = vld [vmem:[#allocation3 + $0x468] sm:$0xff] }
 0x6ad   : > { %3168 = vmatpush1.msra.mxu0 %v2685_v55  ;;  %v2737_v27 = vmul.f32 %v10245_v14, %v2722_v48  ;;  %13094 = vst [vmem:[#allocation18_spill] sm:$0xff] %v10288_v61  ;;  %v2688_v38 = vmul.f32 %v10271_v59, %v2673_v43  ;;  %v2687_v53 = vmul.f32 %v10273_v58, %v2674_v26 }
 0x6ae   : > { %7687 = vmatmul.mubr.msk.f32.vlgmr.msra.gmra.mxu0 %vm730_vm9, %v10261_v10  ;;  %7747 = vmatprep.subr.msk.mxu0 %vm236_vm0, %v13009_v56 }
 0x6af   : > { %v3014_v29 = vpop.permute.xlu0 %3013  ;;  %3236 = vmatprep.subr.mxu1 %v2737_v27  ;;  %v3016_v3 = vpop.permute.xlu1 %3015  ;;  %7748 = vmatpush1.msk.msra.mxu0 %vm236_vm0, %v13009_v56  ;;  %v10303_v27 = vld [vmem:[#allocation3 + $0x420] sm:$0xff] }
 0x6b0   : > { %v3022_v55 = vsel %vm3019_vm10, %v10103_v8, %v3014_v29  ;;  %v3021_v42 = vsel %vm3019_vm10, %v3014_v29, %v3016_v3  ;;  %3237 = vmatpush1.msra.mxu1 %v2736_v41  ;;  %3343 = vmatprep.mubr.f32.mxu0 %v13006_v46  ;;  %13095 = vst [vmem:[#allocation20_spill] sm:$0xff] %v10303_v27 }
 0x6b1   : > { %v3040_v48 = vmul.f32 %v10283_v28, %v3022_v55  ;;  %3238 = vmatprep.subr.mxu1 %v2688_v38  ;;  %v3041_v43 = vmul.f32 %v10288_v61, %v3021_v42  ;;  %v10358_v61 = vld [vmem:[#allocation3 + $0x3a8] sm:$0xff] }
 0x6b2   : > { %3239 = vmatpush1.msra.mxu1 %v2687_v53  ;;  %v10323_v53 = vld [vmem:[#allocation3 + $0x470] sm:$0xff] }
 0x6b3   : > { %v2965_v26 = vpop.permute.xlu0 %2964  ;;  %3293 = vmatprep.subr.mxu0 %v3041_v43  ;;  %v2967_v58 = vpop.permute.xlu1 %2966  ;;  %7749 = vmatprep.subr.msk.mxu1 %vm236_vm0, %v13009_v56  ;;  %13097 = vst [vmem:[#allocation19_spill] sm:$0xff] %v10323_v53 }
 0x6b4   : > { %v2973_v8 = vsel %vm2970_vm11, %v10116_v36, %v2965_v26  ;;  %v2972_v29 = vsel %vm2970_vm11, %v2965_v26, %v2967_v58  ;;  %3294 = vmatpush1.msra.mxu0 %v3040_v48  ;;  %7688 = vmatmul.mubr.msk.f32.vlgmr.msra.gmra.mxu1 %vm730_vm9, %v10261_v10  ;;  %v10325_v36 = vld [vmem:[#allocation3 + $0x478] sm:$0xff] }
 0x6b5   : > { %v2991_v41 = vmul.f32 %v10303_v27, %v2973_v8  ;;  %v2992_v38 = vmul.f32 %v10305_v25, %v2972_v29  ;;  %7750 = vmatpush1.msk.msra.mxu1 %vm236_vm0, %v13009_v56  ;;  %3414 = vmatprep.mubr.f32.mxu1 %v13006_v46  ;;  %13098 = vst [vmem:[#allocation22_spill] sm:$0xff] %v10325_v36  ;;  %v10334_v29 = vld [vmem:[#allocation3 + $0x430] sm:$0xff]  ;;  %v10336_v27 = vld [vmem:[#allocation3 + $0x3e8] sm:$0xff]  ;;  %v10338_v25 = vld [vmem:[#allocation3 + $0x438] sm:$0xff] }
 0x6b6   : > { %13099 = vst [vmem:[#allocation27_spill] sm:$0xff] %v10338_v25 }
 0x6b7   : > { %v3018_v55 = vpop.permute.xlu0 %3017  ;;  %3295 = vmatprep.subr.mxu0 %v2992_v38  ;;  %v2916_v42 = vpop.permute.xlu1 %2915  ;;  %v10340_v38 = vld [vmem:[#allocation3 + $0x3e0] sm:$0xff] }
 0x6b8   : > { %v3020_v48 = vsel %vm3019_vm10, %v3016_v3, %v3018_v55  ;;  %v3027_v43 = vsel %vm3019_vm10, %v3018_v55, %v9998_v37  ;;  %3296 = vmatpush1.msra.mxu0 %v2991_v41  ;;  %v2924_v3 = vsel %vm2921_vm12, %v10129_v39, %v2916_v42 }
 0x6b9   : > { %v3042_v26 = vmul.f32 %v10323_v53, %v3020_v48  ;;  %v3043_v8 = vmul.f32 %v10325_v36, %v3027_v43  ;;  %v10356_v53 = vld [vmem:[#allocation3 + $0x3a0] sm:$0xff] }
 0x6bb   : > { %v2918_v28 = vpop.permute.xlu0 %2917  ;;  %3364 = vmatprep.subr.mxu1 %v3043_v8  ;;  %v2969_v37 = vpop.permute.xlu1 %2968  ;;  %v2942_v8 = vmul.f32 %v10340_v38, %v2924_v3 }
 0x6bc   : > { %v2923_v41 = vsel %vm2921_vm12, %v2916_v42, %v2918_v28  ;;  %v2971_v55 = vsel %vm2970_vm11, %v2967_v58, %v2969_v37  ;;  %v2978_v48 = vsel %vm2970_vm11, %v2969_v37, %v10000_v50  ;;  %3365 = vmatpush1.msra.mxu1 %v3042_v26 }
 0x6bd   : > { %v2993_v43 = vmul.f32 %v10334_v29, %v2971_v55  ;;  %v2943_v36 = vmul.f32 %v10336_v27, %v2923_v41  ;;  %v2994_v39 = vmul.f32 %v10338_v25, %v2978_v48  ;;  %v10367_v41 = vld [vmem:[#allocation3 + $0x3f0] sm:$0xff]  ;;  %v10369_v55 = vld [vmem:[#allocation3 + $0x3f8] sm:$0xff] }
 0x6be   : > { %13100 = vst [vmem:[#allocation23_spill] sm:$0xff] %v10367_v41  ;;  %13101 = vst [vmem:[#allocation28_spill] sm:$0xff] %v10369_v55 }
 0x6bf   : > { %v2867_v42 = vpop.permute.xlu0 %2866  ;;  %3297 = vmatprep.subr.mxu0 %v2943_v36  ;;  %3366 = vmatprep.subr.mxu1 %v2994_v39  ;;  %v2869_v58 = vpop.permute.xlu1 %2868 }
 0x6c0   : > { %v2875_v50 = vsel %vm2872_vm13, %v10142_v31, %v2867_v42  ;;  %v2874_v26 = vsel %vm2872_vm13, %v2867_v42, %v2869_v58  ;;  %3298 = vmatpush1.msra.mxu0 %v2942_v8  ;;  %3367 = vmatpush1.msra.mxu1 %v2993_v43  ;;  %v10379_v8 = vld [vmem:[#allocation3 + $0x3b8] sm:$0xff] }
 0x6c1   : > { %v2893_v37 = vmul.f32 %v10356_v53, %v2875_v50  ;;  %v2894_v3 = vmul.f32 %v10358_v61, %v2874_v26  ;;  %13102 = vst [vmem:[#allocation24_spill] sm:$0xff] %v10379_v8  ;;  %v10382_v50 = vld [vmem:[#allocation3 + $0x3b0] sm:$0xff] }
 0x6c2   : > { %13103 = vst [vmem:[#allocation25_spill] sm:$0xff] %v10382_v50 }
 0x6c3   : > { %v2920_v36 = vpop.permute.xlu0 %2919  ;;  %3299 = vmatprep.subr.mxu0 %v2894_v3  ;;  %v2871_v48 = vpop.permute.xlu1 %2870  ;;  %v10391_v3 = vld [vmem:[#allocation3 + $0x328] sm:$0xff] }
 0x6c4   : > { %v2922_v39 = vsel %vm2921_vm12, %v2918_v28, %v2920_v36  ;;  %v2929_v31 = vsel %vm2921_vm12, %v2920_v36, %v10010_v52  ;;  %v2880_v43 = vsel %vm2872_vm13, %v2871_v48, %v10012_v45  ;;  %3300 = vmatpush1.msra.mxu0 %v2893_v37  ;;  %v2873_v26 = vsel %vm2872_vm13, %v2869_v58, %v2871_v48  ;;  %v10389_v52 = vld [vmem:[#allocation3 + $0x320] sm:$0xff] }
 0x6c5   : > { %v2944_v42 = vmul.f32 %v10367_v41, %v2922_v39  ;;  %3301 = vmatprep.subr.mxu0 %v9953_v7  ;;  %v2945_v28 = vmul.f32 %v10369_v55, %v2929_v31  ;;  %v2896_v36 = vmul.f32 %v10379_v8, %v2880_v43  ;;  %v2895_v39 = vmul.f32 %v10382_v50, %v2873_v26  ;;  %v10402_v31 = vld [vmem:[#allocation3 + $0x2e0] sm:$0xff]  ;;  %v10450_v8 = vld [vmem:[#allocation3 + $0x268] sm:$0xff] }
 0x6c6   : > { %3302 = vmatpush1.msra.mxu0 %v9910_v54  ;;  %13104 = vst [vmem:[#allocation26_spill] sm:$0xff] %v10402_v31  ;;  %13113 = vst [vmem:[#allocation38_spill] sm:$0xff] %v10450_v8 }
 0x6c7   : > { %v2808_v45 = vpop.permute.xlu0 %2807  ;;  %3368 = vmatprep.subr.mxu1 %v2945_v28  ;;  %v2810_v37 = vpop.permute.xlu1 %2809  ;;  %v10404_v28 = vld [vmem:[#allocation3 + $0x2e8] sm:$0xff] }
 0x6c8   : > { %v2819_v58 = vsel %vm2815_vm14, %v10195_v2, %v2808_v45  ;;  %v2818_v7 = vsel %vm2815_vm14, %v2808_v45, %v2810_v37  ;;  %3369 = vmatpush1.msra.mxu1 %v2944_v42  ;;  %13105 = vst [vmem:[#allocation29_spill] sm:$0xff] %v10404_v28 }
 0x6c9   : > { %v2836_v54 = vmul.f32 %v10389_v52, %v2819_v58  ;;  %3370 = vmatprep.subr.mxu1 %v2896_v36  ;;  %v2837_v48 = vmul.f32 %v10391_v3, %v2818_v7  ;;  %v10417_v58 = vld [vmem:[#allocation3 + $0x338] sm:$0xff] }
 0x6ca   : > { %3371 = vmatpush1.msra.mxu1 %v2895_v39  ;;  %v10415_v39 = vld [vmem:[#allocation3 + $0x330] sm:$0xff]  ;;  %13107 = vst [vmem:[#allocation50_spill] sm:$0xff] %v10417_v58 }
 0x6cb   : > { %v2759_v43 = vpop.permute.xlu0 %2758  ;;  %3303 = vmatprep.subr.mxu0 %v2837_v48  ;;  %3372 = vmatprep.subr.mxu1 %v9930_v17  ;;  %v2761_v26 = vpop.permute.xlu1 %2760  ;;  %13106 = vst [vmem:[#allocation30_spill] sm:$0xff] %v10415_v39 }
 0x6cc   : > { %v2770_v2 = vsel %vm2766_vm15, %v10197_v15, %v2759_v43  ;;  %v2769_v42 = vsel %vm2766_vm15, %v2759_v43, %v2761_v26  ;;  %3304 = vmatpush1.msra.mxu0 %v2836_v54  ;;  %3373 = vmatpush1.msra.mxu1 %v9956_v19  ;;  %v10426_v43 = vld [vmem:[#allocation3 + $0x2f0] sm:$0xff] }
 0x6cd   : > { %v2787_v45 = vmul.f32 %v10402_v31, %v2770_v2  ;;  %v2788_v36 = vmul.f32 %v10404_v28, %v2769_v42  ;;  %13108 = vst [vmem:[#allocation32_spill] sm:$0xff] %v10426_v43  ;;  %v10428_v2 = vld [vmem:[#allocation3 + $0x2a8] sm:$0xff]  ;;  %v10430_v42 = vld [vmem:[#allocation3 + $0x2f8] sm:$0xff] }
 0x6ce   : > { %13109 = vst [vmem:[#allocation31_spill] sm:$0xff] %v10428_v2  ;;  %13110 = vst [vmem:[#allocation47_spill] sm:$0xff] %v10430_v42 }
 0x6cf   : > { %v2812_v17 = vpop.permute.xlu0 %2811  ;;  %3305 = vmatprep.subr.mxu0 %v2788_v36  ;;  %v2710_v7 = vpop.permute.xlu1 %2709  ;;  %v10432_v36 = vld [vmem:[#allocation3 + $0x2a0] sm:$0xff] }
 0x6d0   : > { %v2816_v15 = vsel %vm2815_vm14, %v2812_v17, %v10160_v21  ;;  %v2817_v54 = vsel %vm2815_vm14, %v2810_v37, %v2812_v17  ;;  %3306 = vmatpush1.msra.mxu0 %v2787_v45  ;;  %13111 = vst [vmem:[#allocation49_spill] sm:$0xff] %v10432_v36  ;;  %v2721_v21 = vsel %vm2717_vm1, %v10254_v23, %v2710_v7 }
 0x6d1   : > { %v2838_v19 = vmul.f32 %v10415_v39, %v2817_v54  ;;  %v2839_v48 = vmul.f32 %v10417_v58, %v2816_v15  ;;  %v10448_v39 = vld [vmem:[#allocation3 + $0x260] sm:$0xff] }
 0x6d2   : > { %13112 = vst [vmem:[#allocation34_spill] sm:$0xff] %v10448_v39 }
 0x6d3   : > { %v2712_v50 = vpop.permute.xlu0 %2711  ;;  %3374 = vmatprep.subr.mxu1 %v2839_v48  ;;  %v2763_v37 = vpop.permute.xlu1 %2762  ;;  %v2738_v48 = vmul.f32 %v10432_v36, %v2721_v21 }
 0x6d4   : > { %v2720_v45 = vsel %vm2717_vm1, %v2710_v7, %v2712_v50  ;;  %v2767_v17 = vsel %vm2766_vm15, %v2763_v37, %v10162_v30  ;;  %v2768_v15 = vsel %vm2766_vm15, %v2761_v26, %v2763_v37  ;;  %3375 = vmatpush1.msra.mxu1 %v2838_v19 }
 0x6d5   : > { %v2789_v54 = vmul.f32 %v10426_v43, %v2768_v15  ;;  %v2739_v58 = vmul.f32 %v10428_v2, %v2720_v45  ;;  %v2790_v23 = vmul.f32 %v10430_v42, %v2767_v17  ;;  %v10459_v45 = vld [vmem:[#allocation3 + $0x2b0] sm:$0xff]  ;;  %v10461_v17 = vld [vmem:[#allocation3 + $0x2b8] sm:$0xff] }
 0x6d6   : > { %13114 = vst [vmem:[#allocation33_spill] sm:$0xff] %v10459_v45  ;;  %13115 = vst [vmem:[#allocation48_spill] sm:$0xff] %v10461_v17 }
 0x6d7   : > { %v2661_v7 = vpop.permute.xlu0 %2660  ;;  %3307 = vmatprep.subr.mxu0 %v2739_v58  ;;  %3376 = vmatprep.subr.mxu1 %v2790_v23  ;;  %v2663_v30 = vpop.permute.xlu1 %2662 }
 0x6d8   : > { %v2672_v26 = vsel %vm2668_vm2, %v10256_v49, %v2661_v7  ;;  %v2671_v19 = vsel %vm2668_vm2, %v2661_v7, %v2663_v30  ;;  %3308 = vmatpush1.msra.mxu0 %v2738_v48  ;;  %3377 = vmatpush1.msra.mxu1 %v2789_v54  ;;  %v10471_v48 = vld [vmem:[#allocation3 + $0x278] sm:$0xff] }
 0x6d9   : > { %v2689_v37 = vmul.f32 %v10448_v39, %v2672_v26  ;;  %v2690_v21 = vmul.f32 %v10450_v8, %v2671_v19  ;;  %13116 = vst [vmem:[#allocation40_spill] sm:$0xff] %v10471_v48  ;;  %v10474_v26 = vld [vmem:[#allocation3 + $0x270] sm:$0xff] }
 0x6da   : > { %13117 = vst [vmem:[#allocation35_spill] sm:$0xff] %v10474_v26 }
 0x6db   : > { %v2714_v58 = vpop.permute.xlu0 %2713  ;;  %3309 = vmatprep.subr.mxu0 %v2690_v21  ;;  %v2665_v15 = vpop.permute.xlu1 %2664 }
 0x6dc   : > { %v2718_v49 = vsel %vm2717_vm1, %v2714_v58, %v10225_v34  ;;  %v2719_v23 = vsel %vm2717_vm1, %v2712_v50, %v2714_v58  ;;  %v2669_v54 = vsel %vm2668_vm2, %v2665_v15, %v10227_v51  ;;  %3310 = vmatpush1.msra.mxu0 %v2689_v37  ;;  %v2670_v19 = vsel %vm2668_vm2, %v2663_v30, %v2665_v15 }
 0x6dd   : > { %v2740_v7 = vmul.f32 %v10459_v45, %v2719_v23  ;;  %v2741_v21 = vmul.f32 %v10461_v17, %v2718_v49  ;;  %7689 = vmatmul.mubr.msk.f32.vlgmr.msra.gmra.mxu0 %vm730_vm9, %v10261_v10  ;;  %7751 = vmatprep.subr.msk.mxu0 %vm236_vm0, %v13009_v56  ;;  %v2692_v51 = vmul.f32 %v10471_v48, %v2669_v54 }
 0x6de   : > { %3978 = vmatprep.mubr.f32.mxu0 %v13006_v46  ;;  %7752 = vmatpush1.msk.msra.mxu0 %vm236_vm0, %v13009_v56  ;;  %v2691_v34 = vmul.f32 %v10474_v26, %v2670_v19 }
 0x6df   : > { %3378 = vmatprep.subr.mxu1 %v2741_v21 }
 0x6e0   : > { %3379 = vmatpush1.msra.mxu1 %v2740_v7 }
 0x6e1   : > { %3380 = vmatprep.subr.mxu1 %v2692_v51 }
 0x6e2   : > { %3381 = vmatpush1.msra.mxu1 %v2691_v34 }
 0x6e3   : > { %7690 = vmatmul.mubr.msk.f32.vlgmr.msra.gmra.mxu1 %vm730_vm9, %v10261_v10  ;;  %7753 = vmatprep.subr.msk.mxu1 %vm236_vm0, %v13009_v56 }
 0x6e4   : > { %7754 = vmatpush1.msk.msra.mxu1 %vm236_vm0, %v13009_v56  ;;  %4049 = vmatprep.mubr.f32.mxu1 %v13006_v46 }
 0x76e   : > { %v3203_v50 = vpop.f32.mrf.mxu0 }
 0x76f   : > { %v3421_v30 = vmul.f32 0.1, %v3203_v50 }
 0x770   : > { %v3205_v10 = vpop.f32.mrf.mxu0 }
 0x771   : > { %v10499_v37 = vmax.f32 %v3203_v50, %v3421_v30  ;;  %v3422_v49 = vmul.f32 0.1, %v3205_v10 }
 0x773   : > { %3733 = vrot.lane.b32.xlu1 %v10499_v37, %s8071_s27  ;;  %3781 = vrot.lane.b32.xlu0 %v10499_v37, %s8072_s28  ;;  %v10519_v54 = vmax.f32 %v3205_v10, %v3422_v49 }
 0x774   : > { %v3274_v58 = vpop.f32.mrf.mxu1 }
 0x775   : > { %v3423_v15 = vmul.f32 0.1, %v3274_v58 }
 0x776   : > { %v3276_v7 = vpop.f32.mrf.mxu1 }
 0x777   : > { %3637 = vrot.lane.b32.xlu1 %v10499_v37, %s8073_s29  ;;  %3685 = vrot.lane.b32.xlu0 %v10499_v37, %s8074_s30  ;;  %v10513_v23 = vmax.f32 %v3274_v58, %v3423_v15  ;;  %v3424_v19 = vmul.f32 0.1, %v3276_v7 }
 0x779   : > { %v10545_v21 = vmax.f32 %v3276_v7, %v3424_v19 }
 0x77b   : > { %3533 = vrot.lane.b32.xlu1 %v10499_v37, %s8076_s6  ;;  %3581 = vrot.lane.b32.xlu0 %v10499_v37, %s8075_s5 }
 0x77f   : > { %3437 = vrot.lane.b32.xlu1 %v10499_v37, %s8078_s8  ;;  %3485 = vrot.lane.b32.xlu0 %v10499_v37, %s8077_s7 }
 0x783   : > { %3783 = vrot.lane.b32.xlu0 %v10519_v54, %s8072_s28  ;;  %3785 = vrot.lane.b32.xlu1 %v10513_v23, %s8072_s28 }
 0x787   : > { %3737 = vrot.lane.b32.xlu0 %v10513_v23, %s8071_s27  ;;  %3735 = vrot.lane.b32.xlu1 %v10519_v54, %s8071_s27 }
 0x78b   : > { %3687 = vrot.lane.b32.xlu0 %v10519_v54, %s8074_s30  ;;  %3689 = vrot.lane.b32.xlu1 %v10513_v23, %s8074_s30 }
 0x78f   : > { %3641 = vrot.lane.b32.xlu0 %v10513_v23, %s8073_s29  ;;  %3639 = vrot.lane.b32.xlu1 %v10519_v54, %s8073_s29 }
 0x793   : > { %3535 = vrot.lane.b32.xlu0 %v10519_v54, %s8076_s6  ;;  %3583 = vrot.lane.b32.xlu1 %v10519_v54, %s8075_s5 }
 0x797   : > { %3439 = vrot.lane.b32.xlu0 %v10519_v54, %s8078_s8  ;;  %3487 = vrot.lane.b32.xlu1 %v10519_v54, %s8077_s7 }
 0x79b   : > { %3585 = vrot.lane.b32.xlu0 %v10513_v23, %s8075_s5  ;;  %3691 = vrot.lane.b32.xlu1 %v10545_v21, %s8074_s30 }
 0x79d   : > { %v3345_v51 = vpop.f32.mrf.mxu0 }
 0x79e   : > { %v3425_v34 = vmul.f32 0.1, %v3345_v51 }
 0x79f   : > { %3537 = vrot.lane.b32.xlu0 %v10513_v23, %s8076_s6  ;;  %3587 = vrot.lane.b32.xlu1 %v10545_v21, %s8075_s5  ;;  %v3347_v58 = vpop.f32.mrf.mxu0 }
 0x7a0   : > { %v10563_v50 = vmax.f32 %v3345_v51, %v3425_v34  ;;  %v3426_v49 = vmul.f32 0.1, %v3347_v58 }
 0x7a2   : > { %13118 = vst [vmem:[#allocation42_spill] sm:$0xff] %v10563_v50  ;;  %v10587_v7 = vmax.f32 %v3347_v58, %v3426_v49 }
 0x7a3   : > { %3489 = vrot.lane.b32.xlu0 %v10513_v23, %s8077_s7  ;;  %3539 = vrot.lane.b32.xlu1 %v10545_v21, %s8076_s6  ;;  %v3416_v30 = vpop.f32.mrf.mxu1 }
 0x7a4   : > { %v3427_v10 = vmul.f32 0.1, %v3416_v30 }
 0x7a5   : > { %v3418_v19 = vpop.f32.mrf.mxu1 }
 0x7a6   : > { %v10577_v15 = vmax.f32 %v3416_v30, %v3427_v10  ;;  %v3428_v51 = vmul.f32 0.1, %v3418_v19 }
 0x7a7   : > { %3441 = vrot.lane.b32.xlu0 %v10513_v23, %s8078_s8  ;;  %3491 = vrot.lane.b32.xlu1 %v10545_v21, %s8077_s7 }
 0x7a8   : > { %13119 = vst [vmem:[#allocation36_spill] sm:$0xff] %v10577_v15  ;;  %v10605_v34 = vmax.f32 %v3418_v19, %v3428_v51 }
 0x7aa   : > { %13120 = vst [vmem:[#allocation41_spill] sm:$0xff] %v10605_v34 }
 0x7ab   : > { %3443 = vrot.lane.b32.xlu1 %v10545_v21, %s8078_s8  ;;  %3787 = vrot.lane.b32.xlu0 %v10545_v21, %s8072_s28 }
 0x7af   : > { %3739 = vrot.lane.b32.xlu0 %v10545_v21, %s8071_s27  ;;  %3789 = vrot.lane.b32.xlu1 %v10563_v50, %s8072_s28 }
 0x7b3   : > { %3643 = vrot.lane.b32.xlu0 %v10545_v21, %s8073_s29  ;;  %3741 = vrot.lane.b32.xlu1 %v10563_v50, %s8071_s27 }
 0x7b7   : > { %3693 = vrot.lane.b32.xlu0 %v10563_v50, %s8074_s30  ;;  %3645 = vrot.lane.b32.xlu1 %v10563_v50, %s8073_s29 }
 0x7bb   : > { %3589 = vrot.lane.b32.xlu0 %v10563_v50, %s8075_s5  ;;  %3793 = vrot.lane.b32.xlu1 %v10577_v15, %s8072_s28 }
 0x7bf   : > { %3791 = vrot.lane.b32.xlu0 %v10587_v7, %s8072_s28  ;;  %3745 = vrot.lane.b32.xlu1 %v10577_v15, %s8071_s27 }
 0x7c3   : > { %3743 = vrot.lane.b32.xlu0 %v10587_v7, %s8071_s27  ;;  %3697 = vrot.lane.b32.xlu1 %v10577_v15, %s8074_s30 }
 0x7c7   : > { %3695 = vrot.lane.b32.xlu0 %v10587_v7, %s8074_s30  ;;  %3649 = vrot.lane.b32.xlu1 %v10577_v15, %s8073_s29 }
 0x7cb   : > { %3647 = vrot.lane.b32.xlu0 %v10587_v7, %s8073_s29  ;;  %3591 = vrot.lane.b32.xlu1 %v10587_v7, %s8075_s5 }
 0x7cf   : > { %3547 = vrot.lane.b32.xlu1 %v10605_v34, %s8076_s6  ;;  %3595 = vrot.lane.b32.xlu0 %v10605_v34, %s8075_s5 }
 0x7d3   : > { %3451 = vrot.lane.b32.xlu1 %v10605_v34, %s8078_s8  ;;  %3499 = vrot.lane.b32.xlu0 %v10605_v34, %s8077_s7 }
 0x7d7   : > { %3541 = vrot.lane.b32.xlu1 %v10563_v50, %s8076_s6  ;;  %3543 = vrot.lane.b32.xlu0 %v10587_v7, %s8076_s6 }
 0x7db   : > { %3495 = vrot.lane.b32.xlu1 %v10587_v7, %s8077_s7  ;;  %3493 = vrot.lane.b32.xlu0 %v10563_v50, %s8077_s7 }
 0x7df   : > { %3747 = vrot.lane.b32.xlu1 %v10605_v34, %s8071_s27  ;;  %3795 = vrot.lane.b32.xlu0 %v10605_v34, %s8072_s28 }
 0x7e3   : > { %3651 = vrot.lane.b32.xlu1 %v10605_v34, %s8073_s29  ;;  %3699 = vrot.lane.b32.xlu0 %v10605_v34, %s8074_s30 }
 0x7e5   : > { %v10631_v30 = vpop.permute.xlu0 %3781  ;;  %v10633_v10 = vpop.permute.xlu1 %3733 }
 0x7e7   : > { %3447 = vrot.lane.b32.xlu1 %v10587_v7, %s8078_s8  ;;  %3445 = vrot.lane.b32.xlu0 %v10563_v50, %s8078_s8 }
 0x7e9   : > { %v10639_v58 = vpop.permute.xlu0 %3685  ;;  %v10641_v49 = vpop.permute.xlu1 %3637 }
 0x7ea   : > { %13121 = vst [vmem:[#allocation37_spill] sm:$0xff] %v10641_v49 }
 0x7eb   : > { %3545 = vrot.lane.b32.xlu1 %v10577_v15, %s8076_s6  ;;  %3593 = vrot.lane.b32.xlu0 %v10577_v15, %s8075_s5 }
 0x7ed   : > { %v10647_v19 = vpop.permute.xlu0 %3581  ;;  %v10649_v51 = vpop.permute.xlu1 %3533 }
 0x7ef   : > { %3449 = vrot.lane.b32.xlu1 %v10577_v15, %s8078_s8  ;;  %3497 = vrot.lane.b32.xlu0 %v10577_v15, %s8077_s7 }
 0x7f1   : > { %v10655_v26 = vpop.permute.xlu0 %3485  ;;  %v10657_v48 = vpop.permute.xlu1 %3437 }
 0x7f5   : > { %v3784_v17 = vpop.permute.xlu0 %3783  ;;  %v3786_v45 = vpop.permute.xlu1 %3785 }
 0x7f6   : > { %v3803_v43 = vsel %vm3019_vm10, %v10631_v30, %v3784_v17  ;;  %v3802_v42 = vsel %vm3019_vm10, %v3784_v17, %v3786_v45 }
 0x7f7   : > { %v3813_v34 = vmul.f32 %v3803_v43, %v10034_v40  ;;  %v3814_v39 = vmul.f32 %v3802_v42, %v10032_v47 }
 0x7f9   : > { %v3738_v8 = vpop.permute.xlu0 %3737  ;;  %3928 = vmatprep.subr.mxu0 %v3814_v39  ;;  %v3736_v15 = vpop.permute.xlu1 %3735 }
 0x7fa   : > { %v3754_v2 = vsel %vm2970_vm11, %v3736_v15, %v3738_v8  ;;  %v3755_v36 = vsel %vm2970_vm11, %v10633_v10, %v3736_v15  ;;  %3929 = vmatpush1.msra.mxu0 %v3813_v34 }
 0x7fb   : > { %v3765_v31 = vmul.f32 %v3755_v36, %v10046_v13  ;;  %v3766_v28 = vmul.f32 %v3754_v2, %v10044_v57 }
 0x7fd   : > { %v3688_v17 = vpop.permute.xlu0 %3687  ;;  %3930 = vmatprep.subr.mxu0 %v3766_v28  ;;  %v3690_v40 = vpop.permute.xlu1 %3689 }
 0x7fe   : > { %v3707_v47 = vsel %vm2921_vm12, %v10639_v58, %v3688_v17  ;;  %v3706_v39 = vsel %vm2921_vm12, %v3688_v17, %v3690_v40  ;;  %3931 = vmatpush1.msra.mxu0 %v3765_v31 }
 0x7ff   : > { %v3717_v43 = vmul.f32 %v3707_v47, %v10056_v44  ;;  %v3718_v42 = vmul.f32 %v3706_v39, %v10054_v9 }
 0x801   : > { %v3642_v15 = vpop.permute.xlu0 %3641  ;;  %3932 = vmatprep.subr.mxu0 %v3718_v42  ;;  %v3640_v13 = vpop.permute.xlu1 %3639 }
 0x802   : > { %v3658_v57 = vsel %vm2872_vm13, %v3640_v13, %v3642_v15  ;;  %v3659_v28 = vsel %vm2872_vm13, %v10641_v49, %v3640_v13  ;;  %3933 = vmatpush1.msra.mxu0 %v3717_v43 }
 0x803   : > { %v3669_v2 = vmul.f32 %v3659_v28, %v10072_v62  ;;  %v3670_v36 = vmul.f32 %v3658_v57, %v10070_v20 }
 0x805   : > { %v10687_v31 = vpop.permute.xlu0 %3535  ;;  %3934 = vmatprep.subr.mxu0 %v3670_v36  ;;  %v3584_v44 = vpop.permute.xlu1 %3583 }
 0x806   : > { %v3603_v9 = vsel %vm2815_vm14, %v10647_v19, %v3584_v44  ;;  %3935 = vmatpush1.msra.mxu0 %v3669_v2 }
 0x807   : > { %3936 = vmatprep.subr.mxu0 %v10519_v54  ;;  %v3614_v34 = vmul.f32 %v3603_v9, %v10090_v11 }
 0x808   : > { %3937 = vmatpush1.msra.mxu0 %v10499_v37 }
 0x809   : > { %v10695_v17 = vpop.permute.xlu0 %3439  ;;  %3938 = vmatprep.subr.mxu0 %v3614_v34  ;;  %v10697_v62 = vpop.permute.xlu1 %3487 }
 0x80d   : > { %v3586_v20 = vpop.permute.xlu0 %3585  ;;  %v3692_v47 = vpop.permute.xlu1 %3691 }
 0x811   : > { %v3538_v39 = vpop.permute.xlu0 %3537  ;;  %v10699_v43 = vpop.permute.xlu1 %3587 }
 0x815   : > { %v3490_v42 = vpop.permute.xlu0 %3489  ;;  %v10701_v13 = vpop.permute.xlu1 %3539 }
 0x819   : > { %v3442_v57 = vpop.permute.xlu0 %3441  ;;  %v10703_v28 = vpop.permute.xlu1 %3491 }
 0x81d   : > { %v3788_v54 = vpop.permute.xlu0 %3787  ;;  %v10705_v11 = vpop.permute.xlu1 %3443 }
 0x81e   : > { %v3801_v37 = vsel %vm3019_vm10, %v3786_v45, %v3788_v54 }
 0x81f   : > { %v3815_v55 = vmul.f32 %v3801_v37, %v10099_v32 }
 0x821   : > { %v3740_v2 = vpop.permute.xlu0 %3739  ;;  %v10709_v36 = vpop.permute.xlu1 %3789 }
 0x822   : > { %v3800_v9 = vsel %vm3019_vm10, %v3788_v54, %v10709_v36  ;;  %v3753_v50 = vsel %vm2970_vm11, %v3738_v8, %v3740_v2 }
 0x823   : > { %v3816_v34 = vmul.f32 %v3800_v9, %v10101_v6  ;;  %v3767_v54 = vmul.f32 %v3753_v50, %v10112_v60  ;;  %v3705_v6 = vsel %vm2921_vm12, %v3690_v40, %v3692_v47 }
 0x824   : > { %v3719_v50 = vmul.f32 %v3705_v6, %v10125_v4  ;;  %v3553_v4 = vsel %vm2766_vm15, %v3538_v39, %v10701_v13 }
 0x825   : > { %v3644_v49 = vpop.permute.xlu0 %3643  ;;  %3999 = vmatprep.subr.mxu1 %v3816_v34  ;;  %v10718_v41 = vpop.permute.xlu1 %3741 }
 0x826   : > { %v3752_v45 = vsel %vm2970_vm11, %v3740_v2, %v10718_v41  ;;  %4000 = vmatpush1.msra.mxu1 %v3815_v55  ;;  %v3657_v60 = vsel %vm2872_vm13, %v3642_v15, %v3644_v49 }
 0x827   : > { %v3768_v25 = vmul.f32 %v3752_v45, %v10114_v35  ;;  %v3671_v9 = vmul.f32 %v3657_v60, %v10138_v33 }
 0x829   : > { %v10727_v32 = vpop.permute.xlu0 %3693  ;;  %4001 = vmatprep.subr.mxu1 %v3768_v25  ;;  %v10729_v8 = vpop.permute.xlu1 %3645 }
 0x82a   : > { %v3704_v37 = vsel %vm2921_vm12, %v3692_v47, %v10727_v32  ;;  %v3656_v55 = vsel %vm2872_vm13, %v3644_v49, %v10729_v8  ;;  %4002 = vmatpush1.msra.mxu1 %v3767_v54  ;;  %v3601_v47 = vsel %vm2815_vm14, %v3586_v20, %v10699_v43  ;;  %v3602_v49 = vsel %vm2815_vm14, %v3584_v44, %v3586_v20 }
 0x82b   : > { %v3720_v35 = vmul.f32 %v3704_v37, %v10127_v5  ;;  %v3672_v2 = vmul.f32 %v3656_v55, %v10140_v16  ;;  %v3554_v5 = vsel %vm2766_vm15, %v10687_v31, %v3538_v39  ;;  %v3616_v33 = vmul.f32 %v3601_v47, %v10186_v0 }
 0x82c   : > { %v3615_v34 = vmul.f32 %v3602_v49, %v10188_v22  ;;  %v3505_v44 = vsel %vm2717_vm1, %v3490_v42, %v10703_v28  ;;  %v3506_v20 = vsel %vm2717_vm1, %v10697_v62, %v3490_v42  ;;  %v3568_v39 = vmul.f32 %v3553_v4, %v10209_v24  ;;  %v13124_v49 = vld [vmem:[#allocation15_spill] sm:$0xff] }
 0x82d   : > { %v10741_v40 = vpop.permute.xlu0 %3589  ;;  %4003 = vmatprep.subr.mxu1 %v3720_v35  ;;  %v10743_v25 = vpop.permute.xlu1 %3793  ;;  %v3457_v0 = vsel %vm2668_vm2, %v3442_v57, %v10705_v11  ;;  %v3458_v22 = vsel %vm2668_vm2, %v10695_v17, %v3442_v57  ;;  %v3520_v42 = vmul.f32 %v3505_v44, %v10245_v14  ;;  %v3519_v54 = vmul.f32 %v3506_v20, %v10247_v18  ;;  %v10789_v57 = vld [vmem:[%s12871_s1 + $0x20] sm:$0xff]  ;;  %v13126_v20 = vld [vmem:[#allocation10_spill] sm:$0xff] }
 0x82e   : > { %4004 = vmatpush1.msra.mxu1 %v3719_v50  ;;  %v3472_v24 = vmul.f32 %v3457_v0, %v10271_v59  ;;  %v3555_v59 = vsel %vm2766_vm15, %v10649_v51, %v10687_v31  ;;  %v3507_v47 = vsel %vm2717_vm1, %v10655_v26, %v10697_v62  ;;  %v13123_v31 = vld [vmem:[#allocation14_spill] sm:$0xff]  ;;  %v13128_v0 = vld [vmem:[#allocation12_spill] sm:$0xff] }
 0x82f   : > { %4005 = vmatprep.subr.mxu1 %v3672_v2  ;;  %v3566_v4 = vmul.f32 %v3555_v59, %v13124_v49 }
 0x830   : > { %4006 = vmatpush1.msra.mxu1 %v3671_v9 }
 0x831   : > { %v3792_v16 = vpop.permute.xlu0 %3791  ;;  %4007 = vmatprep.subr.mxu1 %v10545_v21  ;;  %v10759_v15 = vpop.permute.xlu1 %3745  ;;  %v3567_v21 = vmul.f32 %v3554_v5, %v10211_v63  ;;  %v13122_v63 = vld [vmem:[#allocation16_spill] sm:$0xff]  ;;  %v3459_v5 = vsel %vm2668_vm2, %v10657_v48, %v10695_v17  ;;  %v3518_v17 = vmul.f32 %v3507_v47, %v13126_v20 }
 0x832   : > { %4008 = vmatpush1.msra.mxu1 %v10513_v23  ;;  %v3471_v6 = vmul.f32 %v3458_v22, %v13122_v63  ;;  %v3470_v22 = vmul.f32 %v3459_v5, %v13128_v0 }
 0x833   : > { %4009 = vmatprep.subr.mxu1 %v3616_v33 }
 0x834   : > { %4010 = vmatpush1.msra.mxu1 %v3615_v34 }
 0x835   : > { %v3744_v45 = vpop.permute.xlu0 %3743  ;;  %4011 = vmatprep.subr.mxu1 %v3568_v39  ;;  %v10778_v23 = vpop.permute.xlu1 %3697  ;;  %v13127_v39 = vld [vmem:[#allocation11_spill] sm:$0xff] }
 0x836   : > { %4012 = vmatpush1.msra.mxu1 %v3567_v21  ;;  %v3751_v59 = vsel %vm2970_vm11, %v10718_v41, %v3744_v45 }
 0x837   : > { %4013 = vmatprep.subr.mxu1 %v3520_v42  ;;  %v3798_v42 = vsel %vm3019_vm10, %v3792_v16, %v10743_v25 }
 0x838   : > { %4014 = vmatpush1.msra.mxu1 %v3519_v54  ;;  %v13129_v54 = vld [vmem:[#allocation13_spill] sm:$0xff] }
 0x839   : > { %v3696_v37 = vpop.permute.xlu0 %3695  ;;  %4015 = vmatprep.subr.mxu1 %v3472_v24  ;;  %v10784_v55 = vpop.permute.xlu1 %3649 }
 0x83a   : > { %4016 = vmatpush1.msra.mxu1 %v3471_v6  ;;  %v3750_v6 = vsel %vm2970_vm11, %v3744_v45, %v10759_v15  ;;  %v3702_v47 = vsel %vm2921_vm12, %v3696_v37, %v10778_v23  ;;  %v3703_v45 = vsel %vm2921_vm12, %v10727_v32, %v3696_v37  ;;  %v3600_v32 = vsel %vm2815_vm14, %v10699_v43, %v10741_v40 }
 0x83b   : > { %7757 = vmatprep.subr.msk.mxu1 %vm236_vm0, %v13009_v56  ;;  %7693 = vmatmul.mubr.msk.f32.vlgmr.msra.gmra.mxu1 %vm730_vm9, %v10789_v57  ;;  %v3721_v37 = vmul.f32 %v3703_v45, %v10340_v38  ;;  %v3617_v0 = vmul.f32 %v3600_v32, %v10389_v52 }
 0x83c   : > { %7758 = vmatpush1.msk.msra.mxu1 %vm236_vm0, %v13009_v56  ;;  %4191 = vmatprep.mubr.f32.mxu1 %v13006_v46 }
 0x83d   : > { %v3648_v18 = vpop.permute.xlu0 %3647  ;;  %v10800_v14 = vpop.permute.xlu1 %3591 }
 0x841   : > { %v10806_v60 = vpop.permute.xlu0 %3595  ;;  %v10808_v35 = vpop.permute.xlu1 %3547 }
 0x842   : > { %v3604_v50 = vsel %vm2815_vm14, %v10806_v60, %v10647_v19  ;;  %v3556_v2 = vsel %vm2766_vm15, %v10808_v35, %v10649_v51  ;;  %v13125_v19 = vld [vmem:[#allocation9_spill] sm:$0xff] }
 0x843   : > { %v3613_v9 = vmul.f32 %v3604_v50, %v13123_v31  ;;  %v3565_v33 = vmul.f32 %v3556_v2, %v13125_v19  ;;  %v13130_v50 = vld [vmem:[#allocation18_spill] sm:$0xff]  ;;  %v3654_v19 = vsel %vm2872_vm13, %v3648_v18, %v10784_v55 }
 0x844   : > { %v3818_v2 = vmul.f32 %v3798_v42, %v13130_v50  ;;  %v3674_v38 = vmul.f32 %v3654_v19, %v10358_v61  ;;  %v13140_v50 = vld [vmem:[#allocation28_spill] sm:$0xff] }
 0x845   : > { %v10829_v34 = vpop.permute.xlu0 %3499  ;;  %3939 = vmatpush1.msra.mxu0 %v3613_v9  ;;  %v10831_v51 = vpop.permute.xlu1 %3451  ;;  %v13132_v9 = vld [vmem:[#allocation21_spill] sm:$0xff] }
 0x846   : > { %v3508_v62 = vsel %vm2717_vm1, %v10829_v34, %v10655_v26  ;;  %v3460_v44 = vsel %vm2668_vm2, %v10831_v51, %v10657_v48  ;;  %3940 = vmatprep.subr.mxu0 %v3566_v4  ;;  %v3799_v48 = vsel %vm3019_vm10, %v10709_v36, %v3792_v16  ;;  %v13131_v36 = vld [vmem:[#allocation17_spill] sm:$0xff]  ;;  %v3770_v49 = vmul.f32 %v3750_v6, %v13132_v9  ;;  %v13133_v4 = vld [vmem:[#allocation20_spill] sm:$0xff] }
 0x847   : > { %v3517_v21 = vmul.f32 %v3508_v62, %v13127_v39  ;;  %3941 = vmatpush1.msra.mxu0 %v3565_v33  ;;  %v3469_v26 = vmul.f32 %v3460_v44, %v13129_v54  ;;  %v3817_v16 = vmul.f32 %v3799_v48, %v13131_v36  ;;  %v3769_v5 = vmul.f32 %v3751_v59, %v13133_v4  ;;  %v13138_v6 = vld [vmem:[#allocation37_spill] sm:$0xff]  ;;  %v13142_v36 = vld [vmem:[#allocation26_spill] sm:$0xff]  ;;  %v13144_v4 = vld [vmem:[#allocation24_spill] sm:$0xff] }
 0x848   : > { %3942 = vmatprep.subr.mxu0 %v3518_v17  ;;  %v3655_v33 = vsel %vm2872_vm13, %v10729_v8, %v3648_v18  ;;  %v3722_v62 = vmul.f32 %v3702_v47, %v10336_v27  ;;  %v3599_v44 = vsel %vm2815_vm14, %v10741_v40, %v10800_v14  ;;  %v13134_v18 = vld [vmem:[#allocation19_spill] sm:$0xff]  ;;  %v13143_v47 = vld [vmem:[#allocation49_spill] sm:$0xff] }
 0x849   : > { %v10848_v24 = vpop.permute.xlu0 %3543  ;;  %3943 = vmatpush1.msra.mxu0 %v3517_v21  ;;  %v3542_v63 = vpop.permute.xlu1 %3541  ;;  %v3673_v8 = vmul.f32 %v3655_v33, %v10356_v53  ;;  %v13135_v21 = vld [vmem:[#allocation22_spill] sm:$0xff]  ;;  %v3618_v61 = vmul.f32 %v3599_v44, %v10391_v3  ;;  %v13146_v33 = vld [vmem:[#allocation25_spill] sm:$0xff] }
 0x84a   : > { %3944 = vmatprep.subr.mxu0 %v3470_v22 }
 0x84b   : > { %3945 = vmatpush1.msra.mxu0 %v3469_v26 }
 0x84c   : > { %7692 = vmatmul.mubr.msk.f32.vlgmr.msra.gmra.mxu0 %vm730_vm9, %v10789_v57  ;;  %7755 = vmatprep.subr.msk.mxu0 %vm236_vm0, %v13009_v56 }
 0x84d   : > { %v3494_v31 = vpop.permute.xlu0 %3493  ;;  %7756 = vmatpush1.msk.msra.mxu0 %vm236_vm0, %v13009_v56  ;;  %v10872_v41 = vpop.permute.xlu1 %3495  ;;  %4120 = vmatprep.mubr.f32.mxu0 %v13006_v46 }
 0x84e   : > { %4070 = vmatprep.subr.mxu0 %v3818_v2  ;;  %v3503_v22 = vsel %vm2717_vm1, %v3494_v31, %v10872_v41 }
 0x84f   : > { %4071 = vmatpush1.msra.mxu0 %v3817_v16 }
 0x850   : > { %4072 = vmatprep.subr.mxu0 %v3770_v49 }
 0x851   : > { %v3796_v20 = vpop.permute.xlu0 %3795  ;;  %4073 = vmatpush1.msra.mxu0 %v3769_v5  ;;  %v3748_v17 = vpop.permute.xlu1 %3747 }
 0x852   : > { %v3797_v27 = vsel %vm3019_vm10, %v10743_v25, %v3796_v20  ;;  %v3804_v43 = vsel %vm3019_vm10, %v3796_v20, %v10631_v30  ;;  %4074 = vmatprep.subr.mxu0 %v3722_v62  ;;  %v3749_v40 = vsel %vm2970_vm11, %v10759_v15, %v3748_v17  ;;  %v3756_v53 = vsel %vm2970_vm11, %v3748_v17, %v10633_v10 }
 0x853   : > { %v3819_v39 = vmul.f32 %v3797_v27, %v13134_v18  ;;  %4075 = vmatpush1.msra.mxu0 %v3721_v37  ;;  %v3820_v25 = vmul.f32 %v3804_v43, %v13135_v21  ;;  %v3551_v30 = vsel %vm2766_vm15, %v3542_v63, %v10848_v24  ;;  %v3552_v15 = vsel %vm2766_vm15, %v10701_v13, %v3542_v63  ;;  %v13137_v63 = vld [vmem:[#allocation23_spill] sm:$0xff]  ;;  %v13147_v37 = vld [vmem:[#allocation38_spill] sm:$0xff]  ;;  %v13151_v21 = vld [vmem:[#allocation36_spill] sm:$0xff] }
 0x854   : > { %4076 = vmatprep.subr.mxu0 %v3674_v38  ;;  %v3504_v10 = vsel %vm2717_vm1, %v10703_v28, %v3494_v31  ;;  %v3771_v54 = vmul.f32 %v3749_v40, %v10334_v29  ;;  %v13136_v28 = vld [vmem:[#allocation27_spill] sm:$0xff]  ;;  %v13139_v29 = vld [vmem:[#allocation42_spill] sm:$0xff]  ;;  %v3569_v16 = vmul.f32 %v3552_v15, %v13142_v36  ;;  %v13149_v38 = vld [vmem:[#allocation41_spill] sm:$0xff] }
 0x855   : > { %v3700_v52 = vpop.permute.xlu0 %3699  ;;  %4077 = vmatpush1.msra.mxu0 %v3673_v8  ;;  %4141 = vmatprep.subr.mxu1 %v3820_v25  ;;  %v3652_v42 = vpop.permute.xlu1 %3651  ;;  %v3772_v26 = vmul.f32 %v3756_v53, %v13136_v28  ;;  %v3521_v31 = vmul.f32 %v3504_v10, %v13143_v47  ;;  %v13148_v8 = vld [vmem:[#allocation34_spill] sm:$0xff] }
 0x856   : > { %v3701_v3 = vsel %vm2921_vm12, %v10778_v23, %v3700_v52  ;;  %v3708_v13 = vsel %vm2921_vm12, %v3700_v52, %v10639_v58  ;;  %4078 = vmatprep.subr.mxu0 %v10587_v7  ;;  %v3660_v59 = vsel %vm2872_vm13, %v3652_v42, %v13138_v6  ;;  %4142 = vmatpush1.msra.mxu1 %v3819_v39  ;;  %v13141_v7 = vld [vmem:[#allocation29_spill] sm:$0xff]  ;;  %v13150_v39 = vld [vmem:[#allocation30_spill] sm:$0xff] }
 0x857   : > { %v3723_v48 = vmul.f32 %v3701_v3, %v13137_v63  ;;  %4079 = vmatpush1.msra.mxu0 %v13139_v29  ;;  %v3724_v2 = vmul.f32 %v3708_v13, %v13140_v50  ;;  %v3653_v23 = vsel %vm2872_vm13, %v10784_v55, %v3652_v42  ;;  %4143 = vmatprep.subr.mxu1 %v3772_v26  ;;  %v13145_v55 = vld [vmem:[#allocation31_spill] sm:$0xff]  ;;  %v13155_v52 = vld [vmem:[#allocation33_spill] sm:$0xff]  ;;  %v13156_v3 = vld [vmem:[#allocation48_spill] sm:$0xff] }
 0x858   : > { %4080 = vmatprep.subr.mxu0 %v3618_v61  ;;  %v3570_v58 = vmul.f32 %v3551_v30, %v13141_v7  ;;  %4144 = vmatpush1.msra.mxu1 %v3771_v54  ;;  %v3676_v5 = vmul.f32 %v3660_v59, %v13144_v4  ;;  %v3522_v19 = vmul.f32 %v3503_v22, %v13145_v55  ;;  %v13153_v30 = vld [vmem:[#allocation47_spill] sm:$0xff] }
 0x859   : > { %v3446_v45 = vpop.permute.xlu0 %3445  ;;  %4081 = vmatpush1.msra.mxu0 %v3617_v0  ;;  %v3448_v9 = vpop.permute.xlu1 %3447  ;;  %4145 = vmatprep.subr.mxu1 %v3724_v2  ;;  %v3675_v62 = vmul.f32 %v3653_v23, %v13146_v33 }
 0x85a   : > { %v3455_v49 = vsel %vm2668_vm2, %v3446_v45, %v3448_v9  ;;  %4082 = vmatprep.subr.mxu0 %v3570_v58  ;;  %v3456_v32 = vsel %vm2668_vm2, %v10705_v11, %v3446_v45  ;;  %4146 = vmatpush1.msra.mxu1 %v3723_v48 }
 0x85b   : > { %4083 = vmatpush1.msra.mxu0 %v3569_v16  ;;  %v3474_v44 = vmul.f32 %v3455_v49, %v13147_v37  ;;  %4147 = vmatprep.subr.mxu1 %v3676_v5  ;;  %v3473_v27 = vmul.f32 %v3456_v32, %v13148_v8 }
 0x85c   : > { %4084 = vmatprep.subr.mxu0 %v3522_v19  ;;  %4148 = vmatpush1.msra.mxu1 %v3675_v62 }
 0x85d   : > { %v3594_v20 = vpop.permute.xlu0 %3593  ;;  %4085 = vmatpush1.msra.mxu0 %v3521_v31  ;;  %v3546_v17 = vpop.permute.xlu1 %3545  ;;  %4149 = vmatprep.subr.mxu1 %v13149_v38 }
 0x85e   : > { %v3597_v43 = vsel %vm2815_vm14, %v3594_v20, %v10806_v60  ;;  %v3598_v11 = vsel %vm2815_vm14, %v10800_v14, %v3594_v20  ;;  %v3549_v18 = vsel %vm2766_vm15, %v3546_v17, %v10808_v35  ;;  %v3550_v53 = vsel %vm2766_vm15, %v10848_v24, %v3546_v17  ;;  %4086 = vmatprep.subr.mxu0 %v3474_v44  ;;  %v13152_v60 = vld [vmem:[#allocation50_spill] sm:$0xff]  ;;  %v13154_v35 = vld [vmem:[#allocation32_spill] sm:$0xff] }
 0x85f   : > { %v3619_v40 = vmul.f32 %v3598_v11, %v13150_v39  ;;  %4150 = vmatpush1.msra.mxu1 %v13151_v21  ;;  %v3620_v25 = vmul.f32 %v3597_v43, %v13152_v60  ;;  %4087 = vmatpush1.msra.mxu0 %v3473_v27  ;;  %v3572_v61 = vmul.f32 %v3549_v18, %v13153_v30  ;;  %v4583_v60 = vld [vmem:[#allocation3 + $0x448] sm:$0xff] }
 0x860   : > { %7694 = vmatmul.mubr.msk.f32.vlgmr.msra.gmra.mxu0 %vm730_vm9, %v10789_v57  ;;  %v3571_v15 = vmul.f32 %v3550_v53, %v13154_v35  ;;  %7759 = vmatprep.subr.msk.mxu0 %vm236_vm0, %v13009_v56 }
 0x861   : > { %v3498_v0 = vpop.permute.xlu0 %3497  ;;  %4151 = vmatprep.subr.mxu1 %v3620_v25  ;;  %v3450_v14 = vpop.permute.xlu1 %3449  ;;  %7760 = vmatpush1.msk.msra.mxu0 %vm236_vm0, %v13009_v56  ;;  %v4582_v25 = vld [vmem:[#allocation3 + $0x440] sm:$0xff] }
 0x862   : > { %v3501_v24 = vsel %vm2717_vm1, %v3498_v0, %v10829_v34  ;;  %v3502_v10 = vsel %vm2717_vm1, %v10872_v41, %v3498_v0  ;;  %v3453_v22 = vsel %vm2668_vm2, %v3450_v14, %v10831_v51  ;;  %4152 = vmatpush1.msra.mxu1 %v3619_v40  ;;  %v3454_v54 = vsel %vm2668_vm2, %v3448_v9, %v3450_v14  ;;  %v13157_v34 = vld [vmem:[#allocation40_spill] sm:$0xff]  ;;  %v13158_v51 = vld [vmem:[#allocation35_spill] sm:$0xff] }
 0x863   : > { %v3523_v42 = vmul.f32 %v3502_v10, %v13155_v52  ;;  %4153 = vmatprep.subr.mxu1 %v3572_v61  ;;  %v3524_v13 = vmul.f32 %v3501_v24, %v13156_v3  ;;  %v3476_v41 = vmul.f32 %v3453_v22, %v13157_v34  ;;  %v3475_v28 = vmul.f32 %v3454_v54, %v13158_v51  ;;  %v4534_v24 = vld [vmem:[#allocation3 + $0x400] sm:$0xff] }
 0x864   : > { %4154 = vmatpush1.msra.mxu1 %v3571_v15  ;;  %4755 = vmatprep.mubr.f32.mxu0 %v13006_v46  ;;  %v4535_v15 = vld [vmem:[#allocation3 + $0x408] sm:$0xff]  ;;  %v4486_v54 = vld [vmem:[#allocation3 + $0x3c0] sm:$0xff] }
 0x865   : > { %4155 = vmatprep.subr.mxu1 %v3524_v13 }
 0x866   : > { %4156 = vmatpush1.msra.mxu1 %v3523_v42  ;;  %v4487_v42 = vld [vmem:[#allocation3 + $0x3c8] sm:$0xff] }
 0x867   : > { %4157 = vmatprep.subr.mxu1 %v3476_v41 }
 0x868   : > { %4158 = vmatpush1.msra.mxu1 %v3475_v28 }
 0x869   : > { %7695 = vmatmul.mubr.msk.f32.vlgmr.msra.gmra.mxu1 %vm730_vm9, %v10789_v57  ;;  %7761 = vmatprep.subr.msk.mxu1 %vm236_vm0, %v13009_v56 }
 0x86a   : > { %7762 = vmatpush1.msk.msra.mxu1 %vm236_vm0, %v13009_v56  ;;  %4826 = vmatprep.mubr.f32.mxu1 %v13006_v46 }
 0x8fb   : > { %v4051_v29 = vpop.f32.mrf.mxu1 }
 0x8fc   : > { %v4200_v50 = vmul.f32 0.1, %v4051_v29 }
 0x8fd   : > { %v4053_v23 = vpop.f32.mrf.mxu1 }
 0x8fe   : > { %v11044_v2 = vmax.f32 %v4051_v29, %v4200_v50  ;;  %v4201_v7 = vmul.f32 0.1, %v4053_v23 }
 0x900   : > { %v11062_v58 = vmax.f32 %v4053_v23, %v4201_v7 }
 0x90c   : > { %v3980_v26 = vpop.f32.mrf.mxu0 }
 0x90d   : > { %v4198_v63 = vmul.f32 0.1, %v3980_v26 }
 0x90e   : > { %v3982_v57 = vpop.f32.mrf.mxu0 }
 0x90f   : > { %v11008_v48 = vmax.f32 %v3980_v26, %v4198_v63  ;;  %v4199_v6 = vmul.f32 0.1, %v3982_v57  ;;  %v4439_v63 = vld [vmem:[#allocation3 + $0x388] sm:$0xff] }
 0x911   : > { %4510 = vrot.lane.b32.xlu1 %v11008_v48, %s8071_s27  ;;  %4558 = vrot.lane.b32.xlu0 %v11008_v48, %s8072_s28  ;;  %v11026_v59 = vmax.f32 %v3982_v57, %v4199_v6  ;;  %v4438_v57 = vld [vmem:[#allocation3 + $0x380] sm:$0xff] }
 0x915   : > { %4414 = vrot.lane.b32.xlu1 %v11008_v48, %s8073_s29  ;;  %4462 = vrot.lane.b32.xlu0 %v11008_v48, %s8074_s30 }
 0x919   : > { %4310 = vrot.lane.b32.xlu1 %v11008_v48, %s8076_s6  ;;  %4358 = vrot.lane.b32.xlu0 %v11008_v48, %s8075_s5 }
 0x91d   : > { %4214 = vrot.lane.b32.xlu1 %v11008_v48, %s8078_s8  ;;  %4262 = vrot.lane.b32.xlu0 %v11008_v48, %s8077_s7 }
 0x920   : > { %v4122_v36 = vpop.f32.mrf.mxu0 }
 0x921   : > { %4512 = vrot.lane.b32.xlu1 %v11026_v59, %s8071_s27  ;;  %4560 = vrot.lane.b32.xlu0 %v11026_v59, %s8072_s28  ;;  %v4202_v16 = vmul.f32 0.1, %v4122_v36 }
 0x922   : > { %v4124_v31 = vpop.f32.mrf.mxu0 }
 0x923   : > { %v11080_v47 = vmax.f32 %v4122_v36, %v4202_v16  ;;  %v4203_v45 = vmul.f32 0.1, %v4124_v31 }
 0x925   : > { %4416 = vrot.lane.b32.xlu1 %v11026_v59, %s8073_s29  ;;  %4464 = vrot.lane.b32.xlu0 %v11026_v59, %s8074_s30  ;;  %v11090_v9 = vmax.f32 %v4124_v31, %v4203_v45  ;;  %v4383_v45 = vld [vmem:[#allocation3 + $0x308] sm:$0xff] }
 0x929   : > { %4360 = vrot.lane.b32.xlu1 %v11026_v59, %s8075_s5  ;;  %4312 = vrot.lane.b32.xlu0 %v11026_v59, %s8076_s6  ;;  %v4193_v49 = vpop.f32.mrf.mxu1 }
 0x92a   : > { %v4204_v4 = vmul.f32 0.1, %v4193_v49 }
 0x92b   : > { %v4195_v55 = vpop.f32.mrf.mxu1 }
 0x92c   : > { %v11100_v5 = vmax.f32 %v4193_v49, %v4204_v4  ;;  %v4205_v19 = vmul.f32 0.1, %v4195_v55 }
 0x92d   : > { %4264 = vrot.lane.b32.xlu1 %v11026_v59, %s8077_s7  ;;  %4216 = vrot.lane.b32.xlu0 %v11026_v59, %s8078_s8 }
 0x92e   : > { %v11118_v33 = vmax.f32 %v4195_v55, %v4205_v19 }
 0x931   : > { %4562 = vrot.lane.b32.xlu1 %v11044_v2, %s8072_s28  ;;  %4514 = vrot.lane.b32.xlu0 %v11044_v2, %s8071_s27 }
 0x935   : > { %4466 = vrot.lane.b32.xlu1 %v11044_v2, %s8074_s30  ;;  %4418 = vrot.lane.b32.xlu0 %v11044_v2, %s8073_s29 }
 0x939   : > { %4362 = vrot.lane.b32.xlu1 %v11044_v2, %s8075_s5  ;;  %4314 = vrot.lane.b32.xlu0 %v11044_v2, %s8076_s6 }
 0x93d   : > { %4266 = vrot.lane.b32.xlu1 %v11044_v2, %s8077_s7  ;;  %4218 = vrot.lane.b32.xlu0 %v11044_v2, %s8078_s8 }
 0x941   : > { %4564 = vrot.lane.b32.xlu1 %v11062_v58, %s8072_s28  ;;  %4516 = vrot.lane.b32.xlu0 %v11062_v58, %s8071_s27 }
 0x945   : > { %4468 = vrot.lane.b32.xlu1 %v11062_v58, %s8074_s30  ;;  %4420 = vrot.lane.b32.xlu0 %v11062_v58, %s8073_s29 }
 0x949   : > { %4316 = vrot.lane.b32.xlu1 %v11062_v58, %s8076_s6  ;;  %4364 = vrot.lane.b32.xlu0 %v11062_v58, %s8075_s5 }
 0x94d   : > { %4220 = vrot.lane.b32.xlu1 %v11062_v58, %s8078_s8  ;;  %4268 = vrot.lane.b32.xlu0 %v11062_v58, %s8077_s7 }
 0x951   : > { %4518 = vrot.lane.b32.xlu1 %v11080_v47, %s8071_s27  ;;  %4566 = vrot.lane.b32.xlu0 %v11080_v47, %s8072_s28 }
 0x955   : > { %4422 = vrot.lane.b32.xlu1 %v11080_v47, %s8073_s29  ;;  %4470 = vrot.lane.b32.xlu0 %v11080_v47, %s8074_s30 }
 0x959   : > { %4366 = vrot.lane.b32.xlu0 %v11080_v47, %s8075_s5  ;;  %4472 = vrot.lane.b32.xlu1 %v11090_v9, %s8074_s30 }
 0x95d   : > { %4318 = vrot.lane.b32.xlu0 %v11080_v47, %s8076_s6  ;;  %4368 = vrot.lane.b32.xlu1 %v11090_v9, %s8075_s5 }
 0x961   : > { %4320 = vrot.lane.b32.xlu1 %v11090_v9, %s8076_s6  ;;  %4568 = vrot.lane.b32.xlu0 %v11090_v9, %s8072_s28 }
 0x965   : > { %4520 = vrot.lane.b32.xlu0 %v11090_v9, %s8071_s27  ;;  %4570 = vrot.lane.b32.xlu1 %v11100_v5, %s8072_s28 }
 0x969   : > { %4424 = vrot.lane.b32.xlu0 %v11090_v9, %s8073_s29  ;;  %4522 = vrot.lane.b32.xlu1 %v11100_v5, %s8071_s27 }
 0x96d   : > { %4474 = vrot.lane.b32.xlu0 %v11100_v5, %s8074_s30  ;;  %4426 = vrot.lane.b32.xlu1 %v11100_v5, %s8073_s29 }
 0x971   : > { %4324 = vrot.lane.b32.xlu1 %v11118_v33, %s8076_s6  ;;  %4372 = vrot.lane.b32.xlu0 %v11118_v33, %s8075_s5 }
 0x975   : > { %4228 = vrot.lane.b32.xlu1 %v11118_v33, %s8078_s8  ;;  %4276 = vrot.lane.b32.xlu0 %v11118_v33, %s8077_s7 }
 0x979   : > { %4270 = vrot.lane.b32.xlu1 %v11080_v47, %s8077_s7  ;;  %4370 = vrot.lane.b32.xlu0 %v11100_v5, %s8075_s5 }
 0x97d   : > { %4524 = vrot.lane.b32.xlu1 %v11118_v33, %s8071_s27  ;;  %4572 = vrot.lane.b32.xlu0 %v11118_v33, %s8072_s28  ;;  %s7670_s28 = sshll.u32 %s13237_s18, 3 }
 0x97e   : > { %s225_s5 = scalar_lea.vmem %s12874_s4, %s7670_s28 }
 0x981   : > { %4428 = vrot.lane.b32.xlu1 %v11118_v33, %s8073_s29  ;;  %4476 = vrot.lane.b32.xlu0 %v11118_v33, %s8074_s30 }
 0x983   : > { %v11140_v62 = vpop.permute.xlu0 %4558  ;;  %v11142_v32 = vpop.permute.xlu1 %4510 }
 0x985   : > { %4322 = vrot.lane.b32.xlu1 %v11100_v5, %s8076_s6  ;;  %4272 = vrot.lane.b32.xlu0 %v11090_v9, %s8077_s7 }
 0x987   : > { %v11148_v37 = vpop.permute.xlu0 %4462  ;;  %v11150_v44 = vpop.permute.xlu1 %4414 }
 0x989   : > { %4224 = vrot.lane.b32.xlu1 %v11090_v9, %s8078_s8  ;;  %4222 = vrot.lane.b32.xlu0 %v11080_v47, %s8078_s8 }
 0x98b   : > { %v11156_v20 = vpop.permute.xlu0 %4358  ;;  %v11158_v17 = vpop.permute.xlu1 %4310 }
 0x98d   : > { %4226 = vrot.lane.b32.xlu1 %v11100_v5, %s8078_s8  ;;  %4274 = vrot.lane.b32.xlu0 %v11100_v5, %s8077_s7 }
 0x98f   : > { %v11164_v8 = vpop.permute.xlu0 %4262  ;;  %v11166_v27 = vpop.permute.xlu1 %4214 }
 0x993   : > { %v4561_v43 = vpop.permute.xlu0 %4560  ;;  %v4513_v11 = vpop.permute.xlu1 %4512 }
 0x994   : > { %v4580_v0 = vsel %vm3019_vm10, %v11140_v62, %v4561_v43  ;;  %v4532_v10 = vsel %vm2970_vm11, %v11142_v32, %v4513_v11 }
 0x995   : > { %v4590_v52 = vmul.f32 %v4582_v25, %v4580_v0  ;;  %v4542_v51 = vmul.f32 %v4534_v24, %v4532_v10 }
 0x997   : > { %v4465_v38 = vpop.permute.xlu0 %4464  ;;  %v4417_v18 = vpop.permute.xlu1 %4416 }
 0x998   : > { %v4484_v3 = vsel %vm2921_vm12, %v11148_v37, %v4465_v38  ;;  %v4436_v6 = vsel %vm2872_vm13, %v11150_v44, %v4417_v18 }
 0x999   : > { %v4494_v50 = vmul.f32 %v4486_v54, %v4484_v3  ;;  %v4446_v16 = vmul.f32 %v4438_v57, %v4436_v6 }
 0x99b   : > { %v11168_v39 = vpop.permute.xlu0 %4312  ;;  %v11170_v40 = vpop.permute.xlu1 %4360 }
 0x99c   : > { %v4380_v31 = vsel %vm2815_vm14, %v11156_v20, %v11170_v40 }
 0x99d   : > { %v4391_v55 = vmul.f32 %v4383_v45, %v4380_v31 }
 0x99f   : > { %v11172_v53 = vpop.permute.xlu0 %4216  ;;  %v11174_v21 = vpop.permute.xlu1 %4264 }
 0x9a3   : > { %v4515_v14 = vpop.permute.xlu0 %4514  ;;  %v4563_v30 = vpop.permute.xlu1 %4562 }
 0x9a4   : > { %v4531_v61 = vsel %vm2970_vm11, %v4513_v11, %v4515_v14  ;;  %v4579_v35 = vsel %vm3019_vm10, %v4561_v43, %v4563_v30 }
 0x9a5   : > { %v4591_v22 = vmul.f32 %v4583_v60, %v4579_v35  ;;  %v4543_v41 = vmul.f32 %v4535_v15, %v4531_v61  ;;  %v4585_v61 = vld [vmem:[#allocation3 + $0x458] sm:$0xff] }
 0x9a7   : > { %v11189_v13 = vpop.permute.xlu0 %4418  ;;  %4705 = vmatprep.subr.mxu0 %v4591_v22  ;;  %v4467_v34 = vpop.permute.xlu1 %4466  ;;  %v4537_v22 = vld [vmem:[#allocation3 + $0x418] sm:$0xff] }
 0x9a8   : > { %v4435_v28 = vsel %vm2872_vm13, %v4417_v18, %v11189_v13  ;;  %v4483_v26 = vsel %vm2921_vm12, %v4465_v38, %v4467_v34  ;;  %4706 = vmatpush1.msra.mxu0 %v4590_v52  ;;  %v4536_v52 = vld [vmem:[#allocation3 + $0x410] sm:$0xff] }
 0x9a9   : > { %4707 = vmatprep.subr.mxu0 %v4543_v41  ;;  %v4495_v29 = vmul.f32 %v4487_v42, %v4483_v26  ;;  %v4447_v36 = vmul.f32 %v4439_v63, %v4435_v28  ;;  %v4488_v41 = vld [vmem:[#allocation3 + $0x3d0] sm:$0xff] }
 0x9aa   : > { %4708 = vmatpush1.msra.mxu0 %v4542_v51 }
 0x9ab   : > { %v11199_v23 = vpop.permute.xlu0 %4314  ;;  %4709 = vmatprep.subr.mxu0 %v4495_v29  ;;  %v4363_v7 = vpop.permute.xlu1 %4362  ;;  %v4441_v29 = vld [vmem:[#allocation3 + $0x398] sm:$0xff] }
 0x9ac   : > { %4710 = vmatpush1.msra.mxu0 %v4494_v50  ;;  %v4440_v50 = vld [vmem:[#allocation3 + $0x390] sm:$0xff] }
 0x9ad   : > { %4711 = vmatprep.subr.mxu0 %v4447_v36 }
 0x9ae   : > { %4712 = vmatpush1.msra.mxu0 %v4446_v16 }
 0x9af   : > { %v11205_v49 = vpop.permute.xlu0 %4218  ;;  %4713 = vmatprep.subr.mxu0 %v11026_v59  ;;  %v11208_v4 = vpop.permute.xlu1 %4266  ;;  %v4584_v59 = vld [vmem:[#allocation3 + $0x450] sm:$0xff] }
 0x9b0   : > { %4714 = vmatpush1.msra.mxu0 %v11008_v48 }
 0x9b1   : > { %4715 = vmatprep.subr.mxu0 %v4391_v55 }
 0x9b3   : > { %v4517_v19 = vpop.permute.xlu0 %4516  ;;  %v4565_v43 = vpop.permute.xlu1 %4564 }
 0x9b4   : > { %v4578_v35 = vsel %vm3019_vm10, %v4563_v30, %v4565_v43  ;;  %v4530_v42 = vsel %vm2970_vm11, %v4515_v14, %v4517_v19  ;;  %v4489_v30 = vld [vmem:[#allocation3 + $0x3d8] sm:$0xff] }
 0x9b5   : > { %v4592_v3 = vmul.f32 %v4584_v59, %v4578_v35  ;;  %v4544_v57 = vmul.f32 %v4536_v52, %v4530_v42  ;;  %v4337_v59 = vld [vmem:[#allocation3 + $0x2d8] sm:$0xff]  ;;  %v4336_v35 = vld [vmem:[#allocation3 + $0x2d0] sm:$0xff] }
 0x9b6   : > { %v4289_v42 = vld [vmem:[#allocation3 + $0x298] sm:$0xff] }
 0x9b7   : > { %v4421_v11 = vpop.permute.xlu0 %4420  ;;  %v4469_v38 = vpop.permute.xlu1 %4468 }
 0x9b8   : > { %v4482_v51 = vsel %vm2921_vm12, %v4467_v34, %v4469_v38  ;;  %v4434_v34 = vsel %vm2872_vm13, %v11189_v13, %v4421_v11  ;;  %v4379_v13 = vsel %vm2815_vm14, %v11170_v40, %v4363_v7 }
 0x9b9   : > { %v4496_v16 = vmul.f32 %v4488_v41, %v4482_v51  ;;  %v4241_v41 = vld [vmem:[#allocation3 + $0x258] sm:$0xff]  ;;  %v4240_v51 = vld [vmem:[#allocation3 + $0x250] sm:$0xff] }
 0x9bb   : > { %v11211_v18 = vpop.permute.xlu0 %4364  ;;  %v11213_v60 = vpop.permute.xlu1 %4316 }
 0x9bf   : > { %v11215_v25 = vpop.permute.xlu0 %4268  ;;  %v11217_v0 = vpop.permute.xlu1 %4220 }
 0x9c0   : > { %v4282_v52 = vsel %vm2717_vm1, %v11208_v4, %v11215_v25 }
 0x9c3   : > { %v11221_v15 = vpop.permute.xlu0 %4566  ;;  %v11223_v48 = vpop.permute.xlu1 %4518 }
 0x9c4   : > { %v4577_v24 = vsel %vm3019_vm10, %v4565_v43, %v11221_v15  ;;  %v4529_v10 = vsel %vm2970_vm11, %v4517_v19, %v11223_v48  ;;  %v4448_v19 = vmul.f32 %v4440_v50, %v4434_v34  ;;  %v4378_v43 = vsel %vm2815_vm14, %v4363_v7, %v11211_v18  ;;  %v11293_v50 = vld [vmem:[%s12871_s1 + $0x28] sm:$0xff] }
 0x9c5   : > { %v4593_v54 = vmul.f32 %v4585_v61, %v4577_v24  ;;  %v4545_v63 = vmul.f32 %v4537_v22, %v4529_v10  ;;  %v4384_v61 = vld [vmem:[#allocation3 + $0x310] sm:$0xff]  ;;  %v4331_v24 = vsel %vm2766_vm15, %v11168_v39, %v11199_v23 }
 0x9c6   : > { %v4392_v7 = vmul.f32 %v4384_v61, %v4379_v13 }
 0x9c7   : > { %v11235_v28 = vpop.permute.xlu0 %4470  ;;  %4776 = vmatprep.subr.mxu1 %v4593_v54  ;;  %v11237_v26 = vpop.permute.xlu1 %4422  ;;  %v4288_v54 = vld [vmem:[#allocation3 + $0x290] sm:$0xff] }
 0x9c8   : > { %v4481_v6 = vsel %vm2921_vm12, %v4469_v38, %v11235_v28  ;;  %v4433_v14 = vsel %vm2872_vm13, %v4421_v11, %v11237_v26  ;;  %4777 = vmatpush1.msra.mxu1 %v4592_v3  ;;  %v4385_v38 = vld [vmem:[#allocation3 + $0x318] sm:$0xff]  ;;  %v4330_v11 = vsel %vm2766_vm15, %v11199_v23, %v11213_v60  ;;  %v4283_v23 = vsel %vm2717_vm1, %v11174_v21, %v11208_v4 }
 0x9c9   : > { %4778 = vmatprep.subr.mxu1 %v4545_v63  ;;  %v4497_v36 = vmul.f32 %v4489_v30, %v4481_v6  ;;  %v4449_v55 = vmul.f32 %v4441_v29, %v4433_v14  ;;  %v4393_v40 = vmul.f32 %v4385_v38, %v4378_v43  ;;  %v4344_v3 = vmul.f32 %v4336_v35, %v4331_v24  ;;  %v4382_v43 = vld [vmem:[#allocation3 + $0x300] sm:$0xff] }
 0x9ca   : > { %4779 = vmatpush1.msra.mxu1 %v4544_v57  ;;  %v4234_v30 = vsel %vm2668_vm2, %v11205_v49, %v11217_v0  ;;  %v4297_v4 = vmul.f32 %v4289_v42, %v4282_v52  ;;  %v4296_v6 = vmul.f32 %v4288_v54, %v4283_v23  ;;  %v4332_v38 = vsel %vm2766_vm15, %v11158_v17, %v11168_v39  ;;  %v4334_v35 = vld [vmem:[#allocation3 + $0x2c0] sm:$0xff] }
 0x9cb   : > { %v11248_v31 = vpop.permute.xlu0 %4366  ;;  %4780 = vmatprep.subr.mxu1 %v4497_v36  ;;  %v11250_v45 = vpop.permute.xlu1 %4472  ;;  %v4249_v14 = vmul.f32 %v4241_v41, %v4234_v30  ;;  %v4284_v39 = vsel %vm2717_vm1, %v11164_v8, %v11174_v21  ;;  %v4286_v52 = vld [vmem:[#allocation3 + $0x280] sm:$0xff] }
 0x9cc   : > { %4781 = vmatpush1.msra.mxu1 %v4496_v16 }
 0x9cd   : > { %4782 = vmatprep.subr.mxu1 %v4449_v55 }
 0x9ce   : > { %4783 = vmatpush1.msra.mxu1 %v4448_v19 }
 0x9cf   : > { %v11266_v10 = vpop.permute.xlu0 %4318  ;;  %4784 = vmatprep.subr.mxu1 %v11062_v58  ;;  %v11269_v22 = vpop.permute.xlu1 %4368  ;;  %v4345_v58 = vmul.f32 %v4337_v59, %v4330_v11  ;;  %v4335_v11 = vld [vmem:[#allocation3 + $0x2c8] sm:$0xff] }
 0x9d0   : > { %4785 = vmatpush1.msra.mxu1 %v11044_v2  ;;  %v4235_v2 = vsel %vm2668_vm2, %v11172_v53, %v11205_v49  ;;  %v4343_v42 = vmul.f32 %v4335_v11, %v4332_v38  ;;  %v4539_v11 = vld [vmem:[#allocation3 + $0x428] sm:$0xff] }
 0x9d1   : > { %4786 = vmatprep.subr.mxu1 %v4393_v40  ;;  %v4248_v29 = vmul.f32 %v4240_v51, %v4235_v2  ;;  %v4586_v2 = vld [vmem:[#allocation3 + $0x460] sm:$0xff] }
 0x9d2   : > { %4787 = vmatpush1.msra.mxu1 %v4392_v7  ;;  %v4287_v7 = vld [vmem:[#allocation3 + $0x288] sm:$0xff] }
 0x9d3   : > { %v4569_v63 = vpop.permute.xlu0 %4568  ;;  %4788 = vmatprep.subr.mxu1 %v4345_v58  ;;  %v11288_v57 = vpop.permute.xlu1 %4320 }
 0x9d4   : > { %4789 = vmatpush1.msra.mxu1 %v4344_v3  ;;  %v4238_v3 = vld [vmem:[#allocation3 + $0x240] sm:$0xff] }
 0x9d5   : > { %4790 = vmatprep.subr.mxu1 %v4297_v4  ;;  %v4576_v4 = vsel %vm3019_vm10, %v11221_v15, %v4569_v63 }
 0x9d6   : > { %4791 = vmatpush1.msra.mxu1 %v4296_v6 }
 0x9d7   : > { %v4521_v34 = vpop.permute.xlu0 %4520  ;;  %4792 = vmatprep.subr.mxu1 %v4249_v14  ;;  %v11295_v36 = vpop.permute.xlu1 %4570 }
 0x9d8   : > { %4793 = vmatpush1.msra.mxu1 %v4248_v29  ;;  %v4587_v29 = vld [vmem:[#allocation3 + $0x468] sm:$0xff]  ;;  %v4528_v38 = vsel %vm2970_vm11, %v11223_v48, %v4521_v34  ;;  %v4588_v48 = vld [vmem:[#allocation3 + $0x470] sm:$0xff] }
 0x9d9   : > { %7698 = vmatmul.mubr.msk.f32.vlgmr.msra.gmra.mxu1 %vm730_vm9, %v11293_v50  ;;  %7765 = vmatprep.subr.msk.mxu1 %vm236_vm0, %v13009_v56 }
 0x9da   : > { %7766 = vmatpush1.msk.msra.mxu1 %vm236_vm0, %v13009_v56  ;;  %4968 = vmatprep.mubr.f32.mxu1 %v13006_v46 }
 0x9db   : > { %v11306_v49 = vpop.permute.xlu0 %4424  ;;  %v11308_v16 = vpop.permute.xlu1 %4522 }
 0x9dc   : > { %v4527_v15 = vsel %vm2970_vm11, %v4521_v34, %v11308_v16 }
 0x9df   : > { %v11310_v55 = vpop.permute.xlu0 %4474  ;;  %v11312_v19 = vpop.permute.xlu1 %4426 }
 0x9e3   : > { %v11318_v61 = vpop.permute.xlu0 %4372  ;;  %v11320_v13 = vpop.permute.xlu1 %4324 }
 0x9e4   : > { %v4381_v59 = vsel %vm2815_vm14, %v11318_v61, %v11156_v20  ;;  %v4333_v24 = vsel %vm2766_vm15, %v11320_v13, %v11158_v17  ;;  %v4236_v20 = vsel %vm2668_vm2, %v11166_v27, %v11172_v53  ;;  %v4239_v17 = vld [vmem:[#allocation3 + $0x248] sm:$0xff]  ;;  %v4295_v53 = vmul.f32 %v4287_v7, %v4284_v39  ;;  %v4490_v39 = vld [vmem:[#allocation3 + $0x3e0] sm:$0xff] }
 0x9e5   : > { %v4390_v40 = vmul.f32 %v4382_v43, %v4381_v59  ;;  %v4342_v54 = vmul.f32 %v4334_v35, %v4333_v24  ;;  %v4247_v51 = vmul.f32 %v4239_v17, %v4236_v20  ;;  %v4538_v43 = vld [vmem:[#allocation3 + $0x420] sm:$0xff]  ;;  %v4594_v59 = vmul.f32 %v4586_v2, %v4576_v4  ;;  %v4589_v24 = vld [vmem:[#allocation3 + $0x478] sm:$0xff]  ;;  %v4492_v2 = vld [vmem:[#allocation3 + $0x3f0] sm:$0xff] }
 0x9e6   : > { %v4546_v34 = vmul.f32 %v4538_v43, %v4528_v38  ;;  %v4442_v20 = vld [vmem:[#allocation3 + $0x3a0] sm:$0xff]  ;;  %v4547_v17 = vmul.f32 %v4539_v11, %v4527_v15  ;;  %v4493_v4 = vld [vmem:[#allocation3 + $0x3f8] sm:$0xff] }
 0x9e7   : > { %v11338_v23 = vpop.permute.xlu0 %4276  ;;  %4716 = vmatpush1.msra.mxu0 %v4390_v40  ;;  %v11340_v58 = vpop.permute.xlu1 %4228  ;;  %v4432_v40 = vsel %vm2872_vm13, %v11237_v26, %v11306_v49  ;;  %v4431_v26 = vsel %vm2872_vm13, %v11306_v49, %v11312_v19 }
 0x9e8   : > { %v4285_v21 = vsel %vm2717_vm1, %v11338_v23, %v11164_v8  ;;  %v4237_v30 = vsel %vm2668_vm2, %v11340_v58, %v11166_v27  ;;  %4717 = vmatprep.subr.mxu0 %v4343_v42  ;;  %v4575_v8 = vsel %vm3019_vm10, %v4569_v63, %v11295_v36  ;;  %v4480_v63 = vsel %vm2921_vm12, %v11235_v28, %v11250_v45  ;;  %v4491_v42 = vld [vmem:[#allocation3 + $0x3e8] sm:$0xff] }
 0x9e9   : > { %v4294_v41 = vmul.f32 %v4286_v52, %v4285_v21  ;;  %4718 = vmatpush1.msra.mxu0 %v4342_v54  ;;  %v4246_v6 = vmul.f32 %v4238_v3, %v4237_v30  ;;  %v4595_v35 = vmul.f32 %v4587_v29, %v4575_v8  ;;  %v4479_v28 = vsel %vm2921_vm12, %v11250_v45, %v11310_v55  ;;  %v4443_v21 = vld [vmem:[#allocation3 + $0x3a8] sm:$0xff]  ;;  %v4540_v30 = vld [vmem:[#allocation3 + $0x430] sm:$0xff] }
 0x9ea   : > { %4719 = vmatprep.subr.mxu0 %v4295_v53  ;;  %v4376_v8 = vsel %vm2815_vm14, %v11248_v31, %v11269_v22  ;;  %v4451_v43 = vmul.f32 %v4443_v21, %v4431_v26  ;;  %v4290_v21 = vld [vmem:[#allocation3 + $0x2a0] sm:$0xff] }
 0x9eb   : > { %v11356_v14 = vpop.permute.xlu0 %4370  ;;  %4720 = vmatpush1.msra.mxu0 %v4294_v41  ;;  %v11358_v27 = vpop.permute.xlu1 %4270 }
 0x9ec   : > { %4721 = vmatprep.subr.mxu0 %v4247_v51  ;;  %v4498_v51 = vmul.f32 %v4490_v39, %v4480_v63  ;;  %v4387_v63 = vld [vmem:[#allocation3 + $0x328] sm:$0xff]  ;;  %v4386_v39 = vld [vmem:[#allocation3 + $0x320] sm:$0xff] }
 0x9ed   : > { %4722 = vmatpush1.msra.mxu0 %v4246_v6  ;;  %v4450_v6 = vmul.f32 %v4442_v20, %v4432_v40  ;;  %v4338_v40 = vld [vmem:[#allocation3 + $0x2e0] sm:$0xff]  ;;  %v4389_v20 = vld [vmem:[#allocation3 + $0x338] sm:$0xff] }
 0x9ee   : > { %7697 = vmatmul.mubr.msk.f32.vlgmr.msra.gmra.mxu0 %vm730_vm9, %v11293_v50  ;;  %7763 = vmatprep.subr.msk.mxu0 %vm236_vm0, %v13009_v56 }
 0x9ef   : > { %v4573_v7 = vpop.permute.xlu0 %4572  ;;  %7764 = vmatpush1.msk.msra.mxu0 %vm236_vm0, %v13009_v56  ;;  %v4525_v52 = vpop.permute.xlu1 %4524  ;;  %4897 = vmatprep.mubr.f32.mxu0 %v13006_v46 }
 0x9f0   : > { %v4574_v54 = vsel %vm3019_vm10, %v11295_v36, %v4573_v7  ;;  %v4581_v45 = vsel %vm3019_vm10, %v4573_v7, %v11140_v62  ;;  %4847 = vmatprep.subr.mxu0 %v4595_v35  ;;  %v4526_v53 = vsel %vm2970_vm11, %v11308_v16, %v4525_v52  ;;  %v4533_v49 = vsel %vm2970_vm11, %v4525_v52, %v11142_v32  ;;  %v4541_v36 = vld [vmem:[#allocation3 + $0x438] sm:$0xff]  ;;  %v4339_v52 = vld [vmem:[#allocation3 + $0x2e8] sm:$0xff] }
 0x9f1   : > { %v4596_v3 = vmul.f32 %v4588_v48, %v4574_v54  ;;  %4848 = vmatpush1.msra.mxu0 %v4594_v59  ;;  %v4597_v41 = vmul.f32 %v4589_v24, %v4581_v45  ;;  %v4499_v62 = vmul.f32 %v4491_v42, %v4479_v28  ;;  %v4548_v32 = vmul.f32 %v4540_v30, %v4526_v53  ;;  %v4445_v24 = vld [vmem:[#allocation3 + $0x3b8] sm:$0xff] }
 0x9f2   : > { %4849 = vmatprep.subr.mxu0 %v4547_v17  ;;  %v4549_v11 = vmul.f32 %v4541_v36, %v4533_v49  ;;  %v4328_v28 = vsel %vm2766_vm15, %v11266_v10, %v11288_v57  ;;  %v4395_v7 = vmul.f32 %v4387_v63, %v4376_v8  ;;  %v4374_v42 = vsel %vm2815_vm14, %v11356_v14, %v11318_v61  ;;  %v4291_v61 = vld [vmem:[#allocation3 + $0x2a8] sm:$0xff]  ;;  %v4340_v36 = vld [vmem:[#allocation3 + $0x2f0] sm:$0xff] }
 0x9f3   : > { %v4477_v29 = vpop.permute.xlu0 %4476  ;;  %4850 = vmatpush1.msra.mxu0 %v4546_v34  ;;  %4918 = vmatprep.subr.mxu1 %v4597_v41  ;;  %v4429_v16 = vpop.permute.xlu1 %4428  ;;  %v4444_v34 = vld [vmem:[#allocation3 + $0x3b0] sm:$0xff]  ;;  %v4397_v49 = vmul.f32 %v4389_v20, %v4374_v42  ;;  %v4341_v41 = vld [vmem:[#allocation3 + $0x2f8] sm:$0xff] }
 0x9f4   : > { %v4478_v38 = vsel %vm2921_vm12, %v11310_v55, %v4477_v29  ;;  %v4485_v15 = vsel %vm2921_vm12, %v4477_v29, %v11148_v37  ;;  %4851 = vmatprep.subr.mxu0 %v4499_v62  ;;  %v4437_v48 = vsel %vm2872_vm13, %v4429_v16, %v11150_v44  ;;  %4919 = vmatpush1.msra.mxu1 %v4596_v3 }
 0x9f5   : > { %v4500_v59 = vmul.f32 %v4492_v2, %v4478_v38  ;;  %4852 = vmatpush1.msra.mxu0 %v4498_v51  ;;  %v4501_v35 = vmul.f32 %v4493_v4, %v4485_v15  ;;  %v4377_v55 = vsel %vm2815_vm14, %v11211_v18, %v11248_v31  ;;  %v4430_v37 = vsel %vm2872_vm13, %v11312_v19, %v4429_v16  ;;  %v4388_v19 = vld [vmem:[#allocation3 + $0x330] sm:$0xff]  ;;  %v4245_v38 = vld [vmem:[#allocation3 + $0x278] sm:$0xff] }
 0x9f6   : > { %4920 = vmatprep.subr.mxu1 %v4549_v11  ;;  %4853 = vmatprep.subr.mxu0 %v4451_v43  ;;  %v4329_v44 = vsel %vm2766_vm15, %v11213_v60, %v11266_v10  ;;  %v4375_v60 = vsel %vm2815_vm14, %v11269_v22, %v11356_v14  ;;  %v4453_v10 = vmul.f32 %v4445_v24, %v4437_v48  ;;  %v4243_v14 = vld [vmem:[#allocation3 + $0x268] sm:$0xff]  ;;  %v4244_v11 = vld [vmem:[#allocation3 + $0x270] sm:$0xff] }
 0x9f7   : > { %4921 = vmatpush1.msra.mxu1 %v4548_v32  ;;  %v4273_v18 = vpop.permute.xlu0 %4272  ;;  %4854 = vmatpush1.msra.mxu0 %v4450_v6  ;;  %v4323_v31 = vpop.permute.xlu1 %4322  ;;  %v4394_v26 = vmul.f32 %v4386_v39, %v4377_v55  ;;  %v4452_v54 = vmul.f32 %v4444_v34, %v4430_v37  ;;  %v4346_v17 = vmul.f32 %v4338_v40, %v4329_v44 }
 0x9f8   : > { %4922 = vmatprep.subr.mxu1 %v4501_v35  ;;  %4855 = vmatprep.subr.mxu0 %v11090_v9  ;;  %v4280_v45 = vsel %vm2717_vm1, %v11358_v27, %v4273_v18  ;;  %v4281_v22 = vsel %vm2717_vm1, %v11215_v25, %v11358_v27  ;;  %v4347_v9 = vmul.f32 %v4339_v52, %v4328_v28 }
 0x9f9   : > { %4923 = vmatpush1.msra.mxu1 %v4500_v59  ;;  %4856 = vmatpush1.msra.mxu0 %v11080_v47  ;;  %v4396_v3 = vmul.f32 %v4388_v19, %v4375_v60  ;;  %v4326_v30 = vsel %vm2766_vm15, %v4323_v31, %v11320_v13  ;;  %v4327_v25 = vsel %vm2766_vm15, %v11288_v57, %v4323_v31  ;;  %v4242_v13 = vld [vmem:[#allocation3 + $0x260] sm:$0xff]  ;;  %v4292_v57 = vld [vmem:[#allocation3 + $0x2b0] sm:$0xff] }
 0x9fa   : > { %4924 = vmatprep.subr.mxu1 %v4453_v10  ;;  %4857 = vmatprep.subr.mxu0 %v4395_v7  ;;  %v4299_v51 = vmul.f32 %v4291_v61, %v4280_v45  ;;  %v4298_v2 = vmul.f32 %v4290_v21, %v4281_v22  ;;  %v4349_v8 = vmul.f32 %v4341_v41, %v4326_v30 }
 0x9fb   : > { %4925 = vmatpush1.msra.mxu1 %v4452_v54  ;;  %v4223_v53 = vpop.permute.xlu0 %4222  ;;  %4858 = vmatpush1.msra.mxu0 %v4394_v26  ;;  %v4225_v47 = vpop.permute.xlu1 %4224  ;;  %v4348_v6 = vmul.f32 %v4340_v36, %v4327_v25 }
 0x9fc   : > { %4926 = vmatprep.subr.mxu1 %v11118_v33  ;;  %v4232_v27 = vsel %vm2668_vm2, %v4223_v53, %v4225_v47  ;;  %4859 = vmatprep.subr.mxu0 %v4347_v9  ;;  %v4233_v62 = vsel %vm2668_vm2, %v11217_v0, %v4223_v53  ;;  %v4293_v33 = vld [vmem:[#allocation3 + $0x2b8] sm:$0xff] }
 0x9fd   : > { %4927 = vmatpush1.msra.mxu1 %v11100_v5  ;;  %4860 = vmatpush1.msra.mxu0 %v4346_v17  ;;  %v4251_v4 = vmul.f32 %v4243_v14, %v4232_v27  ;;  %v4250_v43 = vmul.f32 %v4242_v13, %v4233_v62 }
 0x9fe   : > { %4928 = vmatprep.subr.mxu1 %v4397_v49  ;;  %4861 = vmatprep.subr.mxu0 %v4299_v51 }
 0x9ff   : > { %4929 = vmatpush1.msra.mxu1 %v4396_v3  ;;  %v4275_v29 = vpop.permute.xlu0 %4274  ;;  %4862 = vmatpush1.msra.mxu0 %v4298_v2  ;;  %v4227_v16 = vpop.permute.xlu1 %4226 }
 0xa00   : > { %v4278_v32 = vsel %vm2717_vm1, %v4275_v29, %v11338_v23  ;;  %v4279_v5 = vsel %vm2717_vm1, %v4273_v18, %v4275_v29  ;;  %4930 = vmatprep.subr.mxu1 %v4349_v8  ;;  %v4230_v0 = vsel %vm2668_vm2, %v4227_v16, %v11340_v58  ;;  %v4231_v63 = vsel %vm2668_vm2, %v4225_v47, %v4227_v16 }
 0xa01   : > { %v4300_v15 = vmul.f32 %v4292_v57, %v4279_v5  ;;  %4863 = vmatprep.subr.mxu0 %v4251_v4  ;;  %4931 = vmatpush1.msra.mxu1 %v4348_v6  ;;  %v4301_v59 = vmul.f32 %v4293_v33, %v4278_v32  ;;  %v4253_v23 = vmul.f32 %v4245_v38, %v4230_v0 }
 0xa02   : > { %4864 = vmatpush1.msra.mxu0 %v4250_v43  ;;  %v4252_v48 = vmul.f32 %v4244_v11, %v4231_v63 }
 0xa03   : > { %7699 = vmatmul.mubr.msk.f32.vlgmr.msra.gmra.mxu0 %vm730_vm9, %v11293_v50  ;;  %4932 = vmatprep.subr.mxu1 %v4301_v59 }
 0xa04   : > { %4933 = vmatpush1.msra.mxu1 %v4300_v15  ;;  %7767 = vmatprep.subr.msk.mxu0 %vm236_vm0, %v13009_v56 }
 0xa05   : > { %4934 = vmatprep.subr.mxu1 %v4253_v23  ;;  %7768 = vmatpush1.msk.msra.mxu0 %vm236_vm0, %v13009_v56 }
 0xa06   : > { %4935 = vmatpush1.msra.mxu1 %v4252_v48  ;;  %5529 = vmatprep.mubr.f32.mxu0 %v13006_v46 }
 0xa07   : > { %7700 = vmatmul.mubr.msk.f32.vlgmr.msra.gmra.mxu1 %vm730_vm9, %v11293_v50  ;;  %7769 = vmatprep.subr.msk.mxu1 %vm236_vm0, %v13009_v56 }
 0xa08   : > { %7770 = vmatpush1.msk.msra.mxu1 %vm236_vm0, %v13009_v56  ;;  %5600 = vmatprep.mubr.f32.mxu1 %v13006_v46 }
 0xa99   : > { %v4828_v58 = vpop.f32.mrf.mxu1 }
 0xa9a   : > { %v4977_v35 = vmul.f32 0.1, %v4828_v58 }
 0xa9b   : > { %v4830_v40 = vpop.f32.mrf.mxu1 }
 0xa9c   : > { %v4985_v24 = vmax.f32 %v4828_v58, %v4977_v35  ;;  %v4978_v28 = vmul.f32 0.1, %v4830_v40 }
 0xa9e   : > { %4995 = vrot.lane.b32.xlu1 %v4985_v24, %s8073_s29  ;;  %v4986_v18 = vmax.f32 %v4830_v40, %v4978_v28 }
 0xaae   : > { %v4757_v39 = vpop.f32.mrf.mxu0 }
 0xaaf   : > { %v4975_v55 = vmul.f32 0.1, %v4757_v39 }
 0xab0   : > { %v4759_v34 = vpop.f32.mrf.mxu0 }
 0xab1   : > { %v4983_v37 = vmax.f32 %v4757_v39, %v4975_v55  ;;  %v4976_v50 = vmul.f32 0.1, %v4759_v34 }
 0xab3   : > { %4991 = vrot.lane.b32.xlu0 %v4983_v37, %s8073_s29  ;;  %v4984_v44 = vmax.f32 %v4759_v34, %v4976_v50 }
 0xab7   : > { %4993 = vrot.lane.b32.xlu0 %v4984_v44, %s8073_s29 }
 0xabb   : > { %4997 = vrot.lane.b32.xlu0 %v4986_v18, %s8073_s29 }
 0xac3   : > { %v4899_v31 = vpop.f32.mrf.mxu0 }
 0xac4   : > { %v4979_v7 = vmul.f32 0.1, %v4899_v31 }
 0xac5   : > { %v4901_v52 = vpop.f32.mrf.mxu0 }
 0xac6   : > { %v4987_v19 = vmax.f32 %v4899_v31, %v4979_v7  ;;  %v4980_v42 = vmul.f32 0.1, %v4901_v52 }
 0xac7   : > { %v4970_v60 = vpop.f32.mrf.mxu1 }
 0xac8   : > { %4999 = vrot.lane.b32.xlu1 %v4987_v19, %s8073_s29  ;;  %v4981_v10 = vmul.f32 0.1, %v4970_v60  ;;  %v4988_v26 = vmax.f32 %v4901_v52, %v4980_v42 }
 0xac9   : > { %v4972_v20 = vpop.f32.mrf.mxu1 }
 0xaca   : > { %v4989_v54 = vmax.f32 %v4970_v60, %v4981_v10  ;;  %v4982_v45 = vmul.f32 0.1, %v4972_v20 }
 0xacc   : > { %v4990_v61 = vmax.f32 %v4972_v20, %v4982_v45  ;;  %5001 = vrot.lane.b32.xlu1 %v4988_v26, %s8073_s29  ;;  %5003 = vrot.lane.b32.xlu0 %v4989_v54, %s8073_s29  ;;  %v11651_v45 = vld [vmem:[#allocation3 + $0x688] sm:$0xff] }
 0xad0   : > { %5005 = vrot.lane.b32.xlu1 %v4990_v61, %s8073_s29 }
 0xb10   : > { %v4996_v21 = vpop.permute.xlu1 %4995 }
 0xb25   : > { %v4992_v17 = vpop.permute.xlu0 %4991 }
 0xb29   : > { %v4994_v22 = vpop.permute.xlu0 %4993 }
 0xb2a   : > { %v5012_v9 = vsel %vm2872_vm13, %v4994_v22, %v4996_v21  ;;  %v5013_v14 = vsel %vm2872_vm13, %v4992_v17, %v4994_v22 }
 0xb2b   : > { %v5015_v3 = vmax.f32 %v4983_v37, %v5013_v14  ;;  %v5016_v30 = vmax.f32 %v4984_v44, %v5012_v9 }
 0xb2d   : > { %v4998_v53 = vpop.permute.xlu0 %4997  ;;  %5023 = vrot.lane.b32.xlu1 %v5015_v3, %s8071_s27  ;;  %5025 = vrot.lane.b32.xlu0 %v5016_v30, %s8071_s27 }
 0xb2e   : > { %v5011_v47 = vsel %vm2872_vm13, %v4996_v21, %v4998_v53 }
 0xb2f   : > { %v5017_v49 = vmax.f32 %v4985_v24, %v5011_v47 }
 0xb31   : > { %5027 = vrot.lane.b32.xlu1 %v5017_v49, %s8071_s27 }
 0xb3a   : > { %v5000_v41 = vpop.permute.xlu1 %4999 }
 0xb3b   : > { %v5010_v36 = vsel %vm2872_vm13, %v4998_v53, %v5000_v41 }
 0xb3c   : > { %v5018_v25 = vmax.f32 %v4986_v18, %v5010_v36  ;;  %v11685_v36 = vld [vmem:[#allocation3 + $0x600] sm:$0xff] }
 0xb3e   : > { %5029 = vrot.lane.b32.xlu0 %v5018_v25, %s8071_s27  ;;  %v5002_v27 = vpop.permute.xlu1 %5001  ;;  %v5004_v51 = vpop.permute.xlu0 %5003 }
 0xb3f   : > { %v5009_v2 = vsel %vm2872_vm13, %v5000_v41, %v5002_v27  ;;  %v5008_v13 = vsel %vm2872_vm13, %v5002_v27, %v5004_v51  ;;  %v11683_v41 = vld [vmem:[#allocation3 + $0x608] sm:$0xff] }
 0xb40   : > { %v5019_v62 = vmax.f32 %v4987_v19, %v5009_v2  ;;  %v11513_v4 = vmax.f32 %v4988_v26, %v5008_v13 }
 0xb42   : > { %5031 = vrot.lane.b32.xlu0 %v5019_v62, %s8071_s27  ;;  %v5006_v57 = vpop.permute.xlu1 %5005  ;;  %5033 = vrot.lane.b32.xlu1 %v11513_v4, %s8071_s27 }
 0xb43   : > { %v5007_v8 = vsel %vm2872_vm13, %v5004_v51, %v5006_v57  ;;  %v5014_v33 = vsel %vm2872_vm13, %v5006_v57, %v4992_v17  ;;  %v11702_v57 = vld [vmem:[#allocation3 + $0x5c8] sm:$0xff] }
 0xb44   : > { %v5021_v6 = vmax.f32 %v4989_v54, %v5007_v8  ;;  %v5022_v29 = vmax.f32 %v4990_v61, %v5014_v33  ;;  %v11653_v61 = vld [vmem:[#allocation3 + $0x680] sm:$0xff] }
 0xb45   : > { %v11704_v8 = vld [vmem:[#allocation3 + $0x5c0] sm:$0xff] }
 0xb46   : > { %5037 = vrot.lane.b32.xlu0 %v5022_v29, %s8071_s27  ;;  %5035 = vrot.lane.b32.xlu1 %v5021_v6, %s8071_s27 }
 0xb9f   : > { %v5026_v16 = vpop.permute.xlu0 %5025  ;;  %v5024_v43 = vpop.permute.xlu1 %5023 }
 0xba0   : > { %v5045_v32 = vsel %vm2970_vm11, %v5024_v43, %v5026_v16 }
 0xba1   : > { %v11526_v5 = vmax.f32 %v5015_v3, %v5045_v32  ;;  %v11669_v3 = vld [vmem:[#allocation3 + $0x648] sm:$0xff] }
 0xba3   : > { %5104 = vrot.lane.b32.xlu1 %v11526_v5, %s8079_s16  ;;  %5153 = vrot.lane.b32.xlu0 %v11526_v5, %s8080_s17  ;;  %v5028_v0 = vpop.permute.xlu1 %5027 }
 0xba4   : > { %v5044_v38 = vsel %vm2970_vm11, %v5026_v16, %v5028_v0 }
 0xba5   : > { %v11538_v15 = vmax.f32 %v5016_v30, %v5044_v38  ;;  %v11671_v30 = vld [vmem:[#allocation3 + $0x640] sm:$0xff] }
 0xba7   : > { %5259 = vrot.lane.b32.xlu1 %v11526_v5, %s8081_s19  ;;  %5055 = vrot.lane.b32.xlu0 %v11526_v5, %s8082_s20 }
 0xbab   : > { %5202 = vrot.lane.b32.xlu0 %v11526_v5, %s8083_s21  ;;  %5106 = vrot.lane.b32.xlu1 %v11538_v15, %s8079_s16 }
 0xbaf   : > { %5261 = vrot.lane.b32.xlu1 %v11538_v15, %s8081_s19  ;;  %5155 = vrot.lane.b32.xlu0 %v11538_v15, %s8080_s17 }
 0xbb0   : > { %v5030_v11 = vpop.permute.xlu0 %5029 }
 0xbb1   : > { %v5043_v63 = vsel %vm2970_vm11, %v5028_v0, %v5030_v11 }
 0xbb2   : > { %v11554_v59 = vmax.f32 %v5017_v49, %v5043_v63  ;;  %v11724_v63 = vld [vmem:[#allocation3 + $0x690] sm:$0xff] }
 0xbb3   : > { %5204 = vrot.lane.b32.xlu1 %v11538_v15, %s8083_s21  ;;  %5057 = vrot.lane.b32.xlu0 %v11538_v15, %s8082_s20 }
 0xbb4   : > { %v5032_v23 = vpop.permute.xlu0 %5031  ;;  %v5034_v48 = vpop.permute.xlu1 %5033 }
 0xbb5   : > { %v5041_v58 = vsel %vm2970_vm11, %v5032_v23, %v5034_v48  ;;  %v5042_v24 = vsel %vm2970_vm11, %v5030_v11, %v5032_v23  ;;  %v11722_v11 = vld [vmem:[#allocation3 + $0x548] sm:$0xff]  ;;  %v11726_v23 = vld [vmem:[#allocation3 + $0x698] sm:$0xff] }
 0xbb6   : > { %v11566_v35 = vmax.f32 %v5019_v62, %v5041_v58  ;;  %v11574_v39 = vmax.f32 %v5018_v25, %v5042_v24 }
 0xbb7   : > { %5108 = vrot.lane.b32.xlu0 %v11554_v59, %s8079_s16  ;;  %5157 = vrot.lane.b32.xlu1 %v11554_v59, %s8080_s17 }
 0xbb8   : > { %v5038_v55 = vpop.permute.xlu0 %5037  ;;  %v5036_v50 = vpop.permute.xlu1 %5035 }
 0xbb9   : > { %v5046_v34 = vsel %vm2970_vm11, %v5038_v55, %v5024_v43  ;;  %v5039_v40 = vsel %vm2970_vm11, %v5036_v50, %v5038_v55  ;;  %v5040_v44 = vsel %vm2970_vm11, %v5034_v48, %v5036_v50 }
 0xbba   : > { %v11594_v37 = vmax.f32 %v5022_v29, %v5046_v34  ;;  %v11609_v28 = vmax.f32 %v11513_v4, %v5040_v44  ;;  %v11611_v18 = vmax.f32 %v5021_v6, %v5039_v40  ;;  %v11744_v40 = vld [vmem:[#allocation3 + $0x658] sm:$0xff]  ;;  %v11746_v44 = vld [vmem:[#allocation3 + $0x650] sm:$0xff] }
 0xbbb   : > { %5263 = vrot.lane.b32.xlu0 %v11554_v59, %s8081_s19  ;;  %5059 = vrot.lane.b32.xlu1 %v11554_v59, %s8082_s20 }
 0xbbf   : > { %5206 = vrot.lane.b32.xlu1 %v11554_v59, %s8083_s21  ;;  %5161 = vrot.lane.b32.xlu0 %v11566_v35, %s8080_s17 }
 0xbc3   : > { %5159 = vrot.lane.b32.xlu1 %v11574_v39, %s8080_s17  ;;  %5110 = vrot.lane.b32.xlu0 %v11574_v39, %s8079_s16 }
 0xbc7   : > { %5112 = vrot.lane.b32.xlu1 %v11566_v35, %s8079_s16  ;;  %5063 = vrot.lane.b32.xlu0 %v11566_v35, %s8082_s20 }
 0xbcb   : > { %5061 = vrot.lane.b32.xlu1 %v11574_v39, %s8082_s20  ;;  %5265 = vrot.lane.b32.xlu0 %v11574_v39, %s8081_s19 }
 0xbcf   : > { %5267 = vrot.lane.b32.xlu1 %v11566_v35, %s8081_s19  ;;  %5208 = vrot.lane.b32.xlu0 %v11574_v39, %s8083_s21 }
 0xbd3   : > { %5167 = vrot.lane.b32.xlu1 %v11594_v37, %s8080_s17  ;;  %5216 = vrot.lane.b32.xlu0 %v11594_v37, %s8083_s21 }
 0xbd7   : > { %5069 = vrot.lane.b32.xlu1 %v11594_v37, %s8082_s20  ;;  %5118 = vrot.lane.b32.xlu0 %v11594_v37, %s8079_s16 }
 0xbdb   : > { %5163 = vrot.lane.b32.xlu0 %v11609_v28, %s8080_s17  ;;  %5165 = vrot.lane.b32.xlu1 %v11611_v18, %s8080_s17 }
 0xbdf   : > { %5114 = vrot.lane.b32.xlu0 %v11609_v28, %s8079_s16  ;;  %5116 = vrot.lane.b32.xlu1 %v11611_v18, %s8079_s16 }
 0xbe3   : > { %5065 = vrot.lane.b32.xlu0 %v11609_v28, %s8082_s20  ;;  %5067 = vrot.lane.b32.xlu1 %v11611_v18, %s8082_s20 }
 0xbe7   : > { %5269 = vrot.lane.b32.xlu0 %v11609_v28, %s8081_s19  ;;  %5271 = vrot.lane.b32.xlu1 %v11611_v18, %s8081_s19 }
 0xbeb   : > { %5273 = vrot.lane.b32.xlu0 %v11594_v37, %s8081_s19  ;;  %5210 = vrot.lane.b32.xlu1 %v11566_v35, %s8083_s21 }
 0xbef   : > { %5212 = vrot.lane.b32.xlu0 %v11609_v28, %s8083_s21  ;;  %5214 = vrot.lane.b32.xlu1 %v11611_v18, %s8083_s21 }
 0xc15   : > { %v11637_v31 = vpop.permute.xlu0 %5153  ;;  %v11639_v7 = vpop.permute.xlu1 %5104 }
 0xc19   : > { %v11641_v52 = vpop.permute.xlu0 %5055  ;;  %v11643_v19 = vpop.permute.xlu1 %5259 }
 0xc1d   : > { %v11645_v42 = vpop.permute.xlu0 %5202  ;;  %v5107_v60 = vpop.permute.xlu1 %5106 }
 0xc1e   : > { %v11676_v53 = vsel %vm5120_vm4, %v11639_v7, %v5107_v60 }
 0xc1f   : > { %v5340_v13 = vmul.f32 %v11671_v30, %v11676_v53 }
 0xc21   : > { %v5156_v10 = vpop.permute.xlu0 %5155  ;;  %v5262_v20 = vpop.permute.xlu1 %5261 }
 0xc22   : > { %v11658_v17 = vsel %vm5169_vm3, %v11637_v31, %v5156_v10  ;;  %v5282_v33 = vsel %vm5275_vm6, %v11643_v19, %v5262_v20 }
 0xc23   : > { %v5364_v49 = vmul.f32 %v11653_v61, %v11658_v17  ;;  %v5292_v0 = vmul.f32 %v11704_v8, %v5282_v33 }
 0xc25   : > { %v5058_v26 = vpop.permute.xlu0 %5057  ;;  %v11647_v54 = vpop.permute.xlu1 %5204 }
 0xc26   : > { %v11690_v25 = vsel %vm5071_vm5, %v11641_v52, %v5058_v26  ;;  %v5225_v38 = vsel %vm5218_vm7, %v11645_v42, %v11647_v54 }
 0xc27   : > { %v5316_v29 = vmul.f32 %v11685_v36, %v11690_v25  ;;  %v5236_v24 = vmul.f32 %v11722_v11, %v5225_v38 }
 0xc29   : > { %v5109_v21 = vpop.permute.xlu0 %5108  ;;  %v5158_v22 = vpop.permute.xlu1 %5157 }
 0xc2a   : > { %v11663_v9 = vsel %vm5120_vm4, %v5107_v60, %v5109_v21  ;;  %v11667_v14 = vsel %vm5169_vm3, %v5156_v10, %v5158_v22 }
 0xc2b   : > { %v5365_v47 = vmul.f32 %v11651_v45, %v11667_v14  ;;  %v5341_v2 = vmul.f32 %v11669_v3, %v11663_v9 }
 0xc2d   : > { %v5264_v27 = vpop.permute.xlu0 %5263  ;;  %5479 = vmatprep.subr.mxu0 %v5365_v47  ;;  %v5060_v51 = vpop.permute.xlu1 %5059  ;;  %v11765_v47 = vld [vmem:[#allocation3 + $0x610] sm:$0xff] }
 0xc2e   : > { %v5281_v62 = vsel %vm5275_vm6, %v5262_v20, %v5264_v27  ;;  %v11700_v4 = vsel %vm5071_vm5, %v5058_v26, %v5060_v51  ;;  %5480 = vmatpush1.msra.mxu0 %v5364_v49  ;;  %13159 = vst [vmem:[#allocation39_spill] sm:$0xff] %v11765_v47 }
 0xc2f   : > { %5481 = vmatprep.subr.mxu0 %v5341_v2  ;;  %v5317_v6 = vmul.f32 %v11683_v41, %v11700_v4  ;;  %v5293_v32 = vmul.f32 %v11702_v57, %v5281_v62 }
 0xc30   : > { %5482 = vmatpush1.msra.mxu0 %v5340_v13 }
 0xc31   : > { %v11714_v16 = vpop.permute.xlu0 %5161  ;;  %5483 = vmatprep.subr.mxu0 %v5317_v6  ;;  %v5207_v43 = vpop.permute.xlu1 %5206 }
 0xc32   : > { %5484 = vmatpush1.msra.mxu0 %v5316_v29  ;;  %v11782_v29 = vld [vmem:[#allocation3 + $0x5d8] sm:$0xff] }
 0xc33   : > { %5485 = vmatprep.subr.mxu0 %v5293_v32  ;;  %13160 = vst [vmem:[#allocation44_spill] sm:$0xff] %v11782_v29  ;;  %v11784_v32 = vld [vmem:[#allocation3 + $0x5d0] sm:$0xff] }
 0xc34   : > { %5486 = vmatpush1.msra.mxu0 %v5292_v0  ;;  %13161 = vst [vmem:[#allocation43_spill] sm:$0xff] %v11784_v32 }
 0xc35   : > { %v5111_v48 = vpop.permute.xlu0 %5110  ;;  %5487 = vmatprep.subr.mxu0 %v11538_v15  ;;  %v5160_v58 = vpop.permute.xlu1 %5159 }
 0xc36   : > { %v11733_v55 = vsel %vm5169_vm3, %v5160_v58, %v11714_v16  ;;  %v11737_v34 = vsel %vm5169_vm3, %v5158_v22, %v5160_v58  ;;  %5488 = vmatpush1.msra.mxu0 %v11526_v5  ;;  %v11750_v60 = vsel %vm5120_vm4, %v5109_v21, %v5111_v48  ;;  %v11767_v21 = vld [vmem:[#allocation3 + $0x618] sm:$0xff] }
 0xc37   : > { %v5366_v50 = vmul.f32 %v11724_v63, %v11737_v34  ;;  %5489 = vmatprep.subr.mxu0 %v5236_v24  ;;  %v5367_v15 = vmul.f32 %v11726_v23, %v11733_v55  ;;  %v5342_v22 = vmul.f32 %v11746_v44, %v11750_v60 }
 0xc39   : > { %v11752_v10 = vpop.permute.xlu0 %5063  ;;  %5550 = vmatprep.subr.mxu1 %v5367_v15  ;;  %v11754_v20 = vpop.permute.xlu1 %5112  ;;  %v11802_v15 = vld [vmem:[#allocation3 + $0x540] sm:$0xff] }
 0xc3a   : > { %v11759_v5 = vsel %vm5120_vm4, %v5111_v48, %v11754_v20  ;;  %5551 = vmatpush1.msra.mxu1 %v5366_v50  ;;  %v11797_v50 = vld [vmem:[#allocation3 + $0x558] sm:$0xff] }
 0xc3b   : > { %v5343_v26 = vmul.f32 %v11744_v40, %v11759_v5  ;;  %13162 = vst [vmem:[#allocation45_spill] sm:$0xff] %v11797_v50 }
 0xc3d   : > { %v5266_v49 = vpop.permute.xlu0 %5265  ;;  %5552 = vmatprep.subr.mxu1 %v5343_v26  ;;  %v5062_v2 = vpop.permute.xlu1 %5061  ;;  %v11804_v26 = vld [vmem:[#allocation3 + $0x550] sm:$0xff] }
 0xc3e   : > { %v11772_v13 = vsel %vm5071_vm5, %v5062_v2, %v11752_v10  ;;  %v11776_v62 = vsel %vm5071_vm5, %v5060_v51, %v5062_v2  ;;  %5553 = vmatpush1.msra.mxu1 %v5342_v22  ;;  %v5280_v0 = vsel %vm5275_vm6, %v5264_v27, %v5266_v49  ;;  %13163 = vst [vmem:[#allocation46_spill] sm:$0xff] %v11804_v26 }
 0xc3f   : > { %v5318_v33 = vmul.f32 %v11765_v47, %v11776_v62  ;;  %v5319_v6 = vmul.f32 %v11767_v21, %v11772_v13  ;;  %v5294_v24 = vmul.f32 %v11784_v32, %v5280_v0  ;;  %v5224_v22 = vsel %vm5218_vm7, %v11647_v54, %v5207_v43  ;;  %v11817_v0 = vld [vmem:[#allocation3 + $0x500] sm:$0xff]  ;;  %v11829_v32 = vld [vmem:[#allocation3 + $0x4c8] sm:$0xff] }
 0xc40   : > { %13164 = vst [vmem:[#allocation16_spill] sm:$0xff] %v11817_v0  ;;  %v11835_v47 = vld [vmem:[#allocation3 + $0x4c0] sm:$0xff] }
 0xc41   : > { %v11788_v38 = vpop.permute.xlu0 %5208  ;;  %5554 = vmatprep.subr.mxu1 %v5319_v6  ;;  %v11790_v48 = vpop.permute.xlu1 %5267 }
 0xc42   : > { %v5279_v51 = vsel %vm5275_vm6, %v5266_v49, %v11790_v48  ;;  %5555 = vmatpush1.msra.mxu1 %v5318_v33  ;;  %v5223_v27 = vsel %vm5218_vm7, %v5207_v43, %v11788_v38  ;;  %v11811_v33 = vld [vmem:[#allocation3 + $0x508] sm:$0xff] }
 0xc43   : > { %v5295_v58 = vmul.f32 %v11782_v29, %v5279_v51  ;;  %v5238_v54 = vmul.f32 %v11797_v50, %v5223_v27  ;;  %v11831_v29 = vld [vmem:[#allocation3 + $0x510] sm:$0xff]  ;;  %v11845_v50 = vld [vmem:[#allocation3 + $0x488] sm:$0xff] }
 0xc44   : > { %13166 = vst [vmem:[#allocation15_spill] sm:$0xff] %v11831_v29 }
 0xc45   : > { %v11809_v49 = vpop.permute.xlu0 %5216  ;;  %5556 = vmatprep.subr.mxu1 %v5295_v58  ;;  %v5168_v2 = vpop.permute.xlu1 %5167  ;;  %v11827_v58 = vld [vmem:[#allocation3 + $0x518] sm:$0xff] }
 0xc46   : > { %v5226_v6 = vsel %vm5218_vm7, %v11809_v49, %v11645_v42  ;;  %v11822_v51 = vsel %vm5169_vm3, %v5168_v2, %v11637_v31  ;;  %5557 = vmatpush1.msra.mxu1 %v5294_v24  ;;  %13165 = vst [vmem:[#allocation14_spill] sm:$0xff] %v11827_v58  ;;  %v5237_v42 = vmul.f32 %v11804_v26, %v5224_v22  ;;  %v11847_v22 = vld [vmem:[#allocation3 + $0x4d0] sm:$0xff] }
 0xc47   : > { %v5235_v43 = vmul.f32 %v11802_v15, %v5226_v6  ;;  %5558 = vmatprep.subr.mxu1 %v11574_v39  ;;  %v5187_v31 = vmul.f32 %v11811_v33, %v11658_v17  ;;  %v5186_v24 = vmul.f32 %v11817_v0, %v11822_v51  ;;  %v11843_v6 = vld [vmem:[#allocation3 + $0x4d8] sm:$0xff]  ;;  %v5189_v17 = vmul.f32 %v11827_v58, %v11737_v34  ;;  %v11859_v0 = vld [vmem:[#allocation3 + $0x480] sm:$0xff]  ;;  %v11869_v34 = vld [vmem:[#allocation3 + $0x490] sm:$0xff] }
 0xc48   : > { %5559 = vmatpush1.msra.mxu1 %v11554_v59  ;;  %13168 = vst [vmem:[#allocation10_spill] sm:$0xff] %v11869_v34 }
 0xc49   : > { %v5119_v27 = vpop.permute.xlu0 %5118  ;;  %5490 = vmatpush1.msra.mxu0 %v5235_v43  ;;  %5560 = vmatprep.subr.mxu1 %v5238_v54  ;;  %v11841_v39 = vpop.permute.xlu1 %5069  ;;  %v5138_v54 = vmul.f32 %v11829_v32, %v11676_v53  ;;  %v5188_v43 = vmul.f32 %v11831_v29, %v11667_v14  ;;  %v5140_v14 = vmul.f32 %v11843_v6, %v11750_v60 }
 0xc4a   : > { %v5128_v59 = vsel %vm5120_vm4, %v5119_v27, %v11639_v7  ;;  %5491 = vmatprep.subr.mxu0 %v5187_v31  ;;  %5561 = vmatpush1.msra.mxu1 %v5237_v42  ;;  %v11865_v7 = vsel %vm5071_vm5, %v11841_v39, %v11641_v52  ;;  %v11867_v42 = vld [vmem:[#allocation3 + $0x498] sm:$0xff]  ;;  %v5089_v53 = vmul.f32 %v11845_v50, %v11690_v25  ;;  %v11877_v52 = vld [vmem:[#allocation3 + $0x6a8] sm:$0xff] }
 0xc4b   : > { %v5137_v26 = vmul.f32 %v11835_v47, %v5128_v59  ;;  %5492 = vmatpush1.msra.mxu0 %v5186_v24  ;;  %13167 = vst [vmem:[#allocation9_spill] sm:$0xff] %v11867_v42  ;;  %5562 = vmatprep.subr.mxu1 %v5189_v17  ;;  %v5139_v31 = vmul.f32 %v11847_v22, %v11663_v9  ;;  %13169 = vst [vmem:[#allocation11_spill] sm:$0xff] %v11877_v52  ;;  %v11890_v9 = vld [vmem:[%s12871_s1 + $0x30] sm:$0xff] }
 0xc4c   : > { %5493 = vmatprep.subr.mxu0 %v5138_v54  ;;  %5563 = vmatpush1.msra.mxu1 %v5188_v43  ;;  %v5088_v58 = vmul.f32 %v11859_v0, %v11865_v7  ;;  %v5091_v25 = vmul.f32 %v11867_v42, %v11776_v62  ;;  %v5090_v60 = vmul.f32 %v11869_v34, %v11700_v4  ;;  %v11903_v62 = vld [vmem:[#allocation3 + $0x6b8] sm:$0xff]  ;;  %v11911_v4 = vld [vmem:[#allocation3 + $0x660] sm:$0xff] }
 0xc4d   : > { %v5164_v29 = vpop.permute.xlu0 %5163  ;;  %5494 = vmatpush1.msra.mxu0 %v5137_v26  ;;  %v5166_v24 = vpop.permute.xlu1 %5165  ;;  %5564 = vmatprep.subr.mxu1 %v5140_v14  ;;  %v11894_v26 = vld [vmem:[#allocation3 + $0x6a0] sm:$0xff]  ;;  %13171 = vst [vmem:[#allocation13_spill] sm:$0xff] %v11903_v62  ;;  %13172 = vst [vmem:[#allocation18_spill] sm:$0xff] %v11911_v4 }
 0xc4e   : > { %v11883_v17 = vsel %vm5169_vm3, %v5164_v29, %v5166_v24  ;;  %5495 = vmatprep.subr.mxu0 %v5089_v53  ;;  %5565 = vmatpush1.msra.mxu1 %v5139_v31  ;;  %13170 = vst [vmem:[#allocation12_spill] sm:$0xff] %v11894_v26  ;;  %v11899_v54 = vsel %vm5169_vm3, %v11714_v16, %v5164_v29  ;;  %v11913_v16 = vld [vmem:[#allocation3 + $0x668] sm:$0xff]  ;;  %v11915_v31 = vld [vmem:[#allocation3 + $0x678] sm:$0xff] }
 0xc4f   : > { %v5369_v43 = vmul.f32 %v11877_v52, %v11883_v17  ;;  %5496 = vmatpush1.msra.mxu0 %v5088_v58  ;;  %5566 = vmatprep.subr.mxu1 %v5091_v25  ;;  %v11907_v14 = vsel %vm5169_vm3, %v5166_v24, %v5168_v2  ;;  %13173 = vst [vmem:[#allocation17_spill] sm:$0xff] %v11913_v16  ;;  %13174 = vst [vmem:[#allocation21_spill] sm:$0xff] %v11915_v31  ;;  %v11917_v58 = vld [vmem:[#allocation3 + $0x6b0] sm:$0xff] }
 0xc50   : > { %7702 = vmatmul.mubr.msk.f32.vlgmr.msra.gmra.mxu0 %vm730_vm9, %v11890_v9  ;;  %5567 = vmatpush1.msra.mxu1 %v5090_v60  ;;  %13175 = vst [vmem:[#allocation20_spill] sm:$0xff] %v11917_v58  ;;  %v11930_v24 = vld [vmem:[#allocation3 + $0x670] sm:$0xff]  ;;  %v5368_v52 = vmul.f32 %v11894_v26, %v11899_v54  ;;  %v11956_v26 = vld [vmem:[#allocation3 + $0x638] sm:$0xff]  ;;  %v5370_v42 = vmul.f32 %v11917_v58, %v11907_v14  ;;  %v11993_v58 = vld [vmem:[#allocation3 + $0x5e8] sm:$0xff] }
 0xc51   : > { %v5115_v53 = vpop.permute.xlu0 %5114  ;;  %v5117_v29 = vpop.permute.xlu1 %5116  ;;  %7771 = vmatprep.subr.msk.mxu0 %vm236_vm0, %v13009_v56  ;;  %7773 = vmatprep.subr.msk.mxu1 %vm236_vm0, %v13009_v56  ;;  %13176 = vst [vmem:[#allocation19_spill] sm:$0xff] %v11930_v24  ;;  %13177 = vst [vmem:[#allocation22_spill] sm:$0xff] %v11956_v26 }
 0xc52   : > { %v11925_v2 = vsel %vm5120_vm4, %v11754_v20, %v5115_v53  ;;  %v11934_v25 = vsel %vm5120_vm4, %v5117_v29, %v5119_v27  ;;  %v11938_v60 = vsel %vm5120_vm4, %v5115_v53, %v5117_v29  ;;  %7772 = vmatpush1.msk.msra.mxu0 %vm236_vm0, %v13009_v56  ;;  %v5371_v20 = vmul.f32 %v11903_v62, %v11822_v51  ;;  %v11953_v53 = vld [vmem:[#allocation3 + $0x620] sm:$0xff]  ;;  %v11965_v62 = vld [vmem:[#allocation3 + $0x628] sm:$0xff] }
 0xc53   : > { %v5344_v34 = vmul.f32 %v11911_v4, %v11925_v2  ;;  %v5345_v27 = vmul.f32 %v11913_v16, %v11938_v60  ;;  %7703 = vmatmul.mubr.msk.f32.vlgmr.msra.gmra.mxu1 %vm730_vm9, %v11890_v9  ;;  %5621 = vmatprep.subr.mxu0 %v5369_v43  ;;  %v5347_v29 = vmul.f32 %v11915_v31, %v5128_v59  ;;  %v11967_v43 = vld [vmem:[#allocation3 + $0x630] sm:$0xff] }
 0xc54   : > { %v5346_v51 = vmul.f32 %v11930_v24, %v11934_v25  ;;  %7774 = vmatpush1.msk.msra.mxu1 %vm236_vm0, %v13009_v56  ;;  %5622 = vmatpush1.msra.mxu0 %v5368_v52  ;;  %13178 = vst [vmem:[#allocation27_spill] sm:$0xff] %v11967_v43  ;;  %13180 = vst [vmem:[#allocation37_spill] sm:$0xff] %v11993_v58 }
 0xc55   : > { %v5066_v4 = vpop.permute.xlu0 %5065  ;;  %v5068_v16 = vpop.permute.xlu1 %5067  ;;  %5692 = vmatprep.subr.mxu1 %v5371_v20  ;;  %5623 = vmatprep.subr.mxu0 %v5345_v27  ;;  %v5323_v20 = vmul.f32 %v11956_v26, %v11865_v7 }
 0xc56   : > { %v11972_v59 = vsel %vm5071_vm5, %v11752_v10, %v5066_v4  ;;  %v11977_v24 = vsel %vm5071_vm5, %v5068_v16, %v11841_v39  ;;  %v11981_v52 = vsel %vm5071_vm5, %v5066_v4, %v5068_v16  ;;  %5693 = vmatpush1.msra.mxu1 %v5370_v42  ;;  %5624 = vmatpush1.msra.mxu0 %v5344_v34  ;;  %v11991_v39 = vld [vmem:[#allocation3 + $0x5e0] sm:$0xff] }
 0xc57   : > { %v5320_v31 = vmul.f32 %v11953_v53, %v11972_v59  ;;  %5694 = vmatprep.subr.mxu1 %v5347_v29  ;;  %v5321_v10 = vmul.f32 %v11965_v62, %v11981_v52  ;;  %v5322_v27 = vmul.f32 %v11967_v43, %v11977_v24  ;;  %13179 = vst [vmem:[#allocation23_spill] sm:$0xff] %v11991_v39  ;;  %v12005_v43 = vld [vmem:[#allocation3 + $0x5f8] sm:$0xff] }
 0xc58   : > { %5695 = vmatpush1.msra.mxu1 %v5346_v51  ;;  %5671 = vmatprep.mubr.f32.mxu0 %v13006_v46  ;;  %v12003_v51 = vld [vmem:[#allocation3 + $0x5f0] sm:$0xff]  ;;  %13182 = vst [vmem:[#allocation28_spill] sm:$0xff] %v12005_v43 }
 0xc59   : > { %v5270_v42 = vpop.permute.xlu0 %5269  ;;  %v5272_v4 = vpop.permute.xlu1 %5271  ;;  %5696 = vmatprep.subr.mxu1 %v5323_v20  ;;  %5625 = vmatprep.subr.mxu0 %v5321_v10  ;;  %13181 = vst [vmem:[#allocation42_spill] sm:$0xff] %v12003_v51 }
 0xc5a   : > { %v5278_v7 = vsel %vm5275_vm6, %v11790_v48, %v5270_v42  ;;  %v5277_v16 = vsel %vm5275_vm6, %v5270_v42, %v5272_v4  ;;  %5697 = vmatpush1.msra.mxu1 %v5322_v27  ;;  %5626 = vmatpush1.msra.mxu0 %v5320_v31  ;;  %v12017_v42 = vld [vmem:[#allocation3 + $0x568] sm:$0xff] }
 0xc5b   : > { %v5296_v34 = vmul.f32 %v11991_v39, %v5278_v7  ;;  %v5297_v29 = vmul.f32 %v11993_v58, %v5277_v16  ;;  %5742 = vmatprep.mubr.f32.mxu1 %v13006_v46  ;;  %v12019_v7 = vld [vmem:[#allocation3 + $0x570] sm:$0xff]  ;;  %v12021_v16 = vld [vmem:[#allocation3 + $0x578] sm:$0xff] }
 0xc5c   : > { %13183 = vst [vmem:[#allocation29_spill] sm:$0xff] %v12019_v7  ;;  %13184 = vst [vmem:[#allocation26_spill] sm:$0xff] %v12021_v16  ;;  %v12049_v39 = vld [vmem:[#allocation3 + $0x4f8] sm:$0xff] }
 0xc5d   : > { %v5274_v20 = vpop.permute.xlu0 %5273  ;;  %5627 = vmatprep.subr.mxu0 %v5297_v29  ;;  %v5211_v26 = vpop.permute.xlu1 %5210  ;;  %13187 = vst [vmem:[#allocation31_spill] sm:$0xff] %v12049_v39 }
 0xc5e   : > { %v5276_v48 = vsel %vm5275_vm6, %v5272_v4, %v5274_v20  ;;  %v5283_v10 = vsel %vm5275_vm6, %v5274_v20, %v11643_v19  ;;  %5628 = vmatpush1.msra.mxu0 %v5296_v34  ;;  %v12023_v4 = vld [vmem:[#allocation3 + $0x560] sm:$0xff]  ;;  %v5222_v19 = vsel %vm5218_vm7, %v11788_v38, %v5211_v26  ;;  %v12028_v20 = vld [vmem:[#allocation3 + $0x528] sm:$0xff]  ;;  %v12041_v38 = vld [vmem:[#allocation3 + $0x530] sm:$0xff] }
 0xc5f   : > { %v5298_v27 = vmul.f32 %v12003_v51, %v5276_v48  ;;  %v5299_v31 = vmul.f32 %v12005_v43, %v5283_v10  ;;  %5629 = vmatprep.subr.mxu0 %v11609_v28  ;;  %v12030_v28 = vld [vmem:[#allocation3 + $0x538] sm:$0xff]  ;;  %v12039_v43 = vld [vmem:[#allocation3 + $0x520] sm:$0xff]  ;;  %13186 = vst [vmem:[#allocation24_spill] sm:$0xff] %v12041_v38 }
 0xc60   : > { %5630 = vmatpush1.msra.mxu0 %v11566_v35  ;;  %13185 = vst [vmem:[#allocation49_spill] sm:$0xff] %v12030_v28 }
 0xc61   : > { %v5213_v34 = vpop.permute.xlu0 %5212  ;;  %5698 = vmatprep.subr.mxu1 %v5299_v31  ;;  %v5215_v29 = vpop.permute.xlu1 %5214 }
 0xc62   : > { %v5221_v35 = vsel %vm5218_vm7, %v5211_v26, %v5213_v34  ;;  %v5219_v48 = vsel %vm5218_vm7, %v5215_v29, %v11809_v49  ;;  %v5220_v10 = vsel %vm5218_vm7, %v5213_v34, %v5215_v29  ;;  %5699 = vmatpush1.msra.mxu1 %v5298_v27  ;;  %v12047_v26 = vld [vmem:[#allocation3 + $0x4e8] sm:$0xff]  ;;  %v5239_v49 = vmul.f32 %v12023_v4, %v5222_v19  ;;  %v12053_v27 = vld [vmem:[#allocation3 + $0x4e0] sm:$0xff] }
 0xc63   : > { %v5240_v31 = vmul.f32 %v12017_v42, %v5221_v35  ;;  %v5241_v51 = vmul.f32 %v12019_v7, %v5220_v10  ;;  %v5242_v58 = vmul.f32 %v12021_v16, %v5219_v48  ;;  %5700 = vmatprep.subr.mxu1 %v11594_v37  ;;  %13188 = vst [vmem:[#allocation25_spill] sm:$0xff] %v12053_v27  ;;  %v12059_v35 = vld [vmem:[#allocation3 + $0x4f0] sm:$0xff]  ;;  %v12065_v48 = vld [vmem:[#allocation3 + $0x4a8] sm:$0xff] }
 0xc64   : > { %5701 = vmatpush1.msra.mxu1 %v11611_v18  ;;  %v5191_v34 = vmul.f32 %v12028_v20, %v11899_v54  ;;  %v5193_v29 = vmul.f32 %v12030_v28, %v11907_v14  ;;  %13189 = vst [vmem:[#allocation38_spill] sm:$0xff] %v12059_v35  ;;  %v5190_v37 = vmul.f32 %v12039_v43, %v11733_v55  ;;  %13190 = vst [vmem:[#allocation34_spill] sm:$0xff] %v12065_v48  ;;  %v12067_v18 = vld [vmem:[#allocation3 + $0x4b8] sm:$0xff]  ;;  %v12069_v54 = vld [vmem:[#allocation3 + $0x4a0] sm:$0xff] }
 0xc65   : > { %5631 = vmatprep.subr.mxu0 %v5240_v31  ;;  %5702 = vmatprep.subr.mxu1 %v5242_v58  ;;  %v5192_v19 = vmul.f32 %v12041_v38, %v11883_v17  ;;  %13191 = vst [vmem:[#allocation41_spill] sm:$0xff] %v12067_v18  ;;  %13192 = vst [vmem:[#allocation30_spill] sm:$0xff] %v12069_v54  ;;  %v5142_v14 = vmul.f32 %v12047_v26, %v11925_v2  ;;  %v12075_v10 = vld [vmem:[#allocation3 + $0x4b0] sm:$0xff] }
 0xc66   : > { %5632 = vmatpush1.msra.mxu0 %v5239_v49  ;;  %5703 = vmatpush1.msra.mxu1 %v5241_v51  ;;  %v5144_v58 = vmul.f32 %v12049_v39, %v11934_v25  ;;  %13193 = vst [vmem:[#allocation36_spill] sm:$0xff] %v12075_v10  ;;  %v5141_v55 = vmul.f32 %v12053_v27, %v11759_v5  ;;  %v13199_v27 = vld [vmem:[#allocation43_spill] sm:$0xff] }
 0xc67   : > { %5633 = vmatprep.subr.mxu0 %v5191_v34  ;;  %5704 = vmatprep.subr.mxu1 %v5193_v29  ;;  %v5143_v17 = vmul.f32 %v12059_v35, %v11938_v60  ;;  %v5093_v51 = vmul.f32 %v12065_v48, %v11972_v59  ;;  %v5095_v2 = vmul.f32 %v12067_v18, %v11977_v24 }
 0xc68   : > { %5634 = vmatpush1.msra.mxu0 %v5190_v37  ;;  %5705 = vmatpush1.msra.mxu1 %v5192_v19  ;;  %v5092_v25 = vmul.f32 %v12069_v54, %v11772_v13  ;;  %v5094_v31 = vmul.f32 %v12075_v10, %v11981_v52 }
 0xc69   : > { %5635 = vmatprep.subr.mxu0 %v5142_v14  ;;  %5706 = vmatprep.subr.mxu1 %v5144_v58 }
 0xc6a   : > { %5636 = vmatpush1.msra.mxu0 %v5141_v55  ;;  %5707 = vmatpush1.msra.mxu1 %v5143_v17 }
 0xc6b   : > { %5637 = vmatprep.subr.mxu0 %v5093_v51  ;;  %5708 = vmatprep.subr.mxu1 %v5095_v2 }
 0xc6c   : > { %5638 = vmatpush1.msra.mxu0 %v5092_v25  ;;  %5709 = vmatpush1.msra.mxu1 %v5094_v31 }
 0xc6d   : > { %7704 = vmatmul.mubr.msk.f32.vlgmr.msra.gmra.mxu0 %vm730_vm9, %v11890_v9  ;;  %7705 = vmatmul.mubr.msk.f32.vlgmr.msra.gmra.mxu1 %vm730_vm9, %v11890_v9 }
 0xc6e   : > { %7775 = vmatprep.subr.msk.mxu0 %vm236_vm0, %v13009_v56  ;;  %7777 = vmatprep.subr.msk.mxu1 %vm236_vm0, %v13009_v56 }
 0xc6f   : > { %7776 = vmatpush1.msk.msra.mxu0 %vm236_vm0, %v13009_v56  ;;  %7778 = vmatpush1.msk.msra.mxu1 %vm236_vm0, %v13009_v56 }
 0xc70   : > { %6234 = vmatprep.mubr.f32.mxu0 %v13006_v46  ;;  %6305 = vmatprep.mubr.f32.mxu1 %v13006_v46 }
 0xd10   : > { %v5531_v5 = vpop.f32.mrf.mxu0 }
 0xd11   : > { %v5749_v13 = vmul.f32 0.1, %v5531_v5 }
 0xd12   : > { %v5533_v59 = vpop.f32.mrf.mxu0 }
 0xd13   : > { %v12107_v9 = vmax.f32 %v5531_v5, %v5749_v13  ;;  %v5602_v24 = vpop.f32.mrf.mxu1  ;;  %v5750_v49 = vmul.f32 0.1, %v5533_v59 }
 0xd14   : > { %v5751_v60 = vmul.f32 0.1, %v5602_v24 }
 0xd15   : > { %5813 = vrot.lane.b32.xlu1 %v12107_v9, %s8079_s16  ;;  %5861 = vrot.lane.b32.xlu0 %v12107_v9, %s8080_s17  ;;  %v12123_v34 = vmax.f32 %v5533_v59, %v5750_v49  ;;  %v5604_v29 = vpop.f32.mrf.mxu1 }
 0xd16   : > { %v12113_v52 = vmax.f32 %v5602_v24, %v5751_v60  ;;  %v5752_v37 = vmul.f32 0.1, %v5604_v29 }
 0xd18   : > { %v12141_v19 = vmax.f32 %v5604_v29, %v5752_v37 }
 0xd19   : > { %5965 = vrot.lane.b32.xlu1 %v12107_v9, %s8081_s19  ;;  %5765 = vrot.lane.b32.xlu0 %v12107_v9, %s8082_s20 }
 0xd1d   : > { %5865 = vrot.lane.b32.xlu1 %v12113_v52, %s8080_s17  ;;  %5909 = vrot.lane.b32.xlu0 %v12107_v9, %s8083_s21 }
 0xd21   : > { %5815 = vrot.lane.b32.xlu1 %v12123_v34, %s8079_s16  ;;  %5863 = vrot.lane.b32.xlu0 %v12123_v34, %s8080_s17 }
 0xd25   : > { %5769 = vrot.lane.b32.xlu1 %v12113_v52, %s8082_s20  ;;  %5817 = vrot.lane.b32.xlu0 %v12113_v52, %s8079_s16 }
 0xd29   : > { %5967 = vrot.lane.b32.xlu1 %v12123_v34, %s8081_s19  ;;  %5767 = vrot.lane.b32.xlu0 %v12123_v34, %s8082_s20 }
 0xd2d   : > { %5911 = vrot.lane.b32.xlu1 %v12123_v34, %s8083_s21  ;;  %5969 = vrot.lane.b32.xlu0 %v12113_v52, %s8081_s19  ;;  %v5673_v14 = vpop.f32.mrf.mxu0  ;;  %v5744_v51 = vpop.f32.mrf.mxu1 }
 0xd2e   : > { %v5753_v58 = vmul.f32 0.1, %v5673_v14  ;;  %v5755_v2 = vmul.f32 0.1, %v5744_v51 }
 0xd2f   : > { %v5675_v17 = vpop.f32.mrf.mxu0  ;;  %v5746_v31 = vpop.f32.mrf.mxu1 }
 0xd30   : > { %v12147_v55 = vmax.f32 %v5673_v14, %v5753_v58  ;;  %v5754_v25 = vmul.f32 0.1, %v5675_v17  ;;  %v12161_v5 = vmax.f32 %v5744_v51, %v5755_v2  ;;  %v5756_v24 = vmul.f32 0.1, %v5746_v31 }
 0xd31   : > { %5867 = vrot.lane.b32.xlu1 %v12141_v19, %s8080_s17  ;;  %5913 = vrot.lane.b32.xlu0 %v12113_v52, %s8083_s21 }
 0xd32   : > { %13194 = vst [vmem:[#allocation50_spill] sm:$0xff] %v12161_v5  ;;  %v12167_v13 = vmax.f32 %v5675_v17, %v5754_v25  ;;  %v12173_v60 = vmax.f32 %v5746_v31, %v5756_v24 }
 0xd34   : > { %13195 = vst [vmem:[#allocation47_spill] sm:$0xff] %v12173_v60 }
 0xd35   : > { %5915 = vrot.lane.b32.xlu1 %v12141_v19, %s8083_s21  ;;  %5819 = vrot.lane.b32.xlu0 %v12141_v19, %s8079_s16 }
 0xd39   : > { %5771 = vrot.lane.b32.xlu0 %v12141_v19, %s8082_s20  ;;  %5821 = vrot.lane.b32.xlu1 %v12147_v55, %s8079_s16 }
 0xd3d   : > { %5971 = vrot.lane.b32.xlu0 %v12141_v19, %s8081_s19  ;;  %5773 = vrot.lane.b32.xlu1 %v12147_v55, %s8082_s20 }
 0xd41   : > { %5973 = vrot.lane.b32.xlu1 %v12147_v55, %s8081_s19  ;;  %5869 = vrot.lane.b32.xlu0 %v12147_v55, %s8080_s17 }
 0xd45   : > { %5871 = vrot.lane.b32.xlu0 %v12167_v13, %s8080_s17  ;;  %5873 = vrot.lane.b32.xlu1 %v12161_v5, %s8080_s17 }
 0xd49   : > { %5875 = vrot.lane.b32.xlu1 %v12173_v60, %s8080_s17  ;;  %5923 = vrot.lane.b32.xlu0 %v12173_v60, %s8083_s21 }
 0xd4d   : > { %5779 = vrot.lane.b32.xlu1 %v12173_v60, %s8082_s20  ;;  %5827 = vrot.lane.b32.xlu0 %v12173_v60, %s8079_s16 }
 0xd51   : > { %5825 = vrot.lane.b32.xlu1 %v12161_v5, %s8079_s16  ;;  %5823 = vrot.lane.b32.xlu0 %v12167_v13, %s8079_s16 }
 0xd55   : > { %5777 = vrot.lane.b32.xlu1 %v12161_v5, %s8082_s20  ;;  %5775 = vrot.lane.b32.xlu0 %v12167_v13, %s8082_s20 }
 0xd59   : > { %5977 = vrot.lane.b32.xlu1 %v12161_v5, %s8081_s19  ;;  %5975 = vrot.lane.b32.xlu0 %v12167_v13, %s8081_s19 }
 0xd5d   : > { %5919 = vrot.lane.b32.xlu1 %v12167_v13, %s8083_s21  ;;  %5917 = vrot.lane.b32.xlu0 %v12147_v55, %s8083_s21 }
 0xd61   : > { %5921 = vrot.lane.b32.xlu1 %v12161_v5, %s8083_s21  ;;  %5979 = vrot.lane.b32.xlu0 %v12173_v60, %s8081_s19 }
 0xd87   : > { %v12203_v59 = vpop.permute.xlu0 %5861  ;;  %v12205_v49 = vpop.permute.xlu1 %5813 }
 0xd8b   : > { %v12207_v29 = vpop.permute.xlu0 %5765  ;;  %v12209_v37 = vpop.permute.xlu1 %5965 }
 0xd8f   : > { %v12211_v14 = vpop.permute.xlu0 %5909  ;;  %v5866_v58 = vpop.permute.xlu1 %5865 }
 0xd93   : > { %v5864_v17 = vpop.permute.xlu0 %5863  ;;  %v5816_v51 = vpop.permute.xlu1 %5815 }
 0xd94   : > { %v12215_v2 = vsel %vm5169_vm3, %v5864_v17, %v5866_v58  ;;  %v12220_v25 = vsel %vm5169_vm3, %v12203_v59, %v5864_v17  ;;  %v12229_v10 = vsel %vm5120_vm4, %v12205_v49, %v5816_v51 }
 0xd95   : > { %v6069_v31 = vmul.f32 %v12220_v25, %v11653_v61  ;;  %v6070_v24 = vmul.f32 %v12215_v2, %v11651_v45  ;;  %v6045_v61 = vmul.f32 %v12229_v10, %v11671_v30 }
 0xd97   : > { %v5818_v18 = vpop.permute.xlu0 %5817  ;;  %6184 = vmatprep.subr.mxu0 %v6070_v24  ;;  %v5770_v35 = vpop.permute.xlu1 %5769 }
 0xd98   : > { %v12233_v39 = vsel %vm5120_vm4, %v5816_v51, %v5818_v18  ;;  %6185 = vmatpush1.msra.mxu0 %v6069_v31 }
 0xd99   : > { %v6046_v17 = vmul.f32 %v12233_v39, %v11669_v3 }
 0xd9b   : > { %v5768_v45 = vpop.permute.xlu0 %5767  ;;  %6186 = vmatprep.subr.mxu0 %v6046_v17  ;;  %v5968_v38 = vpop.permute.xlu1 %5967 }
 0xd9c   : > { %v12241_v28 = vsel %vm5071_vm5, %v5768_v45, %v5770_v35  ;;  %v12246_v24 = vsel %vm5071_vm5, %v12207_v29, %v5768_v45  ;;  %6187 = vmatpush1.msra.mxu0 %v6045_v61  ;;  %v5987_v30 = vsel %vm5275_vm6, %v12209_v37, %v5968_v38 }
 0xd9d   : > { %v6021_v51 = vmul.f32 %v12246_v24, %v11685_v36  ;;  %v6022_v3 = vmul.f32 %v12241_v28, %v11683_v41  ;;  %v5997_v61 = vmul.f32 %v5987_v30, %v11704_v8 }
 0xd9f   : > { %v5970_v31 = vpop.permute.xlu0 %5969  ;;  %6188 = vmatprep.subr.mxu0 %v6022_v3  ;;  %v5912_v17 = vpop.permute.xlu1 %5911 }
 0xda0   : > { %v5986_v5 = vsel %vm5275_vm6, %v5968_v38, %v5970_v31  ;;  %6189 = vmatpush1.msra.mxu0 %v6021_v51  ;;  %v5931_v36 = vsel %vm5218_vm7, %v12211_v14, %v5912_v17 }
 0xda1   : > { %v5998_v45 = vmul.f32 %v5986_v5, %v11702_v57  ;;  %v5942_v60 = vmul.f32 %v5931_v36, %v11722_v11 }
 0xda3   : > { %v5914_v41 = vpop.permute.xlu0 %5913  ;;  %6190 = vmatprep.subr.mxu0 %v5998_v45  ;;  %v5868_v7 = vpop.permute.xlu1 %5867 }
 0xda4   : > { %6191 = vmatpush1.msra.mxu0 %v5997_v61  ;;  %v5881_v30 = vsel %vm5169_vm3, %v5866_v58, %v5868_v7 }
 0xda5   : > { %6192 = vmatprep.subr.mxu0 %v12123_v34  ;;  %v6071_v61 = vmul.f32 %v5881_v30, %v11724_v63 }
 0xda6   : > { %6193 = vmatpush1.msra.mxu0 %v12107_v9 }
 0xda7   : > { %v5820_v38 = vpop.permute.xlu0 %5819  ;;  %6194 = vmatprep.subr.mxu0 %v5942_v60  ;;  %v12265_v51 = vpop.permute.xlu1 %5915 }
 0xda8   : > { %v5833_v60 = vsel %vm5120_vm4, %v5818_v18, %v5820_v38 }
 0xda9   : > { %v6047_v18 = vmul.f32 %v5833_v60, %v11746_v44 }
 0xdab   : > { %v5772_v57 = vpop.permute.xlu0 %5771  ;;  %v12267_v8 = vpop.permute.xlu1 %5821 }
 0xdac   : > { %v12280_v9 = vsel %vm5120_vm4, %v5820_v38, %v12267_v8  ;;  %v5785_v16 = vsel %vm5071_vm5, %v5770_v35, %v5772_v57  ;;  %v13197_v38 = vld [vmem:[#allocation39_spill] sm:$0xff] }
 0xdad   : > { %13196 = vst [vmem:[#allocation32_spill] sm:$0xff] %v12280_v9 }
 0xdaf   : > { %v5972_v5 = vpop.permute.xlu0 %5971  ;;  %v12269_v3 = vpop.permute.xlu1 %5773 }
 0xdb0   : > { %v12295_v36 = vsel %vm5071_vm5, %v5772_v57, %v12269_v3  ;;  %v13198_v57 = vld [vmem:[#allocation44_spill] sm:$0xff] }
 0xdb1   : > { %v6024_v35 = vmul.f32 %v12295_v36, %v11767_v21 }
 0xdb3   : > { %v12273_v45 = vpop.permute.xlu0 %5869  ;;  %v12275_v11 = vpop.permute.xlu1 %5973 }
 0xdb4   : > { %v12285_v34 = vsel %vm5169_vm3, %v5868_v7, %v12273_v45  ;;  %v6048_v7 = vmul.f32 %v12280_v9, %v11744_v40  ;;  %v5984_v63 = vsel %vm5275_vm6, %v5972_v5, %v12275_v11  ;;  %v6023_v40 = vmul.f32 %v5785_v16, %v13197_v38 }
 0xdb5   : > { %v6072_v58 = vmul.f32 %v12285_v34, %v11726_v23  ;;  %v5985_v23 = vsel %vm5275_vm6, %v5970_v31, %v5972_v5  ;;  %v5929_v5 = vsel %vm5218_vm7, %v5914_v41, %v12265_v51 }
 0xdb6   : > { %v5999_v46 = vmul.f32 %v5985_v23, %v13199_v27  ;;  %v5894_v27 = vmul.f32 %v12220_v25, %v11811_v33  ;;  %v13201_v23 = vld [vmem:[#allocation45_spill] sm:$0xff] }
 0xdb7   : > { %v5872_v54 = vpop.permute.xlu0 %5871  ;;  %6255 = vmatprep.subr.mxu1 %v6072_v58  ;;  %v12301_v48 = vpop.permute.xlu1 %5873  ;;  %v6000_v58 = vmul.f32 %v5984_v63, %v13198_v57 }
 0xdb8   : > { %6256 = vmatpush1.msra.mxu1 %v6071_v61 }
 0xdb9   : > { %6257 = vmatprep.subr.mxu1 %v6048_v7  ;;  %v5930_v7 = vsel %vm5218_vm7, %v5912_v17, %v5914_v41 }
 0xdba   : > { %6258 = vmatpush1.msra.mxu1 %v6047_v18 }
 0xdbb   : > { %v12313_v9 = vpop.permute.xlu0 %5923  ;;  %6259 = vmatprep.subr.mxu1 %v6024_v35  ;;  %v5876_v44 = vpop.permute.xlu1 %5875  ;;  %v5944_v35 = vmul.f32 %v5929_v5, %v13201_v23  ;;  %v13212_v23 = vld [vmem:[#allocation18_spill] sm:$0xff] }
 0xdbc   : > { %v5932_v31 = vsel %vm5218_vm7, %v12313_v9, %v12211_v14  ;;  %v12323_v21 = vsel %vm5169_vm3, %v5876_v44, %v12203_v59  ;;  %6260 = vmatpush1.msra.mxu1 %v6023_v40  ;;  %v13200_v14 = vld [vmem:[#allocation16_spill] sm:$0xff]  ;;  %v5848_v40 = vmul.f32 %v5833_v60, %v11843_v6  ;;  %v13205_v6 = vld [vmem:[#allocation9_spill] sm:$0xff]  ;;  %v12380_v60 = vsel %vm5169_vm3, %v12273_v45, %v5872_v54 }
 0xdbd   : > { %v5941_v61 = vmul.f32 %v5932_v31, %v11802_v15  ;;  %6261 = vmatprep.subr.mxu1 %v6000_v58  ;;  %v5893_v18 = vmul.f32 %v12323_v21, %v13200_v14  ;;  %v5846_v15 = vmul.f32 %v12229_v10, %v11829_v32  ;;  %v5798_v10 = vmul.f32 %v12246_v24, %v11845_v50  ;;  %v13207_v58 = vld [vmem:[#allocation11_spill] sm:$0xff]  ;;  %v13208_v45 = vld [vmem:[#allocation12_spill] sm:$0xff] }
 0xdbe   : > { %6262 = vmatpush1.msra.mxu1 %v5999_v46  ;;  %v13202_v46 = vld [vmem:[#allocation46_spill] sm:$0xff]  ;;  %v5847_v24 = vmul.f32 %v12233_v39, %v11847_v22 }
 0xdbf   : > { %v5828_v59 = vpop.permute.xlu0 %5827  ;;  %6195 = vmatpush1.msra.mxu0 %v5941_v61  ;;  %6263 = vmatprep.subr.mxu1 %v12141_v19  ;;  %v12336_v63 = vpop.permute.xlu1 %5779  ;;  %v5943_v25 = vmul.f32 %v5930_v7, %v13202_v46  ;;  %v6073_v61 = vmul.f32 %v12380_v60, %v13208_v45  ;;  %v13210_v7 = vld [vmem:[#allocation20_spill] sm:$0xff] }
 0xdc0   : > { %v12344_v33 = vsel %vm5120_vm4, %v5828_v59, %v12205_v49  ;;  %6196 = vmatprep.subr.mxu0 %v5894_v27  ;;  %6264 = vmatpush1.msra.mxu1 %v12113_v52  ;;  %v12354_v32 = vsel %vm5071_vm5, %v12336_v63, %v12207_v29  ;;  %v13203_v49 = vld [vmem:[#allocation14_spill] sm:$0xff]  ;;  %v13204_v52 = vld [vmem:[#allocation15_spill] sm:$0xff]  ;;  %v12365_v29 = vsel %vm5169_vm3, %v5872_v54, %v12301_v48 }
 0xdc1   : > { %v5845_v19 = vmul.f32 %v12344_v33, %v11835_v47  ;;  %6197 = vmatpush1.msra.mxu0 %v5893_v18  ;;  %v5896_v17 = vmul.f32 %v5881_v30, %v13203_v49  ;;  %6265 = vmatprep.subr.mxu1 %v5944_v35  ;;  %v5895_v41 = vmul.f32 %v12215_v2, %v13204_v52  ;;  %v12372_v2 = vld [vmem:[%s12871_s1 + $0x38] sm:$0xff]  ;;  %v13211_v18 = vld [vmem:[#allocation13_spill] sm:$0xff] }
 0xdc2   : > { %6198 = vmatprep.subr.mxu0 %v5846_v15  ;;  %6266 = vmatpush1.msra.mxu1 %v5943_v25  ;;  %v5797_v50 = vmul.f32 %v12354_v32, %v11859_v0  ;;  %v5800_v30 = vmul.f32 %v5785_v16, %v13205_v6  ;;  %v13206_v0 = vld [vmem:[#allocation10_spill] sm:$0xff]  ;;  %v6074_v31 = vmul.f32 %v12365_v29, %v13207_v58  ;;  %v13214_v49 = vld [vmem:[#allocation37_spill] sm:$0xff]  ;;  %v13218_v6 = vld [vmem:[#allocation27_spill] sm:$0xff] }
 0xdc3   : > { %v5824_v38 = vpop.permute.xlu0 %5823  ;;  %6199 = vmatpush1.msra.mxu0 %v5845_v19  ;;  %v5826_v47 = vpop.permute.xlu1 %5825  ;;  %6267 = vmatprep.subr.mxu1 %v5896_v17  ;;  %v5799_v57 = vmul.f32 %v12241_v28, %v13206_v0  ;;  %v12395_v16 = vsel %vm5169_vm3, %v12301_v48, %v5876_v44  ;;  %v13209_v48 = vld [vmem:[#allocation17_spill] sm:$0xff]  ;;  %v6076_v15 = vmul.f32 %v12323_v21, %v13211_v18 }
 0xdc4   : > { %6200 = vmatprep.subr.mxu0 %v5798_v10  ;;  %6268 = vmatpush1.msra.mxu1 %v5895_v41  ;;  %v12388_v5 = vsel %vm5120_vm4, %v5824_v38, %v5826_v47  ;;  %v5831_v28 = vsel %vm5120_vm4, %v12267_v8, %v5824_v38  ;;  %v6075_v14 = vmul.f32 %v12395_v16, %v13210_v7  ;;  %v13213_v10 = vld [vmem:[#allocation23_spill] sm:$0xff]  ;;  %v13215_v52 = vld [vmem:[#allocation21_spill] sm:$0xff] }
 0xdc5   : > { %6201 = vmatpush1.msra.mxu0 %v5797_v50  ;;  %6269 = vmatprep.subr.mxu1 %v5848_v40  ;;  %v6050_v44 = vmul.f32 %v12388_v5, %v13209_v48  ;;  %v6049_v35 = vmul.f32 %v5831_v28, %v13212_v23  ;;  %v6052_v41 = vmul.f32 %v12344_v33, %v13215_v52  ;;  %v13216_v38 = vld [vmem:[#allocation19_spill] sm:$0xff]  ;;  %v13217_v50 = vld [vmem:[#allocation22_spill] sm:$0xff]  ;;  %v13230_v23 = vld [vmem:[#allocation49_spill] sm:$0xff] }
 0xdc6   : > { %7707 = vmatmul.mubr.msk.f32.vlgmr.msra.gmra.mxu0 %vm730_vm9, %v12372_v2  ;;  %6270 = vmatpush1.msra.mxu1 %v5847_v24  ;;  %v6028_v24 = vmul.f32 %v12354_v32, %v13217_v50  ;;  %v5898_v58 = vmul.f32 %v12380_v60, %v12028_v20  ;;  %v5850_v45 = vmul.f32 %v5831_v28, %v12047_v26  ;;  %v13221_v60 = vmov 0.0   ;;  %v13225_v26 = vld [vmem:[#allocation30_spill] sm:$0xff]  ;;  %v13227_v7 = vld [vmem:[#allocation47_spill] sm:$0xff] }
 0xdc7   : > { %v5776_v22 = vpop.permute.xlu0 %5775  ;;  %v5778_v39 = vpop.permute.xlu1 %5777  ;;  %7779 = vmatprep.subr.msk.mxu0 %vm236_vm0, %v13009_v56  ;;  %6271 = vmatprep.subr.mxu1 %v5800_v30  ;;  %v5801_v28 = vmul.f32 %v12295_v36, %v13225_v26  ;;  %v13232_v36 = vld [vmem:[#allocation31_spill] sm:$0xff] }
 0xdc8   : > { %v12405_v54 = vsel %vm5071_vm5, %v5776_v22, %v5778_v39  ;;  %7780 = vmatpush1.msk.msra.mxu0 %vm236_vm0, %v13009_v56  ;;  %v5783_v8 = vsel %vm5071_vm5, %v12269_v3, %v5776_v22  ;;  %6272 = vmatpush1.msra.mxu1 %v5799_v57 }
 0xdc9   : > { %v6026_v27 = vmul.f32 %v12405_v54, %v11965_v62  ;;  %6326 = vmatprep.subr.mxu0 %v6074_v31  ;;  %7781 = vmatprep.subr.msk.mxu1 %vm236_vm0, %v13009_v56  ;;  %v12429_v62 = vsel %vm5120_vm4, %v5826_v47, %v5828_v59  ;;  %v6025_v19 = vmul.f32 %v5783_v8, %v11953_v53 }
 0xdca   : > { %6327 = vmatpush1.msra.mxu0 %v6073_v61  ;;  %7708 = vmatmul.mubr.msk.f32.vlgmr.msra.gmra.mxu1 %vm730_vm9, %v12372_v2  ;;  %v6051_v53 = vmul.f32 %v12429_v62, %v13216_v38  ;;  %v13222_v61 = vld [vmem:[#allocation25_spill] sm:$0xff] }
 0xdcb   : > { %v5976_v46 = vpop.permute.xlu0 %5975  ;;  %v5978_v3 = vpop.permute.xlu1 %5977  ;;  %6328 = vmatprep.subr.mxu0 %v6050_v44  ;;  %7782 = vmatpush1.msk.msra.mxu1 %vm236_vm0, %v13009_v56 }
 0xdcc   : > { %v5983_v21 = vsel %vm5275_vm6, %v12275_v11, %v5976_v46  ;;  %v5982_v25 = vsel %vm5275_vm6, %v5976_v46, %v5978_v3  ;;  %6329 = vmatpush1.msra.mxu0 %v6049_v35  ;;  %v5781_v11 = vsel %vm5071_vm5, %v5778_v39, %v12336_v63  ;;  %6397 = vmatprep.subr.mxu1 %v6076_v15  ;;  %v13220_v39 = vld [vmem:[#allocation28_spill] sm:$0xff]  ;;  %v13229_v15 = vld [vmem:[#allocation50_spill] sm:$0xff] }
 0xdcd   : > { %v6001_v59 = vmul.f32 %v5983_v21, %v13213_v10  ;;  %v6002_v17 = vmul.f32 %v5982_v25, %v13214_v49  ;;  %6330 = vmatprep.subr.mxu0 %v6026_v27  ;;  %6398 = vmatpush1.msra.mxu1 %v6075_v14  ;;  %v6027_v30 = vmul.f32 %v5781_v11, %v13218_v6  ;;  %v13226_v27 = vld [vmem:[#allocation26_spill] sm:$0xff]  ;;  %v13228_v14 = vld [vmem:[#allocation29_spill] sm:$0xff] }
 0xdce   : > { %6331 = vmatpush1.msra.mxu0 %v6025_v19  ;;  %6399 = vmatprep.subr.mxu1 %v6052_v41  ;;  %v5900_v35 = vmul.f32 %v12395_v16, %v13230_v23  ;;  %v13233_v21 = vld [vmem:[#allocation38_spill] sm:$0xff]  ;;  %v13234_v16 = vld [vmem:[#allocation41_spill] sm:$0xff]  ;;  %v13235_v19 = vld [vmem:[#allocation36_spill] sm:$0xff] }
 0xdcf   : > { %v5918_v47 = vpop.permute.xlu0 %5917  ;;  %v5920_v40 = vpop.permute.xlu1 %5919  ;;  %6332 = vmatprep.subr.mxu0 %v6002_v17  ;;  %6400 = vmatpush1.msra.mxu1 %v6051_v53  ;;  %v5851_v25 = vmul.f32 %v12388_v5, %v13233_v21 }
 0xdd0   : > { %v5928_v33 = vsel %vm5218_vm7, %v12265_v51, %v5918_v47  ;;  %v5927_v63 = vsel %vm5218_vm7, %v5918_v47, %v5920_v40  ;;  %6333 = vmatpush1.msra.mxu0 %v6001_v59  ;;  %6401 = vmatprep.subr.mxu1 %v6028_v24 }
 0xdd1   : > { %v5945_v0 = vmul.f32 %v5928_v33, %v12023_v4  ;;  %v5946_v57 = vmul.f32 %v5927_v63, %v12017_v42  ;;  %6334 = vmatprep.subr.mxu0 %v12167_v13  ;;  %6402 = vmatpush1.msra.mxu1 %v6027_v30  ;;  %v5897_v42 = vmul.f32 %v12285_v34, %v12039_v43  ;;  %v13219_v13 = vld [vmem:[#allocation42_spill] sm:$0xff] }
 0xdd2   : > { %6335 = vmatpush1.msra.mxu0 %v12147_v55  ;;  %6376 = vmatprep.mubr.f32.mxu0 %v13221_v60  ;;  %v13224_v34 = vld [vmem:[#allocation34_spill] sm:$0xff] }
 0xdd3   : > { %v5980_v32 = vpop.permute.xlu0 %5979  ;;  %v5922_v51 = vpop.permute.xlu1 %5921  ;;  %6336 = vmatprep.subr.mxu0 %v5946_v57  ;;  %v5802_v44 = vmul.f32 %v5783_v8, %v13224_v34  ;;  %v13231_v8 = vld [vmem:[#allocation24_spill] sm:$0xff]  ;;  %6447 = vmatprep.mubr.f32.mxu1 %v13221_v60 }
 0xdd4   : > { %v5981_v31 = vsel %vm5275_vm6, %v5978_v3, %v5980_v32  ;;  %v5988_v4 = vsel %vm5275_vm6, %v5980_v32, %v12209_v37  ;;  %6337 = vmatpush1.msra.mxu0 %v5945_v0  ;;  %v5925_v20 = vsel %vm5218_vm7, %v5922_v51, %v12313_v9  ;;  %v13223_v37 = vld [vmem:[#allocation32_spill] sm:$0xff]  ;;  %v5926_v43 = vsel %vm5218_vm7, %v5920_v40, %v5922_v51 }
 0xdd5   : > { %v6003_v22 = vmul.f32 %v5981_v31, %v13219_v13  ;;  %v6004_v55 = vmul.f32 %v5988_v4, %v13220_v39  ;;  %6338 = vmatprep.subr.mxu0 %v5898_v58  ;;  %v5849_v48 = vmul.f32 %v13223_v37, %v13222_v61  ;;  %v5948_v9 = vmul.f32 %v5925_v20, %v13226_v27  ;;  %v6767_v61 = vld [vmem:[#allocation3 + $0x688] sm:$0xff]  ;;  %v6766_v37 = vld [vmem:[#allocation3 + $0x680] sm:$0xff] }
 0xdd6   : > { %6339 = vmatpush1.msra.mxu0 %v5897_v42  ;;  %v5947_v18 = vmul.f32 %v5926_v43, %v13228_v14  ;;  %v5899_v46 = vmul.f32 %v12365_v29, %v13231_v8  ;;  %v5852_v3 = vmul.f32 %v12429_v62, %v13232_v36  ;;  %v5804_v29 = vmul.f32 %v5781_v11, %v13234_v16  ;;  %v6742_v27 = vld [vmem:[#allocation3 + $0x640] sm:$0xff] }
 0xdd7   : > { %6403 = vmatprep.subr.mxu1 %v6004_v55  ;;  %6340 = vmatprep.subr.mxu0 %v5850_v45  ;;  %v5803_v62 = vmul.f32 %v12405_v54, %v13235_v19  ;;  %v6694_v16 = vld [vmem:[#allocation3 + $0x5c0] sm:$0xff] }
 0xdd8   : > { %6404 = vmatpush1.msra.mxu1 %v6003_v22  ;;  %6341 = vmatpush1.msra.mxu0 %v5849_v48 }
 0xdd9   : > { %6405 = vmatprep.subr.mxu1 %v13227_v7  ;;  %6342 = vmatprep.subr.mxu0 %v5802_v44  ;;  %v6743_v44 = vld [vmem:[#allocation3 + $0x648] sm:$0xff] }
 0xdda   : > { %6406 = vmatpush1.msra.mxu1 %v13229_v15  ;;  %6343 = vmatpush1.msra.mxu0 %v5801_v28  ;;  %v6718_v15 = vld [vmem:[#allocation3 + $0x600] sm:$0xff] }
 0xddb   : > { %6407 = vmatprep.subr.mxu1 %v5948_v9  ;;  %7709 = vmatmul.mubr.msk.f32.vlgmr.msra.gmra.mxu0 %vm730_vm9, %v12372_v2 }
 0xddc   : > { %6408 = vmatpush1.msra.mxu1 %v5947_v18  ;;  %7783 = vmatprep.subr.msk.mxu0 %vm236_vm0, %v13009_v56  ;;  %v6719_v18 = vld [vmem:[#allocation3 + $0x608] sm:$0xff] }
 0xddd   : > { %6409 = vmatprep.subr.mxu1 %v5900_v35  ;;  %7784 = vmatpush1.msk.msra.mxu0 %vm236_vm0, %v13009_v56 }
 0xdde   : > { %6410 = vmatpush1.msra.mxu1 %v5899_v46  ;;  %6939 = vmatprep.mubr.f32.mxu0 %v13221_v60 }
 0xddf   : > { %6411 = vmatprep.subr.mxu1 %v5852_v3  ;;  %v6695_v3 = vld [vmem:[#allocation3 + $0x5c8] sm:$0xff] }
 0xde0   : > { %6412 = vmatpush1.msra.mxu1 %v5851_v25 }
 0xde1   : > { %6413 = vmatprep.subr.mxu1 %v5804_v29 }
 0xde2   : > { %6414 = vmatpush1.msra.mxu1 %v5803_v62 }
 0xde3   : > { %7710 = vmatmul.mubr.msk.f32.vlgmr.msra.gmra.mxu1 %vm730_vm9, %v12372_v2  ;;  %7785 = vmatprep.subr.msk.mxu1 %vm236_vm0, %v13009_v56 }
 0xde4   : > { %7786 = vmatpush1.msk.msra.mxu1 %vm236_vm0, %v13009_v56  ;;  %7010 = vmatprep.mubr.f32.mxu1 %v13221_v60 }
 0xe86   : > { %v6236_v5 = vpop.f32.mrf.mxu0 }
 0xe87   : > { %v6454_v54 = vmul.f32 0.1, %v6236_v5 }
 0xe88   : > { %v6238_v59 = vpop.f32.mrf.mxu0 }
 0xe89   : > { %v12520_v10 = vmax.f32 %v6236_v5, %v6454_v54  ;;  %v6455_v2 = vmul.f32 0.1, %v6238_v59 }
 0xe8a   : > { %v6307_v17 = vpop.f32.mrf.mxu1 }
 0xe8b   : > { %6518 = vrot.lane.b32.xlu1 %v12520_v10, %s8079_s16  ;;  %6566 = vrot.lane.b32.xlu0 %v12520_v10, %s8080_s17  ;;  %v12530_v49 = vmax.f32 %v6238_v59, %v6455_v2  ;;  %v6456_v52 = vmul.f32 0.1, %v6307_v17 }
 0xe8c   : > { %v6309_v11 = vpop.f32.mrf.mxu1 }
 0xe8d   : > { %v12544_v41 = vmax.f32 %v6307_v17, %v6456_v52  ;;  %v6457_v38 = vmul.f32 0.1, %v6309_v11  ;;  %v6639_v17 = vld [vmem:[#allocation3 + $0x548] sm:$0xff] }
 0xe8f   : > { %6670 = vrot.lane.b32.xlu1 %v12520_v10, %s8081_s19  ;;  %6470 = vrot.lane.b32.xlu0 %v12520_v10, %s8082_s20  ;;  %v12554_v53 = vmax.f32 %v6309_v11, %v6457_v38 }
 0xe93   : > { %6614 = vrot.lane.b32.xlu0 %v12520_v10, %s8083_s21  ;;  %6520 = vrot.lane.b32.xlu1 %v12530_v49, %s8079_s16 }
 0xe97   : > { %6672 = vrot.lane.b32.xlu1 %v12530_v49, %s8081_s19  ;;  %6568 = vrot.lane.b32.xlu0 %v12530_v49, %s8080_s17 }
 0xe9b   : > { %6616 = vrot.lane.b32.xlu1 %v12530_v49, %s8083_s21  ;;  %6472 = vrot.lane.b32.xlu0 %v12530_v49, %s8082_s20  ;;  %v6378_v47 = vpop.f32.mrf.mxu0 }
 0xe9c   : > { %v6458_v40 = vmul.f32 0.1, %v6378_v47 }
 0xe9d   : > { %v6380_v30 = vpop.f32.mrf.mxu0 }
 0xe9e   : > { %v12564_v50 = vmax.f32 %v6378_v47, %v6458_v40  ;;  %v6459_v0 = vmul.f32 0.1, %v6380_v30  ;;  %v6769_v40 = vld [vmem:[#allocation3 + $0x698] sm:$0xff] }
 0xe9f   : > { %6570 = vrot.lane.b32.xlu1 %v12544_v41, %s8080_s17  ;;  %6522 = vrot.lane.b32.xlu0 %v12544_v41, %s8079_s16 }
 0xea0   : > { %v12588_v32 = vmax.f32 %v6380_v30, %v6459_v0 }
 0xea3   : > { %6474 = vrot.lane.b32.xlu1 %v12544_v41, %s8082_s20  ;;  %6674 = vrot.lane.b32.xlu0 %v12544_v41, %s8081_s19  ;;  %v6449_v24 = vpop.f32.mrf.mxu1 }
 0xea4   : > { %v6460_v57 = vmul.f32 0.1, %v6449_v24 }
 0xea5   : > { %v6451_v33 = vpop.f32.mrf.mxu1 }
 0xea6   : > { %v6461_v63 = vmul.f32 0.1, %v6451_v33  ;;  %v12590_v51 = vmax.f32 %v6449_v24, %v6460_v57  ;;  %v6768_v24 = vld [vmem:[#allocation3 + $0x690] sm:$0xff]  ;;  %v6745_v57 = vld [vmem:[#allocation3 + $0x658] sm:$0xff] }
 0xea7   : > { %6572 = vrot.lane.b32.xlu1 %v12554_v53, %s8080_s17  ;;  %6524 = vrot.lane.b32.xlu0 %v12554_v53, %s8079_s16 }
 0xea8   : > { %v12578_v6 = vmax.f32 %v6451_v33, %v6461_v63 }
 0xeab   : > { %6476 = vrot.lane.b32.xlu1 %v12554_v53, %s8082_s20  ;;  %6676 = vrot.lane.b32.xlu0 %v12554_v53, %s8081_s19 }
 0xeaf   : > { %6526 = vrot.lane.b32.xlu1 %v12564_v50, %s8079_s16  ;;  %6574 = vrot.lane.b32.xlu0 %v12564_v50, %s8080_s17 }
 0xeb3   : > { %6678 = vrot.lane.b32.xlu1 %v12564_v50, %s8081_s19  ;;  %6478 = vrot.lane.b32.xlu0 %v12564_v50, %s8082_s20 }
 0xeb7   : > { %6618 = vrot.lane.b32.xlu1 %v12544_v41, %s8083_s21  ;;  %6620 = vrot.lane.b32.xlu0 %v12554_v53, %s8083_s21 }
 0xebb   : > { %6580 = vrot.lane.b32.xlu1 %v12578_v6, %s8080_s17  ;;  %6628 = vrot.lane.b32.xlu0 %v12578_v6, %s8083_s21 }
 0xebf   : > { %6484 = vrot.lane.b32.xlu1 %v12578_v6, %s8082_s20  ;;  %6532 = vrot.lane.b32.xlu0 %v12578_v6, %s8079_s16 }
 0xec3   : > { %6578 = vrot.lane.b32.xlu1 %v12590_v51, %s8080_s17  ;;  %6576 = vrot.lane.b32.xlu0 %v12588_v32, %s8080_s17 }
 0xec7   : > { %6530 = vrot.lane.b32.xlu1 %v12590_v51, %s8079_s16  ;;  %6528 = vrot.lane.b32.xlu0 %v12588_v32, %s8079_s16 }
 0xecb   : > { %6482 = vrot.lane.b32.xlu1 %v12590_v51, %s8082_s20  ;;  %6480 = vrot.lane.b32.xlu0 %v12588_v32, %s8082_s20 }
 0xecf   : > { %6682 = vrot.lane.b32.xlu1 %v12590_v51, %s8081_s19  ;;  %6680 = vrot.lane.b32.xlu0 %v12588_v32, %s8081_s19 }
 0xed3   : > { %6622 = vrot.lane.b32.xlu1 %v12564_v50, %s8083_s21  ;;  %6684 = vrot.lane.b32.xlu0 %v12578_v6, %s8081_s19 }
 0xed7   : > { %6626 = vrot.lane.b32.xlu1 %v12590_v51, %s8083_s21  ;;  %6624 = vrot.lane.b32.xlu0 %v12588_v32, %s8083_s21 }
 0xefd   : > { %v12616_v58 = vpop.permute.xlu0 %6566  ;;  %v12618_v31 = vpop.permute.xlu1 %6518 }
 0xf01   : > { %v12620_v4 = vpop.permute.xlu0 %6470  ;;  %v12622_v42 = vpop.permute.xlu1 %6670 }
 0xf05   : > { %v12624_v13 = vpop.permute.xlu0 %6614  ;;  %v6521_v22 = vpop.permute.xlu1 %6520 }
 0xf06   : > { %v12644_v9 = vsel %vm5120_vm4, %v12618_v31, %v6521_v22 }
 0xf07   : > { %v6750_v36 = vmul.f32 %v6742_v27, %v12644_v9 }
 0xf09   : > { %v6569_v39 = vpop.permute.xlu0 %6568  ;;  %v6673_v55 = vpop.permute.xlu1 %6672 }
 0xf0a   : > { %v12631_v48 = vsel %vm5169_vm3, %v12616_v58, %v6569_v39  ;;  %v6692_v29 = vsel %vm5275_vm6, %v12622_v42, %v6673_v55 }
 0xf0b   : > { %v6774_v14 = vmul.f32 %v6766_v37, %v12631_v48  ;;  %v6702_v2 = vmul.f32 %v6694_v16, %v6692_v29 }
 0xf0d   : > { %v6473_v45 = vpop.permute.xlu0 %6472  ;;  %v12626_v20 = vpop.permute.xlu1 %6616 }
 0xf0e   : > { %v12651_v23 = vsel %vm5071_vm5, %v12620_v4, %v6473_v45  ;;  %v6636_v52 = vsel %vm5218_vm7, %v12624_v13, %v12626_v20 }
 0xf0f   : > { %v6726_v62 = vmul.f32 %v6718_v15, %v12651_v23  ;;  %v6647_v11 = vmul.f32 %v6639_v17, %v6636_v52  ;;  %v6696_v15 = vld [vmem:[#allocation3 + $0x5d0] sm:$0xff] }
 0xf10   : > { %v6592_v17 = vld [vmem:[#allocation3 + $0x510] sm:$0xff] }
 0xf11   : > { %v6523_v43 = vpop.permute.xlu0 %6522  ;;  %v6571_v34 = vpop.permute.xlu1 %6570 }
 0xf12   : > { %v12635_v26 = vsel %vm5120_vm4, %v6521_v22, %v6523_v43  ;;  %v12639_v28 = vsel %vm5169_vm3, %v6569_v39, %v6571_v34 }
 0xf13   : > { %v6775_v7 = vmul.f32 %v6767_v61, %v12639_v28  ;;  %v6751_v35 = vmul.f32 %v6743_v44, %v12635_v26  ;;  %v6720_v61 = vld [vmem:[#allocation3 + $0x610] sm:$0xff] }
 0xf15   : > { %v6675_v8 = vpop.permute.xlu0 %6674  ;;  %6889 = vmatprep.subr.mxu0 %v6775_v7  ;;  %v6475_v46 = vpop.permute.xlu1 %6474 }
 0xf16   : > { %v6691_v21 = vsel %vm5275_vm6, %v6673_v55, %v6675_v8  ;;  %v12659_v25 = vsel %vm5071_vm5, %v6473_v45, %v6475_v46  ;;  %6890 = vmatpush1.msra.mxu0 %v6774_v14  ;;  %v6721_v45 = vld [vmem:[#allocation3 + $0x618] sm:$0xff] }
 0xf17   : > { %v6727_v19 = vmul.f32 %v6719_v18, %v12659_v25  ;;  %6891 = vmatprep.subr.mxu0 %v6751_v35  ;;  %v6703_v5 = vmul.f32 %v6695_v3, %v6691_v21  ;;  %v6697_v14 = vld [vmem:[#allocation3 + $0x5d8] sm:$0xff] }
 0xf18   : > { %6892 = vmatpush1.msra.mxu0 %v6750_v36 }
 0xf19   : > { %v6525_v54 = vpop.permute.xlu0 %6524  ;;  %6893 = vmatprep.subr.mxu0 %v6727_v19  ;;  %v6573_v59 = vpop.permute.xlu1 %6572  ;;  %v6641_v19 = vld [vmem:[#allocation3 + $0x558] sm:$0xff] }
 0xf1a   : > { %6894 = vmatpush1.msra.mxu0 %v6726_v62  ;;  %v6586_v33 = vsel %vm5169_vm3, %v6571_v34, %v6573_v59  ;;  %v12690_v22 = vsel %vm5120_vm4, %v6523_v43, %v6525_v54 }
 0xf1b   : > { %6895 = vmatprep.subr.mxu0 %v6703_v5  ;;  %v6776_v55 = vmul.f32 %v6768_v24, %v6586_v33  ;;  %v6640_v5 = vld [vmem:[#allocation3 + $0x550] sm:$0xff]  ;;  %v6590_v24 = vld [vmem:[#allocation3 + $0x500] sm:$0xff] }
 0xf1c   : > { %6896 = vmatpush1.msra.mxu0 %v6702_v2  ;;  %v6591_v2 = vld [vmem:[#allocation3 + $0x508] sm:$0xff] }
 0xf1d   : > { %v6677_v38 = vpop.permute.xlu0 %6676  ;;  %6897 = vmatprep.subr.mxu0 %v12530_v49  ;;  %v6477_v47 = vpop.permute.xlu1 %6476  ;;  %v6744_v49 = vld [vmem:[#allocation3 + $0x650] sm:$0xff] }
 0xf1e   : > { %6898 = vmatpush1.msra.mxu0 %v12520_v10  ;;  %v12695_v37 = vsel %vm5071_vm5, %v6475_v46, %v6477_v47  ;;  %v6752_v7 = vmul.f32 %v6744_v49, %v12690_v22  ;;  %v6690_v35 = vsel %vm5275_vm6, %v6675_v8, %v6677_v38  ;;  %v6545_v49 = vld [vmem:[#allocation3 + $0x4d8] sm:$0xff] }
 0xf1f   : > { %6899 = vmatprep.subr.mxu0 %v6647_v11  ;;  %v6728_v36 = vmul.f32 %v6720_v61, %v12695_v37  ;;  %v6704_v29 = vmul.f32 %v6696_v15, %v6690_v35  ;;  %v6600_v61 = vmul.f32 %v6592_v17, %v12639_v28  ;;  %v6553_v15 = vmul.f32 %v6545_v49, %v12690_v22 }
 0xf21   : > { %v12674_v63 = vpop.permute.xlu0 %6574  ;;  %v12676_v30 = vpop.permute.xlu1 %6526 }
 0xf22   : > { %v12681_v0 = vsel %vm5169_vm3, %v6573_v59, %v12674_v63  ;;  %v12686_v10 = vsel %vm5120_vm4, %v6525_v54, %v12676_v30  ;;  %v6593_v54 = vld [vmem:[#allocation3 + $0x518] sm:$0xff]  ;;  %v6638_v59 = vld [vmem:[#allocation3 + $0x540] sm:$0xff] }
 0xf23   : > { %v6777_v39 = vmul.f32 %v6769_v40, %v12681_v0  ;;  %v6753_v34 = vmul.f32 %v6745_v57, %v12686_v10  ;;  %v6543_v57 = vld [vmem:[#allocation3 + $0x4c8] sm:$0xff] }
 0xf25   : > { %v12698_v44 = vpop.permute.xlu0 %6478  ;;  %6960 = vmatprep.subr.mxu1 %v6777_v39  ;;  %v12700_v27 = vpop.permute.xlu1 %6678  ;;  %v6601_v39 = vmul.f32 %v6593_v54, %v6586_v33  ;;  %v6496_v33 = vld [vmem:[#allocation3 + $0x490] sm:$0xff] }
 0xf26   : > { %v12706_v43 = vsel %vm5071_vm5, %v6477_v47, %v12698_v44  ;;  %v6689_v18 = vsel %vm5275_vm6, %v6677_v38, %v12700_v27  ;;  %6961 = vmatpush1.msra.mxu1 %v6776_v55 }
 0xf27   : > { %v6729_v46 = vmul.f32 %v6721_v45, %v12706_v43  ;;  %6962 = vmatprep.subr.mxu1 %v6753_v34  ;;  %v6705_v3 = vmul.f32 %v6697_v14, %v6689_v18  ;;  %v6544_v45 = vld [vmem:[#allocation3 + $0x4d0] sm:$0xff]  ;;  %v6542_v34 = vld [vmem:[#allocation3 + $0x4c0] sm:$0xff] }
 0xf28   : > { %6963 = vmatpush1.msra.mxu1 %v6752_v7  ;;  %v6497_v7 = vld [vmem:[#allocation3 + $0x498] sm:$0xff]  ;;  %v6552_v28 = vmul.f32 %v6544_v45, %v12635_v26  ;;  %v6771_v26 = vld [vmem:[#allocation3 + $0x6a8] sm:$0xff]  ;;  %v6722_v45 = vld [vmem:[#allocation3 + $0x620] sm:$0xff] }
 0xf29   : > { %v12715_v21 = vpop.permute.xlu0 %6620  ;;  %6964 = vmatprep.subr.mxu1 %v6729_v46  ;;  %v6619_v16 = vpop.permute.xlu1 %6618  ;;  %v6494_v46 = vld [vmem:[#allocation3 + $0x480] sm:$0xff]  ;;  %v6505_v22 = vmul.f32 %v6497_v7, %v12695_v37  ;;  %v6749_v37 = vld [vmem:[#allocation3 + $0x678] sm:$0xff]  ;;  %v6724_v7 = vld [vmem:[#allocation3 + $0x630] sm:$0xff] }
 0xf2a   : > { %v6634_v62 = vsel %vm5218_vm7, %v6619_v16, %v12715_v21  ;;  %6965 = vmatpush1.msra.mxu1 %v6728_v36  ;;  %v6635_v8 = vsel %vm5218_vm7, %v12626_v20, %v6619_v16  ;;  %v6772_v16 = vld [vmem:[#allocation3 + $0x6b0] sm:$0xff] }
 0xf2b   : > { %6966 = vmatprep.subr.mxu1 %v6705_v3  ;;  %v6649_v52 = vmul.f32 %v6641_v19, %v6634_v62  ;;  %v6648_v47 = vmul.f32 %v6640_v5, %v6635_v8  ;;  %v12754_v19 = vld [vmem:[%s12871_s1 + $0x40] sm:$0xff] }
 0xf2c   : > { %6967 = vmatpush1.msra.mxu1 %v6704_v29  ;;  %v6770_v5 = vld [vmem:[#allocation3 + $0x6a0] sm:$0xff] }
 0xf2d   : > { %v12723_v11 = vpop.permute.xlu0 %6628  ;;  %6968 = vmatprep.subr.mxu1 %v12554_v53  ;;  %v6581_v38 = vpop.permute.xlu1 %6580  ;;  %v6599_v53 = vmul.f32 %v6591_v2, %v12631_v48  ;;  %v6746_v2 = vld [vmem:[#allocation3 + $0x660] sm:$0xff] }
 0xf2e   : > { %v6637_v40 = vsel %vm5218_vm7, %v12723_v11, %v12624_v13  ;;  %v6589_v20 = vsel %vm5169_vm3, %v6581_v38, %v12616_v58  ;;  %6969 = vmatpush1.msra.mxu1 %v12544_v41  ;;  %v6495_v13 = vld [vmem:[#allocation3 + $0x488] sm:$0xff]  ;;  %v6551_v41 = vmul.f32 %v6543_v57, %v12644_v9 }
 0xf2f   : > { %v6646_v55 = vmul.f32 %v6638_v59, %v6637_v40  ;;  %6970 = vmatprep.subr.mxu1 %v6649_v52  ;;  %v6598_v14 = vmul.f32 %v6590_v24, %v6589_v20  ;;  %v6503_v9 = vmul.f32 %v6495_v13, %v12651_v23  ;;  %v6725_v40 = vld [vmem:[#allocation3 + $0x638] sm:$0xff]  ;;  %v6723_v13 = vld [vmem:[#allocation3 + $0x628] sm:$0xff] }
 0xf30   : > { %6971 = vmatpush1.msra.mxu1 %v6648_v47 }
 0xf31   : > { %v6533_v18 = vpop.permute.xlu0 %6532  ;;  %6900 = vmatpush1.msra.mxu0 %v6646_v55  ;;  %6972 = vmatprep.subr.mxu1 %v6601_v39  ;;  %v12736_v58 = vpop.permute.xlu1 %6484 }
 0xf32   : > { %v6541_v48 = vsel %vm5120_vm4, %v6533_v18, %v12618_v31  ;;  %6901 = vmatprep.subr.mxu0 %v6599_v53  ;;  %6973 = vmatpush1.msra.mxu1 %v6600_v61  ;;  %v6493_v36 = vsel %vm5071_vm5, %v12736_v58, %v12620_v4  ;;  %v6504_v31 = vmul.f32 %v6496_v33, %v12659_v25  ;;  %v6773_v4 = vld [vmem:[#allocation3 + $0x6b8] sm:$0xff] }
 0xf33   : > { %v6550_v35 = vmul.f32 %v6542_v34, %v6541_v48  ;;  %6902 = vmatpush1.msra.mxu0 %v6598_v14  ;;  %6974 = vmatprep.subr.mxu1 %v6553_v15  ;;  %v6502_v62 = vmul.f32 %v6494_v46, %v6493_v36  ;;  %v6781_v17 = vmul.f32 %v6773_v4, %v6589_v20  ;;  %v6643_v4 = vld [vmem:[#allocation3 + $0x568] sm:$0xff] }
 0xf34   : > { %6903 = vmatprep.subr.mxu0 %v6551_v41  ;;  %6975 = vmatpush1.msra.mxu1 %v6552_v28  ;;  %v6757_v49 = vmul.f32 %v6749_v37, %v6541_v48  ;;  %v6733_v61 = vmul.f32 %v6725_v40, %v6493_v36  ;;  %v6699_v48 = vld [vmem:[#allocation3 + $0x5e8] sm:$0xff]  ;;  %v6645_v37 = vld [vmem:[#allocation3 + $0x578] sm:$0xff] }
 0xf35   : > { %v6577_v3 = vpop.permute.xlu0 %6576  ;;  %6904 = vmatpush1.msra.mxu0 %v6550_v35  ;;  %v6579_v29 = vpop.permute.xlu1 %6578  ;;  %6976 = vmatprep.subr.mxu1 %v6505_v22  ;;  %v6700_v22 = vld [vmem:[#allocation3 + $0x5f0] sm:$0xff] }
 0xf36   : > { %v12758_v23 = vsel %vm5169_vm3, %v6579_v29, %v6581_v38  ;;  %v12762_v25 = vsel %vm5169_vm3, %v6577_v3, %v6579_v29  ;;  %6905 = vmatprep.subr.mxu0 %v6503_v9  ;;  %6977 = vmatpush1.msra.mxu1 %v6504_v31  ;;  %v12767_v8 = vsel %vm5169_vm3, %v12674_v63, %v6577_v3  ;;  %v6747_v63 = vld [vmem:[#allocation3 + $0x668] sm:$0xff]  ;;  %v6748_v38 = vld [vmem:[#allocation3 + $0x670] sm:$0xff]  ;;  %v6701_v31 = vld [vmem:[#allocation3 + $0x5f8] sm:$0xff] }
 0xf37   : > { %v6779_v54 = vmul.f32 %v6771_v26, %v12762_v25  ;;  %v6780_v59 = vmul.f32 %v6772_v16, %v12758_v23  ;;  %6906 = vmatpush1.msra.mxu0 %v6502_v62  ;;  %7713 = vmatmul.mubr.msk.f32.vlgmr.msra.gmra.mxu1 %vm730_vm9, %v12754_v19  ;;  %v6778_v39 = vmul.f32 %v6770_v5, %v12767_v8  ;;  %v6644_v62 = vld [vmem:[#allocation3 + $0x570] sm:$0xff]  ;;  %v6642_v5 = vld [vmem:[#allocation3 + $0x560] sm:$0xff] }
 0xf38   : > { %7789 = vmatprep.subr.msk.mxu1 %vm236_vm0, %v13009_v56  ;;  %7712 = vmatmul.mubr.msk.f32.vlgmr.msra.gmra.mxu0 %vm730_vm9, %v12754_v19 }
 0xf39   : > { %v6529_v52 = vpop.permute.xlu0 %6528  ;;  %v6531_v47 = vpop.permute.xlu1 %6530  ;;  %7787 = vmatprep.subr.msk.mxu0 %vm236_vm0, %v13009_v56  ;;  %7790 = vmatpush1.msk.msra.mxu1 %vm236_vm0, %v13009_v56 }
 0xf3a   : > { %v12787_v24 = vsel %vm5120_vm4, %v12676_v30, %v6529_v52  ;;  %v12791_v20 = vsel %vm5120_vm4, %v6531_v47, %v6533_v18  ;;  %v12795_v57 = vsel %vm5120_vm4, %v6529_v52, %v6531_v47  ;;  %7788 = vmatpush1.msk.msra.mxu0 %vm236_vm0, %v13009_v56  ;;  %7102 = vmatprep.subr.mxu1 %v6781_v17  ;;  %v6595_v17 = vld [vmem:[#allocation3 + $0x528] sm:$0xff] }
 0xf3b   : > { %v6754_v55 = vmul.f32 %v6746_v2, %v12787_v24  ;;  %v6755_v30 = vmul.f32 %v6747_v63, %v12795_v57  ;;  %v6756_v53 = vmul.f32 %v6748_v38, %v12791_v20  ;;  %7031 = vmatprep.subr.mxu0 %v6779_v54  ;;  %7103 = vmatpush1.msra.mxu1 %v6780_v59  ;;  %v6594_v63 = vld [vmem:[#allocation3 + $0x520] sm:$0xff]  ;;  %v6596_v38 = vld [vmem:[#allocation3 + $0x530] sm:$0xff] }
 0xf3c   : > { %7032 = vmatpush1.msra.mxu0 %v6778_v39  ;;  %7104 = vmatprep.subr.mxu1 %v6757_v49  ;;  %v6547_v49 = vld [vmem:[#allocation3 + $0x4e8] sm:$0xff]  ;;  %v6549_v39 = vld [vmem:[#allocation3 + $0x4f8] sm:$0xff] }
 0xf3d   : > { %v6481_v34 = vpop.permute.xlu0 %6480  ;;  %v6483_v14 = vpop.permute.xlu1 %6482  ;;  %7033 = vmatprep.subr.mxu0 %v6755_v30  ;;  %7105 = vmatpush1.msra.mxu1 %v6756_v53  ;;  %v6546_v30 = vld [vmem:[#allocation3 + $0x4e0] sm:$0xff]  ;;  %v6603_v53 = vmul.f32 %v6595_v17, %v12767_v8  ;;  %v6556_v8 = vmul.f32 %v6548_v12, %v12795_v57  ;;  %v7222_v57 = vld [vmem:[#allocation5 + $0x178] sm:$0xff] }
 0xf3e   : > { %v12807_v1 = vsel %vm5071_vm5, %v12698_v44, %v6481_v34  ;;  %v12812_v56 = vsel %vm5071_vm5, %v6483_v14, %v12736_v58  ;;  %v12816_v18 = vsel %vm5071_vm5, %v6481_v34, %v6483_v14  ;;  %7034 = vmatpush1.msra.mxu0 %v6754_v55  ;;  %7106 = vmatprep.subr.mxu1 %v6733_v61  ;;  %v6698_v44 = vld [vmem:[#allocation3 + $0x5e0] sm:$0xff]  ;;  %v6499_v34 = vld [vmem:[#allocation3 + $0x4a8] sm:$0xff]  ;;  %v6500_v14 = vld [vmem:[#allocation3 + $0x4b0] sm:$0xff] }
 0xf3f   : > { %v6730_v41 = vmul.f32 %v6722_v45, %v12807_v1  ;;  %v6731_v33 = vmul.f32 %v6723_v13, %v12816_v18  ;;  %v6732_v15 = vmul.f32 %v6724_v7, %v12812_v56  ;;  %7081 = vmatprep.mubr.f32.mxu0 %v13221_v60  ;;  %7152 = vmatprep.mubr.f32.mxu1 %v13221_v60  ;;  %v6501_v13 = vld [vmem:[#allocation3 + $0x4b8] sm:$0xff] }
 0xf40   : > { %v6602_v45 = vmul.f32 %v6594_v63, %v12681_v0  ;;  %v6604_v61 = vmul.f32 %v6596_v38, %v12762_v25  ;;  %v6555_v7 = vmul.f32 %v6547_v49, %v12787_v24  ;;  %v6507_v0 = vmul.f32 %v6499_v34, %v12807_v1  ;;  %v7237_v1 = vld [vmem:[#allocation5 + $0x1f0] sm:$0xff]  ;;  %v7198_v17 = vld [vmem:[#allocation5 + $0xb8] sm:$0xff]  ;;  %v7180_v49 = vld [vmem:[#allocation5 + $0x28] sm:$0xff] }
 0xf41   : > { %v6681_v28 = vpop.permute.xlu0 %6680  ;;  %v6683_v35 = vpop.permute.xlu1 %6682  ;;  %7035 = vmatprep.subr.mxu0 %v6731_v33  ;;  %7107 = vmatpush1.msra.mxu1 %v6732_v15  ;;  %v6509_v25 = vmul.f32 %v6501_v13, %v12812_v56  ;;  %v6508_v24 = vmul.f32 %v6500_v14, %v12816_v18  ;;  %v7190_v33 = vld [vmem:[#allocation5 + $0x78] sm:$0xff]  ;;  %v7221_v56 = vld [vmem:[#allocation5 + $0x170] sm:$0xff]  ;;  %v7236_v15 = vld [vmem:[#allocation5 + $0x1e8] sm:$0xff] }
 0xf42   : > { %v6688_v58 = vsel %vm5275_vm6, %v12700_v27, %v6681_v28  ;;  %v6687_v46 = vsel %vm5275_vm6, %v6681_v28, %v6683_v35  ;;  %7036 = vmatpush1.msra.mxu0 %v6730_v41  ;;  %v7189_v18 = vld [vmem:[#allocation5 + $0x70] sm:$0xff]  ;;  %v7188_v28 = vld [vmem:[#allocation5 + $0x68] sm:$0xff]  ;;  %v7194_v12 = vld [vmem:[#allocation5 + $0x98] sm:$0xff] }
 0xf43   : > { %v6706_v36 = vmul.f32 %v6698_v44, %v6688_v58  ;;  %v6707_v9 = vmul.f32 %v6699_v48, %v6687_v46  ;;  %v7204_v44 = vld [vmem:[#allocation5 + $0xe8] sm:$0xff]  ;;  %v7203_v58 = vld [vmem:[#allocation5 + $0xe0] sm:$0xff]  ;;  %v7213_v63 = vld [vmem:[#allocation5 + $0x130] sm:$0xff] }
 0xf44   : > { %v7220_v48 = vld [vmem:[#allocation5 + $0x168] sm:$0xff]  ;;  %v7187_v46 = vld [vmem:[#allocation5 + $0x60] sm:$0xff]  ;;  %v7181_v38 = vld [vmem:[#allocation5 + $0x30] sm:$0xff] }
 0xf45   : > { %v6685_v3 = vpop.permute.xlu0 %6684  ;;  %7037 = vmatprep.subr.mxu0 %v6707_v9  ;;  %v6623_v26 = vpop.permute.xlu1 %6622  ;;  %v7202_v9 = vld [vmem:[#allocation5 + $0xd8] sm:$0xff]  ;;  %v7225_v34 = vld [vmem:[#allocation5 + $0x190] sm:$0xff]  ;;  %v7192_v14 = vld [vmem:[#allocation5 + $0x88] sm:$0xff] }
 0xf46   : > { %v6686_v60 = vsel %vm5275_vm6, %v6683_v35, %v6685_v3  ;;  %v6693_v27 = vsel %vm5275_vm6, %v6685_v3, %v12622_v42  ;;  %7038 = vmatpush1.msra.mxu0 %v6706_v36  ;;  %v6633_v54 = vsel %vm5218_vm7, %v12715_v21, %v6623_v26  ;;  %v6597_v42 = vld [vmem:[#allocation3 + $0x538] sm:$0xff]  ;;  %v7235_v35 = vld [vmem:[#allocation5 + $0x1e0] sm:$0xff]  ;;  %v7233_v3 = vld [vmem:[#allocation5 + $0x1d0] sm:$0xff] }
 0xf47   : > { %v6708_v16 = vmul.f32 %v6700_v22, %v6686_v60  ;;  %v6709_v29 = vmul.f32 %v6701_v31, %v6693_v27  ;;  %7039 = vmatprep.subr.mxu0 %v12588_v32  ;;  %v6650_v55 = vmul.f32 %v6642_v5, %v6633_v54  ;;  %v7234_v36 = vld [vmem:[#allocation5 + $0x1d8] sm:$0xff]  ;;  %v7217_v60 = vld [vmem:[#allocation5 + $0x150] sm:$0xff]  ;;  %v7199_v5 = vld [vmem:[#allocation5 + $0xc0] sm:$0xff] }
 0xf48   : > { %7040 = vmatpush1.msra.mxu0 %v12564_v50  ;;  %v7218_v22 = vld [vmem:[#allocation5 + $0x158] sm:$0xff]  ;;  %v7185_v27 = vld [vmem:[#allocation5 + $0x50] sm:$0xff]  ;;  %v7215_v54 = vld [vmem:[#allocation5 + $0x140] sm:$0xff] }
 0xf49   : > { %v6625_v59 = vpop.permute.xlu0 %6624  ;;  %7108 = vmatprep.subr.mxu1 %v6709_v29  ;;  %v6627_v2 = vpop.permute.xlu1 %6626  ;;  %v7186_v31 = vld [vmem:[#allocation5 + $0x58] sm:$0xff]  ;;  %v7200_v29 = vld [vmem:[#allocation5 + $0xc8] sm:$0xff]  ;;  %v7193_v13 = vld [vmem:[#allocation5 + $0x90] sm:$0xff] }
 0xf4a   : > { %v6632_v52 = vsel %vm5218_vm7, %v6623_v26, %v6625_v59  ;;  %v6630_v50 = vsel %vm5218_vm7, %v6627_v2, %v12723_v11  ;;  %v6631_v32 = vsel %vm5218_vm7, %v6625_v59, %v6627_v2  ;;  %7109 = vmatpush1.msra.mxu1 %v6708_v16  ;;  %v6605_v11 = vmul.f32 %v6597_v42, %v12758_v23  ;;  %v7201_v26 = vld [vmem:[#allocation5 + $0xd0] sm:$0xff]  ;;  %v7232_v16 = vld [vmem:[#allocation5 + $0x1c8] sm:$0xff]  ;;  %v7183_v59 = vld [vmem:[#allocation5 + $0x40] sm:$0xff] }
 0xf4b   : > { %v6651_v47 = vmul.f32 %v6643_v4, %v6632_v52  ;;  %v6652_v21 = vmul.f32 %v6644_v62, %v6631_v32  ;;  %v6653_v40 = vmul.f32 %v6645_v37, %v6630_v50  ;;  %7110 = vmatprep.subr.mxu1 %v12578_v6  ;;  %v6498_v6 = vld [vmem:[#allocation3 + $0x4a0] sm:$0xff]  ;;  %v6554_v23 = vmul.f32 %v6546_v30, %v12686_v10  ;;  %v7206_v10 = vld [vmem:[#allocation5 + $0xf8] sm:$0xff]  ;;  %v7216_v4 = vld [vmem:[#allocation5 + $0x148] sm:$0xff] }
 0xf4c   : > { %7111 = vmatpush1.msra.mxu1 %v12590_v51  ;;  %v6557_v51 = vmul.f32 %v6549_v39, %v12791_v20  ;;  %v6506_v41 = vmul.f32 %v6498_v6, %v12706_v43  ;;  %v7238_v20 = vld [vmem:[#allocation5 + $0x1f8] sm:$0xff]  ;;  %v7205_v43 = vld [vmem:[#allocation5 + $0xf0] sm:$0xff]  ;;  %v7184_v62 = vld [vmem:[#allocation5 + $0x48] sm:$0xff] }
 0xf4d   : > { %7041 = vmatprep.subr.mxu0 %v6651_v47  ;;  %7112 = vmatprep.subr.mxu1 %v6653_v40  ;;  %v7231_v37 = vld [vmem:[#allocation5 + $0x1c0] sm:$0xff]  ;;  %v7230_v2 = vld [vmem:[#allocation5 + $0x1b8] sm:$0xff]  ;;  %v7229_v50 = vld [vmem:[#allocation5 + $0x1b0] sm:$0xff] }
 0xf4e   : > { %7042 = vmatpush1.msra.mxu0 %v6650_v55  ;;  %7113 = vmatpush1.msra.mxu1 %v6652_v21  ;;  %v7214_v42 = vld [vmem:[#allocation5 + $0x138] sm:$0xff]  ;;  %v7197_v32 = vld [vmem:[#allocation5 + $0xb0] sm:$0xff]  ;;  %v7228_v47 = vld [vmem:[#allocation5 + $0x1a8] sm:$0xff] }
 0xf4f   : > { %7043 = vmatprep.subr.mxu0 %v6603_v53  ;;  %7114 = vmatprep.subr.mxu1 %v6605_v11  ;;  %v7182_v52 = vld [vmem:[#allocation5 + $0x38] sm:$0xff]  ;;  %v7196_v21 = vld [vmem:[#allocation5 + $0xa8] sm:$0xff]  ;;  %v7227_v39 = vld [vmem:[#allocation5 + $0x1a0] sm:$0xff] }
 0xf50   : > { %7044 = vmatpush1.msra.mxu0 %v6602_v45  ;;  %7115 = vmatpush1.msra.mxu1 %v6604_v61  ;;  %v7212_v40 = vld [vmem:[#allocation5 + $0x128] sm:$0xff]  ;;  %v7195_v55 = vld [vmem:[#allocation5 + $0xa0] sm:$0xff]  ;;  %v7226_v11 = vld [vmem:[#allocation5 + $0x198] sm:$0xff] }
 0xf51   : > { %7045 = vmatprep.subr.mxu0 %v6555_v7  ;;  %7116 = vmatprep.subr.mxu1 %v6557_v51  ;;  %v7211_v30 = vld [vmem:[#allocation5 + $0x120] sm:$0xff]  ;;  %v7210_v45 = vld [vmem:[#allocation5 + $0x118] sm:$0xff]  ;;  %v7209_v6 = vld [vmem:[#allocation5 + $0x110] sm:$0xff] }
 0xf52   : > { %7046 = vmatpush1.msra.mxu0 %v6554_v23  ;;  %7117 = vmatpush1.msra.mxu1 %v6556_v8  ;;  %v7179_v53 = vld [vmem:[#allocation5 + $0x20] sm:$0xff]  ;;  %v7178_v61 = vld [vmem:[#allocation5 + $0x18] sm:$0xff]  ;;  %v7177_v7 = vld [vmem:[#allocation5 + $0x10] sm:$0xff] }
 0xf53   : > { %7047 = vmatprep.subr.mxu0 %v6507_v0  ;;  %7118 = vmatprep.subr.mxu1 %v6509_v25  ;;  %v7224_v51 = vld [vmem:[#allocation5 + $0x188] sm:$0xff]  ;;  %v7223_v0 = vld [vmem:[#allocation5 + $0x180] sm:$0xff] }
 0xf54   : > { %7048 = vmatpush1.msra.mxu0 %v6506_v41  ;;  %7119 = vmatpush1.msra.mxu1 %v6508_v24  ;;  %v7208_v23 = vld [vmem:[#allocation5 + $0x108] sm:$0xff]  ;;  %v7191_v25 = vld [vmem:[#allocation5 + $0x80] sm:$0xff] }
 0xf55   : > { %7714 = vmatmul.mubr.msk.f32.vlgmr.msra.gmra.mxu0 %vm730_vm9, %v12754_v19  ;;  %7715 = vmatmul.mubr.msk.f32.vlgmr.msra.gmra.mxu1 %vm730_vm9, %v12754_v19  ;;  %v7219_v19 = vld [vmem:[#allocation5 + $0x160] sm:$0xff]  ;;  %v7176_v8 = vld [vmem:[#allocation5 + $0x8] sm:$0xff] }
 0xf56   : > { %7826 = vmatprep.subr.mxu1 %v7238_v20  ;;  %7791 = vmatprep.subr.mxu0 %v7206_v10  ;;  %v7207_v41 = vld [vmem:[#allocation5 + $0x100] sm:$0xff]  ;;  %v7302_v20 = vld [vmem:[#allocation5 + $0x3f8] sm:$0xff] }
 0xf57   : > { %7827 = vmatpush3.msra.mxu1 %v7222_v57  ;;  %7792 = vmatpush3.msra.mxu0 %v7190_v33  ;;  %v7175_v24 = vld [vmem:[#allocation5] sm:$0xff]  ;;  %v7270_v10 = vld [vmem:[#allocation5 + $0x2f8] sm:$0xff] }
 0xf58   : > { %7828 = vmatprep.subr.mxu1 %v7237_v1  ;;  %7793 = vmatprep.subr.mxu0 %v7205_v43 }
 0xf59   : > { %7829 = vmatpush3.msra.mxu1 %v7221_v56  ;;  %7794 = vmatpush3.msra.mxu0 %v7189_v18 }
 0xf5a   : > { %7830 = vmatprep.subr.mxu1 %v7236_v15  ;;  %7795 = vmatprep.subr.mxu0 %v7204_v44 }
 0xf5b   : > { %7831 = vmatpush3.msra.mxu1 %v7220_v48  ;;  %7796 = vmatpush3.msra.mxu0 %v7188_v28 }
 0xf5c   : > { %7832 = vmatprep.subr.mxu1 %v7235_v35  ;;  %7797 = vmatprep.subr.mxu0 %v7203_v58  ;;  %v7286_v58 = vld [vmem:[#allocation5 + $0x378] sm:$0xff] }
 0xf5d   : > { %7833 = vmatpush3.msra.mxu1 %v7219_v19  ;;  %7798 = vmatpush3.msra.mxu0 %v7187_v46  ;;  %v7254_v46 = vld [vmem:[#allocation5 + $0x278] sm:$0xff] }
 0xf5e   : > { %7834 = vmatprep.subr.mxu1 %v7234_v36  ;;  %7799 = vmatprep.subr.mxu0 %v7202_v9  ;;  %v7301_v36 = vld [vmem:[#allocation5 + $0x3f0] sm:$0xff] }
 0xf5f   : > { %7835 = vmatpush3.msra.mxu1 %v7218_v22  ;;  %7800 = vmatpush3.msra.mxu0 %v7186_v31  ;;  %v7269_v9 = vld [vmem:[#allocation5 + $0x2f0] sm:$0xff] }
 0xf60   : > { %7836 = vmatprep.subr.mxu1 %v7233_v3  ;;  %7801 = vmatprep.subr.mxu0 %v7201_v26  ;;  %v7285_v22 = vld [vmem:[#allocation5 + $0x370] sm:$0xff]  ;;  %v7300_v3 = vld [vmem:[#allocation5 + $0x3e8] sm:$0xff] }
 0xf61   : > { %7837 = vmatpush3.msra.mxu1 %v7217_v60  ;;  %7802 = vmatpush3.msra.mxu0 %v7185_v27  ;;  %v7253_v31 = vld [vmem:[#allocation5 + $0x270] sm:$0xff]  ;;  %v7268_v26 = vld [vmem:[#allocation5 + $0x2e8] sm:$0xff] }
 0xf62   : > { %7838 = vmatprep.subr.mxu1 %v7232_v16  ;;  %7803 = vmatprep.subr.mxu0 %v7200_v29  ;;  %v7284_v60 = vld [vmem:[#allocation5 + $0x368] sm:$0xff]  ;;  %v7299_v16 = vld [vmem:[#allocation5 + $0x3e0] sm:$0xff] }
 0xf63   : > { %7839 = vmatpush3.msra.mxu1 %v7216_v4  ;;  %7804 = vmatpush3.msra.mxu0 %v7184_v62  ;;  %v7252_v27 = vld [vmem:[#allocation5 + $0x268] sm:$0xff]  ;;  %v7267_v29 = vld [vmem:[#allocation5 + $0x2e0] sm:$0xff] }
 0xf64   : > { %7840 = vmatprep.subr.mxu1 %v7231_v37  ;;  %7805 = vmatprep.subr.mxu0 %v7199_v5  ;;  %v7283_v4 = vld [vmem:[#allocation5 + $0x360] sm:$0xff]  ;;  %v7298_v37 = vld [vmem:[#allocation5 + $0x3d8] sm:$0xff] }
 0xf65   : > { %7841 = vmatpush3.msra.mxu1 %v7215_v54  ;;  %7806 = vmatpush3.msra.mxu0 %v7183_v59  ;;  %v7251_v62 = vld [vmem:[#allocation5 + $0x260] sm:$0xff]  ;;  %v7266_v5 = vld [vmem:[#allocation5 + $0x2d8] sm:$0xff] }
 0xf66   : > { %7842 = vmatprep.subr.mxu1 %v7230_v2  ;;  %7807 = vmatprep.subr.mxu0 %v7198_v17  ;;  %v7282_v54 = vld [vmem:[#allocation5 + $0x358] sm:$0xff]  ;;  %v7297_v2 = vld [vmem:[#allocation5 + $0x3d0] sm:$0xff] }
 0xf67   : > { %7843 = vmatpush3.msra.mxu1 %v7214_v42  ;;  %7808 = vmatpush3.msra.mxu0 %v7182_v52  ;;  %v7250_v59 = vld [vmem:[#allocation5 + $0x258] sm:$0xff]  ;;  %v7265_v17 = vld [vmem:[#allocation5 + $0x2d0] sm:$0xff] }
 0xf68   : > { %7844 = vmatprep.subr.mxu1 %v7229_v50  ;;  %7809 = vmatprep.subr.mxu0 %v7197_v32  ;;  %v7281_v42 = vld [vmem:[#allocation5 + $0x350] sm:$0xff]  ;;  %v7296_v50 = vld [vmem:[#allocation5 + $0x3c8] sm:$0xff] }
 0xf69   : > { %7845 = vmatpush3.msra.mxu1 %v7213_v63  ;;  %7810 = vmatpush3.msra.mxu0 %v7181_v38  ;;  %v7249_v52 = vld [vmem:[#allocation5 + $0x250] sm:$0xff]  ;;  %v7264_v32 = vld [vmem:[#allocation5 + $0x2c8] sm:$0xff] }
 0xf6a   : > { %7846 = vmatprep.subr.mxu1 %v7228_v47  ;;  %7811 = vmatprep.subr.mxu0 %v7196_v21  ;;  %v7280_v63 = vld [vmem:[#allocation5 + $0x348] sm:$0xff]  ;;  %v7295_v47 = vld [vmem:[#allocation5 + $0x3c0] sm:$0xff] }
 0xf6b   : > { %7847 = vmatpush3.msra.mxu1 %v7212_v40  ;;  %7812 = vmatpush3.msra.mxu0 %v7180_v49  ;;  %v7248_v38 = vld [vmem:[#allocation5 + $0x248] sm:$0xff]  ;;  %v7263_v21 = vld [vmem:[#allocation5 + $0x2c0] sm:$0xff] }
 0xf6c   : > { %7848 = vmatprep.subr.mxu1 %v7227_v39  ;;  %7813 = vmatprep.subr.mxu0 %v7195_v55  ;;  %v7279_v40 = vld [vmem:[#allocation5 + $0x340] sm:$0xff]  ;;  %v7294_v39 = vld [vmem:[#allocation5 + $0x3b8] sm:$0xff] }
 0xf6d   : > { %7849 = vmatpush3.msra.mxu1 %v7211_v30  ;;  %7814 = vmatpush3.msra.mxu0 %v7179_v53  ;;  %v7247_v49 = vld [vmem:[#allocation5 + $0x240] sm:$0xff]  ;;  %v7262_v55 = vld [vmem:[#allocation5 + $0x2b8] sm:$0xff] }
 0xf6e   : > { %7850 = vmatprep.subr.mxu1 %v7226_v11  ;;  %7815 = vmatprep.subr.mxu0 %v7194_v12  ;;  %v7278_v30 = vld [vmem:[#allocation5 + $0x338] sm:$0xff]  ;;  %v7293_v11 = vld [vmem:[#allocation5 + $0x3b0] sm:$0xff] }
 0xf6f   : > { %7851 = vmatpush3.msra.mxu1 %v7210_v45  ;;  %7816 = vmatpush3.msra.mxu0 %v7178_v61  ;;  %v7246_v53 = vld [vmem:[#allocation5 + $0x238] sm:$0xff]  ;;  %v7261_v12 = vld [vmem:[#allocation5 + $0x2b0] sm:$0xff] }
 0xf70   : > { %7852 = vmatprep.subr.mxu1 %v7225_v34  ;;  %7817 = vmatprep.subr.mxu0 %v7193_v13  ;;  %v7277_v45 = vld [vmem:[#allocation5 + $0x330] sm:$0xff]  ;;  %v7292_v34 = vld [vmem:[#allocation5 + $0x3a8] sm:$0xff] }
 0xf71   : > { %7853 = vmatpush3.msra.mxu1 %v7209_v6  ;;  %7818 = vmatpush3.msra.mxu0 %v7177_v7  ;;  %v7245_v61 = vld [vmem:[#allocation5 + $0x230] sm:$0xff]  ;;  %v7260_v13 = vld [vmem:[#allocation5 + $0x2a8] sm:$0xff] }
 0xf72   : > { %7854 = vmatprep.subr.mxu1 %v7224_v51  ;;  %7819 = vmatprep.subr.mxu0 %v7192_v14  ;;  %v7276_v6 = vld [vmem:[#allocation5 + $0x328] sm:$0xff]  ;;  %v7291_v51 = vld [vmem:[#allocation5 + $0x3a0] sm:$0xff] }
 0xf73   : > { %7855 = vmatpush3.msra.mxu1 %v7208_v23  ;;  %7820 = vmatpush3.msra.mxu0 %v7176_v8  ;;  %v7244_v7 = vld [vmem:[#allocation5 + $0x228] sm:$0xff]  ;;  %v7259_v14 = vld [vmem:[#allocation5 + $0x2a0] sm:$0xff] }
 0xf74   : > { %7856 = vmatprep.subr.mxu1 %v7223_v0  ;;  %7821 = vmatprep.subr.mxu0 %v7191_v25  ;;  %v7275_v23 = vld [vmem:[#allocation5 + $0x320] sm:$0xff] }
 0xf75   : > { %7857 = vmatpush3.msra.mxu1 %v7207_v41  ;;  %7822 = vmatpush3.msra.mxu0 %v7175_v24  ;;  %v7243_v25 = vld [vmem:[#allocation5 + $0x220] sm:$0xff]  ;;  %v7290_v41 = vld [vmem:[#allocation5 + $0x398] sm:$0xff] }
 0xf76   : > { %7896 = vmatprep.subr.mxu1 %v7302_v20  ;;  %7861 = vmatprep.subr.mxu0 %v7270_v10  ;;  %v7258_v24 = vld [vmem:[#allocation5 + $0x298] sm:$0xff] }
 0xf77   : > { %v7274_v20 = vld [vmem:[#allocation5 + $0x318] sm:$0xff] }
 0xff7   : > { %v7012_v57 = vpop.f32.mrf.mxu1 }
 0xff8   : > { %v6941_v33 = vpop.f32.mrf.mxu0  ;;  %v7161_v1 = vmul.f32 0.1, %v7012_v57 }
 0xff9   : > { %v7014_v43 = vpop.f32.mrf.mxu1  ;;  %v7159_v56 = vmul.f32 0.1, %v6941_v33 }
 0xffa   : > { %v7162_v18 = vmul.f32 0.1, %v7014_v43  ;;  %v6943_v15 = vpop.f32.mrf.mxu0  ;;  %v7169_v28 = vmax.f32 %v7012_v57, %v7161_v1  ;;  %v7289_v1 = vld [vmem:[#allocation5 + $0x390] sm:$0xff] }
 0xffb   : > { %v7160_v44 = vmul.f32 0.1, %v6943_v15  ;;  %v7167_v19 = vmax.f32 %v6941_v33, %v7159_v56  ;;  %v7242_v33 = vld [vmem:[#allocation5 + $0x218] sm:$0xff] }
 0xffc   : > { %v7170_v48 = vmax.f32 %v7014_v43, %v7162_v18  ;;  %v7257_v18 = vld [vmem:[#allocation5 + $0x290] sm:$0xff] }
 0xffd   : > { %v7168_v35 = vmax.f32 %v6943_v15, %v7160_v44  ;;  %v7273_v15 = vld [vmem:[#allocation5 + $0x310] sm:$0xff] }
 0xffe   : > { %7437 = vmatprep.mubr.f32.mxu1 %v7170_v48  ;;  %v7241_v44 = vld [vmem:[#allocation5 + $0x210] sm:$0xff]  ;;  %v7288_v48 = vld [vmem:[#allocation5 + $0x388] sm:$0xff] }
 0xfff   : > { %7367 = vmatprep.mubr.f32.mxu0 %v7168_v35  ;;  %7438 = vmatmul.mubr.f32.vlgmr.msra.gmra.mxu1 %v7169_v28  ;;  %v7256_v35 = vld [vmem:[#allocation5 + $0x288] sm:$0xff] }
0x1000   : > { %7897 = vmatpush3.msra.mxu1 %v7286_v58  ;;  %7368 = vmatmul.mubr.f32.vlgmr.msra.gmra.mxu0 %v7167_v19  ;;  %v7272_v58 = vld [vmem:[#allocation5 + $0x308] sm:$0xff] }
0x1001   : > { %7862 = vmatpush3.msra.mxu0 %v7254_v46  ;;  %7898 = vmatprep.subr.mxu1 %v7301_v36  ;;  %v7240_v36 = vld [vmem:[#allocation5 + $0x208] sm:$0xff] }
0x1002   : > { %7863 = vmatprep.subr.mxu0 %v7269_v9  ;;  %7899 = vmatpush3.msra.mxu1 %v7285_v22  ;;  %v7287_v22 = vld [vmem:[#allocation5 + $0x380] sm:$0xff] }
0x1003   : > { %7864 = vmatpush3.msra.mxu0 %v7253_v31  ;;  %7900 = vmatprep.subr.mxu1 %v7300_v3  ;;  %v7255_v31 = vld [vmem:[#allocation5 + $0x280] sm:$0xff] }
0x1004   : > { %7865 = vmatprep.subr.mxu0 %v7268_v26  ;;  %7901 = vmatpush3.msra.mxu1 %v7284_v60  ;;  %v7271_v3 = vld [vmem:[#allocation5 + $0x300] sm:$0xff] }
0x1005   : > { %7866 = vmatpush3.msra.mxu0 %v7252_v27  ;;  %7902 = vmatprep.subr.mxu1 %v7299_v16  ;;  %v7239_v26 = vld [vmem:[#allocation5 + $0x200] sm:$0xff] }
0x1006   : > { %7867 = vmatprep.subr.mxu0 %v7267_v29  ;;  %7903 = vmatpush3.msra.mxu1 %v7283_v4 }
0x1007   : > { %7868 = vmatpush3.msra.mxu0 %v7251_v62  ;;  %7904 = vmatprep.subr.mxu1 %v7298_v37 }
0x1008   : > { %7869 = vmatprep.subr.mxu0 %v7266_v5  ;;  %7905 = vmatpush3.msra.mxu1 %v7282_v54 }
0x1009   : > { %7870 = vmatpush3.msra.mxu0 %v7250_v59  ;;  %7906 = vmatprep.subr.mxu1 %v7297_v2 }
0x100a   : > { %7871 = vmatprep.subr.mxu0 %v7265_v17  ;;  %7907 = vmatpush3.msra.mxu1 %v7281_v42 }
0x100b   : > { %7872 = vmatpush3.msra.mxu0 %v7249_v52  ;;  %7908 = vmatprep.subr.mxu1 %v7296_v50 }
0x100c   : > { %7873 = vmatprep.subr.mxu0 %v7264_v32  ;;  %7909 = vmatpush3.msra.mxu1 %v7280_v63 }
0x100d   : > { %7874 = vmatpush3.msra.mxu0 %v7248_v38  ;;  %7910 = vmatprep.subr.mxu1 %v7295_v47 }
0x100e   : > { %7875 = vmatprep.subr.mxu0 %v7263_v21  ;;  %7911 = vmatpush3.msra.mxu1 %v7279_v40 }
0x100f   : > { %7876 = vmatpush3.msra.mxu0 %v7247_v49  ;;  %7912 = vmatprep.subr.mxu1 %v7294_v39 }
0x1010   : > { %7877 = vmatprep.subr.mxu0 %v7262_v55  ;;  %7913 = vmatpush3.msra.mxu1 %v7278_v30 }
0x1011   : > { %7878 = vmatpush3.msra.mxu0 %v7246_v53  ;;  %7914 = vmatprep.subr.mxu1 %v7293_v11 }
0x1012   : > { %7879 = vmatprep.subr.mxu0 %v7261_v12  ;;  %7915 = vmatpush3.msra.mxu1 %v7277_v45 }
0x1013   : > { %7880 = vmatpush3.msra.mxu0 %v7245_v61  ;;  %7916 = vmatprep.subr.mxu1 %v7292_v34 }
0x1014   : > { %7881 = vmatprep.subr.mxu0 %v7260_v13  ;;  %7917 = vmatpush3.msra.mxu1 %v7276_v6 }
0x1015   : > { %v7083_v8 = vpop.f32.mrf.mxu0  ;;  %v7154_v0 = vpop.f32.mrf.mxu1  ;;  %7882 = vmatpush3.msra.mxu0 %v7244_v7  ;;  %7918 = vmatprep.subr.mxu1 %v7291_v51 }
0x1016   : > { %7883 = vmatprep.subr.mxu0 %v7259_v14  ;;  %7919 = vmatpush3.msra.mxu1 %v7275_v23  ;;  %v7165_v19 = vmul.f32 0.1, %v7154_v0  ;;  %v7163_v9 = vmul.f32 0.1, %v7083_v8 }
0x1017   : > { %v7085_v10 = vpop.f32.mrf.mxu0  ;;  %v7156_v57 = vpop.f32.mrf.mxu1  ;;  %7884 = vmatpush3.msra.mxu0 %v7243_v25  ;;  %7920 = vmatprep.subr.mxu1 %v7290_v41 }
0x1018   : > { %v7164_v43 = vmul.f32 0.1, %v7085_v10  ;;  %v7166_v56 = vmul.f32 0.1, %v7156_v57  ;;  %7885 = vmatprep.subr.mxu0 %v7258_v24  ;;  %7921 = vmatpush3.msra.mxu1 %v7274_v20  ;;  %v7173_v60 = vmax.f32 %v7154_v0, %v7165_v19  ;;  %v7171_v27 = vmax.f32 %v7083_v8, %v7163_v9 }
0x1019   : > { %7886 = vmatpush3.msra.mxu0 %v7242_v33  ;;  %7922 = vmatprep.subr.mxu1 %v7289_v1 }
0x101a   : > { %v7172_v28 = vmax.f32 %v7085_v10, %v7164_v43  ;;  %v7174_v46 = vmax.f32 %v7156_v57, %v7166_v56  ;;  %7887 = vmatprep.subr.mxu0 %v7257_v18  ;;  %7923 = vmatpush3.msra.mxu1 %v7273_v15 }
0x101b   : > { %7888 = vmatpush3.msra.mxu0 %v7241_v44  ;;  %7924 = vmatprep.subr.mxu1 %v7288_v48 }
0x101c   : > { %7889 = vmatprep.subr.mxu0 %v7256_v35  ;;  %7925 = vmatpush3.msra.mxu1 %v7272_v58 }
0x101d   : > { %7890 = vmatpush3.msra.mxu0 %v7240_v36  ;;  %7507 = vmatprep.mubr.f32.mxu0 %v7172_v28 }
0x101e   : > { %7926 = vmatprep.subr.mxu1 %v7287_v22  ;;  %7577 = vmatprep.mubr.f32.mxu1 %v7174_v46 }
0x101f   : > { %7891 = vmatprep.subr.mxu0 %v7255_v31  ;;  %7927 = vmatpush3.msra.mxu1 %v7271_v3 }
0x1020   : > { %7892 = vmatpush3.msra.mxu0 %v7239_v26  ;;  %7578 = vmatmul.mubr.f32.vlgmr.msra.gmra.mxu1 %v7173_v60 }
0x1021   : > { %7508 = vmatmul.mubr.f32.vlgmr.msra.gmra.mxu0 %v7171_v27 }
0x10bf   : > { %v7858_v16 = vpop.f32.mrf.mxu1 }
0x10c0   : > { %v7823_v29 = vpop.f32.mrf.mxu0 }
0x10c1   : > { %v7859_v4 = vpop.f32.mrf.mxu1 }
0x10c2   : > { %v7824_v62 = vpop.f32.mrf.mxu0  ;;  %v7860_v37 = vadd.f32 %v7859_v4, %v7858_v16 }
0x10c3   : > { %v7825_v5 = vadd.f32 %v7824_v62, %v7823_v29 }
0x10c5   : > { %v7440_v42 = vadd.f32 %v7860_v37, %v7825_v5 }
0x10e0   : > { %v7928_v54 = vpop.f32.mrf.mxu1 }
0x10e1   : > { %v7893_v59 = vpop.f32.mrf.mxu0 }
0x10e2   : > { %v7929_v2 = vpop.f32.mrf.mxu1 }
0x10e3   : > { %v7894_v17 = vpop.f32.mrf.mxu0  ;;  %v7930_v50 = vadd.f32 %v7929_v2, %v7928_v54 }
0x10e4   : > { %v7895_v52 = vadd.f32 %v7894_v17, %v7893_v59 }
0x10e6   : > { %v7510_v32 = vadd.f32 %v7895_v52, %v7440_v42 }
0x10e8   : > { %v7580_v63 = vadd.f32 %v7930_v50, %v7510_v32 }
0x10ea   : > { %7583 = vst [vmem:[%s225_s5] sm:$0xff] %v7580_v63 }
0x10eb PF: > { %s16_s15 = sadd.s32 1, %s8053_s15  }
0x10ec   : > { %p13_p2 = scmp.ge.s32.totalorder %s16_s15, 4  }
0x10ee   :  { %15 = sbr.rel (!%p13_p2) target bundleno = 2 (0x2), region = 83 }
0x10f3   :  { %7603 = vsyncpa [#allocation4], 1 }
0x10f4   :  { %7605 = vsyncpa [#allocation4 + $0x1], 1 }
0x10f5   :  { %7606 = vsyncpa [#allocation6], 1 }

</bundles_post_ra>
